<compile_context>
chip_gen: v7x
topology: tpu7x:2x2x1
jax: 0.10.0
libtpu: 0.0.40
codegen_flags: <defaults>
</compile_context>

<pallas_src>
import functools

import jax
import jax.numpy as jnp
from jax import lax
from jax.experimental import pallas as pl
from jax.experimental.pallas import tpu as pltpu


# ---------------------------------------------------------------------------
# Fused Conv3d(k=3, pad=1, stride 1|2) + BN + (residual add) + (ReLU)
#   grid = (N, Do, KD); the KD depth taps accumulate into the f32 output block
#   x_ref : (Hx, Wx, C)       one prepared (padded / parity-split) depth plane
#   w_ref : (KD, 9*C, Cout)   folded weights, resident in VMEM (constant index)
#   b_ref : (1, Cout)         folded BN bias
#   a_ref : (Ho*Wo, Cout)     optional residual add (flattened)
#   o_ref : (Ho*Wo, Cout)     f32 output block == accumulator
# ---------------------------------------------------------------------------
def _conv_tap_kernel(*refs, KD, Ho, Wo, C, h_offs, w_offs, relu, has_add):
    if has_add:
        x_ref, w_ref, b_ref, a_ref, o_ref = refs
    else:
        x_ref, w_ref, b_ref, o_ref = refs
        a_ref = None
    kd = pl.program_id(2)

    @pl.when(kd == 0)
    def _init():
        o_ref[...] = jnp.zeros_like(o_ref)

    # In-kernel im2col: one (Ho*Wo, KH*KW*C) slab, one MXU dot per depth tap.
    M = Ho * Wo
    w = w_ref[kd]                                          # (KH*KW*C, Cout)
    pieces = [x_ref[pl.ds(ho, Ho), pl.ds(wo, Wo), :].reshape(M, C)
              for ho in h_offs for wo in w_offs]
    patch = pieces[0] if len(pieces) == 1 else jnp.concatenate(pieces, axis=-1)
    o_ref[...] += jnp.dot(patch, w, preferred_element_type=jnp.float32)

    @pl.when(kd == KD - 1)
    def _finalize():
        y = o_ref[...] + b_ref[...]
        if has_add:
            y = y + a_ref[...]
        if relu:
            y = jnp.maximum(y, 0.0)
        o_ref[...] = y


def _fused_conv(xprep, w_taps, bias, out_spatial, *, stride_d, h_offs, w_offs,
                relu, add=None):
    """xprep: (N, Dx, Hx, Wx, C) prepared input; w_taps: (KD, KH*KW*C, Cout).
    Returns (N, Do, Ho*Wo, Cout) float32."""
    N, _, Hx, Wx, C = xprep.shape
    KD, KHKWC, Cout = w_taps.shape
    Do, Ho, Wo = out_spatial
    M = Ho * Wo
    assert KHKWC == len(h_offs) * len(w_offs) * C

    x_spec = pl.BlockSpec((None, None, Hx, Wx, C),
                          lambda n, d, k: (n, stride_d * d + k, 0, 0, 0))
    w_spec = pl.BlockSpec((KD, KHKWC, Cout), lambda n, d, k: (0, 0, 0))
    b_spec = pl.BlockSpec((1, Cout), lambda n, d, k: (0, 0))
    y_spec = pl.BlockSpec((None, None, M, Cout), lambda n, d, k: (n, d, 0, 0))

    in_specs = [x_spec, w_spec, b_spec]
    args = [xprep, w_taps, bias.reshape(1, Cout)]
    if add is not None:
        in_specs.append(y_spec)
        args.append(add)

    kernel = functools.partial(
        _conv_tap_kernel, KD=KD, Ho=Ho, Wo=Wo, C=C,
        h_offs=tuple(h_offs), w_offs=tuple(w_offs),
        relu=relu, has_add=add is not None)

    flops = 2 * N * Do * KD * M * KHKWC * Cout
    bytes_accessed = 4 * (N * Do * KD * Hx * Wx * C
                          + KD * KHKWC * Cout
                          + N * Do * M * Cout * (2 if add is not None else 1))

    return pl.pallas_call(
        kernel,
        grid=(N, Do, KD),
        in_specs=in_specs,
        out_specs=y_spec,
        out_shape=jax.ShapeDtypeStruct((N, Do, M, Cout), jnp.float32),
        compiler_params=pltpu.CompilerParams(
            dimension_semantics=("parallel", "parallel", "arbitrary")),
        cost_estimate=pl.CostEstimate(
            flops=flops, transcendentals=0, bytes_accessed=bytes_accessed),
    )(*args)


# ---------------------------------------------------------------------------
# Layer wrappers
# ---------------------------------------------------------------------------
def _bn_fold(bn):
    gamma, beta, mean, var = bn
    scale = gamma / jnp.sqrt(var + 1e-5)
    return scale, beta - mean * scale


def conv3d_bn(x, w, bn, *, stride, relu, add=None):
    """x: (N,D,H,W,Cin); w: PyTorch Conv3d (Cout,Cin,3,3,3), pad=1."""
    N, D, H, W, Cin = x.shape
    Cout = w.shape[0]
    scale, bias = _bn_fold(bn)
    # (kd, kh, kw, Cin, Cout) with BN scale folded -> (3, 9*Cin, Cout)
    w_taps = (jnp.transpose(w, (2, 3, 4, 1, 0)) * scale).reshape(3, 9 * Cin, Cout)

    xp = jnp.pad(x, ((0, 0), (1, 1), (1, 1), (1, 1), (0, 0)))
    if stride == 1:
        Do, Ho, Wo = D, H, W
        h_offs = (0, 1, 2)
        w_offs = (0, 1, 2)
    else:
        assert stride == 2 and D % 2 == 0 and H % 2 == 0 and W % 2 == 0
        Do, Ho, Wo = D // 2, H // 2, W // 2
        # rearrange padded H and W into even||odd so all in-kernel slices are
        # unit stride; the depth stride is handled by the grid index_map.
        xp = jnp.concatenate([xp[:, :, 0::2], xp[:, :, 1::2]], axis=2)
        xp = jnp.concatenate([xp[:, :, :, 0::2], xp[:, :, :, 1::2]], axis=3)
        h_offs = (0, Ho + 1, 1)     # taps kh=0,1,2 -> padded rows 2*ho+kh
        w_offs = (0, Wo + 1, 1)

    add_flat = None if add is None else add.reshape(N, Do, Ho * Wo, Cout)
    y = _fused_conv(xp, w_taps, bias, (Do, Ho, Wo), stride_d=stride,
                    h_offs=h_offs, w_offs=w_offs, relu=relu, add=add_flat)
    return y.reshape(N, Do, Ho, Wo, Cout)


# Parity selection: S[parity, tap, k] == 1 iff for output parity p the input
# tap at offset t uses ConvTranspose kernel index k (stride 2, pad 1).
#   p=0: t=0 -> k=1 ;   p=1: t=0 -> k=2, t=1 -> k=0
_PARITY_SEL = (((0, 1, 0), (0, 0, 0)),
               ((0, 0, 1), (1, 0, 0)))


def _deconv_kernel(x0_ref, x1_ref, w_ref, b_ref, o_ref, *, H, W, Cin):
    """One output-depth slab (depths 2d, 2d+1) of the transposed conv.
    x0_ref/x1_ref: (H+1, W+1, Cin) input planes d and d+1 (zero-padded tail);
    w_ref: (2, 4*Cin, 8*Cout); o_ref: (H*W, 8*Cout) parity-blocked output."""
    def patch(x_ref):
        pieces = [x_ref[pl.ds(th, H), pl.ds(tw, W), :].reshape(H * W, Cin)
                  for th in (0, 1) for tw in (0, 1)]
        return jnp.concatenate(pieces, axis=-1)            # (H*W, 4*Cin)

    acc = jnp.dot(patch(x0_ref), w_ref[0], preferred_element_type=jnp.float32)
    acc = acc + jnp.dot(patch(x1_ref), w_ref[1],
                        preferred_element_type=jnp.float32)
    o_ref[...] = acc + b_ref[...]


def deconv3d_bn(x, w_t, bn):
    """ConvTranspose3d(k=3, s=2, p=1, output_padding=1, bias=False) + BN.
    x: (N,D,H,W,Cin); w_t: PyTorch ConvTranspose3d layout (Cin,Cout,3,3,3).
    Returns (N, 2D, 2H, 2W, Cout)."""
    N, D, H, W, Cin = x.shape
    Cout = w_t.shape[1]
    scale, bias = _bn_fold(bn)
    wk = jnp.transpose(w_t, (2, 3, 4, 0, 1)) * scale        # (kd,kh,kw,Cin,Cout)

    # Build the parity-fused weight: W_all[td, th, tw, ci, pd, ph, pw, co]
    S = jnp.asarray(_PARITY_SEL, dtype=wk.dtype)             # (parity, tap, k)
    w_all = jnp.einsum('abc,def,ghi,cfijk->behjadgk', S, S, S, wk)
    w_all = w_all.reshape(2, 4 * Cin, 8 * Cout)
    bias_big = jnp.tile(bias, 8).reshape(1, 8 * Cout)

    # one trailing zero plane/row/col for the "+1" taps of odd parities
    xpad = jnp.pad(x, ((0, 0), (0, 1), (0, 1), (0, 1), (0, 0)))

    x0_spec = pl.BlockSpec((None, None, H + 1, W + 1, Cin),
                           lambda n, d: (n, d, 0, 0, 0))
    x1_spec = pl.BlockSpec((None, None, H + 1, W + 1, Cin),
                           lambda n, d: (n, d + 1, 0, 0, 0))
    w_spec = pl.BlockSpec((2, 4 * Cin, 8 * Cout), lambda n, d: (0, 0, 0))
    b_spec = pl.BlockSpec((1, 8 * Cout), lambda n, d: (0, 0))
    y_spec = pl.BlockSpec((None, None, H * W, 8 * Cout),
                          lambda n, d: (n, d, 0, 0))

    kernel = functools.partial(_deconv_kernel, H=H, W=W, Cin=Cin)
    flops = 2 * N * D * 2 * (H * W) * (4 * Cin) * (8 * Cout)
    bytes_accessed = 4 * (2 * N * (D + 1) * (H + 1) * (W + 1) * Cin
                          + 2 * 4 * Cin * 8 * Cout
                          + N * D * H * W * 8 * Cout)

    y = pl.pallas_call(
        kernel,
        grid=(N, D),
        in_specs=[x0_spec, x1_spec, w_spec, b_spec],
        out_specs=y_spec,
        out_shape=jax.ShapeDtypeStruct((N, D, H * W, 8 * Cout), jnp.float32),
        compiler_params=pltpu.CompilerParams(
            dimension_semantics=("parallel", "parallel")),
        cost_estimate=pl.CostEstimate(
            flops=flops, transcendentals=0, bytes_accessed=bytes_accessed),
    )(xpad, xpad, w_all, bias_big)

    # parity-blocked -> interleaved (N, 2D, 2H, 2W, Cout)
    y = y.reshape(N, D, H, W, 2, 2, 2, Cout)
    y = jnp.transpose(y, (0, 1, 4, 2, 5, 3, 6, 7))
    return y.reshape(N, 2 * D, 2 * H, 2 * W, Cout)


# ---------------------------------------------------------------------------
# hourglass.forward
# ---------------------------------------------------------------------------
def hourglass_forward(params, x_ncdhw, presqu=None, postsqu=None):
    to_last = lambda t: None if t is None else jnp.transpose(t, (0, 2, 3, 4, 1))
    to_first = lambda t: jnp.transpose(t, (0, 4, 1, 2, 3))

    x = to_last(x_ncdhw)
    presqu_l = to_last(presqu)
    postsqu_l = to_last(postsqu)

    out = conv3d_bn(x, params["w1"], params["bn1"], stride=2, relu=True)     # conv1
    pre = conv3d_bn(out, params["w2"], params["bn2"], stride=1, relu=True,   # conv2
                    add=postsqu_l)                                           # (+postsqu) relu
    out = conv3d_bn(pre, params["w3"], params["bn3"], stride=2, relu=True)   # conv3
    out = conv3d_bn(out, params["w4"], params["bn4"], stride=1, relu=True)   # conv4
    dec5 = deconv3d_bn(out, params["w5"], params["bn5"])                     # conv5
    post = jnp.maximum(dec5 + (presqu_l if presqu_l is not None else pre), 0.0)
    out = deconv3d_bn(post, params["w6"], params["bn6"])                     # conv6 (no relu)
    return to_first(out), to_first(pre), to_first(post)


# ---------------------------------------------------------------------------
# Pure-JAX reference (lax.conv_general_dilated) for correctness validation
# ---------------------------------------------------------------------------
def _ref_bn(y, bn):
    gamma, beta, mean, var = bn
    return (y - mean) / jnp.sqrt(var + 1e-5) * gamma + beta


def _ref_conv(x, w, stride):
    w_ = jnp.transpose(w, (2, 3, 4, 1, 0))
    return lax.conv_general_dilated(
        x, w_, window_strides=(stride,) * 3, padding=((1, 1),) * 3,
        dimension_numbers=("NDHWC", "DHWIO", "NDHWC"),
        precision=lax.Precision.HIGHEST)


def _ref_deconv(x, w_t):
    w_ = jnp.transpose(jnp.flip(w_t, (2, 3, 4)), (2, 3, 4, 0, 1))
    return lax.conv_general_dilated(
        x, w_, window_strides=(1, 1, 1), padding=((1, 2),) * 3,
        lhs_dilation=(2, 2, 2),
        dimension_numbers=("NDHWC", "DHWIO", "NDHWC"),
        precision=lax.Precision.HIGHEST)


def hourglass_reference(params, x_ncdhw, presqu=None, postsqu=None):
    t = lambda a: None if a is None else jnp.transpose(a, (0, 2, 3, 4, 1))
    ti = lambda a: jnp.transpose(a, (0, 4, 1, 2, 3))
    x, presqu, postsqu = t(x_ncdhw), t(presqu), t(postsqu)
    out = jnp.maximum(_ref_bn(_ref_conv(x, params["w1"], 2), params["bn1"]), 0.0)
    pre = _ref_bn(_ref_conv(out, params["w2"], 1), params["bn2"])
    pre = jnp.maximum(pre + postsqu, 0.0) if postsqu is not None else jnp.maximum(pre, 0.0)
    out = jnp.maximum(_ref_bn(_ref_conv(pre, params["w3"], 2), params["bn3"]), 0.0)
    out = jnp.maximum(_ref_bn(_ref_conv(out, params["w4"], 1), params["bn4"]), 0.0)
    c5 = _ref_bn(_ref_deconv(out, params["w5"]), params["bn5"])
    post = jnp.maximum(c5 + (presqu if presqu is not None else pre), 0.0)
    out = _ref_bn(_ref_deconv(post, params["w6"]), params["bn6"])
    return ti(out), ti(pre), ti(post)


# ---------------------------------------------------------------------------
if __name__ == "__main__":
    key = jax.random.PRNGKey(0)
    keys = jax.random.split(key, 16)

    inplanes = 4
    c2 = inplanes * 2
    # H, W multiples of 32 keep every in-kernel (Ho,Wo,C)->(Ho*Wo,C) collapse
    # sublane-aligned (Wo % 8 == 0) at all pyramid levels.
    N, D, H, W = 2, 8, 32, 32

    def bn_params(k, c):
        k1, k2, k3, k4 = jax.random.split(k, 4)
        gamma = 1.0 + 0.1 * jax.random.normal(k1, (c,), jnp.float32)
        beta = 0.1 * jax.random.normal(k2, (c,), jnp.float32)
        mean = 0.05 * jax.random.normal(k3, (c,), jnp.float32)
        var = 1.0 + 0.1 * jax.random.uniform(k4, (c,), jnp.float32)
        return gamma, beta, mean, var

    params = {
        # Conv3d weights: (Cout, Cin, 3, 3, 3)
        "w1": 0.05 * jax.random.normal(keys[0], (c2, inplanes, 3, 3, 3), jnp.float32),
        "bn1": bn_params(keys[1], c2),
        "w2": 0.05 * jax.random.normal(keys[2], (c2, c2, 3, 3, 3), jnp.float32),
        "bn2": bn_params(keys[3], c2),
        "w3": 0.05 * jax.random.normal(keys[4], (c2, c2, 3, 3, 3), jnp.float32),
        "bn3": bn_params(keys[5], c2),
        "w4": 0.05 * jax.random.normal(keys[6], (c2, c2, 3, 3, 3), jnp.float32),
        "bn4": bn_params(keys[7], c2),
        # ConvTranspose3d weights: (Cin, Cout, 3, 3, 3)
        "w5": 0.05 * jax.random.normal(keys[8], (c2, c2, 3, 3, 3), jnp.float32),
        "bn5": bn_params(keys[9], c2),
        "w6": 0.05 * jax.random.normal(keys[10], (c2, inplanes, 3, 3, 3), jnp.float32),
        "bn6": bn_params(keys[11], inplanes),
    }

    x = jax.random.normal(keys[12], (N, inplanes, D, H, W), jnp.float32)       # NCDHW
    postsqu = jax.random.normal(keys[13], (N, c2, D // 2, H // 2, W // 2), jnp.float32)
    presqu = None

    fwd = jax.jit(hourglass_forward)
    out, pre, post = fwd(params, x, presqu, postsqu)
    (out, pre, post) = jax.block_until_ready((out, pre, post))

    assert out.shape == (N, inplanes, D, H, W)
    assert pre.shape == (N, c2, D // 2, H // 2, W // 2)
    assert post.shape == (N, c2, D // 2, H // 2, W // 2)

    r_out, r_pre, r_post = hourglass_reference(params, x, presqu, postsqu)
    for a, b in ((out, r_out), (pre, r_pre), (post, r_post)):
        err = float(jnp.max(jnp.abs(a - b)))
        assert err < 5e-3, f"mismatch vs lax reference: {err}"

    print("KERNEL_OK")
</pallas_src>

<mosaic_0001>
module attributes {stable_mosaic.version = 11 : i64} {
  func.func @_conv_tap_kernel(%arg0: i32, %arg1: i32, %arg2: i32, %arg3: memref<1x1x34x34x4xf32, #tpu.memory_space<vmem>>, %arg4: memref<3x36x8xf32, #tpu.memory_space<vmem>>, %arg5: memref<1x8xf32, #tpu.memory_space<vmem>>, %arg6: memref<1x1x256x8xf32, #tpu.memory_space<vmem>>) attributes {dimension_semantics = [#tpu.dimension_semantics<parallel>, #tpu.dimension_semantics<parallel>, #tpu.dimension_semantics<arbitrary>], iteration_bounds = array<i64: 2, 4, 3>, scalar_prefetch = 0 : i64, scratch_operands = 0 : i64, tpu.core_type = #tpu.core_type<tc>, window_params = [{transform_indices = @transform_0, window_bounds = array<i64: 1, 1, 34, 34, 4>}, {pipeline_mode = #tpu.pipeline_mode<synchronous>, transform_indices = @transform_1, window_bounds = array<i64: 3, 36, 8>}, {pipeline_mode = #tpu.pipeline_mode<synchronous>, transform_indices = @transform_2, window_bounds = array<i64: 1, 8>}, {transform_indices = @transform_3, window_bounds = array<i64: 1, 1, 256, 8>}]} {
    %c0_i32 = arith.constant 0 : i32
    %0 = arith.cmpi eq, %arg2, %c0_i32 : i32
    %1 = arith.extui %0 : i1 to i32
    %c0_i32_0 = arith.constant 0 : i32
    %2 = arith.cmpi ne, %1, %c0_i32_0 : i32
    scf.if %2 {
      %cst_54 = arith.constant 0.000000e+00 : f32
      %44 = vector.broadcast %cst_54 : f32 to vector<256x8xf32>
      %c0_55 = arith.constant 0 : index
      %c0_56 = arith.constant 0 : index
      %c0_57 = arith.constant 0 : index
      %c0_58 = arith.constant 0 : index
      %45 = vector.load %arg6[%c0_55, %c0_56, %c0_57, %c0_58] : memref<1x1x256x8xf32, #tpu.memory_space<vmem>>, vector<1x1x256x8xf32>
      %46 = vector.shape_cast %45 : vector<1x1x256x8xf32> to vector<256x8xf32>
      %47 = vector.shape_cast %44 : vector<256x8xf32> to vector<1x1x256x8xf32>
      tpu.vector_store %arg6[%c0_55, %c0_56, %c0_57, %c0_58], %47 {strides = array<i32>} : memref<1x1x256x8xf32, #tpu.memory_space<vmem>>, vector<1x1x256x8xf32>,
    } else {
    }
    %3 = arith.index_cast %arg2 : i32 to index
    %c0 = arith.constant 0 : index
    %c0_1 = arith.constant 0 : index
    %4 = vector.load %arg4[%3, %c0, %c0_1] : memref<3x36x8xf32, #tpu.memory_space<vmem>>, vector<1x36x8xf32>
    %5 = vector.shape_cast %4 : vector<1x36x8xf32> to vector<36x8xf32>
    %c0_2 = arith.constant 0 : index
    %c0_3 = arith.constant 0 : index
    %c0_4 = arith.constant 0 : index
    %c0_5 = arith.constant 0 : index
    %c0_6 = arith.constant 0 : index
    %6 = vector.load %arg3[%c0_2, %c0_3, %c0_4, %c0_5, %c0_6] : memref<1x1x34x34x4xf32, #tpu.memory_space<vmem>>, vector<1x1x16x16x4xf32>
    %7 = vector.shape_cast %6 : vector<1x1x16x16x4xf32> to vector<16x16x4xf32>
    %8 = vector.shape_cast %7 : vector<16x16x4xf32> to vector<256x4xf32>
    %c0_7 = arith.constant 0 : index
    %c0_8 = arith.constant 0 : index
    %c0_9 = arith.constant 0 : index
    %c17 = arith.constant 17 : index
    %c0_10 = arith.constant 0 : index
    %9 = vector.load %arg3[%c0_7, %c0_8, %c0_9, %c17, %c0_10] : memref<1x1x34x34x4xf32, #tpu.memory_space<vmem>>, vector<1x1x16x16x4xf32>
    %10 = vector.shape_cast %9 : vector<1x1x16x16x4xf32> to vector<16x16x4xf32>
    %11 = vector.shape_cast %10 : vector<16x16x4xf32> to vector<256x4xf32>
    %c0_11 = arith.constant 0 : index
    %c0_12 = arith.constant 0 : index
    %c0_13 = arith.constant 0 : index
    %c1 = arith.constant 1 : index
    %c0_14 = arith.constant 0 : index
    %12 = vector.load %arg3[%c0_11, %c0_12, %c0_13, %c1, %c0_14] : memref<1x1x34x34x4xf32, #tpu.memory_space<vmem>>, vector<1x1x16x16x4xf32>
    %13 = vector.shape_cast %12 : vector<1x1x16x16x4xf32> to vector<16x16x4xf32>
    %14 = vector.shape_cast %13 : vector<16x16x4xf32> to vector<256x4xf32>
    %c0_15 = arith.constant 0 : index
    %c0_16 = arith.constant 0 : index
    %c17_17 = arith.constant 17 : index
    %c0_18 = arith.constant 0 : index
    %c0_19 = arith.constant 0 : index
    %15 = vector.load %arg3[%c0_15, %c0_16, %c17_17, %c0_18, %c0_19] : memref<1x1x34x34x4xf32, #tpu.memory_space<vmem>>, vector<1x1x16x16x4xf32>
    %16 = vector.shape_cast %15 : vector<1x1x16x16x4xf32> to vector<16x16x4xf32>
    %17 = vector.shape_cast %16 : vector<16x16x4xf32> to vector<256x4xf32>
    %c0_20 = arith.constant 0 : index
    %c0_21 = arith.constant 0 : index
    %c17_22 = arith.constant 17 : index
    %c17_23 = arith.constant 17 : index
    %c0_24 = arith.constant 0 : index
    %18 = vector.load %arg3[%c0_20, %c0_21, %c17_22, %c17_23, %c0_24] : memref<1x1x34x34x4xf32, #tpu.memory_space<vmem>>, vector<1x1x16x16x4xf32>
    %19 = vector.shape_cast %18 : vector<1x1x16x16x4xf32> to vector<16x16x4xf32>
    %20 = vector.shape_cast %19 : vector<16x16x4xf32> to vector<256x4xf32>
    %c0_25 = arith.constant 0 : index
    %c0_26 = arith.constant 0 : index
    %c17_27 = arith.constant 17 : index
    %c1_28 = arith.constant 1 : index
    %c0_29 = arith.constant 0 : index
    %21 = vector.load %arg3[%c0_25, %c0_26, %c17_27, %c1_28, %c0_29] : memref<1x1x34x34x4xf32, #tpu.memory_space<vmem>>, vector<1x1x16x16x4xf32>
    %22 = vector.shape_cast %21 : vector<1x1x16x16x4xf32> to vector<16x16x4xf32>
    %23 = vector.shape_cast %22 : vector<16x16x4xf32> to vector<256x4xf32>
    %c0_30 = arith.constant 0 : index
    %c0_31 = arith.constant 0 : index
    %c1_32 = arith.constant 1 : index
    %c0_33 = arith.constant 0 : index
    %c0_34 = arith.constant 0 : index
    %24 = vector.load %arg3[%c0_30, %c0_31, %c1_32, %c0_33, %c0_34] : memref<1x1x34x34x4xf32, #tpu.memory_space<vmem>>, vector<1x1x16x16x4xf32>
    %25 = vector.shape_cast %24 : vector<1x1x16x16x4xf32> to vector<16x16x4xf32>
    %26 = vector.shape_cast %25 : vector<16x16x4xf32> to vector<256x4xf32>
    %c0_35 = arith.constant 0 : index
    %c0_36 = arith.constant 0 : index
    %c1_37 = arith.constant 1 : index
    %c17_38 = arith.constant 17 : index
    %c0_39 = arith.constant 0 : index
    %27 = vector.load %arg3[%c0_35, %c0_36, %c1_37, %c17_38, %c0_39] : memref<1x1x34x34x4xf32, #tpu.memory_space<vmem>>, vector<1x1x16x16x4xf32>
    %28 = vector.shape_cast %27 : vector<1x1x16x16x4xf32> to vector<16x16x4xf32>
    %29 = vector.shape_cast %28 : vector<16x16x4xf32> to vector<256x4xf32>
    %c0_40 = arith.constant 0 : index
    %c0_41 = arith.constant 0 : index
    %c1_42 = arith.constant 1 : index
    %c1_43 = arith.constant 1 : index
    %c0_44 = arith.constant 0 : index
    %30 = vector.load %arg3[%c0_40, %c0_41, %c1_42, %c1_43, %c0_44] : memref<1x1x34x34x4xf32, #tpu.memory_space<vmem>>, vector<1x1x16x16x4xf32>
    %31 = vector.shape_cast %30 : vector<1x1x16x16x4xf32> to vector<16x16x4xf32>
    %32 = vector.shape_cast %31 : vector<16x16x4xf32> to vector<256x4xf32>
    %33 = tpu.concatenate %8, %11, %14, %17, %20, %23, %26, %29, %32 in 1 : vector<256x4xf32>, vector<256x4xf32>, vector<256x4xf32>, vector<256x4xf32>, vector<256x4xf32>, vector<256x4xf32>, vector<256x4xf32>, vector<256x4xf32>, vector<256x4xf32> -> vector<256x36xf32>
    %c0_45 = arith.constant 0 : index
    %c0_46 = arith.constant 0 : index
    %c0_47 = arith.constant 0 : index
    %c0_48 = arith.constant 0 : index
    %34 = vector.load %arg6[%c0_45, %c0_46, %c0_47, %c0_48] : memref<1x1x256x8xf32, #tpu.memory_space<vmem>>, vector<1x1x256x8xf32>
    %35 = vector.shape_cast %34 : vector<1x1x256x8xf32> to vector<256x8xf32>
    %cst = arith.constant dense<0.000000e+00> : vector<256x8xf32>
    %36 = tpu.matmul %33, %5, %cst {dimension_numbers = #tpu.dot_dimension_numbers<[1], [0], [0], [1], [0, 0, 1, 1], [], []>} : vector<256x36xf32>, vector<36x8xf32>, vector<256x8xf32> -> vector<256x8xf32>
    %37 = arith.addf %35, %36 : vector<256x8xf32>
    %c0_49 = arith.constant 0 : index
    %c0_50 = arith.constant 0 : index
    %c0_51 = arith.constant 0 : index
    %c0_52 = arith.constant 0 : index
    %38 = vector.load %arg6[%c0_49, %c0_50, %c0_51, %c0_52] : memref<1x1x256x8xf32, #tpu.memory_space<vmem>>, vector<1x1x256x8xf32>
    %39 = vector.shape_cast %38 : vector<1x1x256x8xf32> to vector<256x8xf32>
    %40 = vector.shape_cast %37 : vector<256x8xf32> to vector<1x1x256x8xf32>
    tpu.vector_store %arg6[%c0_49, %c0_50, %c0_51, %c0_52], %40 {strides = array<i32>} : memref<1x1x256x8xf32, #tpu.memory_space<vmem>>, vector<1x1x256x8xf32>,
    %c2_i32 = arith.constant 2 : i32
    %41 = arith.cmpi eq, %arg2, %c2_i32 : i32
    %42 = arith.extui %41 : i1 to i32
    %c0_i32_53 = arith.constant 0 : i32
    %43 = arith.cmpi ne, %42, %c0_i32_53 : i32
    scf.if %43 {
      %c0_54 = arith.constant 0 : index
      %c0_55 = arith.constant 0 : index
      %c0_56 = arith.constant 0 : index
      %c0_57 = arith.constant 0 : index
      %44 = vector.load %arg6[%c0_54, %c0_55, %c0_56, %c0_57] : memref<1x1x256x8xf32, #tpu.memory_space<vmem>>, vector<1x1x256x8xf32>
      %45 = vector.shape_cast %44 : vector<1x1x256x8xf32> to vector<256x8xf32>
      %c0_58 = arith.constant 0 : index
      %c0_59 = arith.constant 0 : index
      %46 = vector.load %arg5[%c0_58, %c0_59] : memref<1x8xf32, #tpu.memory_space<vmem>>, vector<1x8xf32>
      %47 = vector.broadcast %46 : vector<1x8xf32> to vector<256x8xf32>
      %48 = arith.addf %45, %47 : vector<256x8xf32>
      %cst_60 = arith.constant 0.000000e+00 : f32
      %49 = vector.broadcast %cst_60 : f32 to vector<256x8xf32>
      %50 = arith.maximumf %48, %49 : vector<256x8xf32>
      %c0_61 = arith.constant 0 : index
      %c0_62 = arith.constant 0 : index
      %c0_63 = arith.constant 0 : index
      %c0_64 = arith.constant 0 : index
      %51 = vector.load %arg6[%c0_61, %c0_62, %c0_63, %c0_64] : memref<1x1x256x8xf32, #tpu.memory_space<vmem>>, vector<1x1x256x8xf32>
      %52 = vector.shape_cast %51 : vector<1x1x256x8xf32> to vector<256x8xf32>
      %53 = vector.shape_cast %50 : vector<256x8xf32> to vector<1x1x256x8xf32>
      tpu.vector_store %arg6[%c0_61, %c0_62, %c0_63, %c0_64], %53 {strides = array<i32>} : memref<1x1x256x8xf32, #tpu.memory_space<vmem>>, vector<1x1x256x8xf32>,
    } else {
    }
    return
  }
  func.func @transform_0(%arg0: i32, %arg1: i32, %arg2: i32) -> (i32, i32, i32, i32, i32) {
    %c2_i32 = arith.constant 2 : i32
    %0 = arith.muli %c2_i32, %arg1 : i32
    %1 = arith.addi %0, %arg2 : i32
    %c0_i32 = arith.constant 0 : i32
    %c0_i32_0 = arith.constant 0 : i32
    %c0_i32_1 = arith.constant 0 : i32
    %c0_i32_2 = arith.constant 0 : i32
    return %arg0, %1, %c0_i32, %c0_i32_0, %c0_i32_1 : i32, i32, i32, i32, i32
  }
  func.func @transform_1(%arg0: i32, %arg1: i32, %arg2: i32) -> (i32, i32, i32) {
    %c0_i32 = arith.constant 0 : i32
    %c0_i32_0 = arith.constant 0 : i32
    %c0_i32_1 = arith.constant 0 : i32
    %c0_i32_2 = arith.constant 0 : i32
    return %c0_i32, %c0_i32_0, %c0_i32_1 : i32, i32, i32
  }
  func.func @transform_2(%arg0: i32, %arg1: i32, %arg2: i32) -> (i32, i32) {
    %c0_i32 = arith.constant 0 : i32
    %c0_i32_0 = arith.constant 0 : i32
    %c0_i32_1 = arith.constant 0 : i32
    return %c0_i32, %c0_i32_0 : i32, i32
  }
  func.func @transform_3(%arg0: i32, %arg1: i32, %arg2: i32) -> (i32, i32, i32, i32) {
    %c0_i32 = arith.constant 0 : i32
    %c0_i32_0 = arith.constant 0 : i32
    %c0_i32_1 = arith.constant 0 : i32
    return %arg0, %arg1, %c0_i32, %c0_i32_0 : i32, i32, i32, i32
  }
}

module attributes {stable_mosaic.version = 11 : i64} {
  func.func @_conv_tap_kernel(%arg0: i32, %arg1: i32, %arg2: i32, %arg3: memref<1x1x18x18x8xf32, #tpu.memory_space<vmem>>, %arg4: memref<3x72x8xf32, #tpu.memory_space<vmem>>, %arg5: memref<1x8xf32, #tpu.memory_space<vmem>>, %arg6: memref<1x1x256x8xf32, #tpu.memory_space<vmem>>, %arg7: memref<1x1x256x8xf32, #tpu.memory_space<vmem>>) attributes {dimension_semantics = [#tpu.dimension_semantics<parallel>, #tpu.dimension_semantics<parallel>, #tpu.dimension_semantics<arbitrary>], iteration_bounds = array<i64: 2, 4, 3>, scalar_prefetch = 0 : i64, scratch_operands = 0 : i64, tpu.core_type = #tpu.core_type<tc>, window_params = [{transform_indices = @transform_0, window_bounds = array<i64: 1, 1, 18, 18, 8>}, {pipeline_mode = #tpu.pipeline_mode<synchronous>, transform_indices = @transform_1, window_bounds = array<i64: 3, 72, 8>}, {pipeline_mode = #tpu.pipeline_mode<synchronous>, transform_indices = @transform_2, window_bounds = array<i64: 1, 8>}, {transform_indices = @transform_3, window_bounds = array<i64: 1, 1, 256, 8>}, {transform_indices = @transform_4, window_bounds = array<i64: 1, 1, 256, 8>}]} {
    %c0_i32 = arith.constant 0 : i32
    %0 = arith.cmpi eq, %arg2, %c0_i32 : i32
    %1 = arith.extui %0 : i1 to i32
    %c0_i32_0 = arith.constant 0 : i32
    %2 = arith.cmpi ne, %1, %c0_i32_0 : i32
    scf.if %2 {
      %cst_54 = arith.constant 0.000000e+00 : f32
      %44 = vector.broadcast %cst_54 : f32 to vector<256x8xf32>
      %c0_55 = arith.constant 0 : index
      %c0_56 = arith.constant 0 : index
      %c0_57 = arith.constant 0 : index
      %c0_58 = arith.constant 0 : index
      %45 = vector.load %arg7[%c0_55, %c0_56, %c0_57, %c0_58] : memref<1x1x256x8xf32, #tpu.memory_space<vmem>>, vector<1x1x256x8xf32>
      %46 = vector.shape_cast %45 : vector<1x1x256x8xf32> to vector<256x8xf32>
      %47 = vector.shape_cast %44 : vector<256x8xf32> to vector<1x1x256x8xf32>
      tpu.vector_store %arg7[%c0_55, %c0_56, %c0_57, %c0_58], %47 {strides = array<i32>} : memref<1x1x256x8xf32, #tpu.memory_space<vmem>>, vector<1x1x256x8xf32>,
    } else {
    }
    %3 = arith.index_cast %arg2 : i32 to index
    %c0 = arith.constant 0 : index
    %c0_1 = arith.constant 0 : index
    %4 = vector.load %arg4[%3, %c0, %c0_1] : memref<3x72x8xf32, #tpu.memory_space<vmem>>, vector<1x72x8xf32>
    %5 = vector.shape_cast %4 : vector<1x72x8xf32> to vector<72x8xf32>
    %c0_2 = arith.constant 0 : index
    %c0_3 = arith.constant 0 : index
    %c0_4 = arith.constant 0 : index
    %c0_5 = arith.constant 0 : index
    %c0_6 = arith.constant 0 : index
    %6 = vector.load %arg3[%c0_2, %c0_3, %c0_4, %c0_5, %c0_6] : memref<1x1x18x18x8xf32, #tpu.memory_space<vmem>>, vector<1x1x16x16x8xf32>
    %7 = vector.shape_cast %6 : vector<1x1x16x16x8xf32> to vector<16x16x8xf32>
    %8 = vector.shape_cast %7 : vector<16x16x8xf32> to vector<256x8xf32>
    %c0_7 = arith.constant 0 : index
    %c0_8 = arith.constant 0 : index
    %c0_9 = arith.constant 0 : index
    %c1 = arith.constant 1 : index
    %c0_10 = arith.constant 0 : index
    %9 = vector.load %arg3[%c0_7, %c0_8, %c0_9, %c1, %c0_10] : memref<1x1x18x18x8xf32, #tpu.memory_space<vmem>>, vector<1x1x16x16x8xf32>
    %10 = vector.shape_cast %9 : vector<1x1x16x16x8xf32> to vector<16x16x8xf32>
    %11 = vector.shape_cast %10 : vector<16x16x8xf32> to vector<256x8xf32>
    %c0_11 = arith.constant 0 : index
    %c0_12 = arith.constant 0 : index
    %c0_13 = arith.constant 0 : index
    %c2 = arith.constant 2 : index
    %c0_14 = arith.constant 0 : index
    %12 = vector.load %arg3[%c0_11, %c0_12, %c0_13, %c2, %c0_14] : memref<1x1x18x18x8xf32, #tpu.memory_space<vmem>>, vector<1x1x16x16x8xf32>
    %13 = vector.shape_cast %12 : vector<1x1x16x16x8xf32> to vector<16x16x8xf32>
    %14 = vector.shape_cast %13 : vector<16x16x8xf32> to vector<256x8xf32>
    %c0_15 = arith.constant 0 : index
    %c0_16 = arith.constant 0 : index
    %c1_17 = arith.constant 1 : index
    %c0_18 = arith.constant 0 : index
    %c0_19 = arith.constant 0 : index
    %15 = vector.load %arg3[%c0_15, %c0_16, %c1_17, %c0_18, %c0_19] : memref<1x1x18x18x8xf32, #tpu.memory_space<vmem>>, vector<1x1x16x16x8xf32>
    %16 = vector.shape_cast %15 : vector<1x1x16x16x8xf32> to vector<16x16x8xf32>
    %17 = vector.shape_cast %16 : vector<16x16x8xf32> to vector<256x8xf32>
    %c0_20 = arith.constant 0 : index
    %c0_21 = arith.constant 0 : index
    %c1_22 = arith.constant 1 : index
    %c1_23 = arith.constant 1 : index
    %c0_24 = arith.constant 0 : index
    %18 = vector.load %arg3[%c0_20, %c0_21, %c1_22, %c1_23, %c0_24] : memref<1x1x18x18x8xf32, #tpu.memory_space<vmem>>, vector<1x1x16x16x8xf32>
    %19 = vector.shape_cast %18 : vector<1x1x16x16x8xf32> to vector<16x16x8xf32>
    %20 = vector.shape_cast %19 : vector<16x16x8xf32> to vector<256x8xf32>
    %c0_25 = arith.constant 0 : index
    %c0_26 = arith.constant 0 : index
    %c1_27 = arith.constant 1 : index
    %c2_28 = arith.constant 2 : index
    %c0_29 = arith.constant 0 : index
    %21 = vector.load %arg3[%c0_25, %c0_26, %c1_27, %c2_28, %c0_29] : memref<1x1x18x18x8xf32, #tpu.memory_space<vmem>>, vector<1x1x16x16x8xf32>
    %22 = vector.shape_cast %21 : vector<1x1x16x16x8xf32> to vector<16x16x8xf32>
    %23 = vector.shape_cast %22 : vector<16x16x8xf32> to vector<256x8xf32>
    %c0_30 = arith.constant 0 : index
    %c0_31 = arith.constant 0 : index
    %c2_32 = arith.constant 2 : index
    %c0_33 = arith.constant 0 : index
    %c0_34 = arith.constant 0 : index
    %24 = vector.load %arg3[%c0_30, %c0_31, %c2_32, %c0_33, %c0_34] : memref<1x1x18x18x8xf32, #tpu.memory_space<vmem>>, vector<1x1x16x16x8xf32>
    %25 = vector.shape_cast %24 : vector<1x1x16x16x8xf32> to vector<16x16x8xf32>
    %26 = vector.shape_cast %25 : vector<16x16x8xf32> to vector<256x8xf32>
    %c0_35 = arith.constant 0 : index
    %c0_36 = arith.constant 0 : index
    %c2_37 = arith.constant 2 : index
    %c1_38 = arith.constant 1 : index
    %c0_39 = arith.constant 0 : index
    %27 = vector.load %arg3[%c0_35, %c0_36, %c2_37, %c1_38, %c0_39] : memref<1x1x18x18x8xf32, #tpu.memory_space<vmem>>, vector<1x1x16x16x8xf32>
    %28 = vector.shape_cast %27 : vector<1x1x16x16x8xf32> to vector<16x16x8xf32>
    %29 = vector.shape_cast %28 : vector<16x16x8xf32> to vector<256x8xf32>
    %c0_40 = arith.constant 0 : index
    %c0_41 = arith.constant 0 : index
    %c2_42 = arith.constant 2 : index
    %c2_43 = arith.constant 2 : index
    %c0_44 = arith.constant 0 : index
    %30 = vector.load %arg3[%c0_40, %c0_41, %c2_42, %c2_43, %c0_44] : memref<1x1x18x18x8xf32, #tpu.memory_space<vmem>>, vector<1x1x16x16x8xf32>
    %31 = vector.shape_cast %30 : vector<1x1x16x16x8xf32> to vector<16x16x8xf32>
    %32 = vector.shape_cast %31 : vector<16x16x8xf32> to vector<256x8xf32>
    %33 = tpu.concatenate %8, %11, %14, %17, %20, %23, %26, %29, %32 in 1 : vector<256x8xf32>, vector<256x8xf32>, vector<256x8xf32>, vector<256x8xf32>, vector<256x8xf32>, vector<256x8xf32>, vector<256x8xf32>, vector<256x8xf32>, vector<256x8xf32> -> vector<256x72xf32>
    %c0_45 = arith.constant 0 : index
    %c0_46 = arith.constant 0 : index
    %c0_47 = arith.constant 0 : index
    %c0_48 = arith.constant 0 : index
    %34 = vector.load %arg7[%c0_45, %c0_46, %c0_47, %c0_48] : memref<1x1x256x8xf32, #tpu.memory_space<vmem>>, vector<1x1x256x8xf32>
    %35 = vector.shape_cast %34 : vector<1x1x256x8xf32> to vector<256x8xf32>
    %cst = arith.constant dense<0.000000e+00> : vector<256x8xf32>
    %36 = tpu.matmul %33, %5, %cst {dimension_numbers = #tpu.dot_dimension_numbers<[1], [0], [0], [1], [0, 0, 1, 1], [], []>} : vector<256x72xf32>, vector<72x8xf32>, vector<256x8xf32> -> vector<256x8xf32>
    %37 = arith.addf %35, %36 : vector<256x8xf32>
    %c0_49 = arith.constant 0 : index
    %c0_50 = arith.constant 0 : index
    %c0_51 = arith.constant 0 : index
    %c0_52 = arith.constant 0 : index
    %38 = vector.load %arg7[%c0_49, %c0_50, %c0_51, %c0_52] : memref<1x1x256x8xf32, #tpu.memory_space<vmem>>, vector<1x1x256x8xf32>
    %39 = vector.shape_cast %38 : vector<1x1x256x8xf32> to vector<256x8xf32>
    %40 = vector.shape_cast %37 : vector<256x8xf32> to vector<1x1x256x8xf32>
    tpu.vector_store %arg7[%c0_49, %c0_50, %c0_51, %c0_52], %40 {strides = array<i32>} : memref<1x1x256x8xf32, #tpu.memory_space<vmem>>, vector<1x1x256x8xf32>,
    %c2_i32 = arith.constant 2 : i32
    %41 = arith.cmpi eq, %arg2, %c2_i32 : i32
    %42 = arith.extui %41 : i1 to i32
    %c0_i32_53 = arith.constant 0 : i32
    %43 = arith.cmpi ne, %42, %c0_i32_53 : i32
    scf.if %43 {
      %c0_54 = arith.constant 0 : index
      %c0_55 = arith.constant 0 : index
      %c0_56 = arith.constant 0 : index
      %c0_57 = arith.constant 0 : index
      %44 = vector.load %arg7[%c0_54, %c0_55, %c0_56, %c0_57] : memref<1x1x256x8xf32, #tpu.memory_space<vmem>>, vector<1x1x256x8xf32>
      %45 = vector.shape_cast %44 : vector<1x1x256x8xf32> to vector<256x8xf32>
      %c0_58 = arith.constant 0 : index
      %c0_59 = arith.constant 0 : index
      %46 = vector.load %arg5[%c0_58, %c0_59] : memref<1x8xf32, #tpu.memory_space<vmem>>, vector<1x8xf32>
      %47 = vector.broadcast %46 : vector<1x8xf32> to vector<256x8xf32>
      %48 = arith.addf %45, %47 : vector<256x8xf32>
      %c0_60 = arith.constant 0 : index
      %c0_61 = arith.constant 0 : index
      %c0_62 = arith.constant 0 : index
      %c0_63 = arith.constant 0 : index
      %49 = vector.load %arg6[%c0_60, %c0_61, %c0_62, %c0_63] : memref<1x1x256x8xf32, #tpu.memory_space<vmem>>, vector<1x1x256x8xf32>
      %50 = vector.shape_cast %49 : vector<1x1x256x8xf32> to vector<256x8xf32>
      %51 = arith.addf %48, %50 : vector<256x8xf32>
      %cst_64 = arith.constant 0.000000e+00 : f32
      %52 = vector.broadcast %cst_64 : f32 to vector<256x8xf32>
      %53 = arith.maximumf %51, %52 : vector<256x8xf32>
      %c0_65 = arith.constant 0 : index
      %c0_66 = arith.constant 0 : index
      %c0_67 = arith.constant 0 : index
      %c0_68 = arith.constant 0 : index
      %54 = vector.load %arg7[%c0_65, %c0_66, %c0_67, %c0_68] : memref<1x1x256x8xf32, #tpu.memory_space<vmem>>, vector<1x1x256x8xf32>
      %55 = vector.shape_cast %54 : vector<1x1x256x8xf32> to vector<256x8xf32>
      %56 = vector.shape_cast %53 : vector<256x8xf32> to vector<1x1x256x8xf32>
      tpu.vector_store %arg7[%c0_65, %c0_66, %c0_67, %c0_68], %56 {strides = array<i32>} : memref<1x1x256x8xf32, #tpu.memory_space<vmem>>, vector<1x1x256x8xf32>,
    } else {
    }
    return
  }
  func.func @transform_0(%arg0: i32, %arg1: i32, %arg2: i32) -> (i32, i32, i32, i32, i32) {
    %c1_i32 = arith.constant 1 : i32
    %0 = arith.muli %c1_i32, %arg1 : i32
    %1 = arith.addi %0, %arg2 : i32
    %c0_i32 = arith.constant 0 : i32
    %c0_i32_0 = arith.constant 0 : i32
    %c0_i32_1 = arith.constant 0 : i32
    %c0_i32_2 = arith.constant 0 : i32
    return %arg0, %1, %c0_i32, %c0_i32_0, %c0_i32_1 : i32, i32, i32, i32, i32
  }
  func.func @transform_1(%arg0: i32, %arg1: i32, %arg2: i32) -> (i32, i32, i32) {
    %c0_i32 = arith.constant 0 : i32
    %c0_i32_0 = arith.constant 0 : i32
    %c0_i32_1 = arith.constant 0 : i32
    %c0_i32_2 = arith.constant 0 : i32
    return %c0_i32, %c0_i32_0, %c0_i32_1 : i32, i32, i32
  }
  func.func @transform_2(%arg0: i32, %arg1: i32, %arg2: i32) -> (i32, i32) {
    %c0_i32 = arith.constant 0 : i32
    %c0_i32_0 = arith.constant 0 : i32
    %c0_i32_1 = arith.constant 0 : i32
    return %c0_i32, %c0_i32_0 : i32, i32
  }
  func.func @transform_3(%arg0: i32, %arg1: i32, %arg2: i32) -> (i32, i32, i32, i32) {
    %c0_i32 = arith.constant 0 : i32
    %c0_i32_0 = arith.constant 0 : i32
    %c0_i32_1 = arith.constant 0 : i32
    return %arg0, %arg1, %c0_i32, %c0_i32_0 : i32, i32, i32, i32
  }
  func.func @transform_4(%arg0: i32, %arg1: i32, %arg2: i32) -> (i32, i32, i32, i32) {
    %c0_i32 = arith.constant 0 : i32
    %c0_i32_0 = arith.constant 0 : i32
    %c0_i32_1 = arith.constant 0 : i32
    return %arg0, %arg1, %c0_i32, %c0_i32_0 : i32, i32, i32, i32
  }
}

module attributes {stable_mosaic.version = 11 : i64} {
  func.func @_conv_tap_kernel(%arg0: i32, %arg1: i32, %arg2: i32, %arg3: memref<1x1x18x18x8xf32, #tpu.memory_space<vmem>>, %arg4: memref<3x72x8xf32, #tpu.memory_space<vmem>>, %arg5: memref<1x8xf32, #tpu.memory_space<vmem>>, %arg6: memref<1x1x64x8xf32, #tpu.memory_space<vmem>>) attributes {dimension_semantics = [#tpu.dimension_semantics<parallel>, #tpu.dimension_semantics<parallel>, #tpu.dimension_semantics<arbitrary>], iteration_bounds = array<i64: 2, 2, 3>, scalar_prefetch = 0 : i64, scratch_operands = 0 : i64, tpu.core_type = #tpu.core_type<tc>, window_params = [{transform_indices = @transform_0, window_bounds = array<i64: 1, 1, 18, 18, 8>}, {pipeline_mode = #tpu.pipeline_mode<synchronous>, transform_indices = @transform_1, window_bounds = array<i64: 3, 72, 8>}, {pipeline_mode = #tpu.pipeline_mode<synchronous>, transform_indices = @transform_2, window_bounds = array<i64: 1, 8>}, {transform_indices = @transform_3, window_bounds = array<i64: 1, 1, 64, 8>}]} {
    %c0_i32 = arith.constant 0 : i32
    %0 = arith.cmpi eq, %arg2, %c0_i32 : i32
    %1 = arith.extui %0 : i1 to i32
    %c0_i32_0 = arith.constant 0 : i32
    %2 = arith.cmpi ne, %1, %c0_i32_0 : i32
    scf.if %2 {
      %cst_54 = arith.constant 0.000000e+00 : f32
      %44 = vector.broadcast %cst_54 : f32 to vector<64x8xf32>
      %c0_55 = arith.constant 0 : index
      %c0_56 = arith.constant 0 : index
      %c0_57 = arith.constant 0 : index
      %c0_58 = arith.constant 0 : index
      %45 = vector.load %arg6[%c0_55, %c0_56, %c0_57, %c0_58] : memref<1x1x64x8xf32, #tpu.memory_space<vmem>>, vector<1x1x64x8xf32>
      %46 = vector.shape_cast %45 : vector<1x1x64x8xf32> to vector<64x8xf32>
      %47 = vector.shape_cast %44 : vector<64x8xf32> to vector<1x1x64x8xf32>
      tpu.vector_store %arg6[%c0_55, %c0_56, %c0_57, %c0_58], %47 {strides = array<i32>} : memref<1x1x64x8xf32, #tpu.memory_space<vmem>>, vector<1x1x64x8xf32>,
    } else {
    }
    %3 = arith.index_cast %arg2 : i32 to index
    %c0 = arith.constant 0 : index
    %c0_1 = arith.constant 0 : index
    %4 = vector.load %arg4[%3, %c0, %c0_1] : memref<3x72x8xf32, #tpu.memory_space<vmem>>, vector<1x72x8xf32>
    %5 = vector.shape_cast %4 : vector<1x72x8xf32> to vector<72x8xf32>
    %c0_2 = arith.constant 0 : index
    %c0_3 = arith.constant 0 : index
    %c0_4 = arith.constant 0 : index
    %c0_5 = arith.constant 0 : index
    %c0_6 = arith.constant 0 : index
    %6 = vector.load %arg3[%c0_2, %c0_3, %c0_4, %c0_5, %c0_6] : memref<1x1x18x18x8xf32, #tpu.memory_space<vmem>>, vector<1x1x8x8x8xf32>
    %7 = vector.shape_cast %6 : vector<1x1x8x8x8xf32> to vector<8x8x8xf32>
    %8 = vector.shape_cast %7 : vector<8x8x8xf32> to vector<64x8xf32>
    %c0_7 = arith.constant 0 : index
    %c0_8 = arith.constant 0 : index
    %c0_9 = arith.constant 0 : index
    %c9 = arith.constant 9 : index
    %c0_10 = arith.constant 0 : index
    %9 = vector.load %arg3[%c0_7, %c0_8, %c0_9, %c9, %c0_10] : memref<1x1x18x18x8xf32, #tpu.memory_space<vmem>>, vector<1x1x8x8x8xf32>
    %10 = vector.shape_cast %9 : vector<1x1x8x8x8xf32> to vector<8x8x8xf32>
    %11 = vector.shape_cast %10 : vector<8x8x8xf32> to vector<64x8xf32>
    %c0_11 = arith.constant 0 : index
    %c0_12 = arith.constant 0 : index
    %c0_13 = arith.constant 0 : index
    %c1 = arith.constant 1 : index
    %c0_14 = arith.constant 0 : index
    %12 = vector.load %arg3[%c0_11, %c0_12, %c0_13, %c1, %c0_14] : memref<1x1x18x18x8xf32, #tpu.memory_space<vmem>>, vector<1x1x8x8x8xf32>
    %13 = vector.shape_cast %12 : vector<1x1x8x8x8xf32> to vector<8x8x8xf32>
    %14 = vector.shape_cast %13 : vector<8x8x8xf32> to vector<64x8xf32>
    %c0_15 = arith.constant 0 : index
    %c0_16 = arith.constant 0 : index
    %c9_17 = arith.constant 9 : index
    %c0_18 = arith.constant 0 : index
    %c0_19 = arith.constant 0 : index
    %15 = vector.load %arg3[%c0_15, %c0_16, %c9_17, %c0_18, %c0_19] : memref<1x1x18x18x8xf32, #tpu.memory_space<vmem>>, vector<1x1x8x8x8xf32>
    %16 = vector.shape_cast %15 : vector<1x1x8x8x8xf32> to vector<8x8x8xf32>
    %17 = vector.shape_cast %16 : vector<8x8x8xf32> to vector<64x8xf32>
    %c0_20 = arith.constant 0 : index
    %c0_21 = arith.constant 0 : index
    %c9_22 = arith.constant 9 : index
    %c9_23 = arith.constant 9 : index
    %c0_24 = arith.constant 0 : index
    %18 = vector.load %arg3[%c0_20, %c0_21, %c9_22, %c9_23, %c0_24] : memref<1x1x18x18x8xf32, #tpu.memory_space<vmem>>, vector<1x1x8x8x8xf32>
    %19 = vector.shape_cast %18 : vector<1x1x8x8x8xf32> to vector<8x8x8xf32>
    %20 = vector.shape_cast %19 : vector<8x8x8xf32> to vector<64x8xf32>
    %c0_25 = arith.constant 0 : index
    %c0_26 = arith.constant 0 : index
    %c9_27 = arith.constant 9 : index
    %c1_28 = arith.constant 1 : index
    %c0_29 = arith.constant 0 : index
    %21 = vector.load %arg3[%c0_25, %c0_26, %c9_27, %c1_28, %c0_29] : memref<1x1x18x18x8xf32, #tpu.memory_space<vmem>>, vector<1x1x8x8x8xf32>
    %22 = vector.shape_cast %21 : vector<1x1x8x8x8xf32> to vector<8x8x8xf32>
    %23 = vector.shape_cast %22 : vector<8x8x8xf32> to vector<64x8xf32>
    %c0_30 = arith.constant 0 : index
    %c0_31 = arith.constant 0 : index
    %c1_32 = arith.constant 1 : index
    %c0_33 = arith.constant 0 : index
    %c0_34 = arith.constant 0 : index
    %24 = vector.load %arg3[%c0_30, %c0_31, %c1_32, %c0_33, %c0_34] : memref<1x1x18x18x8xf32, #tpu.memory_space<vmem>>, vector<1x1x8x8x8xf32>
    %25 = vector.shape_cast %24 : vector<1x1x8x8x8xf32> to vector<8x8x8xf32>
    %26 = vector.shape_cast %25 : vector<8x8x8xf32> to vector<64x8xf32>
    %c0_35 = arith.constant 0 : index
    %c0_36 = arith.constant 0 : index
    %c1_37 = arith.constant 1 : index
    %c9_38 = arith.constant 9 : index
    %c0_39 = arith.constant 0 : index
    %27 = vector.load %arg3[%c0_35, %c0_36, %c1_37, %c9_38, %c0_39] : memref<1x1x18x18x8xf32, #tpu.memory_space<vmem>>, vector<1x1x8x8x8xf32>
    %28 = vector.shape_cast %27 : vector<1x1x8x8x8xf32> to vector<8x8x8xf32>
    %29 = vector.shape_cast %28 : vector<8x8x8xf32> to vector<64x8xf32>
    %c0_40 = arith.constant 0 : index
    %c0_41 = arith.constant 0 : index
    %c1_42 = arith.constant 1 : index
    %c1_43 = arith.constant 1 : index
    %c0_44 = arith.constant 0 : index
    %30 = vector.load %arg3[%c0_40, %c0_41, %c1_42, %c1_43, %c0_44] : memref<1x1x18x18x8xf32, #tpu.memory_space<vmem>>, vector<1x1x8x8x8xf32>
    %31 = vector.shape_cast %30 : vector<1x1x8x8x8xf32> to vector<8x8x8xf32>
    %32 = vector.shape_cast %31 : vector<8x8x8xf32> to vector<64x8xf32>
    %33 = tpu.concatenate %8, %11, %14, %17, %20, %23, %26, %29, %32 in 1 : vector<64x8xf32>, vector<64x8xf32>, vector<64x8xf32>, vector<64x8xf32>, vector<64x8xf32>, vector<64x8xf32>, vector<64x8xf32>, vector<64x8xf32>, vector<64x8xf32> -> vector<64x72xf32>
    %c0_45 = arith.constant 0 : index
    %c0_46 = arith.constant 0 : index
    %c0_47 = arith.constant 0 : index
    %c0_48 = arith.constant 0 : index
    %34 = vector.load %arg6[%c0_45, %c0_46, %c0_47, %c0_48] : memref<1x1x64x8xf32, #tpu.memory_space<vmem>>, vector<1x1x64x8xf32>
    %35 = vector.shape_cast %34 : vector<1x1x64x8xf32> to vector<64x8xf32>
    %cst = arith.constant dense<0.000000e+00> : vector<64x8xf32>
    %36 = tpu.matmul %33, %5, %cst {dimension_numbers = #tpu.dot_dimension_numbers<[1], [0], [0], [1], [0, 0, 1, 1], [], []>} : vector<64x72xf32>, vector<72x8xf32>, vector<64x8xf32> -> vector<64x8xf32>
    %37 = arith.addf %35, %36 : vector<64x8xf32>
    %c0_49 = arith.constant 0 : index
    %c0_50 = arith.constant 0 : index
    %c0_51 = arith.constant 0 : index
    %c0_52 = arith.constant 0 : index
    %38 = vector.load %arg6[%c0_49, %c0_50, %c0_51, %c0_52] : memref<1x1x64x8xf32, #tpu.memory_space<vmem>>, vector<1x1x64x8xf32>
    %39 = vector.shape_cast %38 : vector<1x1x64x8xf32> to vector<64x8xf32>
    %40 = vector.shape_cast %37 : vector<64x8xf32> to vector<1x1x64x8xf32>
    tpu.vector_store %arg6[%c0_49, %c0_50, %c0_51, %c0_52], %40 {strides = array<i32>} : memref<1x1x64x8xf32, #tpu.memory_space<vmem>>, vector<1x1x64x8xf32>,
    %c2_i32 = arith.constant 2 : i32
    %41 = arith.cmpi eq, %arg2, %c2_i32 : i32
    %42 = arith.extui %41 : i1 to i32
    %c0_i32_53 = arith.constant 0 : i32
    %43 = arith.cmpi ne, %42, %c0_i32_53 : i32
    scf.if %43 {
      %c0_54 = arith.constant 0 : index
      %c0_55 = arith.constant 0 : index
      %c0_56 = arith.constant 0 : index
      %c0_57 = arith.constant 0 : index
      %44 = vector.load %arg6[%c0_54, %c0_55, %c0_56, %c0_57] : memref<1x1x64x8xf32, #tpu.memory_space<vmem>>, vector<1x1x64x8xf32>
      %45 = vector.shape_cast %44 : vector<1x1x64x8xf32> to vector<64x8xf32>
      %c0_58 = arith.constant 0 : index
      %c0_59 = arith.constant 0 : index
      %46 = vector.load %arg5[%c0_58, %c0_59] : memref<1x8xf32, #tpu.memory_space<vmem>>, vector<1x8xf32>
      %47 = vector.broadcast %46 : vector<1x8xf32> to vector<64x8xf32>
      %48 = arith.addf %45, %47 : vector<64x8xf32>
      %cst_60 = arith.constant 0.000000e+00 : f32
      %49 = vector.broadcast %cst_60 : f32 to vector<64x8xf32>
      %50 = arith.maximumf %48, %49 : vector<64x8xf32>
      %c0_61 = arith.constant 0 : index
      %c0_62 = arith.constant 0 : index
      %c0_63 = arith.constant 0 : index
      %c0_64 = arith.constant 0 : index
      %51 = vector.load %arg6[%c0_61, %c0_62, %c0_63, %c0_64] : memref<1x1x64x8xf32, #tpu.memory_space<vmem>>, vector<1x1x64x8xf32>
      %52 = vector.shape_cast %51 : vector<1x1x64x8xf32> to vector<64x8xf32>
      %53 = vector.shape_cast %50 : vector<64x8xf32> to vector<1x1x64x8xf32>
      tpu.vector_store %arg6[%c0_61, %c0_62, %c0_63, %c0_64], %53 {strides = array<i32>} : memref<1x1x64x8xf32, #tpu.memory_space<vmem>>, vector<1x1x64x8xf32>,
    } else {
    }
    return
  }
  func.func @transform_0(%arg0: i32, %arg1: i32, %arg2: i32) -> (i32, i32, i32, i32, i32) {
    %c2_i32 = arith.constant 2 : i32
    %0 = arith.muli %c2_i32, %arg1 : i32
    %1 = arith.addi %0, %arg2 : i32
    %c0_i32 = arith.constant 0 : i32
    %c0_i32_0 = arith.constant 0 : i32
    %c0_i32_1 = arith.constant 0 : i32
    %c0_i32_2 = arith.constant 0 : i32
    return %arg0, %1, %c0_i32, %c0_i32_0, %c0_i32_1 : i32, i32, i32, i32, i32
  }
  func.func @transform_1(%arg0: i32, %arg1: i32, %arg2: i32) -> (i32, i32, i32) {
    %c0_i32 = arith.constant 0 : i32
    %c0_i32_0 = arith.constant 0 : i32
    %c0_i32_1 = arith.constant 0 : i32
    %c0_i32_2 = arith.constant 0 : i32
    return %c0_i32, %c0_i32_0, %c0_i32_1 : i32, i32, i32
  }
  func.func @transform_2(%arg0: i32, %arg1: i32, %arg2: i32) -> (i32, i32) {
    %c0_i32 = arith.constant 0 : i32
    %c0_i32_0 = arith.constant 0 : i32
    %c0_i32_1 = arith.constant 0 : i32
    return %c0_i32, %c0_i32_0 : i32, i32
  }
  func.func @transform_3(%arg0: i32, %arg1: i32, %arg2: i32) -> (i32, i32, i32, i32) {
    %c0_i32 = arith.constant 0 : i32
    %c0_i32_0 = arith.constant 0 : i32
    %c0_i32_1 = arith.constant 0 : i32
    return %arg0, %arg1, %c0_i32, %c0_i32_0 : i32, i32, i32, i32
  }
}

module attributes {stable_mosaic.version = 11 : i64} {
  func.func @_conv_tap_kernel(%arg0: i32, %arg1: i32, %arg2: i32, %arg3: memref<1x1x10x10x8xf32, #tpu.memory_space<vmem>>, %arg4: memref<3x72x8xf32, #tpu.memory_space<vmem>>, %arg5: memref<1x8xf32, #tpu.memory_space<vmem>>, %arg6: memref<1x1x64x8xf32, #tpu.memory_space<vmem>>) attributes {dimension_semantics = [#tpu.dimension_semantics<parallel>, #tpu.dimension_semantics<parallel>, #tpu.dimension_semantics<arbitrary>], iteration_bounds = array<i64: 2, 2, 3>, scalar_prefetch = 0 : i64, scratch_operands = 0 : i64, tpu.core_type = #tpu.core_type<tc>, window_params = [{transform_indices = @transform_0, window_bounds = array<i64: 1, 1, 10, 10, 8>}, {pipeline_mode = #tpu.pipeline_mode<synchronous>, transform_indices = @transform_1, window_bounds = array<i64: 3, 72, 8>}, {pipeline_mode = #tpu.pipeline_mode<synchronous>, transform_indices = @transform_2, window_bounds = array<i64: 1, 8>}, {transform_indices = @transform_3, window_bounds = array<i64: 1, 1, 64, 8>}]} {
    %c0_i32 = arith.constant 0 : i32
    %0 = arith.cmpi eq, %arg2, %c0_i32 : i32
    %1 = arith.extui %0 : i1 to i32
    %c0_i32_0 = arith.constant 0 : i32
    %2 = arith.cmpi ne, %1, %c0_i32_0 : i32
    scf.if %2 {
      %cst_54 = arith.constant 0.000000e+00 : f32
      %44 = vector.broadcast %cst_54 : f32 to vector<64x8xf32>
      %c0_55 = arith.constant 0 : index
      %c0_56 = arith.constant 0 : index
      %c0_57 = arith.constant 0 : index
      %c0_58 = arith.constant 0 : index
      %45 = vector.load %arg6[%c0_55, %c0_56, %c0_57, %c0_58] : memref<1x1x64x8xf32, #tpu.memory_space<vmem>>, vector<1x1x64x8xf32>
      %46 = vector.shape_cast %45 : vector<1x1x64x8xf32> to vector<64x8xf32>
      %47 = vector.shape_cast %44 : vector<64x8xf32> to vector<1x1x64x8xf32>
      tpu.vector_store %arg6[%c0_55, %c0_56, %c0_57, %c0_58], %47 {strides = array<i32>} : memref<1x1x64x8xf32, #tpu.memory_space<vmem>>, vector<1x1x64x8xf32>,
    } else {
    }
    %3 = arith.index_cast %arg2 : i32 to index
    %c0 = arith.constant 0 : index
    %c0_1 = arith.constant 0 : index
    %4 = vector.load %arg4[%3, %c0, %c0_1] : memref<3x72x8xf32, #tpu.memory_space<vmem>>, vector<1x72x8xf32>
    %5 = vector.shape_cast %4 : vector<1x72x8xf32> to vector<72x8xf32>
    %c0_2 = arith.constant 0 : index
    %c0_3 = arith.constant 0 : index
    %c0_4 = arith.constant 0 : index
    %c0_5 = arith.constant 0 : index
    %c0_6 = arith.constant 0 : index
    %6 = vector.load %arg3[%c0_2, %c0_3, %c0_4, %c0_5, %c0_6] : memref<1x1x10x10x8xf32, #tpu.memory_space<vmem>>, vector<1x1x8x8x8xf32>
    %7 = vector.shape_cast %6 : vector<1x1x8x8x8xf32> to vector<8x8x8xf32>
    %8 = vector.shape_cast %7 : vector<8x8x8xf32> to vector<64x8xf32>
    %c0_7 = arith.constant 0 : index
    %c0_8 = arith.constant 0 : index
    %c0_9 = arith.constant 0 : index
    %c1 = arith.constant 1 : index
    %c0_10 = arith.constant 0 : index
    %9 = vector.load %arg3[%c0_7, %c0_8, %c0_9, %c1, %c0_10] : memref<1x1x10x10x8xf32, #tpu.memory_space<vmem>>, vector<1x1x8x8x8xf32>
    %10 = vector.shape_cast %9 : vector<1x1x8x8x8xf32> to vector<8x8x8xf32>
    %11 = vector.shape_cast %10 : vector<8x8x8xf32> to vector<64x8xf32>
    %c0_11 = arith.constant 0 : index
    %c0_12 = arith.constant 0 : index
    %c0_13 = arith.constant 0 : index
    %c2 = arith.constant 2 : index
    %c0_14 = arith.constant 0 : index
    %12 = vector.load %arg3[%c0_11, %c0_12, %c0_13, %c2, %c0_14] : memref<1x1x10x10x8xf32, #tpu.memory_space<vmem>>, vector<1x1x8x8x8xf32>
    %13 = vector.shape_cast %12 : vector<1x1x8x8x8xf32> to vector<8x8x8xf32>
    %14 = vector.shape_cast %13 : vector<8x8x8xf32> to vector<64x8xf32>
    %c0_15 = arith.constant 0 : index
    %c0_16 = arith.constant 0 : index
    %c1_17 = arith.constant 1 : index
    %c0_18 = arith.constant 0 : index
    %c0_19 = arith.constant 0 : index
    %15 = vector.load %arg3[%c0_15, %c0_16, %c1_17, %c0_18, %c0_19] : memref<1x1x10x10x8xf32, #tpu.memory_space<vmem>>, vector<1x1x8x8x8xf32>
    %16 = vector.shape_cast %15 : vector<1x1x8x8x8xf32> to vector<8x8x8xf32>
    %17 = vector.shape_cast %16 : vector<8x8x8xf32> to vector<64x8xf32>
    %c0_20 = arith.constant 0 : index
    %c0_21 = arith.constant 0 : index
    %c1_22 = arith.constant 1 : index
    %c1_23 = arith.constant 1 : index
    %c0_24 = arith.constant 0 : index
    %18 = vector.load %arg3[%c0_20, %c0_21, %c1_22, %c1_23, %c0_24] : memref<1x1x10x10x8xf32, #tpu.memory_space<vmem>>, vector<1x1x8x8x8xf32>
    %19 = vector.shape_cast %18 : vector<1x1x8x8x8xf32> to vector<8x8x8xf32>
    %20 = vector.shape_cast %19 : vector<8x8x8xf32> to vector<64x8xf32>
    %c0_25 = arith.constant 0 : index
    %c0_26 = arith.constant 0 : index
    %c1_27 = arith.constant 1 : index
    %c2_28 = arith.constant 2 : index
    %c0_29 = arith.constant 0 : index
    %21 = vector.load %arg3[%c0_25, %c0_26, %c1_27, %c2_28, %c0_29] : memref<1x1x10x10x8xf32, #tpu.memory_space<vmem>>, vector<1x1x8x8x8xf32>
    %22 = vector.shape_cast %21 : vector<1x1x8x8x8xf32> to vector<8x8x8xf32>
    %23 = vector.shape_cast %22 : vector<8x8x8xf32> to vector<64x8xf32>
    %c0_30 = arith.constant 0 : index
    %c0_31 = arith.constant 0 : index
    %c2_32 = arith.constant 2 : index
    %c0_33 = arith.constant 0 : index
    %c0_34 = arith.constant 0 : index
    %24 = vector.load %arg3[%c0_30, %c0_31, %c2_32, %c0_33, %c0_34] : memref<1x1x10x10x8xf32, #tpu.memory_space<vmem>>, vector<1x1x8x8x8xf32>
    %25 = vector.shape_cast %24 : vector<1x1x8x8x8xf32> to vector<8x8x8xf32>
    %26 = vector.shape_cast %25 : vector<8x8x8xf32> to vector<64x8xf32>
    %c0_35 = arith.constant 0 : index
    %c0_36 = arith.constant 0 : index
    %c2_37 = arith.constant 2 : index
    %c1_38 = arith.constant 1 : index
    %c0_39 = arith.constant 0 : index
    %27 = vector.load %arg3[%c0_35, %c0_36, %c2_37, %c1_38, %c0_39] : memref<1x1x10x10x8xf32, #tpu.memory_space<vmem>>, vector<1x1x8x8x8xf32>
    %28 = vector.shape_cast %27 : vector<1x1x8x8x8xf32> to vector<8x8x8xf32>
    %29 = vector.shape_cast %28 : vector<8x8x8xf32> to vector<64x8xf32>
    %c0_40 = arith.constant 0 : index
    %c0_41 = arith.constant 0 : index
    %c2_42 = arith.constant 2 : index
    %c2_43 = arith.constant 2 : index
    %c0_44 = arith.constant 0 : index
    %30 = vector.load %arg3[%c0_40, %c0_41, %c2_42, %c2_43, %c0_44] : memref<1x1x10x10x8xf32, #tpu.memory_space<vmem>>, vector<1x1x8x8x8xf32>
    %31 = vector.shape_cast %30 : vector<1x1x8x8x8xf32> to vector<8x8x8xf32>
    %32 = vector.shape_cast %31 : vector<8x8x8xf32> to vector<64x8xf32>
    %33 = tpu.concatenate %8, %11, %14, %17, %20, %23, %26, %29, %32 in 1 : vector<64x8xf32>, vector<64x8xf32>, vector<64x8xf32>, vector<64x8xf32>, vector<64x8xf32>, vector<64x8xf32>, vector<64x8xf32>, vector<64x8xf32>, vector<64x8xf32> -> vector<64x72xf32>
    %c0_45 = arith.constant 0 : index
    %c0_46 = arith.constant 0 : index
    %c0_47 = arith.constant 0 : index
    %c0_48 = arith.constant 0 : index
    %34 = vector.load %arg6[%c0_45, %c0_46, %c0_47, %c0_48] : memref<1x1x64x8xf32, #tpu.memory_space<vmem>>, vector<1x1x64x8xf32>
    %35 = vector.shape_cast %34 : vector<1x1x64x8xf32> to vector<64x8xf32>
    %cst = arith.constant dense<0.000000e+00> : vector<64x8xf32>
    %36 = tpu.matmul %33, %5, %cst {dimension_numbers = #tpu.dot_dimension_numbers<[1], [0], [0], [1], [0, 0, 1, 1], [], []>} : vector<64x72xf32>, vector<72x8xf32>, vector<64x8xf32> -> vector<64x8xf32>
    %37 = arith.addf %35, %36 : vector<64x8xf32>
    %c0_49 = arith.constant 0 : index
    %c0_50 = arith.constant 0 : index
    %c0_51 = arith.constant 0 : index
    %c0_52 = arith.constant 0 : index
    %38 = vector.load %arg6[%c0_49, %c0_50, %c0_51, %c0_52] : memref<1x1x64x8xf32, #tpu.memory_space<vmem>>, vector<1x1x64x8xf32>
    %39 = vector.shape_cast %38 : vector<1x1x64x8xf32> to vector<64x8xf32>
    %40 = vector.shape_cast %37 : vector<64x8xf32> to vector<1x1x64x8xf32>
    tpu.vector_store %arg6[%c0_49, %c0_50, %c0_51, %c0_52], %40 {strides = array<i32>} : memref<1x1x64x8xf32, #tpu.memory_space<vmem>>, vector<1x1x64x8xf32>,
    %c2_i32 = arith.constant 2 : i32
    %41 = arith.cmpi eq, %arg2, %c2_i32 : i32
    %42 = arith.extui %41 : i1 to i32
    %c0_i32_53 = arith.constant 0 : i32
    %43 = arith.cmpi ne, %42, %c0_i32_53 : i32
    scf.if %43 {
      %c0_54 = arith.constant 0 : index
      %c0_55 = arith.constant 0 : index
      %c0_56 = arith.constant 0 : index
      %c0_57 = arith.constant 0 : index
      %44 = vector.load %arg6[%c0_54, %c0_55, %c0_56, %c0_57] : memref<1x1x64x8xf32, #tpu.memory_space<vmem>>, vector<1x1x64x8xf32>
      %45 = vector.shape_cast %44 : vector<1x1x64x8xf32> to vector<64x8xf32>
      %c0_58 = arith.constant 0 : index
      %c0_59 = arith.constant 0 : index
      %46 = vector.load %arg5[%c0_58, %c0_59] : memref<1x8xf32, #tpu.memory_space<vmem>>, vector<1x8xf32>
      %47 = vector.broadcast %46 : vector<1x8xf32> to vector<64x8xf32>
      %48 = arith.addf %45, %47 : vector<64x8xf32>
      %cst_60 = arith.constant 0.000000e+00 : f32
      %49 = vector.broadcast %cst_60 : f32 to vector<64x8xf32>
      %50 = arith.maximumf %48, %49 : vector<64x8xf32>
      %c0_61 = arith.constant 0 : index
      %c0_62 = arith.constant 0 : index
      %c0_63 = arith.constant 0 : index
      %c0_64 = arith.constant 0 : index
      %51 = vector.load %arg6[%c0_61, %c0_62, %c0_63, %c0_64] : memref<1x1x64x8xf32, #tpu.memory_space<vmem>>, vector<1x1x64x8xf32>
      %52 = vector.shape_cast %51 : vector<1x1x64x8xf32> to vector<64x8xf32>
      %53 = vector.shape_cast %50 : vector<64x8xf32> to vector<1x1x64x8xf32>
      tpu.vector_store %arg6[%c0_61, %c0_62, %c0_63, %c0_64], %53 {strides = array<i32>} : memref<1x1x64x8xf32, #tpu.memory_space<vmem>>, vector<1x1x64x8xf32>,
    } else {
    }
    return
  }
  func.func @transform_0(%arg0: i32, %arg1: i32, %arg2: i32) -> (i32, i32, i32, i32, i32) {
    %c1_i32 = arith.constant 1 : i32
    %0 = arith.muli %c1_i32, %arg1 : i32
    %1 = arith.addi %0, %arg2 : i32
    %c0_i32 = arith.constant 0 : i32
    %c0_i32_0 = arith.constant 0 : i32
    %c0_i32_1 = arith.constant 0 : i32
    %c0_i32_2 = arith.constant 0 : i32
    return %arg0, %1, %c0_i32, %c0_i32_0, %c0_i32_1 : i32, i32, i32, i32, i32
  }
  func.func @transform_1(%arg0: i32, %arg1: i32, %arg2: i32) -> (i32, i32, i32) {
    %c0_i32 = arith.constant 0 : i32
    %c0_i32_0 = arith.constant 0 : i32
    %c0_i32_1 = arith.constant 0 : i32
    %c0_i32_2 = arith.constant 0 : i32
    return %c0_i32, %c0_i32_0, %c0_i32_1 : i32, i32, i32
  }
  func.func @transform_2(%arg0: i32, %arg1: i32, %arg2: i32) -> (i32, i32) {
    %c0_i32 = arith.constant 0 : i32
    %c0_i32_0 = arith.constant 0 : i32
    %c0_i32_1 = arith.constant 0 : i32
    return %c0_i32, %c0_i32_0 : i32, i32
  }
  func.func @transform_3(%arg0: i32, %arg1: i32, %arg2: i32) -> (i32, i32, i32, i32) {
    %c0_i32 = arith.constant 0 : i32
    %c0_i32_0 = arith.constant 0 : i32
    %c0_i32_1 = arith.constant 0 : i32
    return %arg0, %arg1, %c0_i32, %c0_i32_0 : i32, i32, i32, i32
  }
}

module attributes {stable_mosaic.version = 11 : i64} {
  func.func @_deconv_kernel(%arg0: i32, %arg1: i32, %arg2: memref<1x1x9x9x8xf32, #tpu.memory_space<vmem>>, %arg3: memref<1x1x9x9x8xf32, #tpu.memory_space<vmem>>, %arg4: memref<2x32x64xf32, #tpu.memory_space<vmem>>, %arg5: memref<1x64xf32, #tpu.memory_space<vmem>>, %arg6: memref<1x1x64x64xf32, #tpu.memory_space<vmem>>) attributes {dimension_semantics = [#tpu.dimension_semantics<parallel>, #tpu.dimension_semantics<parallel>], iteration_bounds = array<i64: 2, 2>, scalar_prefetch = 0 : i64, scratch_operands = 0 : i64, tpu.core_type = #tpu.core_type<tc>, window_params = [{transform_indices = @transform_0, window_bounds = array<i64: 1, 1, 9, 9, 8>}, {transform_indices = @transform_1, window_bounds = array<i64: 1, 1, 9, 9, 8>}, {pipeline_mode = #tpu.pipeline_mode<synchronous>, transform_indices = @transform_2, window_bounds = array<i64: 2, 32, 64>}, {pipeline_mode = #tpu.pipeline_mode<synchronous>, transform_indices = @transform_3, window_bounds = array<i64: 1, 64>}, {transform_indices = @transform_4, window_bounds = array<i64: 1, 1, 64, 64>}]} {
    %c0 = arith.constant 0 : index
    %c0_0 = arith.constant 0 : index
    %c0_1 = arith.constant 0 : index
    %c0_2 = arith.constant 0 : index
    %c0_3 = arith.constant 0 : index
    %0 = vector.load %arg2[%c0, %c0_0, %c0_1, %c0_2, %c0_3] : memref<1x1x9x9x8xf32, #tpu.memory_space<vmem>>, vector<1x1x8x8x8xf32>
    %1 = vector.shape_cast %0 : vector<1x1x8x8x8xf32> to vector<8x8x8xf32>
    %2 = vector.shape_cast %1 : vector<8x8x8xf32> to vector<64x8xf32>
    %c0_4 = arith.constant 0 : index
    %c0_5 = arith.constant 0 : index
    %c0_6 = arith.constant 0 : index
    %c1 = arith.constant 1 : index
    %c0_7 = arith.constant 0 : index
    %3 = vector.load %arg2[%c0_4, %c0_5, %c0_6, %c1, %c0_7] : memref<1x1x9x9x8xf32, #tpu.memory_space<vmem>>, vector<1x1x8x8x8xf32>
    %4 = vector.shape_cast %3 : vector<1x1x8x8x8xf32> to vector<8x8x8xf32>
    %5 = vector.shape_cast %4 : vector<8x8x8xf32> to vector<64x8xf32>
    %c0_8 = arith.constant 0 : index
    %c0_9 = arith.constant 0 : index
    %c1_10 = arith.constant 1 : index
    %c0_11 = arith.constant 0 : index
    %c0_12 = arith.constant 0 : index
    %6 = vector.load %arg2[%c0_8, %c0_9, %c1_10, %c0_11, %c0_12] : memref<1x1x9x9x8xf32, #tpu.memory_space<vmem>>, vector<1x1x8x8x8xf32>
    %7 = vector.shape_cast %6 : vector<1x1x8x8x8xf32> to vector<8x8x8xf32>
    %8 = vector.shape_cast %7 : vector<8x8x8xf32> to vector<64x8xf32>
    %c0_13 = arith.constant 0 : index
    %c0_14 = arith.constant 0 : index
    %c1_15 = arith.constant 1 : index
    %c1_16 = arith.constant 1 : index
    %c0_17 = arith.constant 0 : index
    %9 = vector.load %arg2[%c0_13, %c0_14, %c1_15, %c1_16, %c0_17] : memref<1x1x9x9x8xf32, #tpu.memory_space<vmem>>, vector<1x1x8x8x8xf32>
    %10 = vector.shape_cast %9 : vector<1x1x8x8x8xf32> to vector<8x8x8xf32>
    %11 = vector.shape_cast %10 : vector<8x8x8xf32> to vector<64x8xf32>
    %12 = tpu.concatenate %2, %5, %8, %11 in 1 : vector<64x8xf32>, vector<64x8xf32>, vector<64x8xf32>, vector<64x8xf32> -> vector<64x32xf32>
    %c0_18 = arith.constant 0 : index
    %c0_19 = arith.constant 0 : index
    %c0_20 = arith.constant 0 : index
    %13 = vector.load %arg4[%c0_18, %c0_19, %c0_20] : memref<2x32x64xf32, #tpu.memory_space<vmem>>, vector<1x32x64xf32>
    %14 = vector.shape_cast %13 : vector<1x32x64xf32> to vector<32x64xf32>
    %cst = arith.constant dense<0.000000e+00> : vector<64x64xf32>
    %15 = tpu.matmul %12, %14, %cst {dimension_numbers = #tpu.dot_dimension_numbers<[1], [0], [0], [1], [0, 0, 1, 1], [], []>} : vector<64x32xf32>, vector<32x64xf32>, vector<64x64xf32> -> vector<64x64xf32>
    %c0_21 = arith.constant 0 : index
    %c0_22 = arith.constant 0 : index
    %c0_23 = arith.constant 0 : index
    %c0_24 = arith.constant 0 : index
    %c0_25 = arith.constant 0 : index
    %16 = vector.load %arg3[%c0_21, %c0_22, %c0_23, %c0_24, %c0_25] : memref<1x1x9x9x8xf32, #tpu.memory_space<vmem>>, vector<1x1x8x8x8xf32>
    %17 = vector.shape_cast %16 : vector<1x1x8x8x8xf32> to vector<8x8x8xf32>
    %18 = vector.shape_cast %17 : vector<8x8x8xf32> to vector<64x8xf32>
    %c0_26 = arith.constant 0 : index
    %c0_27 = arith.constant 0 : index
    %c0_28 = arith.constant 0 : index
    %c1_29 = arith.constant 1 : index
    %c0_30 = arith.constant 0 : index
    %19 = vector.load %arg3[%c0_26, %c0_27, %c0_28, %c1_29, %c0_30] : memref<1x1x9x9x8xf32, #tpu.memory_space<vmem>>, vector<1x1x8x8x8xf32>
    %20 = vector.shape_cast %19 : vector<1x1x8x8x8xf32> to vector<8x8x8xf32>
    %21 = vector.shape_cast %20 : vector<8x8x8xf32> to vector<64x8xf32>
    %c0_31 = arith.constant 0 : index
    %c0_32 = arith.constant 0 : index
    %c1_33 = arith.constant 1 : index
    %c0_34 = arith.constant 0 : index
    %c0_35 = arith.constant 0 : index
    %22 = vector.load %arg3[%c0_31, %c0_32, %c1_33, %c0_34, %c0_35] : memref<1x1x9x9x8xf32, #tpu.memory_space<vmem>>, vector<1x1x8x8x8xf32>
    %23 = vector.shape_cast %22 : vector<1x1x8x8x8xf32> to vector<8x8x8xf32>
    %24 = vector.shape_cast %23 : vector<8x8x8xf32> to vector<64x8xf32>
    %c0_36 = arith.constant 0 : index
    %c0_37 = arith.constant 0 : index
    %c1_38 = arith.constant 1 : index
    %c1_39 = arith.constant 1 : index
    %c0_40 = arith.constant 0 : index
    %25 = vector.load %arg3[%c0_36, %c0_37, %c1_38, %c1_39, %c0_40] : memref<1x1x9x9x8xf32, #tpu.memory_space<vmem>>, vector<1x1x8x8x8xf32>
    %26 = vector.shape_cast %25 : vector<1x1x8x8x8xf32> to vector<8x8x8xf32>
    %27 = vector.shape_cast %26 : vector<8x8x8xf32> to vector<64x8xf32>
    %28 = tpu.concatenate %18, %21, %24, %27 in 1 : vector<64x8xf32>, vector<64x8xf32>, vector<64x8xf32>, vector<64x8xf32> -> vector<64x32xf32>
    %c1_41 = arith.constant 1 : index
    %c0_42 = arith.constant 0 : index
    %c0_43 = arith.constant 0 : index
    %29 = vector.load %arg4[%c1_41, %c0_42, %c0_43] : memref<2x32x64xf32, #tpu.memory_space<vmem>>, vector<1x32x64xf32>
    %30 = vector.shape_cast %29 : vector<1x32x64xf32> to vector<32x64xf32>
    %cst_44 = arith.constant dense<0.000000e+00> : vector<64x64xf32>
    %31 = tpu.matmul %28, %30, %cst_44 {dimension_numbers = #tpu.dot_dimension_numbers<[1], [0], [0], [1], [0, 0, 1, 1], [], []>} : vector<64x32xf32>, vector<32x64xf32>, vector<64x64xf32> -> vector<64x64xf32>
    %32 = arith.addf %15, %31 : vector<64x64xf32>
    %c0_45 = arith.constant 0 : index
    %c0_46 = arith.constant 0 : index
    %33 = vector.load %arg5[%c0_45, %c0_46] : memref<1x64xf32, #tpu.memory_space<vmem>>, vector<1x64xf32>
    %34 = vector.broadcast %33 : vector<1x64xf32> to vector<64x64xf32>
    %35 = arith.addf %32, %34 : vector<64x64xf32>
    %c0_47 = arith.constant 0 : index
    %c0_48 = arith.constant 0 : index
    %c0_49 = arith.constant 0 : index
    %c0_50 = arith.constant 0 : index
    %36 = vector.load %arg6[%c0_47, %c0_48, %c0_49, %c0_50] : memref<1x1x64x64xf32, #tpu.memory_space<vmem>>, vector<1x1x64x64xf32>
    %37 = vector.shape_cast %36 : vector<1x1x64x64xf32> to vector<64x64xf32>
    %38 = vector.shape_cast %35 : vector<64x64xf32> to vector<1x1x64x64xf32>
    tpu.vector_store %arg6[%c0_47, %c0_48, %c0_49, %c0_50], %38 {strides = array<i32>} : memref<1x1x64x64xf32, #tpu.memory_space<vmem>>, vector<1x1x64x64xf32>,
    return
  }
  func.func @transform_0(%arg0: i32, %arg1: i32) -> (i32, i32, i32, i32, i32) {
    %c0_i32 = arith.constant 0 : i32
    %c0_i32_0 = arith.constant 0 : i32
    %c0_i32_1 = arith.constant 0 : i32
    %c0_i32_2 = arith.constant 0 : i32
    return %arg0, %arg1, %c0_i32, %c0_i32_0, %c0_i32_1 : i32, i32, i32, i32, i32
  }
  func.func @transform_1(%arg0: i32, %arg1: i32) -> (i32, i32, i32, i32, i32) {
    %c1_i32 = arith.constant 1 : i32
    %0 = arith.addi %arg1, %c1_i32 : i32
    %c0_i32 = arith.constant 0 : i32
    %c0_i32_0 = arith.constant 0 : i32
    %c0_i32_1 = arith.constant 0 : i32
    %c0_i32_2 = arith.constant 0 : i32
    return %arg0, %0, %c0_i32, %c0_i32_0, %c0_i32_1 : i32, i32, i32, i32, i32
  }
  func.func @transform_2(%arg0: i32, %arg1: i32) -> (i32, i32, i32) {
    %c0_i32 = arith.constant 0 : i32
    %c0_i32_0 = arith.constant 0 : i32
    %c0_i32_1 = arith.constant 0 : i32
    %c0_i32_2 = arith.constant 0 : i32
    return %c0_i32, %c0_i32_0, %c0_i32_1 : i32, i32, i32
  }
  func.func @transform_3(%arg0: i32, %arg1: i32) -> (i32, i32) {
    %c0_i32 = arith.constant 0 : i32
    %c0_i32_0 = arith.constant 0 : i32
    %c0_i32_1 = arith.constant 0 : i32
    return %c0_i32, %c0_i32_0 : i32, i32
  }
  func.func @transform_4(%arg0: i32, %arg1: i32) -> (i32, i32, i32, i32) {
    %c0_i32 = arith.constant 0 : i32
    %c0_i32_0 = arith.constant 0 : i32
    %c0_i32_1 = arith.constant 0 : i32
    return %arg0, %arg1, %c0_i32, %c0_i32_0 : i32, i32, i32, i32
  }
}

module attributes {stable_mosaic.version = 11 : i64} {
  func.func @_deconv_kernel(%arg0: i32, %arg1: i32, %arg2: memref<1x1x17x17x8xf32, #tpu.memory_space<vmem>>, %arg3: memref<1x1x17x17x8xf32, #tpu.memory_space<vmem>>, %arg4: memref<2x32x32xf32, #tpu.memory_space<vmem>>, %arg5: memref<1x32xf32, #tpu.memory_space<vmem>>, %arg6: memref<1x1x256x32xf32, #tpu.memory_space<vmem>>) attributes {dimension_semantics = [#tpu.dimension_semantics<parallel>, #tpu.dimension_semantics<parallel>], iteration_bounds = array<i64: 2, 4>, scalar_prefetch = 0 : i64, scratch_operands = 0 : i64, tpu.core_type = #tpu.core_type<tc>, window_params = [{transform_indices = @transform_0, window_bounds = array<i64: 1, 1, 17, 17, 8>}, {transform_indices = @transform_1, window_bounds = array<i64: 1, 1, 17, 17, 8>}, {pipeline_mode = #tpu.pipeline_mode<synchronous>, transform_indices = @transform_2, window_bounds = array<i64: 2, 32, 32>}, {pipeline_mode = #tpu.pipeline_mode<synchronous>, transform_indices = @transform_3, window_bounds = array<i64: 1, 32>}, {transform_indices = @transform_4, window_bounds = array<i64: 1, 1, 256, 32>}]} {
    %c0 = arith.constant 0 : index
    %c0_0 = arith.constant 0 : index
    %c0_1 = arith.constant 0 : index
    %c0_2 = arith.constant 0 : index
    %c0_3 = arith.constant 0 : index
    %0 = vector.load %arg2[%c0, %c0_0, %c0_1, %c0_2, %c0_3] : memref<1x1x17x17x8xf32, #tpu.memory_space<vmem>>, vector<1x1x16x16x8xf32>
    %1 = vector.shape_cast %0 : vector<1x1x16x16x8xf32> to vector<16x16x8xf32>
    %2 = vector.shape_cast %1 : vector<16x16x8xf32> to vector<256x8xf32>
    %c0_4 = arith.constant 0 : index
    %c0_5 = arith.constant 0 : index
    %c0_6 = arith.constant 0 : index
    %c1 = arith.constant 1 : index
    %c0_7 = arith.constant 0 : index
    %3 = vector.load %arg2[%c0_4, %c0_5, %c0_6, %c1, %c0_7] : memref<1x1x17x17x8xf32, #tpu.memory_space<vmem>>, vector<1x1x16x16x8xf32>
    %4 = vector.shape_cast %3 : vector<1x1x16x16x8xf32> to vector<16x16x8xf32>
    %5 = vector.shape_cast %4 : vector<16x16x8xf32> to vector<256x8xf32>
    %c0_8 = arith.constant 0 : index
    %c0_9 = arith.constant 0 : index
    %c1_10 = arith.constant 1 : index
    %c0_11 = arith.constant 0 : index
    %c0_12 = arith.constant 0 : index
    %6 = vector.load %arg2[%c0_8, %c0_9, %c1_10, %c0_11, %c0_12] : memref<1x1x17x17x8xf32, #tpu.memory_space<vmem>>, vector<1x1x16x16x8xf32>
    %7 = vector.shape_cast %6 : vector<1x1x16x16x8xf32> to vector<16x16x8xf32>
    %8 = vector.shape_cast %7 : vector<16x16x8xf32> to vector<256x8xf32>
    %c0_13 = arith.constant 0 : index
    %c0_14 = arith.constant 0 : index
    %c1_15 = arith.constant 1 : index
    %c1_16 = arith.constant 1 : index
    %c0_17 = arith.constant 0 : index
    %9 = vector.load %arg2[%c0_13, %c0_14, %c1_15, %c1_16, %c0_17] : memref<1x1x17x17x8xf32, #tpu.memory_space<vmem>>, vector<1x1x16x16x8xf32>
    %10 = vector.shape_cast %9 : vector<1x1x16x16x8xf32> to vector<16x16x8xf32>
    %11 = vector.shape_cast %10 : vector<16x16x8xf32> to vector<256x8xf32>
    %12 = tpu.concatenate %2, %5, %8, %11 in 1 : vector<256x8xf32>, vector<256x8xf32>, vector<256x8xf32>, vector<256x8xf32> -> vector<256x32xf32>
    %c0_18 = arith.constant 0 : index
    %c0_19 = arith.constant 0 : index
    %c0_20 = arith.constant 0 : index
    %13 = vector.load %arg4[%c0_18, %c0_19, %c0_20] : memref<2x32x32xf32, #tpu.memory_space<vmem>>, vector<1x32x32xf32>
    %14 = vector.shape_cast %13 : vector<1x32x32xf32> to vector<32x32xf32>
    %cst = arith.constant dense<0.000000e+00> : vector<256x32xf32>
    %15 = tpu.matmul %12, %14, %cst {dimension_numbers = #tpu.dot_dimension_numbers<[1], [0], [0], [1], [0, 0, 1, 1], [], []>} : vector<256x32xf32>, vector<32x32xf32>, vector<256x32xf32> -> vector<256x32xf32>
    %c0_21 = arith.constant 0 : index
    %c0_22 = arith.constant 0 : index
    %c0_23 = arith.constant 0 : index
    %c0_24 = arith.constant 0 : index
    %c0_25 = arith.constant 0 : index
    %16 = vector.load %arg3[%c0_21, %c0_22, %c0_23, %c0_24, %c0_25] : memref<1x1x17x17x8xf32, #tpu.memory_space<vmem>>, vector<1x1x16x16x8xf32>
    %17 = vector.shape_cast %16 : vector<1x1x16x16x8xf32> to vector<16x16x8xf32>
    %18 = vector.shape_cast %17 : vector<16x16x8xf32> to vector<256x8xf32>
    %c0_26 = arith.constant 0 : index
    %c0_27 = arith.constant 0 : index
    %c0_28 = arith.constant 0 : index
    %c1_29 = arith.constant 1 : index
    %c0_30 = arith.constant 0 : index
    %19 = vector.load %arg3[%c0_26, %c0_27, %c0_28, %c1_29, %c0_30] : memref<1x1x17x17x8xf32, #tpu.memory_space<vmem>>, vector<1x1x16x16x8xf32>
    %20 = vector.shape_cast %19 : vector<1x1x16x16x8xf32> to vector<16x16x8xf32>
    %21 = vector.shape_cast %20 : vector<16x16x8xf32> to vector<256x8xf32>
    %c0_31 = arith.constant 0 : index
    %c0_32 = arith.constant 0 : index
    %c1_33 = arith.constant 1 : index
    %c0_34 = arith.constant 0 : index
    %c0_35 = arith.constant 0 : index
    %22 = vector.load %arg3[%c0_31, %c0_32, %c1_33, %c0_34, %c0_35] : memref<1x1x17x17x8xf32, #tpu.memory_space<vmem>>, vector<1x1x16x16x8xf32>
    %23 = vector.shape_cast %22 : vector<1x1x16x16x8xf32> to vector<16x16x8xf32>
    %24 = vector.shape_cast %23 : vector<16x16x8xf32> to vector<256x8xf32>
    %c0_36 = arith.constant 0 : index
    %c0_37 = arith.constant 0 : index
    %c1_38 = arith.constant 1 : index
    %c1_39 = arith.constant 1 : index
    %c0_40 = arith.constant 0 : index
    %25 = vector.load %arg3[%c0_36, %c0_37, %c1_38, %c1_39, %c0_40] : memref<1x1x17x17x8xf32, #tpu.memory_space<vmem>>, vector<1x1x16x16x8xf32>
    %26 = vector.shape_cast %25 : vector<1x1x16x16x8xf32> to vector<16x16x8xf32>
    %27 = vector.shape_cast %26 : vector<16x16x8xf32> to vector<256x8xf32>
    %28 = tpu.concatenate %18, %21, %24, %27 in 1 : vector<256x8xf32>, vector<256x8xf32>, vector<256x8xf32>, vector<256x8xf32> -> vector<256x32xf32>
    %c1_41 = arith.constant 1 : index
    %c0_42 = arith.constant 0 : index
    %c0_43 = arith.constant 0 : index
    %29 = vector.load %arg4[%c1_41, %c0_42, %c0_43] : memref<2x32x32xf32, #tpu.memory_space<vmem>>, vector<1x32x32xf32>
    %30 = vector.shape_cast %29 : vector<1x32x32xf32> to vector<32x32xf32>
    %cst_44 = arith.constant dense<0.000000e+00> : vector<256x32xf32>
    %31 = tpu.matmul %28, %30, %cst_44 {dimension_numbers = #tpu.dot_dimension_numbers<[1], [0], [0], [1], [0, 0, 1, 1], [], []>} : vector<256x32xf32>, vector<32x32xf32>, vector<256x32xf32> -> vector<256x32xf32>
    %32 = arith.addf %15, %31 : vector<256x32xf32>
    %c0_45 = arith.constant 0 : index
    %c0_46 = arith.constant 0 : index
    %33 = vector.load %arg5[%c0_45, %c0_46] : memref<1x32xf32, #tpu.memory_space<vmem>>, vector<1x32xf32>
    %34 = vector.broadcast %33 : vector<1x32xf32> to vector<256x32xf32>
    %35 = arith.addf %32, %34 : vector<256x32xf32>
    %c0_47 = arith.constant 0 : index
    %c0_48 = arith.constant 0 : index
    %c0_49 = arith.constant 0 : index
    %c0_50 = arith.constant 0 : index
    %36 = vector.load %arg6[%c0_47, %c0_48, %c0_49, %c0_50] : memref<1x1x256x32xf32, #tpu.memory_space<vmem>>, vector<1x1x256x32xf32>
    %37 = vector.shape_cast %36 : vector<1x1x256x32xf32> to vector<256x32xf32>
    %38 = vector.shape_cast %35 : vector<256x32xf32> to vector<1x1x256x32xf32>
    tpu.vector_store %arg6[%c0_47, %c0_48, %c0_49, %c0_50], %38 {strides = array<i32>} : memref<1x1x256x32xf32, #tpu.memory_space<vmem>>, vector<1x1x256x32xf32>,
    return
  }
  func.func @transform_0(%arg0: i32, %arg1: i32) -> (i32, i32, i32, i32, i32) {
    %c0_i32 = arith.constant 0 : i32
    %c0_i32_0 = arith.constant 0 : i32
    %c0_i32_1 = arith.constant 0 : i32
    %c0_i32_2 = arith.constant 0 : i32
    return %arg0, %arg1, %c0_i32, %c0_i32_0, %c0_i32_1 : i32, i32, i32, i32, i32
  }
  func.func @transform_1(%arg0: i32, %arg1: i32) -> (i32, i32, i32, i32, i32) {
    %c1_i32 = arith.constant 1 : i32
    %0 = arith.addi %arg1, %c1_i32 : i32
    %c0_i32 = arith.constant 0 : i32
    %c0_i32_0 = arith.constant 0 : i32
    %c0_i32_1 = arith.constant 0 : i32
    %c0_i32_2 = arith.constant 0 : i32
    return %arg0, %0, %c0_i32, %c0_i32_0, %c0_i32_1 : i32, i32, i32, i32, i32
  }
  func.func @transform_2(%arg0: i32, %arg1: i32) -> (i32, i32, i32) {
    %c0_i32 = arith.constant 0 : i32
    %c0_i32_0 = arith.constant 0 : i32
    %c0_i32_1 = arith.constant 0 : i32
    %c0_i32_2 = arith.constant 0 : i32
    return %c0_i32, %c0_i32_0, %c0_i32_1 : i32, i32, i32
  }
  func.func @transform_3(%arg0: i32, %arg1: i32) -> (i32, i32) {
    %c0_i32 = arith.constant 0 : i32
    %c0_i32_0 = arith.constant 0 : i32
    %c0_i32_1 = arith.constant 0 : i32
    return %c0_i32, %c0_i32_0 : i32, i32
  }
  func.func @transform_4(%arg0: i32, %arg1: i32) -> (i32, i32, i32, i32) {
    %c0_i32 = arith.constant 0 : i32
    %c0_i32_0 = arith.constant 0 : i32
    %c0_i32_1 = arith.constant 0 : i32
    return %arg0, %arg1, %c0_i32, %c0_i32_0 : i32, i32, i32, i32
  }
}

</mosaic_0001>

<bundles_post_ra>
// kernel: hourglass_forward.6
= control target key start
LH: loop header
LB: loop body
LE: loop exit
PB: predicated region body
PF: predicated region fallthrough
CT: control target
= control target key end

     0   :  { %s3017_s12 = smov 0   ;;  %s3019_s13 = smov 0   ;;  %s4747_s0 = inlined_call_operand.vmem [shape: f32[2,10,34,34,4], index: 0, kind: input, shape index: {}]   ;;  %s4748_s1 = inlined_call_operand.vmem [shape: f32[3,36,8], index: 1, kind: input, shape index: {}]   ;;  %s4749_s2 = inlined_call_operand.vmem [shape: f32[1,8], index: 2, kind: input, shape index: {}]   ;;  %s4750_s3 = inlined_call_operand.vmem [shape: f32[2,4,256,8], index: 3, kind: output, shape index: {}]  }
   0x1   :  { %s3021_s14 = smov 0   ;;  %s3023_s15 = smov 0  }
   0x2   :  { %s3025_s16 = smov 0   ;;  %s3027_s17 = smov 0  }
   0x3   :  { %s3029_s18 = smov 0  }
   0x4 LB: > { %s25_s19 = sadd.s32 1, %s2974_s15  ;;  %s28_s20 = sadd.s32 1, %s2978_s16  ;;  %s2986_s18 = sphi %s3029_s18, %s13_s18   ;;  %s2982_s17 = sphi %s3027_s17, %s4836_s17   ;;  %s2978_s16 = sphi %s3025_s16, %s4835_s16   ;;  %s2974_s15 = sphi %s3023_s15, %s4834_s15   ;;  %s2970_s14 = sphi %s3021_s14, %s4833_s14   ;;  %s2966_s13 = sphi %s3019_s13, %s4832_s13   ;;  %s2962_s12 = sphi %s3017_s12, %s4831_s12  }
   0x5   : > { %p26_p0 = scmp.ge.s32.totalorder %s25_s19, 3  ;;  %p2520_p1 = scmp.ge.s32.totalorder %s2986_s18, 1 }
   0x6   : > { %p172_p2 = scmp.lt.s32.totalorder %s2986_s18, 25  ;;  %s32_s21 = sadd.s32 1, %s2982_s17 }
   0x7   : > { %s4838_s19 = smov (%p26_p0, %s25_s19), 0  ;;  %s4840_s20 = smov (!%p26_p0, %s28_s20), %s2978_s16 }
   0x8   : > { %p173_p3 = pnand %p2520_p1, %p172_p2  ;;  %p30_p4 = scmp.ge.s32.totalorder %s4840_s20, 4 }
   0xa   : > { %s4842_s20 = smov (%p30_p4, %s4840_s20), 0  ;;  %s4844_s21 = smov (!%p30_p4, %s32_s21), %s2982_s17 }
   0xb   : > { %p34_p5 = scmp.ge.s32.totalorder %s4844_s21, 2  ;;  %176 = sbr.rel (%p173_p3) target bundleno = 897 (0x381), region = 32 }
   0xd   : > { %s4846_s21 = smov (%p34_p5, %s4844_s21), 0 }
  0x12   : > { %s2521_s22 = sshll.u32 %s2966_s13, 1  ;;  %p208_p6 = scmp.lt.s32.totalorder %s2970_s14, 1 }
  0x13   : > { %s207_s23 = sadd.s32 %s2962_s12, %s2521_s22  ;;  %p221_p7 = scmp.lt.s32.totalorder %s2966_s13, 3 }
  0x14   : > { %s4848_s14 = smov (!%p208_p6, %s2970_s14), 1  ;;  %p210_p8 = scmp.lt.s32.totalorder %s207_s23, 9 }
  0x15   : > { %s2866_s24 = smul.u32 1700, %s4848_s14  ;;  %s2524_s25 = sshll.u32 %s4848_s14, 7 }
  0x16   : > { %s4850_s23 = smov (!%p210_p8, %s207_s23), 9  ;;  %s4852_s13 = smov (!%p221_p7, %s2966_s13), 3 }
  0x17   : > { %s2865_s26 = smul.u32 170, %s4850_s23  ;;  %s2523_s27 = sshll.u32 %s4852_s13, 5 }
  0x18   : > { %s225_s29 = sadd.s32 %s2524_s25, %s2523_s27  ;;  %p2526_p9 = scmp.ne.s32.totalorder %s2962_s12, 0 }
  0x19   : > { %s214_s28 = sadd.s32 %s2866_s24, %s2865_s26  ;;  %s2525_s4 = sshll.u32 %s225_s29, 3  ;;  %vm232_vm0 = vcmask (!%p2526_p9), 64512   ;;  %v2988_v0 = vmov (!%p2526_p9), 0.0  }
  0x1a   : > { %s2522_s30 = sshll.u32 %s214_s28, 3  ;;  %s3075_s10 = scalar_lea.vmem %s4750_s3, %s2525_s4 }
  0x1b   : > { %s3070_s7 = scalar_lea.vmem %s4747_s0, %s2522_s30  ;;  %231 = sbr.rel (%p2526_p9) target bundleno = 43 (0x2b), region = 36  ;;  %233 = vst.msk [vmem:[%s3075_s10] sm:$0xff] (!%p2526_p9), %vm232_vm0, %v2988_v0  ;;  %234 = vst.msk [vmem:[%s3075_s10 + $0x8] sm:$0xff] (!%p2526_p9), %vm232_vm0, %v2988_v0 }
  0x1c   : > { %235 = vst.msk [vmem:[%s3075_s10 + $0x10] sm:$0xff] (!%p2526_p9), %vm232_vm0, %v2988_v0  ;;  %236 = vst.msk [vmem:[%s3075_s10 + $0x18] sm:$0xff] (!%p2526_p9), %vm232_vm0, %v2988_v0 }
  0x1d   : > { %237 = vst.msk [vmem:[%s3075_s10 + $0x20] sm:$0xff] (!%p2526_p9), %vm232_vm0, %v2988_v0  ;;  %238 = vst.msk [vmem:[%s3075_s10 + $0x28] sm:$0xff] (!%p2526_p9), %vm232_vm0, %v2988_v0 }
  0x1e   : > { %239 = vst.msk [vmem:[%s3075_s10 + $0x30] sm:$0xff] (!%p2526_p9), %vm232_vm0, %v2988_v0  ;;  %240 = vst.msk [vmem:[%s3075_s10 + $0x38] sm:$0xff] (!%p2526_p9), %vm232_vm0, %v2988_v0 }
  0x1f   : > { %241 = vst.msk [vmem:[%s3075_s10 + $0x40] sm:$0xff] (!%p2526_p9), %vm232_vm0, %v2988_v0  ;;  %242 = vst.msk [vmem:[%s3075_s10 + $0x48] sm:$0xff] (!%p2526_p9), %vm232_vm0, %v2988_v0 }
  0x20   : > { %243 = vst.msk [vmem:[%s3075_s10 + $0x50] sm:$0xff] (!%p2526_p9), %vm232_vm0, %v2988_v0  ;;  %244 = vst.msk [vmem:[%s3075_s10 + $0x58] sm:$0xff] (!%p2526_p9), %vm232_vm0, %v2988_v0 }
  0x21   : > { %245 = vst.msk [vmem:[%s3075_s10 + $0x60] sm:$0xff] (!%p2526_p9), %vm232_vm0, %v2988_v0  ;;  %246 = vst.msk [vmem:[%s3075_s10 + $0x68] sm:$0xff] (!%p2526_p9), %vm232_vm0, %v2988_v0 }
  0x22   : > { %247 = vst.msk [vmem:[%s3075_s10 + $0x70] sm:$0xff] %vm232_vm0, %v2988_v0  ;;  %248 = vst.msk [vmem:[%s3075_s10 + $0x78] sm:$0xff] %vm232_vm0, %v2988_v0 }
  0x23   : > { %249 = vst.msk [vmem:[%s3075_s10 + $0x80] sm:$0xff] %vm232_vm0, %v2988_v0  ;;  %250 = vst.msk [vmem:[%s3075_s10 + $0x88] sm:$0xff] %vm232_vm0, %v2988_v0 }
  0x24   : > { %251 = vst.msk [vmem:[%s3075_s10 + $0x90] sm:$0xff] %vm232_vm0, %v2988_v0  ;;  %252 = vst.msk [vmem:[%s3075_s10 + $0x98] sm:$0xff] %vm232_vm0, %v2988_v0 }
  0x25   : > { %253 = vst.msk [vmem:[%s3075_s10 + $0xa0] sm:$0xff] %vm232_vm0, %v2988_v0  ;;  %254 = vst.msk [vmem:[%s3075_s10 + $0xa8] sm:$0xff] %vm232_vm0, %v2988_v0 }
  0x26   : > { %255 = vst.msk [vmem:[%s3075_s10 + $0xb0] sm:$0xff] %vm232_vm0, %v2988_v0  ;;  %256 = vst.msk [vmem:[%s3075_s10 + $0xb8] sm:$0xff] %vm232_vm0, %v2988_v0 }
  0x27   : > { %257 = vst.msk [vmem:[%s3075_s10 + $0xc0] sm:$0xff] %vm232_vm0, %v2988_v0  ;;  %258 = vst.msk [vmem:[%s3075_s10 + $0xc8] sm:$0xff] %vm232_vm0, %v2988_v0 }
  0x28   : > { %259 = vst.msk [vmem:[%s3075_s10 + $0xd0] sm:$0xff] %vm232_vm0, %v2988_v0  ;;  %260 = vst.msk [vmem:[%s3075_s10 + $0xd8] sm:$0xff] %vm232_vm0, %v2988_v0 }
  0x29   : > { %261 = vst.msk [vmem:[%s3075_s10 + $0xe0] sm:$0xff] %vm232_vm0, %v2988_v0  ;;  %262 = vst.msk [vmem:[%s3075_s10 + $0xe8] sm:$0xff] %vm232_vm0, %v2988_v0 }
  0x2a   : > { %263 = vst.msk [vmem:[%s3075_s10 + $0xf0] sm:$0xff] %vm232_vm0, %v2988_v0  ;;  %264 = vst.msk [vmem:[%s3075_s10 + $0xf8] sm:$0xff] %vm232_vm0, %v2988_v0 }
  0x2b PF: > { %v3143_v1 = vld [vmem:[%s3070_s7 + $0x39] sm:$0xff]  ;;  %v304_v2 = vld [vmem:[%s3070_s7 + $0x11] sm:$0xff]  ;;  %s2989_s11 = smov 4   ;;  %v3150_v3 = vld [vmem:[%s3070_s7 + $0x41] sm:$0xff]  ;;  %s2990_s13 = smov 8   ;;  %vm1979_vm1 = vcmask 1043456  }
  0x2c   : > { %598 = vrot.lane.b32.xlu1 %v3143_v1, %s2989_s11  ;;  %594 = vrot.lane.b32.xlu0 %v304_v2, %s2989_s11  ;;  %v305_v4 = vld [vmem:[%s3070_s7 + $0x19] sm:$0xff]  ;;  %v3157_v5 = vld [vmem:[%s3070_s7 + $0x69] sm:$0xff]  ;;  %s2991_s14 = smov 12   ;;  %s2992_s22 = smov 16   ;;  %vm1586_vm2 = vcmask 31744   ;;  %vm1619_vm3 = vcmask 64512  }
  0x2d   : > { %v3160_v6 = vld [vmem:[%s3070_s7 + $0x61] sm:$0xff]  ;;  %v311_v7 = vld [vmem:[%s3070_s7 + $0x91] sm:$0xff]  ;;  %v3168_v8 = vld [vmem:[%s3070_s7 + $0x89] sm:$0xff]  ;;  %s2993_s23 = smov 20   ;;  %s2994_s24 = smov 24   ;;  %vm1652_vm4 = vcmask 97280  }
  0x2e   : > { %v313_v9 = vld [vmem:[%s3070_s7 + $0xb9] sm:$0xff]  ;;  %v312_v10 = vld [vmem:[%s3070_s7 + $0xb1] sm:$0xff]  ;;  %v315_v11 = vld [vmem:[%s3070_s7 + $0xe1] sm:$0xff]  ;;  %s265_s25 = smul.u32 40, %s2962_s12  ;;  %s2995_s29 = smov 28   ;;  %vm1685_vm5 = vcmask 130048  }
  0x2f   : > { %v314_v12 = vld [vmem:[%s3070_s7 + $0xd9] sm:$0xff]  ;;  %v317_v13 = vld [vmem:[%s3070_s7 + $0x109] sm:$0xff]  ;;  %v316_v14 = vld [vmem:[%s3070_s7 + $0x101] sm:$0xff]  ;;  %s2996_s30 = smov 32   ;;  %vm1718_vm6 = vcmask 162816   ;;  %vm1751_vm7 = vcmask 195584  }
  0x30   : > { %600 = vrot.lane.b32.xlu1 %v3150_v3, %s2989_s11  ;;  %596 = vrot.lane.b32.xlu0 %v305_v4, %s2989_s11  ;;  %v319_v15 = vld [vmem:[%s3070_s7 + $0x131] sm:$0xff]  ;;  %v318_v16 = vld [vmem:[%s3070_s7 + $0x129] sm:$0xff]  ;;  %s3546_s28 = scalar_lea.vmem %s4748_s1, %s265_s25  ;;  %vm1784_vm8 = vcmask 228352   ;;  %vm1817_vm9 = vcmask 261120   ;;  %vm1882_vm10 = vcmask 293888   ;;  %p2752_p10 = scmp.ne.s32.totalorder %s2962_s12, 2 }
  0x31   : > { %v321_v17 = vld [vmem:[%s3070_s7 + $0x159] sm:$0xff]  ;;  %v320_v18 = vld [vmem:[%s3070_s7 + $0x151] sm:$0xff]  ;;  %v3194_v19 = vld [vmem:[%s3070_s7 + $0x181] sm:$0xff] }
  0x32   : > { %v3197_v20 = vld [vmem:[%s3070_s7 + $0x179] sm:$0xff]  ;;  %v3204_v21 = vld [vmem:[%s3070_s7 + $0x1a9] sm:$0xff]  ;;  %v3207_v22 = vld [vmem:[%s3070_s7 + $0x1a1] sm:$0xff] }
  0x33   : > { %v3214_v23 = vld [vmem:[%s3070_s7 + $0x1d1] sm:$0xff]  ;;  %v3217_v24 = vld [vmem:[%s3070_s7 + $0x1c9] sm:$0xff]  ;;  %v329_v25 = vld [vmem:[%s3070_s7 + $0x1f9] sm:$0xff] }
  0x34   : > { %604 = vrot.lane.b32.xlu1 %v3157_v5, %s2989_s11  ;;  %602 = vrot.lane.b32.xlu0 %v3160_v6, %s2989_s11  ;;  %4761 = vst [vmem:[#allocation2_spill] sm:$0xff] %v3214_v23  ;;  %4762 = vst [vmem:[#allocation3_spill] sm:$0xff] %v3217_v24  ;;  %v328_v26 = vld [vmem:[%s3070_s7 + $0x1f1] sm:$0xff]  ;;  %v331_v27 = vld [vmem:[%s3070_s7 + $0x221] sm:$0xff] }
  0x35   : > { %v330_v28 = vld [vmem:[%s3070_s7 + $0x219] sm:$0xff]  ;;  %v333_v29 = vld [vmem:[%s3070_s7 + $0x249] sm:$0xff]  ;;  %v332_v30 = vld [vmem:[%s3070_s7 + $0x241] sm:$0xff] }
  0x36   : > { %v335_v31 = vld [vmem:[%s3070_s7 + $0x271] sm:$0xff]  ;;  %v334_v32 = vld [vmem:[%s3070_s7 + $0x269] sm:$0xff]  ;;  %v336_v34 = vld [vmem:[%s3070_s7 + $0x1] sm:$0xff] }
  0x37   : > { %v337_v33 = vld [vmem:[%s3070_s7 + $0x9] sm:$0xff]  ;;  %v3244_v35 = vld [vmem:[%s3070_s7 + $0x31] sm:$0xff]  ;;  %v3254_v37 = vld [vmem:[%s3070_s7 + $0x59] sm:$0xff] }
  0x38   : > { %608 = vrot.lane.b32.xlu1 %v311_v7, %s2989_s11  ;;  %606 = vrot.lane.b32.xlu0 %v3168_v8, %s2989_s11  ;;  %v3247_v36 = vld [vmem:[%s3070_s7 + $0x29] sm:$0xff]  ;;  %v3257_v38 = vld [vmem:[%s3070_s7 + $0x51] sm:$0xff] }
  0x39   : > { %v3264_v39 = vld [vmem:[%s3070_s7 + $0x81] sm:$0xff]  ;;  %v3267_v40 = vld [vmem:[%s3070_s7 + $0x79] sm:$0xff]  ;;  %v345_v41 = vld [vmem:[%s3070_s7 + $0xa9] sm:$0xff] }
  0x3a   : > { %4763 = vst [vmem:[#allocation4_spill] sm:$0xff] %v3264_v39  ;;  %4764 = vst [vmem:[#allocation5_spill] sm:$0xff] %v3267_v40  ;;  %v344_v42 = vld [vmem:[%s3070_s7 + $0xa1] sm:$0xff]  ;;  %v347_v43 = vld [vmem:[%s3070_s7 + $0xd1] sm:$0xff] }
  0x3b   : > { %v346_v44 = vld [vmem:[%s3070_s7 + $0xc9] sm:$0xff]  ;;  %v349_v45 = vld [vmem:[%s3070_s7 + $0xf9] sm:$0xff]  ;;  %v348_v46 = vld [vmem:[%s3070_s7 + $0xf1] sm:$0xff] }
  0x3c   : > { %612 = vrot.lane.b32.xlu1 %v313_v9, %s2989_s11  ;;  %610 = vrot.lane.b32.xlu0 %v312_v10, %s2989_s11  ;;  %v351_v47 = vld [vmem:[%s3070_s7 + $0x121] sm:$0xff]  ;;  %v350_v48 = vld [vmem:[%s3070_s7 + $0x119] sm:$0xff] }
  0x3d   : > { %v353_v49 = vld [vmem:[%s3070_s7 + $0x149] sm:$0xff]  ;;  %v352_v50 = vld [vmem:[%s3070_s7 + $0x141] sm:$0xff]  ;;  %v3294_v51 = vld [vmem:[%s3070_s7 + $0x171] sm:$0xff] }
  0x3e   : > { %v3297_v52 = vld [vmem:[%s3070_s7 + $0x169] sm:$0xff]  ;;  %v3304_v53 = vld [vmem:[%s3070_s7 + $0x199] sm:$0xff]  ;;  %v3307_v54 = vld [vmem:[%s3070_s7 + $0x191] sm:$0xff] }
  0x3f   : > { %v3314_v55 = vld [vmem:[%s3070_s7 + $0x1c1] sm:$0xff]  ;;  %v3317_v56 = vld [vmem:[%s3070_s7 + $0x1b9] sm:$0xff]  ;;  %v361_v57 = vld [vmem:[%s3070_s7 + $0x1e9] sm:$0xff] }
  0x40   : > { %616 = vrot.lane.b32.xlu1 %v315_v11, %s2989_s11  ;;  %614 = vrot.lane.b32.xlu0 %v314_v12, %s2989_s11  ;;  %4765 = vst [vmem:[#allocation6_spill] sm:$0xff] %v3314_v55  ;;  %4766 = vst [vmem:[#allocation7_spill] sm:$0xff] %v3317_v56  ;;  %v360_v58 = vld [vmem:[%s3070_s7 + $0x1e1] sm:$0xff]  ;;  %v363_v59 = vld [vmem:[%s3070_s7 + $0x211] sm:$0xff] }
  0x41   : > { %v362_v60 = vld [vmem:[%s3070_s7 + $0x209] sm:$0xff]  ;;  %v365_v63 = vld [vmem:[%s3070_s7 + $0x239] sm:$0xff]  ;;  %v364_v0 = vld [vmem:[%s3070_s7 + $0x231] sm:$0xff] }
  0x42   : > { %v367_v7 = vld [vmem:[%s3070_s7 + $0x261] sm:$0xff]  ;;  %v366_v9 = vld [vmem:[%s3070_s7 + $0x259] sm:$0xff]  ;;  %v2528_v12 = vld [vmem:[%s3070_s7 + $0x2b0] sm:$0xff] }
  0x44   : > { %620 = vrot.lane.b32.xlu1 %v317_v13, %s2989_s11  ;;  %618 = vrot.lane.b32.xlu0 %v316_v14, %s2989_s11  ;;  %v2527_v13 = vld [vmem:[%s3070_s7 + $0x2a8] sm:$0xff] }
  0x48   : > { %624 = vrot.lane.b32.xlu1 %v319_v15, %s2989_s11  ;;  %622 = vrot.lane.b32.xlu0 %v318_v16, %s2989_s11  ;;  %v2530_v16 = vld [vmem:[%s3070_s7 + $0x2d8] sm:$0xff] }
  0x4c   : > { %628 = vrot.lane.b32.xlu1 %v321_v17, %s2989_s11  ;;  %626 = vrot.lane.b32.xlu0 %v320_v18, %s2989_s11  ;;  %v2529_v17 = vld [vmem:[%s3070_s7 + $0x2d0] sm:$0xff] }
  0x50   : > { %632 = vrot.lane.b32.xlu1 %v3194_v19, %s2989_s11  ;;  %630 = vrot.lane.b32.xlu0 %v3197_v20, %s2989_s11 }
  0x54   : > { %636 = vrot.lane.b32.xlu1 %v3204_v21, %s2989_s11  ;;  %634 = vrot.lane.b32.xlu0 %v3207_v22, %s2989_s11 }
  0x58   : > { %640 = vrot.lane.b32.xlu1 %v3214_v23, %s2989_s11  ;;  %638 = vrot.lane.b32.xlu0 %v3217_v24, %s2989_s11  ;;  %v3565_v23 = vld [vmem:[%s3070_s7 + $0x170] sm:$0xff] }
  0x59   : > { %4788 = vst [vmem:[#allocation29_spill] sm:$0xff] %v3565_v23 }
  0x5c   : > { %644 = vrot.lane.b32.xlu1 %v329_v25, %s2989_s11  ;;  %642 = vrot.lane.b32.xlu0 %v328_v26, %s2989_s11  ;;  %v2532_v26 = vld [vmem:[%s3070_s7 + $0x300] sm:$0xff] }
  0x60   : > { %648 = vrot.lane.b32.xlu1 %v331_v27, %s2989_s11  ;;  %646 = vrot.lane.b32.xlu0 %v330_v28, %s2989_s11  ;;  %v2531_v27 = vld [vmem:[%s3070_s7 + $0x2f8] sm:$0xff] }
  0x64   : > { %652 = vrot.lane.b32.xlu1 %v333_v29, %s2989_s11  ;;  %650 = vrot.lane.b32.xlu0 %v332_v30, %s2989_s11  ;;  %v2534_v30 = vld [vmem:[%s3070_s7 + $0x328] sm:$0xff] }
  0x68   : > { %656 = vrot.lane.b32.xlu1 %v335_v31, %s2989_s11  ;;  %654 = vrot.lane.b32.xlu0 %v334_v32, %s2989_s11  ;;  %v2533_v31 = vld [vmem:[%s3070_s7 + $0x320] sm:$0xff] }
  0x6c   : > { %724 = vrot.lane.b32.xlu1 %v337_v33, %s2990_s13  ;;  %722 = vrot.lane.b32.xlu0 %v336_v34, %s2990_s13  ;;  %v2536_v34 = vld [vmem:[%s3070_s7 + $0x350] sm:$0xff] }
  0x70   : > { %728 = vrot.lane.b32.xlu1 %v3244_v35, %s2990_s13  ;;  %726 = vrot.lane.b32.xlu0 %v3247_v36, %s2990_s13 }
  0x74   : > { %732 = vrot.lane.b32.xlu1 %v3254_v37, %s2990_s13  ;;  %730 = vrot.lane.b32.xlu0 %v3257_v38, %s2990_s13 }
  0x78   : > { %736 = vrot.lane.b32.xlu1 %v3264_v39, %s2990_s13  ;;  %734 = vrot.lane.b32.xlu0 %v3267_v40, %s2990_s13  ;;  %v2607_v39 = vld [vmem:[%s3070_s7 + $0x3e9] sm:$0xff] }
  0x7c   : > { %740 = vrot.lane.b32.xlu1 %v345_v41, %s2990_s13  ;;  %738 = vrot.lane.b32.xlu0 %v344_v42, %s2990_s13  ;;  %v2535_v41 = vld [vmem:[%s3070_s7 + $0x348] sm:$0xff] }
  0x80   : > { %744 = vrot.lane.b32.xlu1 %v347_v43, %s2990_s13  ;;  %742 = vrot.lane.b32.xlu0 %v346_v44, %s2990_s13  ;;  %v2538_v44 = vld [vmem:[%s3070_s7 + $0x378] sm:$0xff] }
  0x84   : > { %748 = vrot.lane.b32.xlu1 %v349_v45, %s2990_s13  ;;  %746 = vrot.lane.b32.xlu0 %v348_v46, %s2990_s13  ;;  %v2537_v45 = vld [vmem:[%s3070_s7 + $0x370] sm:$0xff] }
  0x88   : > { %752 = vrot.lane.b32.xlu1 %v351_v47, %s2990_s13  ;;  %750 = vrot.lane.b32.xlu0 %v350_v48, %s2990_s13  ;;  %v2540_v48 = vld [vmem:[%s3070_s7 + $0x3a0] sm:$0xff] }
  0x8c   : > { %756 = vrot.lane.b32.xlu1 %v353_v49, %s2990_s13  ;;  %754 = vrot.lane.b32.xlu0 %v352_v50, %s2990_s13  ;;  %v2539_v49 = vld [vmem:[%s3070_s7 + $0x398] sm:$0xff] }
  0x90   : > { %760 = vrot.lane.b32.xlu1 %v3294_v51, %s2990_s13  ;;  %758 = vrot.lane.b32.xlu0 %v3297_v52, %s2990_s13 }
  0x94   : > { %764 = vrot.lane.b32.xlu1 %v3304_v53, %s2990_s13  ;;  %762 = vrot.lane.b32.xlu0 %v3307_v54, %s2990_s13 }
  0x98   : > { %768 = vrot.lane.b32.xlu1 %v3314_v55, %s2990_s13  ;;  %766 = vrot.lane.b32.xlu0 %v3317_v56, %s2990_s13 }
  0x9c   : > { %772 = vrot.lane.b32.xlu1 %v361_v57, %s2990_s13  ;;  %770 = vrot.lane.b32.xlu0 %v360_v58, %s2990_s13  ;;  %v2542_v58 = vld [vmem:[%s3070_s7 + $0x3c8] sm:$0xff] }
  0x9e   : > { %v3329_v61 = vpop.permute.xlu1 %598  ;;  %v3331_v62 = vpop.permute.xlu0 %594 }
  0x9f   : > { %4767 = vst [vmem:[#allocation8_spill] sm:$0xff] %v3329_v61  ;;  %4768 = vst [vmem:[#allocation9_spill] sm:$0xff] %v3331_v62 }
  0xa0   : > { %776 = vrot.lane.b32.xlu1 %v363_v59, %s2990_s13  ;;  %774 = vrot.lane.b32.xlu0 %v362_v60, %s2990_s13  ;;  %v2541_v59 = vld [vmem:[%s3070_s7 + $0x3c0] sm:$0xff] }
  0xa2   : > { %v3337_v2 = vpop.permute.xlu1 %600  ;;  %v3339_v4 = vpop.permute.xlu0 %596 }
  0xa3   : > { %4769 = vst [vmem:[#allocation10_spill] sm:$0xff] %v3337_v2  ;;  %4770 = vst [vmem:[#allocation11_spill] sm:$0xff] %v3339_v4 }
  0xa4   : > { %780 = vrot.lane.b32.xlu1 %v365_v63, %s2990_s13  ;;  %778 = vrot.lane.b32.xlu0 %v364_v0, %s2990_s13  ;;  %v2544_v0 = vld [vmem:[%s3070_s7 + $0x3f0] sm:$0xff] }
  0xa6   : > { %v3345_v10 = vpop.permute.xlu1 %604  ;;  %v3347_v11 = vpop.permute.xlu0 %602 }
  0xa8   : > { %784 = vrot.lane.b32.xlu1 %v367_v7, %s2990_s13  ;;  %782 = vrot.lane.b32.xlu0 %v366_v9, %s2990_s13  ;;  %v2543_v7 = vld [vmem:[%s3070_s7 + $0x3e8] sm:$0xff] }
  0xaa   : > { %v3353_v14 = vpop.permute.xlu1 %608  ;;  %v3355_v15 = vpop.permute.xlu0 %606 }
  0xac   : > { %852 = vrot.lane.b32.xlu1 %v2528_v12, %s2991_s14  ;;  %850 = vrot.lane.b32.xlu0 %v2527_v13, %s2991_s14  ;;  %v2546_v13 = vld [vmem:[%s3070_s7 + $0x418] sm:$0xff] }
  0xae   : > { %v3361_v18 = vpop.permute.xlu1 %612  ;;  %v3363_v25 = vpop.permute.xlu0 %610 }
  0xb0   : > { %856 = vrot.lane.b32.xlu1 %v2530_v16, %s2991_s14  ;;  %854 = vrot.lane.b32.xlu0 %v2529_v17, %s2991_s14  ;;  %v2545_v16 = vld [vmem:[%s3070_s7 + $0x410] sm:$0xff] }
  0xb2   : > { %v3369_v28 = vpop.permute.xlu1 %616  ;;  %v3371_v29 = vpop.permute.xlu0 %614 }
  0xb4   : > { %860 = vrot.lane.b32.xlu1 %v2532_v26, %s2991_s14  ;;  %858 = vrot.lane.b32.xlu0 %v2531_v27, %s2991_s14  ;;  %v2548_v27 = vld [vmem:[%s3070_s7 + $0x440] sm:$0xff] }
  0xb6   : > { %v3377_v32 = vpop.permute.xlu1 %620  ;;  %v3379_v33 = vpop.permute.xlu0 %618 }
  0xb8   : > { %864 = vrot.lane.b32.xlu1 %v2534_v30, %s2991_s14  ;;  %862 = vrot.lane.b32.xlu0 %v2533_v31, %s2991_s14  ;;  %v2547_v30 = vld [vmem:[%s3070_s7 + $0x438] sm:$0xff] }
  0xba   : > { %v3385_v42 = vpop.permute.xlu1 %624  ;;  %v3387_v43 = vpop.permute.xlu0 %622 }
  0xbc   : > { %868 = vrot.lane.b32.xlu1 %v2536_v34, %s2991_s14  ;;  %866 = vrot.lane.b32.xlu0 %v2535_v41, %s2991_s14  ;;  %v2550_v41 = vld [vmem:[%s3070_s7 + $0x468] sm:$0xff] }
  0xbe   : > { %v3393_v46 = vpop.permute.xlu1 %628  ;;  %v3395_v47 = vpop.permute.xlu0 %626 }
  0xbf   : > { %4771 = vst [vmem:[#allocation12_spill] sm:$0xff] %v3393_v46  ;;  %4772 = vst [vmem:[#allocation13_spill] sm:$0xff] %v3395_v47  ;;  %v2563_v46 = vld [vmem:[%s3070_s7 + $0x309] sm:$0xff] }
  0xc0   : > { %872 = vrot.lane.b32.xlu1 %v2538_v44, %s2991_s14  ;;  %870 = vrot.lane.b32.xlu0 %v2537_v45, %s2991_s14  ;;  %v2549_v44 = vld [vmem:[%s3070_s7 + $0x460] sm:$0xff] }
  0xc2   : > { %v3401_v50 = vpop.permute.xlu1 %632  ;;  %v3403_v57 = vpop.permute.xlu0 %630 }
  0xc3   : > { %4773 = vst [vmem:[#allocation14_spill] sm:$0xff] %v3401_v50  ;;  %4774 = vst [vmem:[#allocation15_spill] sm:$0xff] %v3403_v57 }
  0xc4   : > { %876 = vrot.lane.b32.xlu1 %v2540_v48, %s2991_s14  ;;  %874 = vrot.lane.b32.xlu0 %v2539_v49, %s2991_s14  ;;  %v2552_v49 = vld [vmem:[%s3070_s7 + $0x490] sm:$0xff] }
  0xc6   : > { %v3409_v60 = vpop.permute.xlu1 %636  ;;  %v3411_v63 = vpop.permute.xlu0 %634 }
  0xc8   : > { %880 = vrot.lane.b32.xlu1 %v2542_v58, %s2991_s14  ;;  %878 = vrot.lane.b32.xlu0 %v2541_v59, %s2991_s14  ;;  %v2551_v58 = vld [vmem:[%s3070_s7 + $0x488] sm:$0xff] }
  0xca   : > { %v3417_v9 = vpop.permute.xlu1 %640  ;;  %v3419_v12 = vpop.permute.xlu0 %638 }
  0xcc   : > { %884 = vrot.lane.b32.xlu1 %v2544_v0, %s2991_s14  ;;  %882 = vrot.lane.b32.xlu0 %v2543_v7, %s2991_s14  ;;  %v2554_v7 = vld [vmem:[%s3070_s7 + $0x4b8] sm:$0xff] }
  0xce   : > { %v3425_v17 = vpop.permute.xlu1 %644  ;;  %v3427_v26 = vpop.permute.xlu0 %642 }
  0xd0   : > { %888 = vrot.lane.b32.xlu1 %v2546_v13, %s2991_s14  ;;  %886 = vrot.lane.b32.xlu0 %v2545_v16, %s2991_s14  ;;  %v2553_v13 = vld [vmem:[%s3070_s7 + $0x4b0] sm:$0xff] }
  0xd2   : > { %v3433_v31 = vpop.permute.xlu1 %648  ;;  %v3435_v34 = vpop.permute.xlu0 %646 }
  0xd4   : > { %892 = vrot.lane.b32.xlu1 %v2548_v27, %s2991_s14  ;;  %890 = vrot.lane.b32.xlu0 %v2547_v30, %s2991_s14  ;;  %v2556_v30 = vld [vmem:[%s3070_s7 + $0x4e0] sm:$0xff] }
  0xd6   : > { %v3441_v45 = vpop.permute.xlu1 %652  ;;  %v3443_v48 = vpop.permute.xlu0 %650 }
  0xd8   : > { %896 = vrot.lane.b32.xlu1 %v2550_v41, %s2991_s14  ;;  %894 = vrot.lane.b32.xlu0 %v2549_v44, %s2991_s14  ;;  %v2555_v41 = vld [vmem:[%s3070_s7 + $0x4d8] sm:$0xff] }
  0xda   : > { %v3449_v59 = vpop.permute.xlu1 %656  ;;  %v3451_v0 = vpop.permute.xlu0 %654 }
  0xdb   : > { %4775 = vst [vmem:[#allocation16_spill] sm:$0xff] %v3449_v59  ;;  %4776 = vst [vmem:[#allocation17_spill] sm:$0xff] %v3451_v0  ;;  %v2577_v0 = vld [vmem:[%s3070_s7 + $0x421] sm:$0xff] }
  0xdc   : > { %900 = vrot.lane.b32.xlu1 %v2552_v49, %s2991_s14  ;;  %898 = vrot.lane.b32.xlu0 %v2551_v58, %s2991_s14  ;;  %v2558_v49 = vld [vmem:[%s3070_s7 + $0x508] sm:$0xff]  ;;  %v2557_v58 = vld [vmem:[%s3070_s7 + $0x500] sm:$0xff] }
  0xde   : > { %v3457_v16 = vpop.permute.xlu1 %724  ;;  %v3459_v27 = vpop.permute.xlu0 %722 }
  0xdf   : > { %4777 = vst [vmem:[#allocation18_spill] sm:$0xff] %v3457_v16  ;;  %4778 = vst [vmem:[#allocation19_spill] sm:$0xff] %v3459_v27 }
  0xe0   : > { %904 = vrot.lane.b32.xlu1 %v2554_v7, %s2991_s14  ;;  %902 = vrot.lane.b32.xlu0 %v2553_v13, %s2991_s14  ;;  %v2560_v7 = vld [vmem:[%s3070_s7 + $0x2c1] sm:$0xff]  ;;  %v2559_v13 = vld [vmem:[%s3070_s7 + $0x2b9] sm:$0xff] }
  0xe2   : > { %v3465_v44 = vpop.permute.xlu1 %728  ;;  %v3467_v50 = vpop.permute.xlu0 %726 }
  0xe3   : > { %4779 = vst [vmem:[#allocation20_spill] sm:$0xff] %v3465_v44  ;;  %4780 = vst [vmem:[#allocation21_spill] sm:$0xff] %v3467_v50  ;;  %v2561_v50 = vld [vmem:[%s3070_s7 + $0x2e1] sm:$0xff] }
  0xe4   : > { %908 = vrot.lane.b32.xlu1 %v2556_v30, %s2991_s14  ;;  %906 = vrot.lane.b32.xlu0 %v2555_v41, %s2991_s14  ;;  %v2562_v41 = vld [vmem:[%s3070_s7 + $0x2e9] sm:$0xff] }
  0xe6   : > { %v3473_v2 = vpop.permute.xlu1 %732  ;;  %v3475_v57 = vpop.permute.xlu0 %730 }
  0xe8   : > { %912 = vrot.lane.b32.xlu1 %v2558_v49, %s2991_s14  ;;  %910 = vrot.lane.b32.xlu0 %v2557_v58, %s2991_s14  ;;  %v2564_v58 = vld [vmem:[%s3070_s7 + $0x311] sm:$0xff] }
  0xea   : > { %v3481_v44 = vpop.permute.xlu1 %736  ;;  %v3483_v30 = vpop.permute.xlu0 %734 }
  0xec   : > { %980 = vrot.lane.b32.xlu1 %v2560_v7, %s2992_s22  ;;  %978 = vrot.lane.b32.xlu0 %v2559_v13, %s2992_s22  ;;  %v2575_v7 = vld [vmem:[%s3070_s7 + $0x3f9] sm:$0xff]  ;;  %v2565_v13 = vld [vmem:[%s3070_s7 + $0x331] sm:$0xff] }
  0xee   : > { %v3489_v61 = vpop.permute.xlu1 %740  ;;  %v3491_v49 = vpop.permute.xlu0 %738 }
  0xf0   : > { %984 = vrot.lane.b32.xlu1 %v2562_v41, %s2992_s22  ;;  %982 = vrot.lane.b32.xlu0 %v2561_v50, %s2992_s22  ;;  %v2591_v50 = vld [vmem:[%s3070_s7 + $0x2a9] sm:$0xff]  ;;  %v2576_v41 = vld [vmem:[%s3070_s7 + $0x401] sm:$0xff] }
  0xf2   : > { %v3497_v16 = vpop.permute.xlu1 %744  ;;  %v3499_v4 = vpop.permute.xlu0 %742 }
  0xf4   : > { %988 = vrot.lane.b32.xlu1 %v2564_v58, %s2992_s22  ;;  %986 = vrot.lane.b32.xlu0 %v2563_v46, %s2992_s22  ;;  %v2592_v46 = vld [vmem:[%s3070_s7 + $0x2b1] sm:$0xff] }
  0xf6   : > { %v3505_v27 = vpop.permute.xlu1 %748  ;;  %v3507_v47 = vpop.permute.xlu0 %746 }
  0xf8   : > { %1010 = vrot.lane.b32.xlu1 %v2575_v7, %s2992_s22  ;;  %990 = vrot.lane.b32.xlu0 %v2565_v13, %s2992_s22  ;;  %v2608_v13 = vld [vmem:[%s3070_s7 + $0x3f1] sm:$0xff] }
  0xfa   : > { %v3513_v62 = vpop.permute.xlu1 %752  ;;  %v3515_v58 = vpop.permute.xlu0 %750 }
  0xfc   : > { %1106 = vrot.lane.b32.xlu1 %v2591_v50, %s2993_s23  ;;  %1012 = vrot.lane.b32.xlu0 %v2576_v41, %s2992_s22  ;;  %v3533_v50 = vld [vmem:[%s3070_s7 + $0x28] sm:$0xff] }
  0xfd   : > { %4785 = vst [vmem:[#allocation26_spill] sm:$0xff] %v3533_v50 }
  0xfe   : > { %v3521_v55 = vpop.permute.xlu1 %756  ;;  %v3523_v7 = vpop.permute.xlu0 %754 }
  0xff   : > { %4781 = vst [vmem:[#allocation22_spill] sm:$0xff] %v3521_v55  ;;  %4782 = vst [vmem:[#allocation23_spill] sm:$0xff] %v3523_v7 }
 0x100   : > { %1108 = vrot.lane.b32.xlu1 %v2592_v46, %s2993_s23  ;;  %1138 = vrot.lane.b32.xlu0 %v2607_v39, %s2993_s23  ;;  %v3549_v39 = vld [vmem:[%s3070_s7 + $0x30] sm:$0xff] }
 0x101   : > { %4786 = vst [vmem:[#allocation27_spill] sm:$0xff] %v3549_v39 }
 0x102   : > { %v3528_v40 = vpop.permute.xlu1 %760  ;;  %v3530_v56 = vpop.permute.xlu0 %758 }
 0x103   : > { %4783 = vst [vmem:[#allocation24_spill] sm:$0xff] %v3528_v40  ;;  %4784 = vst [vmem:[#allocation25_spill] sm:$0xff] %v3530_v56  ;;  %v3552_v40 = vld [vmem:[%s3070_s7 + $0x168] sm:$0xff] }
 0x104   : > { %1234 = vrot.lane.b32.xlu1 %v3533_v50, %s2994_s24  ;;  %1140 = vrot.lane.b32.xlu0 %v2608_v13, %s2993_s23  ;;  %4787 = vst [vmem:[#allocation28_spill] sm:$0xff] %v3552_v40  ;;  %v267_v13 = vld [vmem:[%s3546_s28] sm:$0xff]  ;;  %v268_v56 = vld [vmem:[%s3546_s28 + $0x8] sm:$0xff] }
 0x105   : > { %v2851_v50 = vpack.c.bf16 %v268_v56, %v267_v13 }
 0x106   : > { %v3539_v41 = vpop.permute.xlu1 %764  ;;  %v3541_v46 = vpop.permute.xlu0 %762 }
 0x107   : > { %2852 = vmatprep.subr.bf16.mxu0 %v2851_v50  ;;  %2859 = vmatprep.subr.bf16.mxu1 %v2851_v50 }
 0x108   : > { %1236 = vrot.lane.b32.xlu1 %v3549_v39, %s2994_s24  ;;  %1266 = vrot.lane.b32.xlu0 %v3552_v40, %s2994_s24  ;;  %v269_v39 = vld [vmem:[%s3546_s28 + $0x10] sm:$0xff]  ;;  %v270_v40 = vld [vmem:[%s3546_s28 + $0x18] sm:$0xff] }
 0x109   : > { %2854 = vmatpush3.bf16.msra.mxu0 %v2851_v50  ;;  %v2855_v56 = vpack.c.bf16 %v270_v40, %v269_v39  ;;  %2862 = vmatpush3.bf16.msra.mxu1 %v2851_v50  ;;  %v271_v40 = vld [vmem:[%s3546_s28 + $0x20] sm:$0xf]  ;;  %v2578_v50 = vld [vmem:[%s3070_s7 + $0x429] sm:$0xff] }
 0x10a   : > { %v3560_v55 = vpop.permute.xlu1 %768  ;;  %v3562_v7 = vpop.permute.xlu0 %766 }
 0x10b   : > { %2856 = vmatprep.subr.bf16.mxu0 %v2855_v56  ;;  %2860 = vmatprep.subr.bf16.mxu1 %v2855_v56 }
 0x10c   : > { %1362 = vrot.lane.b32.xlu1 %v3143_v1, %s2995_s29  ;;  %1268 = vrot.lane.b32.xlu0 %v3565_v23, %s2994_s24 }
 0x10d   : > { %2858 = vmatpush3.bf16.msra.mxu0 %v2855_v56  ;;  %2863 = vmatpush3.bf16.msra.mxu1 %v2855_v56  ;;  %v2609_v56 = vld [vmem:[%s3070_s7 + $0x411] sm:$0xff] }
 0x10e   : > { %v3574_v13 = vpop.permute.xlu1 %772  ;;  %v3576_v59 = vpop.permute.xlu0 %770  ;;  %2801 = vmatprep.subr.msk.mxu0 %vm1979_vm1, %v271_v40  ;;  %2861 = vmatprep.subr.msk.mxu1 %vm1979_vm1, %v271_v40 }
 0x110   : > { %1014 = vrot.lane.b32.xlu1 %v2577_v0, %s2992_s22  ;;  %1394 = vrot.lane.b32.xlu0 %v3197_v20, %s2995_s29 }
 0x111   : > { %2802 = vmatpush3.msk.msra.mxu0 %vm1979_vm1, %v271_v40  ;;  %2864 = vmatpush3.msk.msra.mxu1 %vm1979_vm1, %v271_v40 }
 0x112   : > { %v3581_v1 = vpop.permute.xlu1 %776  ;;  %v3583_v23 = vpop.permute.xlu0 %774 }
 0x114   : > { %1396 = vrot.lane.b32.xlu1 %v3194_v19, %s2995_s29  ;;  %1364 = vrot.lane.b32.xlu0 %v3150_v3, %s2995_s29  ;;  %v2593_v19 = vld [vmem:[%s3070_s7 + $0x2d1] sm:$0xff] }
 0x116   : > { %v3590_v20 = vpop.permute.xlu1 %780  ;;  %v3592_v0 = vpop.permute.xlu0 %778 }
 0x118   : > { %1522 = vrot.lane.b32.xlu1 %v3297_v52, %s2996_s30  ;;  %1490 = vrot.lane.b32.xlu0 %v3247_v36, %s2996_s30  ;;  %v2594_v36 = vld [vmem:[%s3070_s7 + $0x2d9] sm:$0xff] }
 0x119   : > { %v277_v52 = vld [vmem:[%s3070_s7 + $0x58] sm:$0xff] }
 0x11a   : > { %v3600_v39 = vpop.permute.xlu1 %784  ;;  %v3602_v3 = vpop.permute.xlu0 %782 }
 0x11b   : > { %4789 = vst [vmem:[#allocation30_spill] sm:$0xff] %v3600_v39  ;;  %4790 = vst [vmem:[#allocation31_spill] sm:$0xff] %v3602_v3  ;;  %v276_v3 = vld [vmem:[%s3070_s7 + $0x50] sm:$0xff] }
 0x11c   : > { %1110 = vrot.lane.b32.xlu1 %v2593_v19, %s2993_s23  ;;  %1016 = vrot.lane.b32.xlu0 %v2578_v50, %s2992_s22  ;;  %v1592_v50 = vsel %vm1586_vm2, %v277_v52, %v3345_v10 }
 0x11e   : > { %v3607_v40 = vpop.permute.xlu1 %852  ;;  %v3609_v24 = vpop.permute.xlu0 %850 }
 0x11f   : > { %4791 = vst [vmem:[#allocation32_spill] sm:$0xff] %v3607_v40  ;;  %4792 = vst [vmem:[#allocation33_spill] sm:$0xff] %v3609_v24  ;;  %v3630_v40 = vld [vmem:[%s3070_s7 + $0x80] sm:$0xff] }
 0x120   : > { %1492 = vrot.lane.b32.xlu1 %v3244_v35, %s2996_s30  ;;  %1142 = vrot.lane.b32.xlu0 %v2609_v56, %s2993_s23  ;;  %v1591_v35 = vsel %vm1586_vm2, %v276_v3, %v3347_v11  ;;  %v2610_v56 = vld [vmem:[%s3070_s7 + $0x419] sm:$0xff] }
 0x122   : > { %v3617_v39 = vpop.permute.xlu1 %856  ;;  %v3619_v19 = vpop.permute.xlu0 %854 }
 0x123   : > { %4793 = vst [vmem:[#allocation34_spill] sm:$0xff] %v3617_v39  ;;  %4794 = vst [vmem:[#allocation35_spill] sm:$0xff] %v3619_v19  ;;  %v3633_v39 = vld [vmem:[%s3070_s7 + $0x78] sm:$0xff] }
 0x124   : > { %1112 = vrot.lane.b32.xlu1 %v2594_v36, %s2993_s23  ;;  %1524 = vrot.lane.b32.xlu0 %v3294_v51, %s2996_s30  ;;  %v1625_v36 = vsel %vm1619_vm3, %v1592_v50, %v3473_v2  ;;  %v1624_v51 = vsel %vm1619_vm3, %v1591_v35, %v3475_v57  ;;  %v1594_v2 = vsel %vm1586_vm2, %v3630_v40, %v3353_v14  ;;  %v3654_v50 = vld [vmem:[%s3070_s7 + $0xa8] sm:$0xff]  ;;  %v3657_v35 = vld [vmem:[%s3070_s7 + $0xa0] sm:$0xff] }
 0x125   : > { %v1593_v57 = vsel %vm1586_vm2, %v3633_v39, %v3355_v15 }
 0x126   : > { %v861_v10 = vpop.permute.xlu1 %860  ;;  %v859_v19 = vpop.permute.xlu0 %858 }
 0x127   : > { %v3640_v11 = vsel %vm1652_vm4, %v1625_v36, %v861_v10  ;;  %v3643_v24 = vsel %vm1652_vm4, %v1624_v51, %v859_v19  ;;  %v1627_v19 = vsel %vm1619_vm3, %v1594_v2, %v3481_v44  ;;  %v3664_v51 = vld [vmem:[%s3070_s7 + $0x190] sm:$0xff]  ;;  %v1596_v44 = vsel %vm1586_vm2, %v3654_v50, %v3361_v18  ;;  %v282_v2 = vld [vmem:[%s3070_s7 + $0xc8] sm:$0xff] }
 0x128   : > { %1238 = vrot.lane.b32.xlu1 %v276_v3, %s2994_s24  ;;  %1144 = vrot.lane.b32.xlu0 %v2610_v56, %s2993_s23  ;;  %v1626_v3 = vsel %vm1619_vm3, %v1593_v57, %v3483_v30  ;;  %v1595_v30 = vsel %vm1586_vm2, %v3657_v35, %v3363_v25  ;;  %v283_v10 = vld [vmem:[%s3070_s7 + $0xd0] sm:$0xff]  ;;  %v1629_v57 = vsel %vm1619_vm3, %v1596_v44, %v3489_v61  ;;  %v285_v44 = vld [vmem:[%s3070_s7 + $0xf8] sm:$0xff] }
 0x129   : > { %v1598_v61 = vsel %vm1586_vm2, %v283_v10, %v3369_v28  ;;  %v1597_v25 = vsel %vm1586_vm2, %v282_v2, %v3371_v29  ;;  %v1600_v29 = vsel %vm1586_vm2, %v285_v44, %v3377_v32  ;;  %v286_v10 = vld [vmem:[%s3070_s7 + $0x118] sm:$0xff] }
 0x12a   : > { %v865_v56 = vpop.permute.xlu1 %864  ;;  %v863_v36 = vpop.permute.xlu0 %862  ;;  %v1633_v2 = vsel %vm1619_vm3, %v1600_v29, %v3505_v27  ;;  %v2596_v29 = vld [vmem:[%s3070_s7 + $0x301] sm:$0xff] }
 0x12b   : > { %v3667_v14 = vsel %vm1652_vm4, %v1627_v19, %v865_v56  ;;  %v3670_v15 = vsel %vm1652_vm4, %v1626_v3, %v863_v36  ;;  %v293_v56 = vld [vmem:[%s3070_s7 + $0x198] sm:$0xff] }
 0x12c   : > { %1240 = vrot.lane.b32.xlu1 %v277_v52, %s2994_s24  ;;  %1270 = vrot.lane.b32.xlu0 %v3664_v51, %s2994_s24  ;;  %v1628_v52 = vsel %vm1619_vm3, %v1595_v30, %v3491_v49  ;;  %v2579_v49 = vld [vmem:[%s3070_s7 + $0x449] sm:$0xff] }
 0x12d   : > { %v284_v30 = vld [vmem:[%s3070_s7 + $0xf0] sm:$0xff] }
 0x12e   : > { %v869_v19 = vpop.permute.xlu1 %868  ;;  %v867_v3 = vpop.permute.xlu0 %866 }
 0x12f   : > { %v3689_v36 = vsel %vm1652_vm4, %v1629_v57, %v869_v19  ;;  %v3692_v18 = vsel %vm1652_vm4, %v1628_v52, %v867_v3  ;;  %v1631_v57 = vsel %vm1619_vm3, %v1598_v61, %v3497_v16  ;;  %v1630_v52 = vsel %vm1619_vm3, %v1597_v25, %v3499_v4  ;;  %v287_v4 = vld [vmem:[%s3070_s7 + $0x120] sm:$0xff] }
 0x130   : > { %1366 = vrot.lane.b32.xlu1 %v3160_v6, %s2995_s29  ;;  %1272 = vrot.lane.b32.xlu0 %v293_v56, %s2994_s24  ;;  %v1599_v16 = vsel %vm1586_vm2, %v284_v30, %v3379_v33  ;;  %v1602_v33 = vsel %vm1586_vm2, %v287_v4, %v3385_v42  ;;  %v2580_v42 = vld [vmem:[%s3070_s7 + $0x451] sm:$0xff] }
 0x131   : > { %v1632_v61 = vsel %vm1619_vm3, %v1599_v16, %v3507_v47  ;;  %v1601_v47 = vsel %vm1586_vm2, %v286_v10, %v3387_v43  ;;  %v1635_v27 = vsel %vm1619_vm3, %v1602_v33, %v3513_v62  ;;  %v2595_v62 = vld [vmem:[%s3070_s7 + $0x2f9] sm:$0xff] }
 0x132   : > { %v873_v6 = vpop.permute.xlu1 %872  ;;  %v871_v19 = vpop.permute.xlu0 %870  ;;  %v1634_v44 = vsel %vm1619_vm3, %v1601_v47, %v3515_v58  ;;  %v295_v16 = vld [vmem:[%s3070_s7 + $0x1c0] sm:$0xff]  ;;  %v294_v4 = vld [vmem:[%s3070_s7 + $0x1b8] sm:$0xff] }
 0x133   : > { %v3709_v3 = vsel %vm1652_vm4, %v1631_v57, %v873_v6  ;;  %v3712_v28 = vsel %vm1652_vm4, %v1630_v52, %v871_v19  ;;  %v2611_v52 = vld [vmem:[%s3070_s7 + $0x439] sm:$0xff] }
 0x134   : > { %1018 = vrot.lane.b32.xlu1 %v2579_v49, %s2992_s22  ;;  %1398 = vrot.lane.b32.xlu0 %v3207_v22, %s2995_s29 }
 0x136   : > { %v877_v25 = vpop.permute.xlu1 %876  ;;  %v875_v49 = vpop.permute.xlu0 %874 }
 0x137   : > { %v3728_v22 = vsel %vm1652_vm4, %v1633_v2, %v877_v25  ;;  %v3731_v32 = vsel %vm1652_vm4, %v1632_v61, %v875_v49 }
 0x138   : > { %1400 = vrot.lane.b32.xlu1 %v3204_v21, %s2995_s29  ;;  %1368 = vrot.lane.b32.xlu0 %v3157_v5, %s2995_s29 }
 0x13a   : > { %v881_v30 = vpop.permute.xlu1 %880  ;;  %v879_v57 = vpop.permute.xlu0 %878 }
 0x13b   : > { %v3746_v21 = vsel %vm1652_vm4, %v1635_v27, %v881_v30  ;;  %v3749_v5 = vsel %vm1652_vm4, %v1634_v44, %v879_v57  ;;  %v3826_v44 = vld [vmem:[%s3070_s7 + $0x208] sm:$0xff] }
 0x13c   : > { %4795 = vst [vmem:[#allocation36_spill] sm:$0xff] %v3746_v21  ;;  %1526 = vrot.lane.b32.xlu1 %v3307_v54, %s2996_s30  ;;  %1494 = vrot.lane.b32.xlu0 %v3257_v38, %s2996_s30  ;;  %v1608_v38 = vsel %vm1586_vm2, %v293_v56, %v3409_v60  ;;  %v1607_v54 = vsel %vm1586_vm2, %v3664_v51, %v3411_v63  ;;  %v3798_v51 = vld [vmem:[%s3070_s7 + $0x1e8] sm:$0xff]  ;;  %v3801_v56 = vld [vmem:[%s3070_s7 + $0x1e0] sm:$0xff]  ;;  %v4810_v21 = vld [vmem:[#allocation33_spill] sm:$0xff] }
 0x13d   : > { %v1641_v10 = vsel %vm1619_vm3, %v1608_v38, %v3539_v41  ;;  %v1610_v63 = vsel %vm1586_vm2, %v295_v16, %v3417_v9  ;;  %v1609_v41 = vsel %vm1586_vm2, %v294_v4, %v3419_v12  ;;  %v1611_v12 = vsel %vm1586_vm2, %v3801_v56, %v3427_v26 }
 0x13e   : > { %v3757_v43 = vpop.permute.xlu1 %884  ;;  %v3759_v58 = vpop.permute.xlu0 %882  ;;  %v1643_v49 = vsel %vm1619_vm3, %v1610_v63, %v3560_v55  ;;  %v1642_v33 = vsel %vm1619_vm3, %v1609_v41, %v3562_v7  ;;  %v1612_v55 = vsel %vm1586_vm2, %v3798_v51, %v3425_v17  ;;  %v3823_v7 = vld [vmem:[%s3070_s7 + $0x210] sm:$0xff] }
 0x13f   : > { %v1645_v30 = vsel %vm1619_vm3, %v1612_v55, %v3574_v13  ;;  %v1614_v26 = vsel %vm1586_vm2, %v3823_v7, %v3433_v31  ;;  %v301_v13 = vld [vmem:[%s3070_s7 + $0x238] sm:$0xff] }
 0x140   : > { %1114 = vrot.lane.b32.xlu1 %v2595_v62, %s2993_s23  ;;  %1020 = vrot.lane.b32.xlu0 %v2580_v42, %s2992_s22  ;;  %v1647_v38 = vsel %vm1619_vm3, %v1614_v26, %v3581_v1  ;;  %v2581_v1 = vld [vmem:[%s3070_s7 + $0x471] sm:$0xff] }
 0x142   : > { %v3764_v6 = vpop.permute.xlu1 %888  ;;  %v3766_v19 = vpop.permute.xlu0 %886 }
 0x144   : > { %1496 = vrot.lane.b32.xlu1 %v3254_v37, %s2996_s30  ;;  %1146 = vrot.lane.b32.xlu0 %v2611_v52, %s2993_s23  ;;  %v1640_v37 = vsel %vm1619_vm3, %v1607_v54, %v3541_v46  ;;  %v2612_v46 = vld [vmem:[%s3070_s7 + $0x441] sm:$0xff]  ;;  %v300_v52 = vld [vmem:[%s3070_s7 + $0x230] sm:$0xff] }
 0x146   : > { %v893_v2 = vpop.permute.xlu1 %892  ;;  %v891_v61 = vpop.permute.xlu0 %890 }
 0x147   : > { %v3784_v25 = vsel %vm1652_vm4, %v1641_v10, %v893_v2  ;;  %v3787_v60 = vsel %vm1652_vm4, %v1640_v37, %v891_v61  ;;  %v303_v10 = vld [vmem:[%s3070_s7 + $0x260] sm:$0xff]  ;;  %v302_v37 = vld [vmem:[%s3070_s7 + $0x258] sm:$0xff] }
 0x148   : > { %1116 = vrot.lane.b32.xlu1 %v2596_v29, %s2993_s23  ;;  %1528 = vrot.lane.b32.xlu0 %v3304_v53, %s2996_s30 }
 0x14a   : > { %v897_v53 = vpop.permute.xlu1 %896  ;;  %v895_v47 = vpop.permute.xlu0 %894 }
 0x14b   : > { %v3808_v27 = vsel %vm1652_vm4, %v1643_v49, %v897_v53  ;;  %v3811_v9 = vsel %vm1652_vm4, %v1642_v33, %v895_v47  ;;  %v2660_v49 = vld [vmem:[%s3070_s7 + $0x91] sm:$0xff]  ;;  %v4799_v33 = vld [vmem:[#allocation30_spill] sm:$0xff]  ;;  %v4800_v47 = vld [vmem:[#allocation31_spill] sm:$0xff] }
 0x14c   : > { %1242 = vrot.lane.b32.xlu1 %v3633_v39, %s2994_s24  ;;  %1148 = vrot.lane.b32.xlu0 %v2612_v46, %s2993_s23  ;;  %v1644_v39 = vsel %vm1619_vm3, %v1611_v12, %v3576_v59  ;;  %v1613_v59 = vsel %vm1586_vm2, %v3826_v44, %v3435_v34  ;;  %v1616_v34 = vsel %vm1586_vm2, %v301_v13, %v3441_v45  ;;  %v4796_v45 = vld [vmem:[#allocation3_spill] sm:$0xff]  ;;  %v4798_v46 = vld [vmem:[#allocation17_spill] sm:$0xff] }
 0x14d   : > { %v1649_v2 = vsel %vm1619_vm3, %v1616_v34, %v3590_v20  ;;  %v4802_v13 = vld [vmem:[#allocation7_spill] sm:$0xff] }
 0x14e   : > { %v901_v57 = vpop.permute.xlu1 %900  ;;  %v899_v62 = vpop.permute.xlu0 %898  ;;  %v2613_v34 = vld [vmem:[%s3070_s7 + $0x461] sm:$0xff] }
 0x14f   : > { %v3833_v42 = vsel %vm1652_vm4, %v1645_v30, %v901_v57  ;;  %v3836_v17 = vsel %vm1652_vm4, %v1644_v39, %v899_v62  ;;  %v4801_v62 = vld [vmem:[#allocation2_spill] sm:$0xff] }
 0x150   : > { %1244 = vrot.lane.b32.xlu1 %v3630_v40, %s2994_s24  ;;  %1274 = vrot.lane.b32.xlu0 %v294_v4, %s2994_s24  ;;  %v1646_v40 = vsel %vm1619_vm3, %v1613_v59, %v3583_v23  ;;  %v1615_v23 = vsel %vm1586_vm2, %v300_v52, %v3443_v48  ;;  %v4797_v48 = vld [vmem:[#allocation16_spill] sm:$0xff]  ;;  %v4803_v52 = vld [vmem:[#allocation5_spill] sm:$0xff] }
 0x151   : > { %v1648_v61 = vsel %vm1619_vm3, %v1615_v23, %v3592_v0  ;;  %v1618_v20 = vsel %vm1586_vm2, %v303_v10, %v4797_v48  ;;  %v1617_v0 = vsel %vm1586_vm2, %v302_v37, %v4798_v46  ;;  %v2597_v23 = vld [vmem:[%s3070_s7 + $0x321] sm:$0xff] }
 0x152   : > { %v905_v54 = vpop.permute.xlu1 %904  ;;  %v903_v29 = vpop.permute.xlu0 %902  ;;  %v1651_v53 = vsel %vm1619_vm3, %v1618_v20, %v4799_v33  ;;  %v1650_v55 = vsel %vm1619_vm3, %v1617_v0, %v4800_v47  ;;  %v2661_v47 = vld [vmem:[%s3070_s7 + $0xb1] sm:$0xff] }
 0x153   : > { %v3854_v4 = vsel %vm1652_vm4, %v1647_v38, %v905_v54  ;;  %v3857_v31 = vsel %vm1652_vm4, %v1646_v40, %v903_v29  ;;  %v2582_v38 = vld [vmem:[%s3070_s7 + $0x479] sm:$0xff] }
 0x154   : > { %1370 = vrot.lane.b32.xlu1 %v3168_v8, %s2995_s29  ;;  %1276 = vrot.lane.b32.xlu0 %v295_v16, %s2994_s24  ;;  %v2566_v40 = vld [vmem:[%s3070_s7 + $0x339] sm:$0xff] }
 0x156   : > { %v909_v63 = vpop.permute.xlu1 %908  ;;  %v907_v8 = vpop.permute.xlu0 %906 }
 0x157   : > { %v3874_v16 = vsel %vm1652_vm4, %v1649_v2, %v909_v63  ;;  %v3877_v41 = vsel %vm1652_vm4, %v1648_v61, %v907_v8  ;;  %v4804_v61 = vld [vmem:[#allocation6_spill] sm:$0xff]  ;;  %v4805_v63 = vld [vmem:[#allocation4_spill] sm:$0xff] }
 0x158   : > { %1022 = vrot.lane.b32.xlu1 %v2581_v1, %s2992_s22  ;;  %1402 = vrot.lane.b32.xlu0 %v4796_v45, %s2995_s29  ;;  %v2614_v8 = vld [vmem:[%s3070_s7 + $0x469] sm:$0xff] }
 0x159   : > { %v2598_v45 = vld [vmem:[%s3070_s7 + $0x329] sm:$0xff] }
 0x15a   : > { %v913_v12 = vpop.permute.xlu1 %912  ;;  %v911_v30 = vpop.permute.xlu0 %910 }
 0x15b   : > { %v3892_v39 = vsel %vm1652_vm4, %v1651_v53, %v913_v12  ;;  %v3895_v57 = vsel %vm1652_vm4, %v1650_v55, %v911_v30  ;;  %v2677_v53 = vld [vmem:[%s3070_s7 + $0x1f1] sm:$0xff]  ;;  %v2567_v12 = vld [vmem:[%s3070_s7 + $0x359] sm:$0xff] }
 0x15c   : > { %1404 = vrot.lane.b32.xlu1 %v4801_v62, %s2995_s29  ;;  %1372 = vrot.lane.b32.xlu0 %v2660_v49, %s2995_s29 }
 0x15e   : > { %v3900_v26 = vpop.permute.xlu1 %980  ;;  %v3902_v59 = vpop.permute.xlu0 %978 }
 0x160   : > { %1530 = vrot.lane.b32.xlu1 %v4802_v13, %s2996_s30  ;;  %1498 = vrot.lane.b32.xlu0 %v4803_v52, %s2996_s30  ;;  %v2678_v13 = vld [vmem:[%s3070_s7 + $0x1f9] sm:$0xff] }
 0x161   : > { %v2662_v52 = vld [vmem:[%s3070_s7 + $0xb9] sm:$0xff] }
 0x162   : > { %v3910_v54 = vpop.permute.xlu1 %984  ;;  %v3912_v29 = vpop.permute.xlu0 %982 }
 0x164   : > { %1024 = vrot.lane.b32.xlu1 %v2582_v38, %s2992_s22  ;;  %992 = vrot.lane.b32.xlu0 %v2566_v40, %s2992_s22 }
 0x166   : > { %v3918_v1 = vpop.permute.xlu1 %988  ;;  %v3920_v10 = vpop.permute.xlu0 %986 }
 0x168   : > { %1150 = vrot.lane.b32.xlu1 %v2613_v34, %s2993_s23  ;;  %1118 = vrot.lane.b32.xlu0 %v2597_v23, %s2993_s23  ;;  %v4806_v34 = vld [vmem:[#allocation9_spill] sm:$0xff] }
 0x16a   : > { %v1011_v37 = vpop.permute.xlu1 %1010  ;;  %v3924_v2 = vpop.permute.xlu0 %990 }
 0x16c   : > { %1532 = vrot.lane.b32.xlu1 %v4804_v61, %s2996_s30  ;;  %1500 = vrot.lane.b32.xlu0 %v4805_v63, %s2996_s30  ;;  %v4807_v61 = vld [vmem:[#allocation13_spill] sm:$0xff] }
 0x16e   : > { %v1107_v48 = vpop.permute.xlu1 %1106  ;;  %v3932_v20 = vpop.permute.xlu0 %1012 }
 0x170   : > { %1152 = vrot.lane.b32.xlu1 %v2614_v8, %s2993_s23  ;;  %1120 = vrot.lane.b32.xlu0 %v2598_v45, %s2993_s23  ;;  %v4808_v8 = vld [vmem:[#allocation19_spill] sm:$0xff] }
 0x172   : > { %v3936_v46 = vpop.permute.xlu1 %1108  ;;  %v1139_v0 = vpop.permute.xlu0 %1138 }
 0x174   : > { %1278 = vrot.lane.b32.xlu1 %v3801_v56, %s2994_s24  ;;  %1246 = vrot.lane.b32.xlu0 %v3657_v35, %s2994_s24  ;;  %v2583_v35 = vld [vmem:[%s3070_s7 + $0x499] sm:$0xff] }
 0x176   : > { %v1235_v49 = vpop.permute.xlu1 %1234  ;;  %v3942_v33 = vpop.permute.xlu0 %1140 }
 0x178   : > { %1280 = vrot.lane.b32.xlu1 %v3798_v51, %s2994_s24  ;;  %1248 = vrot.lane.b32.xlu0 %v3654_v50, %s2994_s24  ;;  %v272_v51 = vld [vmem:[%s3070_s7] sm:$0xff] }
 0x179   : > { %v288_v50 = vld [vmem:[%s3070_s7 + $0x140] sm:$0xff]  ;;  %v1587_v23 = vsel %vm1586_vm2, %v272_v51, %v4806_v34 }
 0x17a   : > { %v3950_v55 = vpop.permute.xlu1 %1236  ;;  %v1267_v56 = vpop.permute.xlu0 %1266  ;;  %v1603_v63 = vsel %vm1586_vm2, %v288_v50, %v4807_v61  ;;  %v1620_v45 = vsel %vm1619_vm3, %v1587_v23, %v4808_v8 }
 0x17b   : > { %v1653_v51 = vsel %vm1652_vm4, %v1620_v45, %v4810_v21  ;;  %v273_v21 = vld [vmem:[%s3070_s7 + $0x8] sm:$0xff] }
 0x17c   : > { %1406 = vrot.lane.b32.xlu1 %v2677_v53, %s2995_s29  ;;  %1374 = vrot.lane.b32.xlu0 %v2661_v47, %s2995_s29  ;;  %v4809_v53 = vld [vmem:[#allocation23_spill] sm:$0xff]  ;;  %v1686_v34 = vsel %vm1685_vm5, %v1653_v51, %v3902_v59  ;;  %v4812_v51 = vld [vmem:[#allocation18_spill] sm:$0xff] }
 0x17d   : > { %v1636_v47 = vsel %vm1619_vm3, %v1603_v63, %v4809_v53  ;;  %v1719_v61 = vsel %vm1718_vm6, %v1686_v34, %v1107_v48  ;;  %v2584_v45 = vld [vmem:[%s3070_s7 + $0x4a1] sm:$0xff]  ;;  %v4813_v34 = vld [vmem:[#allocation32_spill] sm:$0xff] }
 0x17e   : > { %v1363_v30 = vpop.permute.xlu1 %1362  ;;  %v3956_v62 = vpop.permute.xlu0 %1268  ;;  %v1669_v50 = vsel %vm1652_vm4, %v1636_v47, %v3759_v58  ;;  %v1752_v58 = vsel %vm1751_vm7, %v1719_v61, %v1235_v49  ;;  %v2568_v59 = vld [vmem:[%s3070_s7 + $0x361] sm:$0xff] }
 0x17f   : > { %v1702_v23 = vsel %vm1685_vm5, %v1669_v50, %v1011_v37  ;;  %v1785_v37 = vsel %vm1784_vm8, %v1752_v58, %v1363_v30  ;;  %v2599_v50 = vld [vmem:[%s3070_s7 + $0x349] sm:$0xff] }
 0x180   : > { %1026 = vrot.lane.b32.xlu1 %v2583_v35, %s2992_s22  ;;  %994 = vrot.lane.b32.xlu0 %v2567_v12, %s2992_s22  ;;  %v2709_v35 = vld [vmem:[%s3070_s7 + $0x1e1] sm:$0xff]  ;;  %v1735_v63 = vsel %vm1718_vm6, %v1702_v23, %v1139_v0  ;;  %v4814_v58 = vld [vmem:[#allocation12_spill] sm:$0xff] }
 0x181   : > { %v2693_v12 = vld [vmem:[%s3070_s7 + $0xa1] sm:$0xff]  ;;  %v1768_v8 = vsel %vm1751_vm7, %v1735_v63, %v1267_v56 }
 0x182   : > { %v3964_v38 = vpop.permute.xlu1 %1014  ;;  %v1395_v40 = vpop.permute.xlu0 %1394  ;;  %v289_v56 = vld [vmem:[%s3070_s7 + $0x148] sm:$0xff] }
 0x183   : > { %v1801_v48 = vsel %vm1784_vm8, %v1768_v8, %v1395_v40  ;;  %v2615_v40 = vld [vmem:[%s3070_s7 + $0x489] sm:$0xff]  ;;  %v1604_v8 = vsel %vm1586_vm2, %v289_v56, %v4814_v58  ;;  %v2663_v58 = vld [vmem:[%s3070_s7 + $0xd9] sm:$0xff] }
 0x184   : > { %1408 = vrot.lane.b32.xlu1 %v2678_v13, %s2995_s29  ;;  %1376 = vrot.lane.b32.xlu0 %v2662_v52, %s2995_s29 }
 0x186   : > { %v1397_v13 = vpop.permute.xlu1 %1396  ;;  %v1365_v52 = vpop.permute.xlu0 %1364 }
 0x188   : > { %1534 = vrot.lane.b32.xlu1 %v2709_v35, %s2996_s30  ;;  %1502 = vrot.lane.b32.xlu0 %v2693_v12, %s2996_s30  ;;  %v4811_v12 = vld [vmem:[#allocation11_spill] sm:$0xff] }
 0x189   : > { %v1588_v49 = vsel %vm1586_vm2, %v273_v21, %v4811_v12 }
 0x18a   : > { %v1523_v0 = vpop.permute.xlu1 %1522  ;;  %v1491_v53 = vpop.permute.xlu0 %1490  ;;  %v1621_v30 = vsel %vm1619_vm3, %v1588_v49, %v4812_v51 }
 0x18b   : > { %v1818_v47 = vsel %vm1817_vm9, %v1785_v37, %v1491_v53  ;;  %v1834_v35 = vsel %vm1817_vm9, %v1801_v48, %v1523_v0  ;;  %v1654_v23 = vsel %vm1652_vm4, %v1621_v30, %v4813_v34  ;;  %v2710_v0 = vld [vmem:[%s3070_s7 + $0x1e9] sm:$0xff] }
 0x18c   : > { %1028 = vrot.lane.b32.xlu1 %v2584_v45, %s2992_s22  ;;  %996 = vrot.lane.b32.xlu0 %v2568_v59, %s2992_s22  ;;  %v1687_v21 = vsel %vm1685_vm5, %v1654_v23, %v3900_v26  ;;  %v4815_v59 = vld [vmem:[#allocation22_spill] sm:$0xff]  ;;  %v2694_v26 = vld [vmem:[%s3070_s7 + $0xa9] sm:$0xff] }
 0x18d   : > { %2803 = vmatprep.mubr.msk.f32.mxu0 %vm1882_vm10, %v1818_v47  ;;  %2827 = vmatprep.mubr.msk.f32.mxu1 %vm1882_vm10, %v1834_v35  ;;  %v1720_v45 = vsel %vm1718_vm6, %v1687_v21, %v3936_v46  ;;  %v1637_v37 = vsel %vm1619_vm3, %v1604_v8, %v4815_v59  ;;  %v2679_v21 = vld [vmem:[%s3070_s7 + $0x219] sm:$0xff]  ;;  %v2569_v59 = vld [vmem:[%s3070_s7 + $0x381] sm:$0xff] }
 0x18e   : > { %v4011_v61 = vpop.permute.xlu1 %1110  ;;  %v4013_v63 = vpop.permute.xlu0 %1016  ;;  %v1753_v48 = vsel %vm1751_vm7, %v1720_v45, %v3950_v55  ;;  %v1670_v53 = vsel %vm1652_vm4, %v1637_v37, %v3757_v43  ;;  %v2616_v55 = vld [vmem:[%s3070_s7 + $0x491] sm:$0xff] }
 0x18f   : > { %v1786_v47 = vsel %vm1784_vm8, %v1753_v48, %v1365_v52  ;;  %v1703_v12 = vsel %vm1685_vm5, %v1670_v53, %v3932_v20  ;;  %v2600_v52 = vld [vmem:[%s3070_s7 + $0x351] sm:$0xff]  ;;  %v4818_v53 = vld [vmem:[#allocation15_spill] sm:$0xff] }
 0x190   : > { %1154 = vrot.lane.b32.xlu1 %v2615_v40, %s2993_s23  ;;  %1122 = vrot.lane.b32.xlu0 %v2599_v50, %s2993_s23  ;;  %v1736_v56 = vsel %vm1718_vm6, %v1703_v12, %v3942_v33  ;;  %v4820_v12 = vld [vmem:[#allocation21_spill] sm:$0xff] }
 0x191   : > { %v1769_v43 = vsel %vm1751_vm7, %v1736_v56, %v3956_v62  ;;  %v2631_v62 = vld [vmem:[%s3070_s7 + $0xc8] sm:$0xff]  ;;  %v4821_v56 = vld [vmem:[#allocation25_spill] sm:$0xff] }
 0x192   : > { %v1493_v46 = vpop.permute.xlu1 %1492  ;;  %v1143_v35 = vpop.permute.xlu0 %1142  ;;  %v1802_v20 = vsel %vm1784_vm8, %v1769_v43, %v1397_v13  ;;  %v2632_v13 = vld [vmem:[%s3070_s7 + $0xd0] sm:$0xff] }
 0x193   : > { %v1819_v49 = vsel %vm1817_vm9, %v1786_v47, %v1493_v46  ;;  %v4819_v47 = vld [vmem:[#allocation28_spill] sm:$0xff] }
 0x194   : > { %1536 = vrot.lane.b32.xlu1 %v2710_v0, %s2996_s30  ;;  %1504 = vrot.lane.b32.xlu0 %v2694_v26, %s2996_s30  ;;  %v4816_v0 = vld [vmem:[#allocation8_spill] sm:$0xff]  ;;  %v1605_v46 = vsel %vm1586_vm2, %v4819_v47, %v4818_v53 }
 0x195   : > { %2804 = vmatmul.mubr.msk.f32.vlgmr.msra.gmra.mrb[0].mxu0 %vm1882_vm10, %v1819_v49  ;;  %v1638_v43 = vsel %vm1619_vm3, %v1605_v46, %v4821_v56  ;;  %v4823_v46 = vld [vmem:[#allocation10_spill] sm:$0xff] }
 0x196   : > { %v4045_v51 = vpop.permute.xlu1 %1112  ;;  %v1525_v30 = vpop.permute.xlu0 %1524  ;;  %v4826_v56 = vld [vmem:[#allocation34_spill] sm:$0xff] }
 0x197   : > { %v1835_v33 = vsel %vm1817_vm9, %v1802_v20, %v1525_v30  ;;  %v4822_v20 = vld [vmem:[#allocation35_spill] sm:$0xff] }
 0x198   : > { %1156 = vrot.lane.b32.xlu1 %v2616_v55, %s2993_s23  ;;  %1124 = vrot.lane.b32.xlu0 %v2600_v52, %s2993_s23  ;;  %v2680_v55 = vld [vmem:[%s3070_s7 + $0x221] sm:$0xff] }
 0x199   : > { %2828 = vmatmul.mubr.msk.f32.vlgmr.msra.gmra.mrb[0].mxu1 %vm1882_vm10, %v1835_v33  ;;  %v2664_v52 = vld [vmem:[%s3070_s7 + $0xe1] sm:$0xff]  ;;  %v1671_v33 = vsel %vm1652_vm4, %v1638_v43, %v3766_v19 }
 0x19a   : > { %v1239_v40 = vpop.permute.xlu1 %1238  ;;  %v4052_v50 = vpop.permute.xlu0 %1144 }
 0x19c   : > { %1282 = vrot.lane.b32.xlu1 %v3826_v44, %s2994_s24  ;;  %1250 = vrot.lane.b32.xlu0 %v2631_v62, %s2994_s24  ;;  %v2585_v44 = vld [vmem:[%s3070_s7 + $0x4c1] sm:$0xff] }
 0x19e   : > { %v1241_v34 = vpop.permute.xlu1 %1240  ;;  %v1271_v23 = vpop.permute.xlu0 %1270 }
 0x1a0   : > { %1284 = vrot.lane.b32.xlu1 %v3823_v7, %s2994_s24  ;;  %1252 = vrot.lane.b32.xlu0 %v2632_v13, %s2994_s24  ;;  %v4817_v7 = vld [vmem:[#allocation26_spill] sm:$0xff] }
 0x1a1   : > { %v1589_v26 = vsel %vm1586_vm2, %v4817_v7, %v4816_v0  ;;  %v2711_v7 = vld [vmem:[%s3070_s7 + $0x209] sm:$0xff] }
 0x1a2   : > { %v1367_v8 = vpop.permute.xlu1 %1366  ;;  %v4063_v45 = vpop.permute.xlu0 %1272  ;;  %v1622_v49 = vsel %vm1619_vm3, %v1589_v26, %v4820_v12  ;;  %v4824_v12 = vld [vmem:[#allocation27_spill] sm:$0xff] }
 0x1a3   : > { %v1655_v30 = vsel %vm1652_vm4, %v1622_v49, %v4822_v20  ;;  %v2570_v49 = vld [vmem:[%s3070_s7 + $0x389] sm:$0xff] }
 0x1a4   : > { %1410 = vrot.lane.b32.xlu1 %v2679_v21, %s2995_s29  ;;  %1378 = vrot.lane.b32.xlu0 %v2663_v58, %s2995_s29  ;;  %v1688_v21 = vsel %vm1685_vm5, %v1655_v30, %v3912_v29  ;;  %v1704_v58 = vsel %vm1685_vm5, %v1671_v33, %v3964_v38  ;;  %v2695_v29 = vld [vmem:[%s3070_s7 + $0xc9] sm:$0xff]  ;;  %v4827_v30 = vld [vmem:[#allocation14_spill] sm:$0xff]  ;;  %v4828_v33 = vld [vmem:[#allocation29_spill] sm:$0xff] }
 0x1a6   : > { %v4069_v37 = vpop.permute.xlu1 %1018  ;;  %v1399_v48 = vpop.permute.xlu0 %1398 }
 0x1a8   : > { %1030 = vrot.lane.b32.xlu1 %v2585_v44, %s2992_s22  ;;  %998 = vrot.lane.b32.xlu0 %v2569_v59, %s2992_s22  ;;  %v1721_v44 = vsel %vm1718_vm6, %v1688_v21, %v4011_v61  ;;  %v1737_v59 = vsel %vm1718_vm6, %v1704_v58, %v1143_v35  ;;  %v1606_v21 = vsel %vm1586_vm2, %v4828_v33, %v4827_v30  ;;  %v2681_v30 = vld [vmem:[%s3070_s7 + $0x241] sm:$0xff] }
 0x1a9   : > { %v1754_v0 = vsel %vm1751_vm7, %v1721_v44, %v1239_v40  ;;  %v1770_v19 = vsel %vm1751_vm7, %v1737_v59, %v1271_v23  ;;  %v1590_v40 = vsel %vm1586_vm2, %v4824_v12, %v4823_v46  ;;  %v4825_v23 = vld [vmem:[#allocation20_spill] sm:$0xff]  ;;  %v2602_v46 = vld [vmem:[%s3070_s7 + $0x379] sm:$0xff]  ;;  %v2665_v33 = vld [vmem:[%s3070_s7 + $0x101] sm:$0xff] }
 0x1aa   : > { %v1401_v62 = vpop.permute.xlu1 %1400  ;;  %v1369_v13 = vpop.permute.xlu0 %1368  ;;  %v1787_v26 = vsel %vm1784_vm8, %v1754_v0, %v1367_v8  ;;  %v1803_v38 = vsel %vm1784_vm8, %v1770_v19, %v1399_v48  ;;  %v1623_v8 = vsel %vm1619_vm3, %v1590_v40, %v4825_v23  ;;  %v2586_v48 = vld [vmem:[%s3070_s7 + $0x4c9] sm:$0xff]  ;;  %v2617_v19 = vld [vmem:[%s3070_s7 + $0x4b1] sm:$0xff] }
 0x1ab   : > { %v1656_v43 = vsel %vm1652_vm4, %v1623_v8, %v4826_v56  ;;  %v4829_v44 = vld [vmem:[#allocation24_spill] sm:$0xff]  ;;  %v2634_v56 = vld [vmem:[%s3070_s7 + $0xf8] sm:$0xff] }
 0x1ac   : > { %1412 = vrot.lane.b32.xlu1 %v2680_v55, %s2995_s29  ;;  %1380 = vrot.lane.b32.xlu0 %v2664_v52, %s2995_s29  ;;  %v1689_v20 = vsel %vm1685_vm5, %v1656_v43, %v3910_v54  ;;  %v1639_v59 = vsel %vm1619_vm3, %v1606_v21, %v4829_v44  ;;  %v2601_v54 = vld [vmem:[%s3070_s7 + $0x371] sm:$0xff]  ;;  %v2587_v44 = vld [vmem:[%s3070_s7 + $0x4e9] sm:$0xff] }
 0x1ad   : > { %v1722_v58 = vsel %vm1718_vm6, %v1689_v20, %v4045_v51  ;;  %v2633_v23 = vld [vmem:[%s3070_s7 + $0xf0] sm:$0xff] }
 0x1ae   : > { %v1527_v53 = vpop.permute.xlu1 %1526  ;;  %v1495_v61 = vpop.permute.xlu0 %1494  ;;  %v1755_v0 = vsel %vm1751_vm7, %v1722_v58, %v1241_v34  ;;  %v2712_v34 = vld [vmem:[%s3070_s7 + $0x211] sm:$0xff] }
 0x1af   : > { %v1836_v35 = vsel %vm1817_vm9, %v1803_v38, %v1527_v53  ;;  %v1820_v47 = vsel %vm1817_vm9, %v1787_v26, %v1495_v61 }
 0x1b0   : > { %1538 = vrot.lane.b32.xlu1 %v2711_v7, %s2996_s30  ;;  %1506 = vrot.lane.b32.xlu0 %v2695_v29, %s2996_s30  ;;  %v1672_v7 = vsel %vm1652_vm4, %v1639_v59, %v3764_v6  ;;  %v1788_v29 = vsel %vm1784_vm8, %v1755_v0, %v1369_v13  ;;  %v2571_v59 = vld [vmem:[%s3070_s7 + $0x3a9] sm:$0xff] }
 0x1b1   : > { %2806 = vmatprep.mubr.msk.f32.mxu0 %vm1882_vm10, %v1820_v47  ;;  %2830 = vmatprep.mubr.msk.f32.mxu1 %vm1882_vm10, %v1836_v35  ;;  %v1705_v38 = vsel %vm1685_vm5, %v1672_v7, %v4013_v63  ;;  %v2696_v63 = vld [vmem:[%s3070_s7 + $0xd1] sm:$0xff]  ;;  %v1706_v7 = vsel %vm1685_vm5, %v3787_v60, %v4069_v37 }
 0x1b2   : > { %v1115_v55 = vpop.permute.xlu1 %1114  ;;  %v4119_v52 = vpop.permute.xlu0 %1020  ;;  %v1738_v61 = vsel %vm1718_vm6, %v1705_v38, %v4052_v50 }
 0x1b3   : > { %v1771_v6 = vsel %vm1751_vm7, %v1738_v61, %v4063_v45  ;;  %v2618_v45 = vld [vmem:[%s3070_s7 + $0x4b9] sm:$0xff]  ;;  %v2682_v61 = vld [vmem:[%s3070_s7 + $0x249] sm:$0xff] }
 0x1b4   : > { %1032 = vrot.lane.b32.xlu1 %v2586_v48, %s2992_s22  ;;  %1000 = vrot.lane.b32.xlu0 %v2570_v49, %s2992_s22  ;;  %v1804_v13 = vsel %vm1784_vm8, %v1771_v6, %v1401_v62  ;;  %v2649_v62 = vld [vmem:[%s3070_s7 + $0x230] sm:$0xff]  ;;  %v2650_v49 = vld [vmem:[%s3070_s7 + $0x238] sm:$0xff] }
 0x1b6   : > { %v1497_v26 = vpop.permute.xlu1 %1496  ;;  %v1147_v51 = vpop.permute.xlu0 %1146 }
 0x1b7   : > { %v1821_v53 = vsel %vm1817_vm9, %v1788_v29, %v1497_v26  ;;  %v1739_v26 = vsel %vm1718_vm6, %v1706_v7, %v1147_v51  ;;  %v2651_v7 = vld [vmem:[%s3070_s7 + $0x258] sm:$0xff] }
 0x1b8   : > { %1158 = vrot.lane.b32.xlu1 %v2617_v19, %s2993_s23  ;;  %1126 = vrot.lane.b32.xlu0 %v2601_v54, %s2993_s23  ;;  %v1690_v54 = vsel %vm1685_vm5, %v3643_v24, %v3920_v10  ;;  %v2666_v24 = vld [vmem:[%s3070_s7 + $0x109] sm:$0xff] }
 0x1b9   : > { %2807 = vmatmul.mubr.msk.f32.gmra.mrb[2].mxu0 %vm1882_vm10, %v1821_v53  ;;  %v1723_v29 = vsel %vm1718_vm6, %v1690_v54, %v1115_v55 }
 0x1ba   : > { %v4151_v35 = vpop.permute.xlu1 %1116  ;;  %v1529_v47 = vpop.permute.xlu0 %1528 }
 0x1bb   : > { %v1837_v50 = vsel %vm1817_vm9, %v1804_v13, %v1529_v47 }
 0x1bc   : > { %1540 = vrot.lane.b32.xlu1 %v2712_v34, %s2996_s30  ;;  %1508 = vrot.lane.b32.xlu0 %v2696_v63, %s2996_s30  ;;  %v2713_v34 = vld [vmem:[%s3070_s7 + $0x231] sm:$0xff] }
 0x1bd   : > { %2831 = vmatmul.mubr.msk.f32.gmra.mrb[2].mxu1 %vm1882_vm10, %v1837_v50  ;;  %v2697_v63 = vld [vmem:[%s3070_s7 + $0xf1] sm:$0xff] }
 0x1be   : > { %v1243_v12 = vpop.permute.xlu1 %1242  ;;  %v1149_v40 = vpop.permute.xlu0 %1148  ;;  %v2588_v50 = vld [vmem:[%s3070_s7 + $0x4f1] sm:$0xff] }
 0x1bf   : > { %v1756_v38 = vsel %vm1751_vm7, %v1723_v29, %v1243_v12  ;;  %v2635_v29 = vld [vmem:[%s3070_s7 + $0x118] sm:$0xff] }
 0x1c0   : > { %1160 = vrot.lane.b32.xlu1 %v2618_v45, %s2993_s23  ;;  %1128 = vrot.lane.b32.xlu0 %v2602_v46, %s2993_s23  ;;  %v2572_v45 = vld [vmem:[%s3070_s7 + $0x3b1] sm:$0xff] }
 0x1c2   : > { %v1245_v8 = vpop.permute.xlu1 %1244  ;;  %v1275_v48 = vpop.permute.xlu0 %1274 }
 0x1c3   : > { %v1772_v53 = vsel %vm1751_vm7, %v1739_v26, %v1275_v48 }
 0x1c4   : > { %1286 = vrot.lane.b32.xlu1 %v2649_v62, %s2994_s24  ;;  %1254 = vrot.lane.b32.xlu0 %v2633_v23, %s2994_s24  ;;  %v1691_v62 = vsel %vm1685_vm5, %v3640_v11, %v3918_v1  ;;  %v1707_v23 = vsel %vm1685_vm5, %v3784_v25, %v4119_v52  ;;  %v2619_v11 = vld [vmem:[%s3070_s7 + $0x4d9] sm:$0xff] }
 0x1c5   : > { %v1724_v48 = vsel %vm1718_vm6, %v1691_v62, %v4151_v35  ;;  %v2603_v1 = vld [vmem:[%s3070_s7 + $0x399] sm:$0xff] }
 0x1c6   : > { %v1371_v43 = vpop.permute.xlu1 %1370  ;;  %v1277_v20 = vpop.permute.xlu0 %1276 }
 0x1c7   : > { %v1789_v10 = vsel %vm1784_vm8, %v1756_v38, %v1371_v43 }
 0x1c8   : > { %1288 = vrot.lane.b32.xlu1 %v2650_v49, %s2994_s24  ;;  %1256 = vrot.lane.b32.xlu0 %v2634_v56, %s2994_s24  ;;  %v1740_v49 = vsel %vm1718_vm6, %v1707_v23, %v1149_v40  ;;  %v1757_v56 = vsel %vm1751_vm7, %v1724_v48, %v1245_v8  ;;  %v2714_v8 = vld [vmem:[%s3070_s7 + $0x239] sm:$0xff] }
 0x1c9   : > { %v1773_v43 = vsel %vm1751_vm7, %v1740_v49, %v1277_v20  ;;  %v2698_v20 = vld [vmem:[%s3070_s7 + $0xf9] sm:$0xff] }
 0x1ca   : > { %v4171_v21 = vpop.permute.xlu1 %1022  ;;  %v1403_v58 = vpop.permute.xlu0 %1402 }
 0x1cb   : > { %v1805_v60 = vsel %vm1784_vm8, %v1772_v53, %v1403_v58  ;;  %v2652_v53 = vld [vmem:[%s3070_s7 + $0x260] sm:$0xff]  ;;  %v1708_v62 = vsel %vm1685_vm5, %v3811_v9, %v4171_v21 }
 0x1cc   : > { %1414 = vrot.lane.b32.xlu1 %v2681_v30, %s2995_s29  ;;  %1382 = vrot.lane.b32.xlu0 %v2665_v33, %s2995_s29 }
 0x1ce   : > { %v1405_v0 = vpop.permute.xlu1 %1404  ;;  %v1373_v19 = vpop.permute.xlu0 %1372 }
 0x1cf   : > { %v1806_v30 = vsel %vm1784_vm8, %v1773_v43, %v1405_v0  ;;  %v1790_v25 = vsel %vm1784_vm8, %v1757_v56, %v1373_v19  ;;  %v2604_v0 = vld [vmem:[%s3070_s7 + $0x3a1] sm:$0xff]  ;;  %v2684_v43 = vld [vmem:[%s3070_s7 + $0x271] sm:$0xff] }
 0x1d0   : > { %1034 = vrot.lane.b32.xlu1 %v2587_v44, %s2992_s22  ;;  %1002 = vrot.lane.b32.xlu0 %v2571_v59, %s2992_s22  ;;  %v2620_v59 = vld [vmem:[%s3070_s7 + $0x4e1] sm:$0xff] }
 0x1d2   : > { %v1531_v37 = vpop.permute.xlu1 %1530  ;;  %v1499_v55 = vpop.permute.xlu0 %1498 }
 0x1d3   : > { %v1838_v51 = vsel %vm1817_vm9, %v1805_v60, %v1531_v37  ;;  %v1822_v6 = vsel %vm1817_vm9, %v1789_v10, %v1499_v55  ;;  %v2683_v60 = vld [vmem:[%s3070_s7 + $0x269] sm:$0xff] }
 0x1d4   : > { %1416 = vrot.lane.b32.xlu1 %v2682_v61, %s2995_s29  ;;  %1384 = vrot.lane.b32.xlu0 %v2666_v24, %s2995_s29  ;;  %v2636_v61 = vld [vmem:[%s3070_s7 + $0x120] sm:$0xff]  ;;  %v2667_v37 = vld [vmem:[%s3070_s7 + $0x129] sm:$0xff] }
 0x1d5   : > { %2809 = vmatprep.mubr.msk.f32.mxu0 %vm1882_vm10, %v1822_v6  ;;  %2833 = vmatprep.mubr.msk.f32.mxu1 %vm1882_vm10, %v1838_v51  ;;  %v2589_v6 = vld [vmem:[%s3070_s7 + $0x511] sm:$0xff] }
 0x1d6   : > { %v4201_v13 = vpop.permute.xlu1 %1024  ;;  %v4203_v47 = vpop.permute.xlu0 %992 }
 0x1d8   : > { %1542 = vrot.lane.b32.xlu1 %v2713_v34, %s2996_s30  ;;  %1510 = vrot.lane.b32.xlu0 %v2697_v63, %s2996_s30  ;;  %v2573_v34 = vld [vmem:[%s3070_s7 + $0x3d1] sm:$0xff] }
 0x1da   : > { %v1151_v46 = vpop.permute.xlu1 %1150  ;;  %v1119_v12 = vpop.permute.xlu0 %1118 }
 0x1db   : > { %v1741_v23 = vsel %vm1718_vm6, %v1708_v62, %v1151_v46  ;;  %v2654_v62 = vld [vmem:[%s3070_s7 + $0x288] sm:$0xff] }
 0x1dc   : > { %1036 = vrot.lane.b32.xlu1 %v2588_v50, %s2992_s22  ;;  %1004 = vrot.lane.b32.xlu0 %v2572_v45, %s2992_s22  ;;  %v1692_v45 = vsel %vm1685_vm5, %v3670_v15, %v3924_v2  ;;  %v2668_v15 = vld [vmem:[%s3070_s7 + $0x131] sm:$0xff] }
 0x1dd   : > { %v1725_v48 = vsel %vm1718_vm6, %v1692_v45, %v1119_v12 }
 0x1de   : > { %v1533_v52 = vpop.permute.xlu1 %1532  ;;  %v1501_v35 = vpop.permute.xlu0 %1500 }
 0x1df   : > { %v1839_v40 = vsel %vm1817_vm9, %v1806_v30, %v1533_v52  ;;  %v1823_v33 = vsel %vm1817_vm9, %v1790_v25, %v1501_v35  ;;  %v2699_v30 = vld [vmem:[%s3070_s7 + $0x119] sm:$0xff] }
 0x1e0   : > { %1162 = vrot.lane.b32.xlu1 %v2619_v11, %s2993_s23  ;;  %1130 = vrot.lane.b32.xlu0 %v2603_v1, %s2993_s23  ;;  %v2715_v1 = vld [vmem:[%s3070_s7 + $0x259] sm:$0xff] }
 0x1e1   : > { %2810 = vmatmul.mubr.msk.f32.gmra.mrb[4].mxu0 %vm1882_vm10, %v1823_v33  ;;  %2834 = vmatmul.mubr.msk.f32.gmra.mrb[4].mxu1 %vm1882_vm10, %v1839_v40  ;;  %v2590_v35 = vld [vmem:[%s3070_s7 + $0x519] sm:$0xff] }
 0x1e2   : > { %v4234_v58 = vpop.permute.xlu1 %1152  ;;  %v4236_v44 = vpop.permute.xlu0 %1120  ;;  %v2574_v40 = vld [vmem:[%s3070_s7 + $0x3d9] sm:$0xff] }
 0x1e4   : > { %1544 = vrot.lane.b32.xlu1 %v2714_v8, %s2996_s30  ;;  %1512 = vrot.lane.b32.xlu0 %v2698_v20, %s2996_s30  ;;  %v1709_v20 = vsel %vm1685_vm5, %v3808_v27, %v4201_v13  ;;  %v2621_v13 = vld [vmem:[%s3070_s7 + $0x501] sm:$0xff] }
 0x1e6   : > { %v1279_v19 = vpop.permute.xlu1 %1278  ;;  %v1247_v54 = vpop.permute.xlu0 %1246 }
 0x1e7   : > { %v1774_v49 = vsel %vm1751_vm7, %v1741_v23, %v1279_v19  ;;  %v1758_v56 = vsel %vm1751_vm7, %v1725_v48, %v1247_v54  ;;  %v2638_v23 = vld [vmem:[%s3070_s7 + $0x148] sm:$0xff] }
 0x1e8   : > { %1164 = vrot.lane.b32.xlu1 %v2620_v59, %s2993_s23  ;;  %1132 = vrot.lane.b32.xlu0 %v2604_v0, %s2993_s23  ;;  %v1693_v59 = vsel %vm1685_vm5, %v3667_v14, %v4203_v47  ;;  %v1742_v0 = vsel %vm1718_vm6, %v1709_v20, %v4234_v58 }
 0x1e9   : > { %v1726_v19 = vsel %vm1718_vm6, %v1693_v59, %v4236_v44  ;;  %v2717_v59 = vld [vmem:[%s3070_s7 + $0x281] sm:$0xff] }
 0x1ea   : > { %v1281_v26 = vpop.permute.xlu1 %1280  ;;  %v1249_v38 = vpop.permute.xlu0 %1248 }
 0x1eb   : > { %v1775_v54 = vsel %vm1751_vm7, %v1742_v0, %v1281_v26  ;;  %v1759_v27 = vsel %vm1751_vm7, %v1726_v19, %v1249_v38  ;;  %v2716_v26 = vld [vmem:[%s3070_s7 + $0x261] sm:$0xff]  ;;  %v2718_v19 = vld [vmem:[%s3070_s7 + $0x289] sm:$0xff] }
 0x1ec   : > { %1290 = vrot.lane.b32.xlu1 %v2651_v7, %s2994_s24  ;;  %1258 = vrot.lane.b32.xlu0 %v2635_v29, %s2994_s24  ;;  %v2605_v7 = vld [vmem:[%s3070_s7 + $0x3c1] sm:$0xff] }
 0x1ed   : > { %v2700_v38 = vld [vmem:[%s3070_s7 + $0x121] sm:$0xff] }
 0x1ee   : > { %v1407_v24 = vpop.permute.xlu1 %1406  ;;  %v1375_v10 = vpop.permute.xlu0 %1374 }
 0x1ef   : > { %v1807_v2 = vsel %vm1784_vm8, %v1774_v49, %v1407_v24  ;;  %v1791_v9 = vsel %vm1784_vm8, %v1758_v56, %v1375_v10  ;;  %v2622_v10 = vld [vmem:[%s3070_s7 + $0x509] sm:$0xff]  ;;  %v2685_v56 = vld [vmem:[%s3070_s7 + $0x291] sm:$0xff] }
 0x1f0   : > { %1292 = vrot.lane.b32.xlu1 %v2652_v53, %s2994_s24  ;;  %1260 = vrot.lane.b32.xlu0 %v2636_v61, %s2994_s24 }
 0x1f2   : > { %v4254_v55 = vpop.permute.xlu1 %1026  ;;  %v4256_v51 = vpop.permute.xlu0 %994 }
 0x1f4   : > { %1418 = vrot.lane.b32.xlu1 %v2683_v60, %s2995_s29  ;;  %1386 = vrot.lane.b32.xlu0 %v2667_v37, %s2995_s29  ;;  %v2606_v60 = vld [vmem:[%s3070_s7 + $0x3c9] sm:$0xff] }
 0x1f6   : > { %v1409_v63 = vpop.permute.xlu1 %1408  ;;  %v1377_v50 = vpop.permute.xlu0 %1376 }
 0x1f7   : > { %v1808_v14 = vsel %vm1784_vm8, %v1775_v54, %v1409_v63  ;;  %v1792_v47 = vsel %vm1784_vm8, %v1759_v27, %v1377_v50  ;;  %v2637_v63 = vld [vmem:[%s3070_s7 + $0x140] sm:$0xff]  ;;  %v2702_v54 = vld [vmem:[%s3070_s7 + $0x149] sm:$0xff] }
 0x1f8   : > { %1038 = vrot.lane.b32.xlu1 %v2589_v6, %s2992_s22  ;;  %1006 = vrot.lane.b32.xlu0 %v2573_v34, %s2992_s22  ;;  %v2653_v34 = vld [vmem:[%s3070_s7 + $0x280] sm:$0xff] }
 0x1fa   : > { %v1535_v21 = vpop.permute.xlu1 %1534  ;;  %v1503_v46 = vpop.permute.xlu0 %1502 }
 0x1fb   : > { %v1840_v12 = vsel %vm1817_vm9, %v1807_v2, %v1535_v21  ;;  %v1824_v11 = vsel %vm1817_vm9, %v1791_v9, %v1503_v46  ;;  %v2686_v9 = vld [vmem:[%s3070_s7 + $0x299] sm:$0xff] }
 0x1fc   : > { %1420 = vrot.lane.b32.xlu1 %v2684_v43, %s2995_s29  ;;  %1388 = vrot.lane.b32.xlu0 %v2668_v15, %s2995_s29  ;;  %v2669_v43 = vld [vmem:[%s3070_s7 + $0x151] sm:$0xff]  ;;  %v2670_v21 = vld [vmem:[%s3070_s7 + $0x159] sm:$0xff] }
 0x1fd   : > { %2812 = vmatprep.mubr.msk.f32.mxu0 %vm1882_vm10, %v1824_v11  ;;  %2836 = vmatprep.mubr.msk.f32.mxu1 %vm1882_vm10, %v1840_v12  ;;  %v1710_v11 = vsel %vm1685_vm5, %v3836_v17, %v4254_v55  ;;  %v2701_v17 = vld [vmem:[%s3070_s7 + $0x141] sm:$0xff] }
 0x1fe   : > { %v4286_v25 = vpop.permute.xlu1 %1028  ;;  %v4288_v52 = vpop.permute.xlu0 %996 }
 0x200   : > { %1546 = vrot.lane.b32.xlu1 %v2715_v1, %s2996_s30  ;;  %1514 = vrot.lane.b32.xlu0 %v2699_v30, %s2996_s30  ;;  %v1694_v1 = vsel %vm1685_vm5, %v3692_v18, %v4256_v51 }
 0x202   : > { %v1155_v33 = vpop.permute.xlu1 %1154  ;;  %v1123_v8 = vpop.permute.xlu0 %1122 }
 0x203   : > { %v1743_v30 = vsel %vm1718_vm6, %v1710_v11, %v1155_v33 }
 0x204   : > { %1040 = vrot.lane.b32.xlu1 %v2590_v35, %s2992_s22  ;;  %1008 = vrot.lane.b32.xlu0 %v2574_v40, %s2992_s22  ;;  %v1727_v35 = vsel %vm1718_vm6, %v1694_v1, %v1123_v8 }
 0x206   : > { %v1537_v58 = vpop.permute.xlu1 %1536  ;;  %v1505_v44 = vpop.permute.xlu0 %1504 }
 0x207   : > { %v1841_v29 = vsel %vm1817_vm9, %v1808_v14, %v1537_v58  ;;  %v1825_v53 = vsel %vm1817_vm9, %v1792_v47, %v1505_v44  ;;  %v1711_v47 = vsel %vm1685_vm5, %v3833_v42, %v4286_v25  ;;  %v1695_v58 = vsel %vm1685_vm5, %v3689_v36, %v4288_v52 }
 0x208   : > { %1166 = vrot.lane.b32.xlu1 %v2621_v13, %s2993_s23  ;;  %1134 = vrot.lane.b32.xlu0 %v2605_v7, %s2993_s23 }
 0x209   : > { %2813 = vmatmul.mubr.msk.f32.gmra.mrb[6].mxu0 %vm1882_vm10, %v1825_v53  ;;  %2837 = vmatmul.mubr.msk.f32.gmra.mrb[6].mxu1 %vm1882_vm10, %v1841_v29 }
 0x20a   : > { %v4320_v61 = vpop.permute.xlu1 %1156  ;;  %v4322_v24 = vpop.permute.xlu0 %1124 }
 0x20b   : > { %v1744_v44 = vsel %vm1718_vm6, %v1711_v47, %v4320_v61  ;;  %v1728_v29 = vsel %vm1718_vm6, %v1695_v58, %v4322_v24 }
 0x20c   : > { %1548 = vrot.lane.b32.xlu1 %v2716_v26, %s2996_s30  ;;  %1516 = vrot.lane.b32.xlu0 %v2700_v38, %s2996_s30 }
 0x20e   : > { %v1283_v37 = vpop.permute.xlu1 %1282  ;;  %v1251_v6 = vpop.permute.xlu0 %1250 }
 0x20f   : > { %v1776_v40 = vsel %vm1751_vm7, %v1743_v30, %v1283_v37  ;;  %v1760_v20 = vsel %vm1751_vm7, %v1727_v35, %v1251_v6 }
 0x210   : > { %1168 = vrot.lane.b32.xlu1 %v2622_v10, %s2993_s23  ;;  %1136 = vrot.lane.b32.xlu0 %v2606_v60, %s2993_s23 }
 0x212   : > { %v1285_v50 = vpop.permute.xlu1 %1284  ;;  %v1253_v45 = vpop.permute.xlu0 %1252 }
 0x213   : > { %v1777_v53 = vsel %vm1751_vm7, %v1744_v44, %v1285_v50  ;;  %v1761_v26 = vsel %vm1751_vm7, %v1728_v29, %v1253_v45  ;;  %v1851_v29 = vld [vmem:[%s3075_s10 + $0x8] sm:$0xff] }
 0x214   : > { %1294 = vrot.lane.b32.xlu1 %v2653_v34, %s2994_s24  ;;  %1262 = vrot.lane.b32.xlu0 %v2637_v63, %s2994_s24 }
 0x216   : > { %v1411_v48 = vpop.permute.xlu1 %1410  ;;  %v1379_v49 = vpop.permute.xlu0 %1378 }
 0x217   : > { %v1809_v55 = vsel %vm1784_vm8, %v1776_v40, %v1411_v48  ;;  %v1793_v18 = vsel %vm1784_vm8, %v1760_v20, %v1379_v49 }
 0x218   : > { %1296 = vrot.lane.b32.xlu1 %v2654_v62, %s2994_s24  ;;  %1264 = vrot.lane.b32.xlu0 %v2638_v23, %s2994_s24 }
 0x21a   : > { %v4340_v15 = vpop.permute.xlu1 %1030  ;;  %v4342_v2 = vpop.permute.xlu0 %998 }
 0x21b   : > { %v1712_v49 = vsel %vm1685_vm5, %v3857_v31, %v4340_v15 }
 0x21c   : > { %1422 = vrot.lane.b32.xlu1 %v2685_v56, %s2995_s29  ;;  %1390 = vrot.lane.b32.xlu0 %v2669_v43, %s2995_s29  ;;  %v1696_v56 = vsel %vm1685_vm5, %v3712_v28, %v4342_v2 }
 0x21e   : > { %v1413_v46 = vpop.permute.xlu1 %1412  ;;  %v1381_v12 = vpop.permute.xlu0 %1380 }
 0x21f   : > { %v1810_v38 = vsel %vm1784_vm8, %v1777_v53, %v1413_v46  ;;  %v1794_v10 = vsel %vm1784_vm8, %v1761_v26, %v1381_v12  ;;  %v1850_v53 = vld [vmem:[%s3075_s10] sm:$0xff] }
 0x220   : > { %1424 = vrot.lane.b32.xlu1 %v2686_v9, %s2995_s29  ;;  %1392 = vrot.lane.b32.xlu0 %v2670_v21, %s2995_s29 }
 0x222   : > { %v1539_v51 = vpop.permute.xlu1 %1538  ;;  %v1507_v33 = vpop.permute.xlu0 %1506 }
 0x223   : > { %v1842_v8 = vsel %vm1817_vm9, %v1809_v55, %v1539_v51  ;;  %v1826_v0 = vsel %vm1817_vm9, %v1793_v18, %v1507_v33 }
 0x224   : > { %1550 = vrot.lane.b32.xlu1 %v2717_v59, %s2996_s30  ;;  %1518 = vrot.lane.b32.xlu0 %v2701_v17, %s2996_s30 }
 0x225   : > { %2815 = vmatprep.mubr.msk.f32.mxu0 %vm1882_vm10, %v1826_v0  ;;  %2839 = vmatprep.mubr.msk.f32.mxu1 %vm1882_vm10, %v1842_v8 }
 0x226   : > { %v1033_v27 = vpop.permute.xlu1 %1032  ;;  %v1001_v13 = vpop.permute.xlu0 %1000 }
 0x227   : > { %v1713_v20 = vsel %vm1685_vm5, %v3854_v4, %v1033_v27  ;;  %v1697_v59 = vsel %vm1685_vm5, %v3709_v3, %v1001_v13 }
 0x228   : > { %1552 = vrot.lane.b32.xlu1 %v2718_v19, %s2996_s30  ;;  %1520 = vrot.lane.b32.xlu0 %v2702_v54, %s2996_s30 }
 0x22a   : > { %v1159_v7 = vpop.permute.xlu1 %1158  ;;  %v1127_v14 = vpop.permute.xlu0 %1126 }
 0x22b   : > { %v1745_v43 = vsel %vm1718_vm6, %v1712_v49, %v1159_v7  ;;  %v1729_v9 = vsel %vm1718_vm6, %v1696_v56, %v1127_v14 }
 0x22e   : > { %v1541_v60 = vpop.permute.xlu1 %1540  ;;  %v1509_v42 = vpop.permute.xlu0 %1508 }
 0x22f   : > { %v1843_v25 = vsel %vm1817_vm9, %v1810_v38, %v1541_v60  ;;  %v1827_v36 = vsel %vm1817_vm9, %v1794_v10, %v1509_v42 }
 0x230   : > { %2816 = vmatmul.mubr.msk.f32.gmra.mrb[8].mxu0 %vm1882_vm10, %v1827_v36  ;;  %2840 = vmatmul.mubr.msk.f32.gmra.mrb[8].mxu1 %vm1882_vm10, %v1843_v25  ;;  %v1867_v36 = vld [vmem:[%s3075_s10 + $0x88] sm:$0xff] }
 0x232   : > { %v1161_v52 = vpop.permute.xlu1 %1160  ;;  %v1129_v61 = vpop.permute.xlu0 %1128 }
 0x233   : > { %v1746_v17 = vsel %vm1718_vm6, %v1713_v20, %v1161_v52  ;;  %v1730_v55 = vsel %vm1718_vm6, %v1697_v59, %v1129_v61  ;;  %v1866_v52 = vld [vmem:[%s3075_s10 + $0x80] sm:$0xff] }
 0x236   : > { %v1287_v24 = vpop.permute.xlu1 %1286  ;;  %v1255_v37 = vpop.permute.xlu0 %1254 }
 0x237   : > { %v1778_v21 = vsel %vm1751_vm7, %v1745_v43, %v1287_v24  ;;  %v1762_v46 = vsel %vm1751_vm7, %v1729_v9, %v1255_v37 }
 0x23a   : > { %v1289_v6 = vpop.permute.xlu1 %1288  ;;  %v1257_v34 = vpop.permute.xlu0 %1256 }
 0x23b   : > { %v1779_v18 = vsel %vm1751_vm7, %v1746_v17, %v1289_v6  ;;  %v1763_v51 = vsel %vm1751_vm7, %v1730_v55, %v1257_v34 }
 0x23e   : > { %v1415_v63 = vpop.permute.xlu1 %1414  ;;  %v1383_v50 = vpop.permute.xlu0 %1382 }
 0x23f   : > { %v1811_v12 = vsel %vm1784_vm8, %v1778_v21, %v1415_v63  ;;  %v1795_v11 = vsel %vm1784_vm8, %v1762_v46, %v1383_v50 }
 0x242   : > { %v4392_v45 = vpop.permute.xlu1 %1034  ;;  %v4394_v62 = vpop.permute.xlu0 %1002 }
 0x243   : > { %v1714_v50 = vsel %vm1685_vm5, %v3877_v41, %v4392_v45 }
 0x246   : > { %v1417_v23 = vpop.permute.xlu1 %1416  ;;  %v1385_v48 = vpop.permute.xlu0 %1384 }
 0x247   : > { %v1812_v33 = vsel %vm1784_vm8, %v1779_v18, %v1417_v23  ;;  %v1796_v8 = vsel %vm1784_vm8, %v1763_v51, %v1385_v48  ;;  %v1698_v23 = vsel %vm1685_vm5, %v3731_v32, %v4394_v62 }
 0x24a   : > { %v1543_v1 = vpop.permute.xlu1 %1542  ;;  %v1511_v30 = vpop.permute.xlu0 %1510 }
 0x24b   : > { %v1844_v31 = vsel %vm1817_vm9, %v1811_v12, %v1543_v1  ;;  %v1828_v15 = vsel %vm1817_vm9, %v1795_v11, %v1511_v30 }
 0x24c   : > { %2818 = vmatprep.mubr.msk.f32.mxu0 %vm1882_vm10, %v1828_v15  ;;  %2842 = vmatprep.mubr.msk.f32.mxu1 %vm1882_vm10, %v1844_v31 }
 0x24e   : > { %v4412_v28 = vpop.permute.xlu1 %1036  ;;  %v4414_v2 = vpop.permute.xlu0 %1004 }
 0x24f   : > { %v1715_v30 = vsel %vm1685_vm5, %v3874_v16, %v4412_v28  ;;  %v1699_v31 = vsel %vm1685_vm5, %v3728_v22, %v4414_v2 }
 0x252   : > { %v1163_v35 = vpop.permute.xlu1 %1162  ;;  %v1131_v40 = vpop.permute.xlu0 %1130 }
 0x253   : > { %v1747_v48 = vsel %vm1718_vm6, %v1714_v50, %v1163_v35  ;;  %v1731_v49 = vsel %vm1718_vm6, %v1698_v23, %v1131_v40 }
 0x256   : > { %v1545_v0 = vpop.permute.xlu1 %1544  ;;  %v1513_v19 = vpop.permute.xlu0 %1512 }
 0x257   : > { %v1845_v4 = vsel %vm1817_vm9, %v1812_v33, %v1545_v0  ;;  %v1829_v3 = vsel %vm1817_vm9, %v1796_v8, %v1513_v19  ;;  %v1853_v19 = vld [vmem:[%s3075_s10 + $0x18] sm:$0xff] }
 0x258   : > { %2819 = vmatmul.mubr.msk.f32.gmra.mrb[10].mxu0 %vm1882_vm10, %v1829_v3  ;;  %2843 = vmatmul.mubr.msk.f32.gmra.mrb[10].mxu1 %vm1882_vm10, %v1845_v4  ;;  %v1852_v4 = vld [vmem:[%s3075_s10 + $0x10] sm:$0xff] }
 0x25a   : > { %v1165_v54 = vpop.permute.xlu1 %1164  ;;  %v1133_v27 = vpop.permute.xlu0 %1132 }
 0x25b   : > { %v1748_v15 = vsel %vm1718_vm6, %v1715_v30, %v1165_v54  ;;  %v1732_v35 = vsel %vm1718_vm6, %v1699_v31, %v1133_v27 }
 0x25e   : > { %v1291_v13 = vpop.permute.xlu1 %1290  ;;  %v1259_v7 = vpop.permute.xlu0 %1258 }
 0x25f   : > { %v1780_v56 = vsel %vm1751_vm7, %v1747_v48, %v1291_v13  ;;  %v1764_v43 = vsel %vm1751_vm7, %v1731_v49, %v1259_v7 }
 0x262   : > { %v1293_v14 = vpop.permute.xlu1 %1292  ;;  %v1261_v47 = vpop.permute.xlu0 %1260 }
 0x263   : > { %v1781_v40 = vsel %vm1751_vm7, %v1748_v15, %v1293_v14  ;;  %v1765_v20 = vsel %vm1751_vm7, %v1732_v35, %v1261_v47  ;;  %v1869_v47 = vld [vmem:[%s3075_s10 + $0x98] sm:$0xff] }
 0x266   : > { %v1419_v58 = vpop.permute.xlu1 %1418  ;;  %v1387_v44 = vpop.permute.xlu0 %1386 }
 0x267   : > { %v1813_v9 = vsel %vm1784_vm8, %v1780_v56, %v1419_v58  ;;  %v1797_v41 = vsel %vm1784_vm8, %v1764_v43, %v1387_v44  ;;  %v1868_v58 = vld [vmem:[%s3075_s10 + $0x90] sm:$0xff] }
 0x268   : > { %v2805_v26 = vpop.f32.mrb[0].mxu0 }
 0x269   : > { %v2209_v38 = vadd.f32 %v2805_v26, %v1851_v29  ;;  %v2049_v10 = vpop.f32.mrb[1].mxu0 }
 0x26a   : > { %v2208_v60 = vadd.f32 %v2049_v10, %v1850_v53  ;;  %v4432_v42 = vpop.permute.xlu1 %1038  ;;  %v4434_v25 = vpop.permute.xlu0 %1006 }
 0x26b   : > { %2241 = vst.msk [vmem:[%s3075_s10 + $0x8] sm:$0xff] %vm1619_vm3, %v2209_v38 }
 0x26c   : > { %2240 = vst.msk [vmem:[%s3075_s10] sm:$0xff] %vm1619_vm3, %v2208_v60  ;;  %v2829_v61 = vpop.f32.mrb[0].mxu1  ;;  %v1716_v60 = vsel %vm1685_vm5, %v3895_v57, %v4432_v42 }
 0x26d   : > { %v2225_v24 = vadd.f32 %v2829_v61, %v1867_v36  ;;  %v2129_v37 = vpop.f32.mrb[1].mxu1  ;;  %v1700_v36 = vsel %vm1685_vm5, %v3749_v5, %v4434_v25  ;;  %v4830_v25 = vld [vmem:[#allocation36_spill] sm:$0xff] }
 0x26e   : > { %v2224_v6 = vadd.f32 %v2129_v37, %v1866_v52  ;;  %v1421_v34 = vpop.permute.xlu1 %1420  ;;  %v1389_v63 = vpop.permute.xlu0 %1388 }
 0x26f   : > { %2257 = vst.msk [vmem:[%s3075_s10 + $0x88] sm:$0xff] %vm1619_vm3, %v2225_v24  ;;  %v1814_v59 = vsel %vm1784_vm8, %v1781_v40, %v1421_v34  ;;  %v1798_v17 = vsel %vm1784_vm8, %v1765_v20, %v1389_v63 }
 0x270   : > { %2256 = vst.msk [vmem:[%s3075_s10 + $0x80] sm:$0xff] %vm1619_vm3, %v2224_v6 }
 0x272   : > { %v1547_v45 = vpop.permute.xlu1 %1546  ;;  %v1515_v21 = vpop.permute.xlu0 %1514 }
 0x273   : > { %v1846_v32 = vsel %vm1817_vm9, %v1813_v9, %v1547_v45  ;;  %v1830_v62 = vsel %vm1817_vm9, %v1797_v41, %v1515_v21 }
 0x274   : > { %2821 = vmatprep.mubr.msk.f32.mxu0 %vm1882_vm10, %v1830_v62  ;;  %2845 = vmatprep.mubr.msk.f32.mxu1 %vm1882_vm10, %v1846_v32  ;;  %v1855_v62 = vld [vmem:[%s3075_s10 + $0x28] sm:$0xff] }
 0x276   : > { %v1041_v46 = vpop.permute.xlu1 %1040  ;;  %v1009_v12 = vpop.permute.xlu0 %1008 }
 0x277   : > { %v1717_v5 = vsel %vm1685_vm5, %v3892_v39, %v1041_v46  ;;  %v1701_v63 = vsel %vm1685_vm5, %v4830_v25, %v1009_v12  ;;  %v1871_v46 = vld [vmem:[%s3075_s10 + $0xa8] sm:$0xff]  ;;  %v1854_v12 = vld [vmem:[%s3075_s10 + $0x20] sm:$0xff] }
 0x278   : > { %v1862_v25 = vld [vmem:[%s3075_s10 + $0x60] sm:$0xff] }
 0x27a   : > { %v1167_v11 = vpop.permute.xlu1 %1166  ;;  %v1135_v1 = vpop.permute.xlu0 %1134 }
 0x27b   : > { %v1749_v52 = vsel %vm1718_vm6, %v1716_v60, %v1167_v11  ;;  %v1733_v61 = vsel %vm1718_vm6, %v1700_v36, %v1135_v1  ;;  %v1870_v11 = vld [vmem:[%s3075_s10 + $0xa0] sm:$0xff]  ;;  %v1876_v60 = vld [vmem:[%s3075_s10 + $0xd0] sm:$0xff] }
 0x27e   : > { %v1549_v55 = vpop.permute.xlu1 %1548  ;;  %v1517_v16 = vpop.permute.xlu0 %1516 }
 0x27f   : > { %v1847_v28 = vsel %vm1817_vm9, %v1814_v59, %v1549_v55  ;;  %v1831_v22 = vsel %vm1817_vm9, %v1798_v17, %v1517_v16  ;;  %v1857_v17 = vld [vmem:[%s3075_s10 + $0x38] sm:$0xff]  ;;  %v1856_v16 = vld [vmem:[%s3075_s10 + $0x30] sm:$0xff] }
 0x280   : > { %2822 = vmatmul.mubr.msk.f32.gmra.mrb[12].mxu0 %vm1882_vm10, %v1831_v22  ;;  %2846 = vmatmul.mubr.msk.f32.gmra.mrb[12].mxu1 %vm1882_vm10, %v1847_v28  ;;  %v1873_v55 = vld [vmem:[%s3075_s10 + $0xb8] sm:$0xff]  ;;  %v1872_v28 = vld [vmem:[%s3075_s10 + $0xb0] sm:$0xff] }
 0x282   : > { %v1169_v2 = vpop.permute.xlu1 %1168  ;;  %v1137_v18 = vpop.permute.xlu0 %1136 }
 0x283   : > { %v1750_v48 = vsel %vm1718_vm6, %v1717_v5, %v1169_v2  ;;  %v1734_v49 = vsel %vm1718_vm6, %v1701_v63, %v1137_v18  ;;  %v1879_v5 = vld [vmem:[%s3075_s10 + $0xe8] sm:$0xff]  ;;  %v1878_v63 = vld [vmem:[%s3075_s10 + $0xe0] sm:$0xff] }
 0x286   : > { %v1295_v51 = vpop.permute.xlu1 %1294  ;;  %v1263_v33 = vpop.permute.xlu0 %1262 }
 0x287   : > { %v1782_v24 = vsel %vm1751_vm7, %v1749_v52, %v1295_v51  ;;  %v1766_v37 = vsel %vm1751_vm7, %v1733_v61, %v1263_v33 }
 0x28a   : > { %v1297_v8 = vpop.permute.xlu1 %1296  ;;  %v1265_v0 = vpop.permute.xlu0 %1264 }
 0x28b   : > { %v1783_v39 = vsel %vm1751_vm7, %v1750_v48, %v1297_v8  ;;  %v1767_v56 = vsel %vm1751_vm7, %v1734_v49, %v1265_v0 }
 0x28c   : > { %v2808_v3 = vpop.f32.mrb[2].mxu0 }
 0x28d   : > { %v2211_v54 = vadd.f32 %v2808_v3, %v1853_v19  ;;  %v2059_v27 = vpop.f32.mrb[3].mxu0  ;;  %v1875_v3 = vld [vmem:[%s3075_s10 + $0xc8] sm:$0xff] }
 0x28e   : > { %v2210_v13 = vadd.f32 %v2059_v27, %v1852_v4  ;;  %v1423_v7 = vpop.permute.xlu1 %1422  ;;  %v1391_v14 = vpop.permute.xlu0 %1390  ;;  %v1859_v4 = vld [vmem:[%s3075_s10 + $0x48] sm:$0xff]  ;;  %v1874_v27 = vld [vmem:[%s3075_s10 + $0xc0] sm:$0xff] }
 0x28f   : > { %2243 = vst.msk [vmem:[%s3075_s10 + $0x18] sm:$0xff] %vm1619_vm3, %v2211_v54  ;;  %v1815_v6 = vsel %vm1784_vm8, %v1782_v24, %v1423_v7  ;;  %v1799_v57 = vsel %vm1784_vm8, %v1766_v37, %v1391_v14  ;;  %v1858_v54 = vld [vmem:[%s3075_s10 + $0x40] sm:$0xff] }
 0x290   : > { %2242 = vst.msk [vmem:[%s3075_s10 + $0x10] sm:$0xff] %vm1619_vm3, %v2210_v13  ;;  %v2832_v44 = vpop.f32.mrb[2].mxu1 }
 0x291   : > { %v2227_v29 = vadd.f32 %v2832_v44, %v1869_v47  ;;  %v2139_v53 = vpop.f32.mrb[3].mxu1 }
 0x292   : > { %v2226_v26 = vadd.f32 %v2139_v53, %v1868_v58  ;;  %v1425_v38 = vpop.permute.xlu1 %1424  ;;  %v1393_v10 = vpop.permute.xlu0 %1392 }
 0x293   : > { %2259 = vst.msk [vmem:[%s3075_s10 + $0x98] sm:$0xff] %vm1619_vm3, %v2227_v29  ;;  %v1816_v43 = vsel %vm1784_vm8, %v1783_v39, %v1425_v38  ;;  %v1800_v9 = vsel %vm1784_vm8, %v1767_v56, %v1393_v10  ;;  %v1877_v38 = vld [vmem:[%s3075_s10 + $0xd8] sm:$0xff]  ;;  %v1860_v10 = vld [vmem:[%s3075_s10 + $0x50] sm:$0xff] }
 0x294   : > { %2258 = vst.msk [vmem:[%s3075_s10 + $0x90] sm:$0xff] %vm1619_vm3, %v2226_v26  ;;  %v1861_v26 = vld [vmem:[%s3075_s10 + $0x58] sm:$0xff] }
 0x296   : > { %v1551_v42 = vpop.permute.xlu1 %1550  ;;  %v1519_v34 = vpop.permute.xlu0 %1518 }
 0x297   : > { %v1848_v50 = vsel %vm1817_vm9, %v1815_v6, %v1551_v42  ;;  %v1832_v23 = vsel %vm1817_vm9, %v1799_v57, %v1519_v34  ;;  %v1863_v34 = vld [vmem:[%s3075_s10 + $0x68] sm:$0xff] }
 0x298   : > { %2824 = vmatprep.mubr.msk.f32.mxu0 %vm1882_vm10, %v1832_v23  ;;  %2848 = vmatprep.mubr.msk.f32.mxu1 %vm1882_vm10, %v1848_v50 }
 0x29a   : > { %v1553_v41 = vpop.permute.xlu1 %1552  ;;  %v1521_v45 = vpop.permute.xlu0 %1520 }
 0x29b   : > { %v1849_v21 = vsel %vm1817_vm9, %v1816_v43, %v1553_v41  ;;  %v1833_v32 = vsel %vm1817_vm9, %v1800_v9, %v1521_v45  ;;  %v1865_v41 = vld [vmem:[%s3075_s10 + $0x78] sm:$0xff] }
 0x29c   : > { %2825 = vmatmul.mubr.msk.f32.gmra.mrb[14].mxu0 %vm1882_vm10, %v1833_v32  ;;  %2849 = vmatmul.mubr.msk.f32.gmra.mrb[14].mxu1 %vm1882_vm10, %v1849_v21  ;;  %v1881_v45 = vld [vmem:[%s3075_s10 + $0xf8] sm:$0xff]  ;;  %v1864_v21 = vld [vmem:[%s3075_s10 + $0x70] sm:$0xff] }
 0x29d   : > { %v1880_v32 = vld [vmem:[%s3075_s10 + $0xf0] sm:$0xff] }
 0x2b4   : > { %v2811_v1 = vpop.f32.mrb[4].mxu0  ;;  %v2835_v30 = vpop.f32.mrb[4].mxu1 }
 0x2b5   : > { %v2213_v31 = vadd.f32 %v2811_v1, %v1855_v62  ;;  %v2229_v15 = vadd.f32 %v2835_v30, %v1871_v46  ;;  %v2069_v35 = vpop.f32.mrb[5].mxu0  ;;  %v2149_v40 = vpop.f32.mrb[5].mxu1 }
 0x2b6   : > { %v2212_v20 = vadd.f32 %v2069_v35, %v1854_v12  ;;  %v2228_v59 = vadd.f32 %v2149_v40, %v1870_v11  ;;  %v2276_v35 = vld [vmem:[%s3075_s10] sm:$0xff] (!%p2752_p10) }
 0x2b7   : > { %2245 = vst.msk [vmem:[%s3075_s10 + $0x28] sm:$0xff] %vm1619_vm3, %v2213_v31  ;;  %2261 = vst.msk [vmem:[%s3075_s10 + $0xa8] sm:$0xff] %vm1619_vm3, %v2229_v15  ;;  %v4597_v40 = vld [vmem:[%s4749_s2] ss:$0 sm:$0xff] (!%p2752_p10) }
 0x2b8   : > { %2244 = vst.msk [vmem:[%s3075_s10 + $0x20] sm:$0xff] %vm1619_vm3, %v2212_v20  ;;  %2260 = vst.msk [vmem:[%s3075_s10 + $0xa0] sm:$0xff] %vm1619_vm3, %v2228_v59  ;;  %v2277_v20 = vld [vmem:[%s3075_s10 + $0x8] sm:$0xff] (!%p2752_p10)  ;;  %v2315_v59 = vadd.f32 (!%p2752_p10), %v4597_v40, %v2276_v35 }
 0x2dc   : > { %v2814_v22 = vpop.f32.mrb[6].mxu0  ;;  %v2838_v2 = vpop.f32.mrb[6].mxu1 }
 0x2dd   : > { %v2215_v18 = vadd.f32 %v2814_v22, %v1857_v17  ;;  %v2231_v51 = vadd.f32 %v2838_v2, %v1873_v55  ;;  %v2079_v33 = vpop.f32.mrb[7].mxu0  ;;  %v2159_v8 = vpop.f32.mrb[7].mxu1  ;;  %v2316_v17 = vadd.f32 (!%p2752_p10), %v4597_v40, %v2277_v20  ;;  %v2278_v55 = vld [vmem:[%s3075_s10 + $0x10] sm:$0xff] (!%p2752_p10) }
 0x2de   : > { %v2214_v0 = vadd.f32 %v2079_v33, %v1856_v16  ;;  %v2230_v19 = vadd.f32 %v2159_v8, %v1872_v28  ;;  %v2279_v16 = vld [vmem:[%s3075_s10 + $0x18] sm:$0xff] (!%p2752_p10)  ;;  %v2280_v28 = vld [vmem:[%s3075_s10 + $0x20] sm:$0xff] (!%p2752_p10)  ;;  %v2317_v22 = vadd.f32 (!%p2752_p10), %v4597_v40, %v2278_v55 }
 0x2df   : > { %2247 = vst.msk [vmem:[%s3075_s10 + $0x38] sm:$0xff] %vm1619_vm3, %v2215_v18  ;;  %2263 = vst.msk [vmem:[%s3075_s10 + $0xb8] sm:$0xff] %vm1619_vm3, %v2231_v51  ;;  %v2318_v2 = vadd.f32 (!%p2752_p10), %v4597_v40, %v2279_v16  ;;  %v2319_v18 = vadd.f32 (!%p2752_p10), %v4597_v40, %v2280_v28  ;;  %v2281_v51 = vld [vmem:[%s3075_s10 + $0x28] sm:$0xff] (!%p2752_p10) }
 0x2e0   : > { %2246 = vst.msk [vmem:[%s3075_s10 + $0x30] sm:$0xff] %vm1619_vm3, %v2214_v0  ;;  %2262 = vst.msk [vmem:[%s3075_s10 + $0xb0] sm:$0xff] %vm1619_vm3, %v2230_v19  ;;  %v2347_v0 = vmax.f32 (!%p2752_p10), %v2315_v59, 0.0  ;;  %v2348_v19 = vmax.f32 (!%p2752_p10), %v2316_v17, 0.0 }
 0x2e2   : > { %2379 = vst.msk [vmem:[%s3075_s10] sm:$0xff] (!%p2752_p10), %vm1619_vm3, %v2347_v0  ;;  %2380 = vst.msk [vmem:[%s3075_s10 + $0x8] sm:$0xff] (!%p2752_p10), %vm1619_vm3, %v2348_v19 }
 0x2e6   : > { %v2283_v8 = vld [vmem:[%s3075_s10 + $0x38] sm:$0xff] (!%p2752_p10) }
 0x2e7   : > { %v2282_v33 = vld [vmem:[%s3075_s10 + $0x30] sm:$0xff] (!%p2752_p10) }
 0x303   : > { %v2817_v13 = vpop.f32.mrb[8].mxu0  ;;  %v2841_v7 = vpop.f32.mrb[8].mxu1 }
 0x304   : > { %v2217_v14 = vadd.f32 %v2817_v13, %v1859_v4  ;;  %v2233_v47 = vadd.f32 %v2841_v7, %v1875_v3  ;;  %v2089_v58 = vpop.f32.mrb[9].mxu0  ;;  %v2169_v44 = vpop.f32.mrb[9].mxu1  ;;  %v2320_v4 = vadd.f32 (!%p2752_p10), %v4597_v40, %v2281_v51  ;;  %v2321_v3 = vadd.f32 (!%p2752_p10), %v4597_v40, %v2282_v33 }
 0x305   : > { %v2216_v29 = vadd.f32 %v2089_v58, %v1858_v54  ;;  %v2232_v53 = vadd.f32 %v2169_v44, %v1874_v27  ;;  %v2349_v7 = vmax.f32 (!%p2752_p10), %v2317_v22, 0.0  ;;  %v2322_v58 = vadd.f32 (!%p2752_p10), %v4597_v40, %v2283_v8 }
 0x306   : > { %2249 = vst.msk [vmem:[%s3075_s10 + $0x48] sm:$0xff] %vm1619_vm3, %v2217_v14  ;;  %2265 = vst.msk [vmem:[%s3075_s10 + $0xc8] sm:$0xff] %vm1619_vm3, %v2233_v47  ;;  %v2350_v14 = vmax.f32 (!%p2752_p10), %v2318_v2, 0.0  ;;  %v2351_v47 = vmax.f32 (!%p2752_p10), %v2319_v18, 0.0 }
 0x307   : > { %2248 = vst.msk [vmem:[%s3075_s10 + $0x40] sm:$0xff] %vm1619_vm3, %v2216_v29  ;;  %2264 = vst.msk [vmem:[%s3075_s10 + $0xc0] sm:$0xff] %vm1619_vm3, %v2232_v53 }
 0x308   : > { %2381 = vst.msk [vmem:[%s3075_s10 + $0x10] sm:$0xff] (!%p2752_p10), %vm1619_vm3, %v2349_v7  ;;  %2382 = vst.msk [vmem:[%s3075_s10 + $0x18] sm:$0xff] (!%p2752_p10), %vm1619_vm3, %v2350_v14 }
 0x309   : > { %2383 = vst.msk [vmem:[%s3075_s10 + $0x20] sm:$0xff] (!%p2752_p10), %vm1619_vm3, %v2351_v47 }
 0x30d   : > { %v2285_v27 = vld [vmem:[%s3075_s10 + $0x48] sm:$0xff] (!%p2752_p10) }
 0x30e   : > { %v2284_v54 = vld [vmem:[%s3075_s10 + $0x40] sm:$0xff] (!%p2752_p10) }
 0x32b   : > { %v2820_v36 = vpop.f32.mrb[10].mxu0  ;;  %v2844_v52 = vpop.f32.mrb[10].mxu1 }
 0x32c   : > { %v2219_v61 = vadd.f32 %v2820_v36, %v1861_v26  ;;  %v2235_v24 = vadd.f32 %v2844_v52, %v1877_v38  ;;  %v2099_v37 = vpop.f32.mrb[11].mxu0  ;;  %v2179_v6 = vpop.f32.mrb[11].mxu1  ;;  %v2352_v26 = vmax.f32 (!%p2752_p10), %v2320_v4, 0.0  ;;  %v2353_v38 = vmax.f32 (!%p2752_p10), %v2321_v3, 0.0 }
 0x32d   : > { %v2218_v57 = vadd.f32 %v2099_v37, %v1860_v10  ;;  %v2234_v42 = vadd.f32 %v2179_v6, %v1876_v60  ;;  %v2323_v10 = vadd.f32 (!%p2752_p10), %v4597_v40, %v2284_v54  ;;  %v2324_v60 = vadd.f32 (!%p2752_p10), %v4597_v40, %v2285_v27 }
 0x32e   : > { %2251 = vst.msk [vmem:[%s3075_s10 + $0x58] sm:$0xff] %vm1619_vm3, %v2219_v61  ;;  %2267 = vst.msk [vmem:[%s3075_s10 + $0xd8] sm:$0xff] %vm1619_vm3, %v2235_v24  ;;  %v2354_v61 = vmax.f32 (!%p2752_p10), %v2322_v58, 0.0 }
 0x32f   : > { %2250 = vst.msk [vmem:[%s3075_s10 + $0x50] sm:$0xff] %vm1619_vm3, %v2218_v57  ;;  %2266 = vst.msk [vmem:[%s3075_s10 + $0xd0] sm:$0xff] %vm1619_vm3, %v2234_v42  ;;  %v2292_v57 = vld [vmem:[%s3075_s10 + $0x80] sm:$0xff] (!%p2752_p10)  ;;  %v2293_v42 = vld [vmem:[%s3075_s10 + $0x88] sm:$0xff] (!%p2752_p10) }
 0x330   : > { %2384 = vst.msk [vmem:[%s3075_s10 + $0x28] sm:$0xff] (!%p2752_p10), %vm1619_vm3, %v2352_v26  ;;  %2385 = vst.msk [vmem:[%s3075_s10 + $0x30] sm:$0xff] (!%p2752_p10), %vm1619_vm3, %v2353_v38 }
 0x331   : > { %2386 = vst.msk [vmem:[%s3075_s10 + $0x38] sm:$0xff] (!%p2752_p10), %vm1619_vm3, %v2354_v61 }
 0x335   : > { %v2287_v44 = vld [vmem:[%s3075_s10 + $0x58] sm:$0xff] (!%p2752_p10) }
 0x336   : > { %v2286_v13 = vld [vmem:[%s3075_s10 + $0x50] sm:$0xff] (!%p2752_p10)  ;;  %v2326_v37 = vadd.f32 (!%p2752_p10), %v4597_v40, %v2287_v44  ;;  %v2303_v16 = vld [vmem:[%s3075_s10 + $0xd8] sm:$0xff] (!%p2752_p10) }
 0x337   : > { %v2325_v24 = vadd.f32 (!%p2752_p10), %v4597_v40, %v2286_v13  ;;  %v2302_v55 = vld [vmem:[%s3075_s10 + $0xd0] sm:$0xff] (!%p2752_p10)  ;;  %v2342_v7 = vadd.f32 (!%p2752_p10), %v4597_v40, %v2303_v16 }
 0x338   : > { %v2341_v13 = vadd.f32 (!%p2752_p10), %v4597_v40, %v2302_v55 }
 0x339   : > { %v2374_v26 = vmax.f32 (!%p2752_p10), %v2342_v7, 0.0 }
 0x33b   : > { %2406 = vst.msk [vmem:[%s3075_s10 + $0xd8] sm:$0xff] (!%p2752_p10), %vm1619_vm3, %v2374_v26 }
 0x353   : > { %v2823_v50 = vpop.f32.mrb[12].mxu0  ;;  %v2847_v23 = vpop.f32.mrb[12].mxu1 }
 0x354   : > { %v2221_v48 = vadd.f32 %v2823_v50, %v1863_v34  ;;  %v2237_v49 = vadd.f32 %v2847_v23, %v1879_v5  ;;  %v2109_v39 = vpop.f32.mrb[13].mxu0  ;;  %v2189_v56 = vpop.f32.mrb[13].mxu1  ;;  %v2355_v34 = vmax.f32 (!%p2752_p10), %v2323_v10, 0.0  ;;  %v2356_v5 = vmax.f32 (!%p2752_p10), %v2324_v60, 0.0  ;;  %v2294_v50 = vld [vmem:[%s3075_s10 + $0x90] sm:$0xff] (!%p2752_p10)  ;;  %v2295_v23 = vld [vmem:[%s3075_s10 + $0x98] sm:$0xff] (!%p2752_p10) }
 0x355   : > { %v2220_v43 = vadd.f32 %v2109_v39, %v1862_v25  ;;  %v2236_v9 = vadd.f32 %v2189_v56, %v1878_v63  ;;  %v2358_v39 = vmax.f32 (!%p2752_p10), %v2326_v37, 0.0 }
 0x356   : > { %2253 = vst.msk [vmem:[%s3075_s10 + $0x68] sm:$0xff] %vm1619_vm3, %v2221_v48  ;;  %2269 = vst.msk [vmem:[%s3075_s10 + $0xe8] sm:$0xff] %vm1619_vm3, %v2237_v49  ;;  %v2296_v48 = vld [vmem:[%s3075_s10 + $0xa0] sm:$0xff] (!%p2752_p10)  ;;  %v2357_v49 = vmax.f32 (!%p2752_p10), %v2325_v24, 0.0 }
 0x357   : > { %2252 = vst.msk [vmem:[%s3075_s10 + $0x60] sm:$0xff] %vm1619_vm3, %v2220_v43  ;;  %2268 = vst.msk [vmem:[%s3075_s10 + $0xe0] sm:$0xff] %vm1619_vm3, %v2236_v9  ;;  %v2297_v9 = vld [vmem:[%s3075_s10 + $0xa8] sm:$0xff] (!%p2752_p10) }
 0x358   : > { %2387 = vst.msk [vmem:[%s3075_s10 + $0x40] sm:$0xff] (!%p2752_p10), %vm1619_vm3, %v2355_v34  ;;  %2388 = vst.msk [vmem:[%s3075_s10 + $0x48] sm:$0xff] (!%p2752_p10), %vm1619_vm3, %v2356_v5  ;;  %v2336_v59 = vadd.f32 (!%p2752_p10), %v4597_v40, %v2297_v9 }
 0x359   : > { %2389 = vst.msk [vmem:[%s3075_s10 + $0x50] sm:$0xff] (!%p2752_p10), %vm1619_vm3, %v2357_v49  ;;  %2390 = vst.msk [vmem:[%s3075_s10 + $0x58] sm:$0xff] (!%p2752_p10), %vm1619_vm3, %v2358_v39 }
 0x35a   : > { %v2368_v0 = vmax.f32 (!%p2752_p10), %v2336_v59, 0.0 }
 0x35c   : > { %2400 = vst.msk [vmem:[%s3075_s10 + $0xa8] sm:$0xff] (!%p2752_p10), %vm1619_vm3, %v2368_v0 }
 0x35d   : > { %v2289_v53 = vld [vmem:[%s3075_s10 + $0x68] sm:$0xff] (!%p2752_p10) }
 0x35e   : > { %v2288_v29 = vld [vmem:[%s3075_s10 + $0x60] sm:$0xff] (!%p2752_p10)  ;;  %v2328_v25 = vadd.f32 (!%p2752_p10), %v4597_v40, %v2289_v53  ;;  %v2305_v33 = vld [vmem:[%s3075_s10 + $0xe8] sm:$0xff] (!%p2752_p10)  ;;  %v2373_v53 = vmax.f32 (!%p2752_p10), %v2341_v13, 0.0 }
 0x35f   : > { %v2327_v6 = vadd.f32 (!%p2752_p10), %v4597_v40, %v2288_v29  ;;  %v2304_v28 = vld [vmem:[%s3075_s10 + $0xe0] sm:$0xff] (!%p2752_p10)  ;;  %v2344_v44 = vadd.f32 (!%p2752_p10), %v4597_v40, %v2305_v33 }
 0x360   : > { %v2343_v14 = vadd.f32 (!%p2752_p10), %v4597_v40, %v2304_v28  ;;  %2405 = vst.msk [vmem:[%s3075_s10 + $0xd0] sm:$0xff] (!%p2752_p10), %vm1619_vm3, %v2373_v53 }
 0x361   : > { %v2359_v56 = vmax.f32 (!%p2752_p10), %v2327_v6, 0.0  ;;  %v2376_v60 = vmax.f32 (!%p2752_p10), %v2344_v44, 0.0 }
 0x362   : > { %v2375_v38 = vmax.f32 (!%p2752_p10), %v2343_v14, 0.0 }
 0x363   : > { %2391 = vst.msk [vmem:[%s3075_s10 + $0x60] sm:$0xff] (!%p2752_p10), %vm1619_vm3, %v2359_v56  ;;  %2408 = vst.msk [vmem:[%s3075_s10 + $0xe8] sm:$0xff] (!%p2752_p10), %vm1619_vm3, %v2376_v60 }
 0x364   : > { %2407 = vst.msk [vmem:[%s3075_s10 + $0xe0] sm:$0xff] (!%p2752_p10), %vm1619_vm3, %v2375_v38 }
 0x36d   : > { %2275 = sbr.rel (%p2752_p10) target bundleno = 897 (0x381), region = 40 }
 0x36f   : > { %v2826_v62 = vpop.f32.mrb[14].mxu0  ;;  %v2850_v46 = vpop.f32.mrb[14].mxu1 }
 0x370   : > { %v2223_v12 = vadd.f32 %v2826_v62, %v1865_v41  ;;  %v2239_v11 = vadd.f32 %v2850_v46, %v1881_v45  ;;  %v2119_v1 = vpop.f32.mrb[15].mxu0  ;;  %v2199_v30 = vpop.f32.mrb[15].mxu1  ;;  %v2298_v41 = vld [vmem:[%s3075_s10 + $0xb0] sm:$0xff] (!%p2752_p10)  ;;  %v2360_v45 = vmax.f32 (!%p2752_p10), %v2328_v25, 0.0  ;;  %v2332_v62 = vadd.f32 (!%p2752_p10), %v4597_v40, %v2293_v42  ;;  %v2299_v46 = vld [vmem:[%s3075_s10 + $0xb8] sm:$0xff] (!%p2752_p10) }
 0x371   : > { %v2222_v31 = vadd.f32 %v2119_v1, %v1864_v21  ;;  %v2238_v15 = vadd.f32 %v2199_v30, %v1880_v32  ;;  %v2331_v32 = vadd.f32 (!%p2752_p10), %v4597_v40, %v2292_v57  ;;  %v2334_v1 = vadd.f32 (!%p2752_p10), %v4597_v40, %v2295_v23 }
 0x372   : > { %2255 = vst.msk [vmem:[%s3075_s10 + $0x78] sm:$0xff] %vm1619_vm3, %v2223_v12  ;;  %2271 = vst.msk [vmem:[%s3075_s10 + $0xf8] sm:$0xff] %vm1619_vm3, %v2239_v11  ;;  %v2333_v11 = vadd.f32 (!%p2752_p10), %v4597_v40, %v2294_v50  ;;  %v2335_v30 = vadd.f32 (!%p2752_p10), %v4597_v40, %v2296_v48  ;;  %v2364_v20 = vmax.f32 (!%p2752_p10), %v2332_v62, 0.0  ;;  %v2337_v17 = vadd.f32 (!%p2752_p10), %v4597_v40, %v2298_v41 }
 0x373   : > { %2254 = vst.msk [vmem:[%s3075_s10 + $0x70] sm:$0xff] %vm1619_vm3, %v2222_v31  ;;  %2270 = vst.msk [vmem:[%s3075_s10 + $0xf0] sm:$0xff] %vm1619_vm3, %v2238_v15  ;;  %v2300_v31 = vld [vmem:[%s3075_s10 + $0xc0] sm:$0xff] (!%p2752_p10)  ;;  %v2301_v15 = vld [vmem:[%s3075_s10 + $0xc8] sm:$0xff] (!%p2752_p10)  ;;  %v2363_v35 = vmax.f32 (!%p2752_p10), %v2331_v32, 0.0  ;;  %v2366_v2 = vmax.f32 (!%p2752_p10), %v2334_v1, 0.0  ;;  %v2338_v51 = vadd.f32 (!%p2752_p10), %v4597_v40, %v2299_v46 }
 0x374   : > { %2392 = vst.msk [vmem:[%s3075_s10 + $0x68] sm:$0xff] %vm1619_vm3, %v2360_v45  ;;  %v2365_v22 = vmax.f32 %v2333_v11, 0.0  ;;  %v2367_v18 = vmax.f32 %v2335_v30, 0.0  ;;  %2396 = vst.msk [vmem:[%s3075_s10 + $0x88] sm:$0xff] %vm1619_vm3, %v2364_v20  ;;  %v2369_v19 = vmax.f32 %v2337_v17, 0.0  ;;  %v2339_v4 = vadd.f32 %v4597_v40, %v2300_v31 }
 0x375   : > { %2395 = vst.msk [vmem:[%s3075_s10 + $0x80] sm:$0xff] %vm1619_vm3, %v2363_v35  ;;  %v2340_v3 = vadd.f32 %v4597_v40, %v2301_v15  ;;  %2398 = vst.msk [vmem:[%s3075_s10 + $0x98] sm:$0xff] %vm1619_vm3, %v2366_v2  ;;  %v2370_v27 = vmax.f32 %v2338_v51, 0.0 }
 0x376   : > { %2397 = vst.msk [vmem:[%s3075_s10 + $0x90] sm:$0xff] %vm1619_vm3, %v2365_v22  ;;  %2399 = vst.msk [vmem:[%s3075_s10 + $0xa0] sm:$0xff] %vm1619_vm3, %v2367_v18  ;;  %v2371_v47 = vmax.f32 %v2339_v4, 0.0 }
 0x377   : > { %2401 = vst.msk [vmem:[%s3075_s10 + $0xb0] sm:$0xff] %vm1619_vm3, %v2369_v19  ;;  %v2372_v58 = vmax.f32 %v2340_v3, 0.0  ;;  %2402 = vst.msk [vmem:[%s3075_s10 + $0xb8] sm:$0xff] %vm1619_vm3, %v2370_v27 }
 0x378   : > { %2403 = vst.msk [vmem:[%s3075_s10 + $0xc0] sm:$0xff] %vm1619_vm3, %v2371_v47 }
 0x379   : > { %v2291_v52 = vld [vmem:[%s3075_s10 + $0x78] sm:$0xff]  ;;  %2404 = vst.msk [vmem:[%s3075_s10 + $0xc8] sm:$0xff] %vm1619_vm3, %v2372_v58 }
 0x37a   : > { %v2290_v36 = vld [vmem:[%s3075_s10 + $0x70] sm:$0xff]  ;;  %v2330_v43 = vadd.f32 %v4597_v40, %v2291_v52  ;;  %v2307_v54 = vld [vmem:[%s3075_s10 + $0xf8] sm:$0xff] }
 0x37b   : > { %v2329_v63 = vadd.f32 %v4597_v40, %v2290_v36  ;;  %v2306_v8 = vld [vmem:[%s3075_s10 + $0xf0] sm:$0xff]  ;;  %v2346_v10 = vadd.f32 %v4597_v40, %v2307_v54 }
 0x37c   : > { %v2362_v12 = vmax.f32 %v2330_v43, 0.0  ;;  %v2345_v29 = vadd.f32 %v4597_v40, %v2306_v8 }
 0x37d   : > { %v2361_v21 = vmax.f32 %v2329_v63, 0.0  ;;  %v2378_v52 = vmax.f32 %v2346_v10, 0.0 }
 0x37e   : > { %2394 = vst.msk [vmem:[%s3075_s10 + $0x78] sm:$0xff] %vm1619_vm3, %v2362_v12  ;;  %v2377_v36 = vmax.f32 %v2345_v29, 0.0 }
 0x37f   : > { %2393 = vst.msk [vmem:[%s3075_s10 + $0x70] sm:$0xff] %vm1619_vm3, %v2361_v21  ;;  %2410 = vst.msk [vmem:[%s3075_s10 + $0xf8] sm:$0xff] %vm1619_vm3, %v2378_v52 }
 0x380   : > { %2409 = vst.msk [vmem:[%s3075_s10 + $0xf0] sm:$0xff] %vm1619_vm3, %v2377_v36 }
 0x381 PF: > { %s13_s18 = sadd.s32 1, %s2986_s18   ;;  %s4831_s12 = smov %s2974_s15 }
 0x382   : > { %p10_p11 = scmp.ge.s32.totalorder %s13_s18, 26   ;;  %s4832_s13 = smov %s2978_s16 }
 0x383   : > { %s4833_s14 = smov %s2982_s17  ;;  %s4834_s15 = smov %s4838_s19 }
 0x384   : > { %s4835_s16 = smov %s4842_s20  ;;  %s4836_s17 = smov %s4846_s21 }
 0x385   :  { %12 = sbr.rel (!%p10_p11) target bundleno = 4 (0x4), region = 73 }

// kernel: hourglass_forward.7
= control target key start
LH: loop header
LB: loop body
LE: loop exit
PB: predicated region body
PF: predicated region fallthrough
CT: control target
= control target key end

     0   :  { %s3184_s15 = smov 0   ;;  %s3186_s16 = smov 0   ;;  %s4975_s0 = inlined_call_operand.vmem [shape: f32[2,6,18,18,8], index: 0, kind: input, shape index: {}]   ;;  %s4976_s1 = inlined_call_operand.vmem [shape: f32[3,72,8], index: 1, kind: input, shape index: {}]   ;;  %s4977_s2 = inlined_call_operand.vmem [shape: f32[1,8], index: 2, kind: input, shape index: {}]   ;;  %s4978_s3 = inlined_call_operand.vmem [shape: f32[2,4,256,8], index: 3, kind: input, shape index: {}]   ;;  %s4979_s4 = inlined_call_operand.vmem [shape: f32[2,4,256,8], index: 4, kind: output, shape index: {}]  }
   0x1   :  { %s3188_s17 = smov 0   ;;  %s3190_s18 = smov 0  }
   0x2   :  { %s3192_s19 = smov 0   ;;  %s3194_s20 = smov 0  }
   0x3   :  { %s3196_s21 = smov 0  }
   0x4 LB: > { %s26_s22 = sadd.s32 1, %s3136_s18  ;;  %s29_s23 = sadd.s32 1, %s3140_s19  ;;  %s3148_s21 = sphi %s3196_s21, %s14_s21   ;;  %s3144_s20 = sphi %s3194_s20, %s5132_s20   ;;  %s3140_s19 = sphi %s3192_s19, %s5131_s19   ;;  %s3136_s18 = sphi %s3190_s18, %s5130_s18   ;;  %s3132_s17 = sphi %s3188_s17, %s5129_s17   ;;  %s3128_s16 = sphi %s3186_s16, %s5128_s16   ;;  %s3124_s15 = sphi %s3184_s15, %s5127_s15  }
   0x5   : > { %p27_p0 = scmp.ge.s32.totalorder %s26_s22, 3  ;;  %p2657_p1 = scmp.ge.s32.totalorder %s3148_s21, 1 }
   0x6   : > { %p209_p2 = scmp.lt.s32.totalorder %s3148_s21, 25  ;;  %s33_s24 = sadd.s32 1, %s3144_s20 }
   0x7   : > { %s5134_s22 = smov (%p27_p0, %s26_s22), 0  ;;  %s5136_s23 = smov (!%p27_p0, %s29_s23), %s3140_s19 }
   0x8   : > { %p210_p3 = pnand %p2657_p1, %p209_p2  ;;  %p31_p4 = scmp.ge.s32.totalorder %s5136_s23, 4 }
   0xa   : > { %s5138_s23 = smov (%p31_p4, %s5136_s23), 0  ;;  %s5140_s24 = smov (!%p31_p4, %s33_s24), %s3144_s20 }
   0xb   : > { %p35_p5 = scmp.ge.s32.totalorder %s5140_s24, 2  ;;  %213 = sbr.rel (%p210_p3) target bundleno = 903 (0x387), region = 36 }
   0xd   : > { %s5142_s24 = smov (%p35_p5, %s5140_s24), 0 }
   0xe   : > { %5019 = sst [smem:[#allocation2_spill]] %s5142_s24 }
  0x12   : > { %s253_s25 = sadd.s32 %s3124_s15, %s3128_s16  ;;  %p254_p6 = scmp.lt.s32.totalorder %s3132_s17, 1 }
  0x13   : > { %p256_p7 = scmp.lt.s32.totalorder %s253_s25, 5  ;;  %p266_p8 = scmp.lt.s32.totalorder %s3128_s16, 3 }
  0x14   : > { %s5144_s17 = smov (!%p254_p6, %s3132_s17), 1  ;;  %p2665_p9 = scmp.ne.s32.totalorder %s3124_s15, 0 }
  0x15   : > { %s5146_s25 = smov (!%p256_p7, %s253_s25), 5  ;;  %s3028_s26 = smul.u32 324, %s5144_s17  ;;  %vm286_vm0 = vcmask (!%p2665_p9), 64512   ;;  %v3150_v0 = vmov (!%p2665_p9), 0.0  }
  0x16   : > { %s3027_s27 = smul.u32 54, %s5146_s25  ;;  %s2660_s28 = sshll.u32 %s5144_s17, 7 }
  0x17   : > { %s5148_s16 = smov (!%p266_p8, %s3128_s16), 3  ;;  %285 = sbr.rel (%p2665_p9) target bundleno = 44 (0x2c), region = 40 }
  0x18   : > { %s260_s29 = sadd.s32 %s3028_s26, %s3027_s27  ;;  %s2659_s5 = sshll.u32 %s5148_s16, 5 }
  0x19   : > { %s2658_s30 = sshll.u32 %s260_s29, 3  ;;  %s270_s9 = sadd.s32 %s2660_s28, %s2659_s5 }
  0x1a   : > { %s3237_s8 = scalar_lea.vmem %s4975_s0, %s2658_s30  ;;  %s2661_s10 = sshll.u32 %s270_s9, 3 }
  0x1b   : > { %s3242_s13 = scalar_lea.vmem %s4978_s3, %s2661_s10  ;;  %s3247_s17 = scalar_lea.vmem %s4979_s4, %s2661_s10 }
  0x1c   : > { %287 = vst.msk [vmem:[%s3247_s17] sm:$0xff] (!%p2665_p9), %vm286_vm0, %v3150_v0  ;;  %288 = vst.msk [vmem:[%s3247_s17 + $0x8] sm:$0xff] (!%p2665_p9), %vm286_vm0, %v3150_v0 }
  0x1d   : > { %289 = vst.msk [vmem:[%s3247_s17 + $0x10] sm:$0xff] (!%p2665_p9), %vm286_vm0, %v3150_v0  ;;  %290 = vst.msk [vmem:[%s3247_s17 + $0x18] sm:$0xff] (!%p2665_p9), %vm286_vm0, %v3150_v0 }
  0x1e   : > { %291 = vst.msk [vmem:[%s3247_s17 + $0x20] sm:$0xff] %vm286_vm0, %v3150_v0  ;;  %292 = vst.msk [vmem:[%s3247_s17 + $0x28] sm:$0xff] %vm286_vm0, %v3150_v0 }
  0x1f   : > { %293 = vst.msk [vmem:[%s3247_s17 + $0x30] sm:$0xff] %vm286_vm0, %v3150_v0  ;;  %294 = vst.msk [vmem:[%s3247_s17 + $0x38] sm:$0xff] %vm286_vm0, %v3150_v0 }
  0x20   : > { %295 = vst.msk [vmem:[%s3247_s17 + $0x40] sm:$0xff] %vm286_vm0, %v3150_v0  ;;  %296 = vst.msk [vmem:[%s3247_s17 + $0x48] sm:$0xff] %vm286_vm0, %v3150_v0 }
  0x21   : > { %297 = vst.msk [vmem:[%s3247_s17 + $0x50] sm:$0xff] %vm286_vm0, %v3150_v0  ;;  %298 = vst.msk [vmem:[%s3247_s17 + $0x58] sm:$0xff] %vm286_vm0, %v3150_v0 }
  0x22   : > { %299 = vst.msk [vmem:[%s3247_s17 + $0x60] sm:$0xff] %vm286_vm0, %v3150_v0  ;;  %300 = vst.msk [vmem:[%s3247_s17 + $0x68] sm:$0xff] %vm286_vm0, %v3150_v0 }
  0x23   : > { %301 = vst.msk [vmem:[%s3247_s17 + $0x70] sm:$0xff] %vm286_vm0, %v3150_v0  ;;  %302 = vst.msk [vmem:[%s3247_s17 + $0x78] sm:$0xff] %vm286_vm0, %v3150_v0 }
  0x24   : > { %303 = vst.msk [vmem:[%s3247_s17 + $0x80] sm:$0xff] %vm286_vm0, %v3150_v0  ;;  %304 = vst.msk [vmem:[%s3247_s17 + $0x88] sm:$0xff] %vm286_vm0, %v3150_v0 }
  0x25   : > { %305 = vst.msk [vmem:[%s3247_s17 + $0x90] sm:$0xff] %vm286_vm0, %v3150_v0  ;;  %306 = vst.msk [vmem:[%s3247_s17 + $0x98] sm:$0xff] %vm286_vm0, %v3150_v0 }
  0x26   : > { %307 = vst.msk [vmem:[%s3247_s17 + $0xa0] sm:$0xff] %vm286_vm0, %v3150_v0  ;;  %308 = vst.msk [vmem:[%s3247_s17 + $0xa8] sm:$0xff] %vm286_vm0, %v3150_v0 }
  0x27   : > { %309 = vst.msk [vmem:[%s3247_s17 + $0xb0] sm:$0xff] %vm286_vm0, %v3150_v0  ;;  %310 = vst.msk [vmem:[%s3247_s17 + $0xb8] sm:$0xff] %vm286_vm0, %v3150_v0 }
  0x28   : > { %311 = vst.msk [vmem:[%s3247_s17 + $0xc0] sm:$0xff] %vm286_vm0, %v3150_v0  ;;  %312 = vst.msk [vmem:[%s3247_s17 + $0xc8] sm:$0xff] %vm286_vm0, %v3150_v0 }
  0x29   : > { %313 = vst.msk [vmem:[%s3247_s17 + $0xd0] sm:$0xff] %vm286_vm0, %v3150_v0  ;;  %314 = vst.msk [vmem:[%s3247_s17 + $0xd8] sm:$0xff] %vm286_vm0, %v3150_v0 }
  0x2a   : > { %315 = vst.msk [vmem:[%s3247_s17 + $0xe0] sm:$0xff] %vm286_vm0, %v3150_v0  ;;  %316 = vst.msk [vmem:[%s3247_s17 + $0xe8] sm:$0xff] %vm286_vm0, %v3150_v0 }
  0x2b   : > { %317 = vst.msk [vmem:[%s3247_s17 + $0xf0] sm:$0xff] %vm286_vm0, %v3150_v0  ;;  %318 = vst.msk [vmem:[%s3247_s17 + $0xf8] sm:$0xff] %vm286_vm0, %v3150_v0 }
  0x2c PF: > { %v3315_v1 = vld [vmem:[%s3237_s8 + $0x19] sm:$0xff]  ;;  %v362_v2 = vld [vmem:[%s3237_s8 + $0x1] sm:$0xff]  ;;  %s3151_s16 = smov 8   ;;  %v363_v4 = vld [vmem:[%s3237_s8 + $0x9] sm:$0xff]  ;;  %s3152_s24 = smov 16   ;;  %vm1644_vm1 = vcmask 64512  }
  0x2d   : > { %656 = vrot.lane.b32.xlu1 %v3315_v1, %s3151_s16  ;;  %652 = vrot.lane.b32.xlu0 %v362_v2, %s3151_s16  ;;  %v3322_v3 = vld [vmem:[%s3237_s8 + $0x21] sm:$0xff]  ;;  %v3329_v5 = vld [vmem:[%s3237_s8 + $0x39] sm:$0xff]  ;;  %s3153_s25 = smov 24   ;;  %s3154_s26 = smov 32   ;;  %vm1677_vm2 = vcmask 130048   ;;  %vm1710_vm3 = vcmask 195584  }
  0x2e   : > { %v3332_v6 = vld [vmem:[%s3237_s8 + $0x31] sm:$0xff]  ;;  %v3342_v8 = vld [vmem:[%s3237_s8 + $0x49] sm:$0xff]  ;;  %v3350_v10 = vld [vmem:[%s3237_s8 + $0x61] sm:$0xff]  ;;  %s3155_s27 = smov 40   ;;  %s319_s28 = smul.u32 72, %s3124_s15  ;;  %vm1743_vm4 = vcmask 261120  }
  0x2f   : > { %v3339_v7 = vld [vmem:[%s3237_s8 + $0x51] sm:$0xff]  ;;  %v371_v9 = vld [vmem:[%s3237_s8 + $0x69] sm:$0xff]  ;;  %v373_v11 = vld [vmem:[%s3237_s8 + $0x81] sm:$0xff]  ;;  %s3156_s6 = smov 48   ;;  %s3157_s7 = smov 56   ;;  %vm1776_vm5 = vcmask 326656  }
  0x30   : > { %5020 = vst [vmem:[#allocation3_spill] sm:$0xff] %v3339_v7  ;;  %v372_v12 = vld [vmem:[%s3237_s8 + $0x79] sm:$0xff]  ;;  %v374_v14 = vld [vmem:[%s3237_s8 + $0x91] sm:$0xff]  ;;  %v376_v16 = vld [vmem:[%s3237_s8 + $0xa9] sm:$0xff]  ;;  %s3829_s5 = scalar_lea.vmem %s4976_s1, %s319_s28  ;;  %s3158_s9 = smov 64   ;;  %vm1809_vm6 = vcmask 392192  }
  0x31   : > { %658 = vrot.lane.b32.xlu1 %v3322_v3, %s3151_s16  ;;  %654 = vrot.lane.b32.xlu0 %v363_v4, %s3151_s16  ;;  %v375_v13 = vld [vmem:[%s3237_s8 + $0x99] sm:$0xff]  ;;  %v377_v15 = vld [vmem:[%s3237_s8 + $0xb1] sm:$0xff]  ;;  %vm1842_vm7 = vcmask 457728   ;;  %vm1875_vm8 = vcmask 523264   ;;  %vm1940_vm9 = vcmask 588800   ;;  %p2890_p10 = scmp.ne.s32.totalorder %s3124_s15, 2 }
  0x32   : > { %v379_v17 = vld [vmem:[%s3237_s8 + $0xc9] sm:$0xff]  ;;  %v378_v18 = vld [vmem:[%s3237_s8 + $0xc1] sm:$0xff]  ;;  %v3375_v20 = vld [vmem:[%s3237_s8 + $0xd9] sm:$0xff] }
  0x33   : > { %v3372_v19 = vld [vmem:[%s3237_s8 + $0xe1] sm:$0xff]  ;;  %v3382_v21 = vld [vmem:[%s3237_s8 + $0xf9] sm:$0xff]  ;;  %v3385_v22 = vld [vmem:[%s3237_s8 + $0xf1] sm:$0xff] }
  0x34   : > { %v3392_v23 = vld [vmem:[%s3237_s8 + $0x111] sm:$0xff]  ;;  %v3395_v24 = vld [vmem:[%s3237_s8 + $0x109] sm:$0xff]  ;;  %v3405_v26 = vld [vmem:[%s3237_s8 + $0x121] sm:$0xff] }
  0x35   : > { %662 = vrot.lane.b32.xlu1 %v3329_v5, %s3151_s16  ;;  %660 = vrot.lane.b32.xlu0 %v3332_v6, %s3151_s16  ;;  %v3402_v25 = vld [vmem:[%s3237_s8 + $0x129] sm:$0xff]  ;;  %5022 = vst [vmem:[#allocation5_spill] sm:$0xff] %v3405_v26  ;;  %v389_v27 = vld [vmem:[%s3237_s8 + $0x141] sm:$0xff] }
  0x36   : > { %5021 = vst [vmem:[#allocation4_spill] sm:$0xff] %v3402_v25  ;;  %v388_v28 = vld [vmem:[%s3237_s8 + $0x139] sm:$0xff]  ;;  %v390_v30 = vld [vmem:[%s3237_s8 + $0x151] sm:$0xff]  ;;  %v392_v32 = vld [vmem:[%s3237_s8 + $0x169] sm:$0xff] }
  0x37   : > { %v391_v29 = vld [vmem:[%s3237_s8 + $0x159] sm:$0xff]  ;;  %v393_v31 = vld [vmem:[%s3237_s8 + $0x171] sm:$0xff]  ;;  %v394_v34 = vld [vmem:[%s3237_s8 + $0x2] sm:$0xff] }
  0x38   : > { %v395_v33 = vld [vmem:[%s3237_s8 + $0xa] sm:$0xff]  ;;  %v3428_v35 = vld [vmem:[%s3237_s8 + $0x22] sm:$0xff]  ;;  %v3431_v36 = vld [vmem:[%s3237_s8 + $0x1a] sm:$0xff] }
  0x39   : > { %666 = vrot.lane.b32.xlu1 %v3339_v7, %s3151_s16  ;;  %664 = vrot.lane.b32.xlu0 %v3342_v8, %s3151_s16  ;;  %v3438_v37 = vld [vmem:[%s3237_s8 + $0x3a] sm:$0xff]  ;;  %v3441_v38 = vld [vmem:[%s3237_s8 + $0x32] sm:$0xff] }
  0x3a   : > { %v3448_v39 = vld [vmem:[%s3237_s8 + $0x52] sm:$0xff]  ;;  %v3451_v40 = vld [vmem:[%s3237_s8 + $0x4a] sm:$0xff]  ;;  %v3461_v42 = vld [vmem:[%s3237_s8 + $0x62] sm:$0xff] }
  0x3b   : > { %5023 = vst [vmem:[#allocation6_spill] sm:$0xff] %v3448_v39  ;;  %5024 = vst [vmem:[#allocation7_spill] sm:$0xff] %v3451_v40  ;;  %v3458_v41 = vld [vmem:[%s3237_s8 + $0x6a] sm:$0xff]  ;;  %v405_v43 = vld [vmem:[%s3237_s8 + $0x82] sm:$0xff] }
  0x3c   : > { %5025 = vst [vmem:[#allocation8_spill] sm:$0xff] %v3458_v41  ;;  %5026 = vst [vmem:[#allocation9_spill] sm:$0xff] %v3461_v42  ;;  %v404_v44 = vld [vmem:[%s3237_s8 + $0x7a] sm:$0xff]  ;;  %v406_v46 = vld [vmem:[%s3237_s8 + $0x92] sm:$0xff] }
  0x3d   : > { %670 = vrot.lane.b32.xlu1 %v371_v9, %s3151_s16  ;;  %668 = vrot.lane.b32.xlu0 %v3350_v10, %s3151_s16  ;;  %v407_v45 = vld [vmem:[%s3237_s8 + $0x9a] sm:$0xff]  ;;  %v409_v47 = vld [vmem:[%s3237_s8 + $0xb2] sm:$0xff] }
  0x3e   : > { %v408_v48 = vld [vmem:[%s3237_s8 + $0xaa] sm:$0xff]  ;;  %v410_v50 = vld [vmem:[%s3237_s8 + $0xc2] sm:$0xff]  ;;  %v3487_v52 = vld [vmem:[%s3237_s8 + $0xda] sm:$0xff] }
  0x3f   : > { %v411_v49 = vld [vmem:[%s3237_s8 + $0xca] sm:$0xff]  ;;  %v3484_v51 = vld [vmem:[%s3237_s8 + $0xe2] sm:$0xff]  ;;  %v3494_v53 = vld [vmem:[%s3237_s8 + $0xfa] sm:$0xff] }
  0x40   : > { %v3497_v54 = vld [vmem:[%s3237_s8 + $0xf2] sm:$0xff]  ;;  %v3507_v56 = vld [vmem:[%s3237_s8 + $0x10a] sm:$0xff]  ;;  %v3517_v58 = vld [vmem:[%s3237_s8 + $0x122] sm:$0xff] }
  0x41   : > { %674 = vrot.lane.b32.xlu1 %v373_v11, %s3151_s16  ;;  %672 = vrot.lane.b32.xlu0 %v372_v12, %s3151_s16  ;;  %v3504_v55 = vld [vmem:[%s3237_s8 + $0x112] sm:$0xff]  ;;  %5028 = vst [vmem:[#allocation11_spill] sm:$0xff] %v3507_v56  ;;  %v3514_v57 = vld [vmem:[%s3237_s8 + $0x12a] sm:$0xff]  ;;  %5030 = vst [vmem:[#allocation13_spill] sm:$0xff] %v3517_v58 }
  0x42   : > { %5027 = vst [vmem:[#allocation10_spill] sm:$0xff] %v3504_v55  ;;  %5029 = vst [vmem:[#allocation12_spill] sm:$0xff] %v3514_v57  ;;  %v421_v59 = vld [vmem:[%s3237_s8 + $0x142] sm:$0xff]  ;;  %v420_v60 = vld [vmem:[%s3237_s8 + $0x13a] sm:$0xff] }
  0x43   : > { %v423_v63 = vld [vmem:[%s3237_s8 + $0x15a] sm:$0xff]  ;;  %v422_v0 = vld [vmem:[%s3237_s8 + $0x152] sm:$0xff]  ;;  %v424_v11 = vld [vmem:[%s3237_s8 + $0x16a] sm:$0xff] }
  0x44   : > { %v425_v9 = vld [vmem:[%s3237_s8 + $0x172] sm:$0xff] }
  0x45   : > { %678 = vrot.lane.b32.xlu1 %v375_v13, %s3151_s16  ;;  %676 = vrot.lane.b32.xlu0 %v374_v14, %s3151_s16 }
  0x49   : > { %682 = vrot.lane.b32.xlu1 %v377_v15, %s3151_s16  ;;  %680 = vrot.lane.b32.xlu0 %v376_v16, %s3151_s16  ;;  %v3552_v16 = vld [vmem:[%s3237_s8 + $0x18] sm:$0xff] }
  0x4a   : > { %5035 = vst [vmem:[#allocation18_spill] sm:$0xff] %v3552_v16 }
  0x4d   : > { %686 = vrot.lane.b32.xlu1 %v379_v17, %s3151_s16  ;;  %684 = vrot.lane.b32.xlu0 %v378_v18, %s3151_s16  ;;  %v3555_v17 = vld [vmem:[%s3237_s8 + $0x20] sm:$0xff] }
  0x4e   : > { %5036 = vst [vmem:[#allocation19_spill] sm:$0xff] %v3555_v17 }
  0x51   : > { %690 = vrot.lane.b32.xlu1 %v3372_v19, %s3151_s16  ;;  %688 = vrot.lane.b32.xlu0 %v3375_v20, %s3151_s16 }
  0x55   : > { %694 = vrot.lane.b32.xlu1 %v3382_v21, %s3151_s16  ;;  %692 = vrot.lane.b32.xlu0 %v3385_v22, %s3151_s16 }
  0x59   : > { %698 = vrot.lane.b32.xlu1 %v3392_v23, %s3151_s16  ;;  %696 = vrot.lane.b32.xlu0 %v3395_v24, %s3151_s16 }
  0x5d   : > { %702 = vrot.lane.b32.xlu1 %v3402_v25, %s3151_s16  ;;  %700 = vrot.lane.b32.xlu0 %v3405_v26, %s3151_s16  ;;  %v3706_v26 = vld [vmem:[%s3237_s8 + $0x128] sm:$0xff] }
  0x5e   : > { %5055 = vst [vmem:[#allocation38_spill] sm:$0xff] %v3706_v26 }
  0x61   : > { %706 = vrot.lane.b32.xlu1 %v389_v27, %s3151_s16  ;;  %704 = vrot.lane.b32.xlu0 %v388_v28, %s3151_s16  ;;  %v3566_v28 = vld [vmem:[%s3237_s8 + $0x38] sm:$0xff] }
  0x65   : > { %710 = vrot.lane.b32.xlu1 %v391_v29, %s3151_s16  ;;  %708 = vrot.lane.b32.xlu0 %v390_v30, %s3151_s16  ;;  %v3569_v29 = vld [vmem:[%s3237_s8 + $0x30] sm:$0xff] }
  0x69   : > { %714 = vrot.lane.b32.xlu1 %v393_v31, %s3151_s16  ;;  %712 = vrot.lane.b32.xlu0 %v392_v32, %s3151_s16  ;;  %v3580_v32 = vld [vmem:[%s3237_s8 + $0x50] sm:$0xff] }
  0x6d   : > { %782 = vrot.lane.b32.xlu1 %v395_v33, %s3152_s24  ;;  %780 = vrot.lane.b32.xlu0 %v394_v34, %s3152_s24  ;;  %v3583_v33 = vld [vmem:[%s3237_s8 + $0x48] sm:$0xff] }
  0x71   : > { %786 = vrot.lane.b32.xlu1 %v3428_v35, %s3152_s24  ;;  %784 = vrot.lane.b32.xlu0 %v3431_v36, %s3152_s24 }
  0x75   : > { %790 = vrot.lane.b32.xlu1 %v3438_v37, %s3152_s24  ;;  %788 = vrot.lane.b32.xlu0 %v3441_v38, %s3152_s24 }
  0x79   : > { %794 = vrot.lane.b32.xlu1 %v3448_v39, %s3152_s24  ;;  %792 = vrot.lane.b32.xlu0 %v3451_v40, %s3152_s24 }
  0x7d   : > { %798 = vrot.lane.b32.xlu1 %v3458_v41, %s3152_s24  ;;  %796 = vrot.lane.b32.xlu0 %v3461_v42, %s3152_s24  ;;  %v3681_v41 = vld [vmem:[%s3237_s8 + $0xf0] sm:$0xff]  ;;  %v3695_v42 = vld [vmem:[%s3237_s8 + $0x108] sm:$0xff] }
  0x81   : > { %802 = vrot.lane.b32.xlu1 %v405_v43, %s3152_s24  ;;  %800 = vrot.lane.b32.xlu0 %v404_v44, %s3152_s24  ;;  %v3594_v44 = vld [vmem:[%s3237_s8 + $0x68] sm:$0xff] }
  0x85   : > { %806 = vrot.lane.b32.xlu1 %v407_v45, %s3152_s24  ;;  %804 = vrot.lane.b32.xlu0 %v406_v46, %s3152_s24  ;;  %v3597_v45 = vld [vmem:[%s3237_s8 + $0x60] sm:$0xff] }
  0x89   : > { %810 = vrot.lane.b32.xlu1 %v409_v47, %s3152_s24  ;;  %808 = vrot.lane.b32.xlu0 %v408_v48, %s3152_s24  ;;  %v3608_v48 = vld [vmem:[%s3237_s8 + $0x80] sm:$0xff] }
  0x8d   : > { %814 = vrot.lane.b32.xlu1 %v411_v49, %s3152_s24  ;;  %812 = vrot.lane.b32.xlu0 %v410_v50, %s3152_s24  ;;  %v3611_v49 = vld [vmem:[%s3237_s8 + $0x78] sm:$0xff] }
  0x91   : > { %818 = vrot.lane.b32.xlu1 %v3484_v51, %s3152_s24  ;;  %816 = vrot.lane.b32.xlu0 %v3487_v52, %s3152_s24 }
  0x95   : > { %822 = vrot.lane.b32.xlu1 %v3494_v53, %s3152_s24  ;;  %820 = vrot.lane.b32.xlu0 %v3497_v54, %s3152_s24 }
  0x99   : > { %826 = vrot.lane.b32.xlu1 %v3504_v55, %s3152_s24  ;;  %824 = vrot.lane.b32.xlu0 %v3507_v56, %s3152_s24  ;;  %v3748_v55 = vld [vmem:[%s3237_s8 + $0x170] sm:$0xff] }
  0x9d   : > { %830 = vrot.lane.b32.xlu1 %v3514_v57, %s3152_s24  ;;  %828 = vrot.lane.b32.xlu0 %v3517_v58, %s3152_s24  ;;  %v3692_v57 = vld [vmem:[%s3237_s8 + $0x110] sm:$0xff] }
  0x9f   : > { %v3525_v61 = vpop.permute.xlu1 %656  ;;  %v3527_v62 = vpop.permute.xlu0 %652 }
  0xa0   : > { %5031 = vst [vmem:[#allocation14_spill] sm:$0xff] %v3525_v61  ;;  %5032 = vst [vmem:[#allocation15_spill] sm:$0xff] %v3527_v62  ;;  %v3650_v61 = vld [vmem:[%s3237_s8 + $0xc8] sm:$0xff]  ;;  %v3678_v62 = vld [vmem:[%s3237_s8 + $0xf8] sm:$0xff] }
  0xa1   : > { %834 = vrot.lane.b32.xlu1 %v421_v59, %s3152_s24  ;;  %832 = vrot.lane.b32.xlu0 %v420_v60, %s3152_s24  ;;  %v3622_v60 = vld [vmem:[%s3237_s8 + $0x98] sm:$0xff]  ;;  %5043 = vst [vmem:[#allocation26_spill] sm:$0xff] %v3650_v61 }
  0xa3   : > { %v3533_v2 = vpop.permute.xlu1 %658  ;;  %v3535_v4 = vpop.permute.xlu0 %654 }
  0xa4   : > { %5033 = vst [vmem:[#allocation16_spill] sm:$0xff] %v3533_v2  ;;  %5034 = vst [vmem:[#allocation17_spill] sm:$0xff] %v3535_v4  ;;  %v3664_v4 = vld [vmem:[%s3237_s8 + $0xe0] sm:$0xff] }
  0xa5   : > { %838 = vrot.lane.b32.xlu1 %v423_v63, %s3152_s24  ;;  %836 = vrot.lane.b32.xlu0 %v422_v0, %s3152_s24  ;;  %v3625_v63 = vld [vmem:[%s3237_s8 + $0x90] sm:$0xff]  ;;  %5047 = vst [vmem:[#allocation30_spill] sm:$0xff] %v3664_v4 }
  0xa7   : > { %v3541_v12 = vpop.permute.xlu1 %662  ;;  %v3543_v13 = vpop.permute.xlu0 %660 }
  0xa9   : > { %842 = vrot.lane.b32.xlu1 %v425_v9, %s3152_s24  ;;  %840 = vrot.lane.b32.xlu0 %v424_v11, %s3152_s24  ;;  %v3636_v11 = vld [vmem:[%s3237_s8 + $0xb0] sm:$0xff] }
  0xab   : > { %v3547_v14 = vpop.permute.xlu1 %666  ;;  %v3549_v15 = vpop.permute.xlu0 %664 }
  0xad   : > { %910 = vrot.lane.b32.xlu1 %v3555_v17, %s3153_s25  ;;  %908 = vrot.lane.b32.xlu0 %v3552_v16, %s3153_s25  ;;  %v3639_v17 = vld [vmem:[%s3237_s8 + $0xa8] sm:$0xff] }
  0xaf   : > { %v3561_v18 = vpop.permute.xlu1 %670  ;;  %v3563_v27 = vpop.permute.xlu0 %668 }
  0xb1   : > { %914 = vrot.lane.b32.xlu1 %v3566_v28, %s3153_s25  ;;  %912 = vrot.lane.b32.xlu0 %v3569_v29, %s3153_s25 }
  0xb3   : > { %v3575_v30 = vpop.permute.xlu1 %674  ;;  %v3577_v31 = vpop.permute.xlu0 %672 }
  0xb5   : > { %918 = vrot.lane.b32.xlu1 %v3580_v32, %s3153_s25  ;;  %916 = vrot.lane.b32.xlu0 %v3583_v33, %s3153_s25 }
  0xb7   : > { %v3589_v34 = vpop.permute.xlu1 %678  ;;  %v3591_v43 = vpop.permute.xlu0 %676 }
  0xb9   : > { %922 = vrot.lane.b32.xlu1 %v3594_v44, %s3153_s25  ;;  %920 = vrot.lane.b32.xlu0 %v3597_v45, %s3153_s25 }
  0xbb   : > { %v3603_v46 = vpop.permute.xlu1 %682  ;;  %v3605_v47 = vpop.permute.xlu0 %680 }
  0xbd   : > { %926 = vrot.lane.b32.xlu1 %v3608_v48, %s3153_s25  ;;  %924 = vrot.lane.b32.xlu0 %v3611_v49, %s3153_s25 }
  0xbf   : > { %v3617_v50 = vpop.permute.xlu1 %686  ;;  %v3619_v59 = vpop.permute.xlu0 %684 }
  0xc0   : > { %5037 = vst [vmem:[#allocation20_spill] sm:$0xff] %v3617_v50  ;;  %5038 = vst [vmem:[#allocation21_spill] sm:$0xff] %v3619_v59  ;;  %v3667_v59 = vld [vmem:[%s3237_s8 + $0xd8] sm:$0xff] }
  0xc1   : > { %930 = vrot.lane.b32.xlu1 %v3622_v60, %s3153_s25  ;;  %928 = vrot.lane.b32.xlu0 %v3625_v63, %s3153_s25  ;;  %5048 = vst [vmem:[#allocation31_spill] sm:$0xff] %v3667_v59 }
  0xc3   : > { %v3631_v0 = vpop.permute.xlu1 %690  ;;  %v3633_v9 = vpop.permute.xlu0 %688 }
  0xc4   : > { %5039 = vst [vmem:[#allocation22_spill] sm:$0xff] %v3631_v0  ;;  %5040 = vst [vmem:[#allocation23_spill] sm:$0xff] %v3633_v9  ;;  %v3653_v0 = vld [vmem:[%s3237_s8 + $0xc0] sm:$0xff] }
  0xc5   : > { %934 = vrot.lane.b32.xlu1 %v3636_v11, %s3153_s25  ;;  %932 = vrot.lane.b32.xlu0 %v3639_v17, %s3153_s25  ;;  %5044 = vst [vmem:[#allocation27_spill] sm:$0xff] %v3653_v0 }
  0xc7   : > { %v3645_v2 = vpop.permute.xlu1 %694  ;;  %v3647_v16 = vpop.permute.xlu0 %692 }
  0xc8   : > { %5041 = vst [vmem:[#allocation24_spill] sm:$0xff] %v3645_v2  ;;  %5042 = vst [vmem:[#allocation25_spill] sm:$0xff] %v3647_v16 }
  0xc9   : > { %938 = vrot.lane.b32.xlu1 %v3650_v61, %s3153_s25  ;;  %936 = vrot.lane.b32.xlu0 %v3653_v0, %s3153_s25 }
  0xcb   : > { %v3659_v9 = vpop.permute.xlu1 %698  ;;  %v3661_v50 = vpop.permute.xlu0 %696 }
  0xcc   : > { %5045 = vst [vmem:[#allocation28_spill] sm:$0xff] %v3659_v9  ;;  %5046 = vst [vmem:[#allocation29_spill] sm:$0xff] %v3661_v50  ;;  %v3737_v50 = vld [vmem:[%s3237_s8 + $0x150] sm:$0xff] }
  0xcd   : > { %942 = vrot.lane.b32.xlu1 %v3664_v4, %s3153_s25  ;;  %940 = vrot.lane.b32.xlu0 %v3667_v59, %s3153_s25  ;;  %5062 = vst [vmem:[#allocation45_spill] sm:$0xff] %v3737_v50 }
  0xcf   : > { %v3673_v61 = vpop.permute.xlu1 %702  ;;  %v3675_v0 = vpop.permute.xlu0 %700 }
  0xd0   : > { %5049 = vst [vmem:[#allocation32_spill] sm:$0xff] %v3673_v61  ;;  %5050 = vst [vmem:[#allocation33_spill] sm:$0xff] %v3675_v0  ;;  %v3720_v61 = vld [vmem:[%s3237_s8 + $0x140] sm:$0xff] }
  0xd1   : > { %946 = vrot.lane.b32.xlu1 %v3678_v62, %s3153_s25  ;;  %944 = vrot.lane.b32.xlu0 %v3681_v41, %s3153_s25  ;;  %5057 = vst [vmem:[#allocation40_spill] sm:$0xff] %v3720_v61 }
  0xd3   : > { %v3687_v4 = vpop.permute.xlu1 %706  ;;  %v3689_v59 = vpop.permute.xlu0 %704 }
  0xd4   : > { %5051 = vst [vmem:[#allocation34_spill] sm:$0xff] %v3687_v4  ;;  %5052 = vst [vmem:[#allocation35_spill] sm:$0xff] %v3689_v59  ;;  %v3709_v4 = vld [vmem:[%s3237_s8 + $0x120] sm:$0xff] }
  0xd5   : > { %950 = vrot.lane.b32.xlu1 %v3692_v57, %s3153_s25  ;;  %948 = vrot.lane.b32.xlu0 %v3695_v42, %s3153_s25  ;;  %5056 = vst [vmem:[#allocation39_spill] sm:$0xff] %v3709_v4 }
  0xd7   : > { %v3701_v58 = vpop.permute.xlu1 %710  ;;  %v3703_v25 = vpop.permute.xlu0 %708 }
  0xd8   : > { %5053 = vst [vmem:[#allocation36_spill] sm:$0xff] %v3701_v58  ;;  %5054 = vst [vmem:[#allocation37_spill] sm:$0xff] %v3703_v25  ;;  %v3723_v25 = vld [vmem:[%s3237_s8 + $0x138] sm:$0xff] }
  0xd9   : > { %954 = vrot.lane.b32.xlu1 %v3706_v26, %s3153_s25  ;;  %952 = vrot.lane.b32.xlu0 %v3709_v4, %s3153_s25  ;;  %5058 = vst [vmem:[#allocation41_spill] sm:$0xff] %v3723_v25  ;;  %v3734_v26 = vld [vmem:[%s3237_s8 + $0x158] sm:$0xff] }
  0xda   : > { %5061 = vst [vmem:[#allocation44_spill] sm:$0xff] %v3734_v26 }
  0xdb   : > { %v3715_v59 = vpop.permute.xlu1 %714  ;;  %v3717_v0 = vpop.permute.xlu0 %712 }
  0xdd   : > { %958 = vrot.lane.b32.xlu1 %v3720_v61, %s3153_s25  ;;  %956 = vrot.lane.b32.xlu0 %v3723_v25, %s3153_s25  ;;  %v3751_v25 = vld [vmem:[%s3237_s8 + $0x168] sm:$0xff] }
  0xdf   : > { %v3729_v58 = vpop.permute.xlu1 %782  ;;  %v3731_v4 = vpop.permute.xlu0 %780 }
  0xe0   : > { %5059 = vst [vmem:[#allocation42_spill] sm:$0xff] %v3729_v58  ;;  %5060 = vst [vmem:[#allocation43_spill] sm:$0xff] %v3731_v4  ;;  %v2697_v58 = vld [vmem:[%s3237_s8 + $0x188] sm:$0xff]  ;;  %v2696_v4 = vld [vmem:[%s3237_s8 + $0x180] sm:$0xff] }
  0xe1   : > { %962 = vrot.lane.b32.xlu1 %v3734_v26, %s3153_s25  ;;  %960 = vrot.lane.b32.xlu0 %v3737_v50, %s3153_s25 }
  0xe3   : > { %v3743_v9 = vpop.permute.xlu1 %786  ;;  %v3745_v61 = vpop.permute.xlu0 %784 }
  0xe4   : > { %5063 = vst [vmem:[#allocation46_spill] sm:$0xff] %v3743_v9  ;;  %5064 = vst [vmem:[#allocation47_spill] sm:$0xff] %v3745_v61 }
  0xe5   : > { %966 = vrot.lane.b32.xlu1 %v3748_v55, %s3153_s25  ;;  %964 = vrot.lane.b32.xlu0 %v3751_v25, %s3153_s25 }
  0xe7   : > { %v3759_v26 = vpop.permute.xlu1 %790  ;;  %v3761_v16 = vpop.permute.xlu0 %788 }
  0xe9   : > { %970 = vrot.lane.b32.xlu1 %v2697_v58, %s3153_s25  ;;  %968 = vrot.lane.b32.xlu0 %v2696_v4, %s3153_s25 }
  0xeb   : > { %v3765_v9 = vpop.permute.xlu1 %794  ;;  %v3767_v61 = vpop.permute.xlu0 %792 }
  0xed   : > { %1038 = vrot.lane.b32.xlu1 %v3322_v3, %s3154_s26  ;;  %1036 = vrot.lane.b32.xlu0 %v3315_v1, %s3154_s26  ;;  %v1658_v1 = vsel %vm1644_vm1, %v3622_v60, %v3589_v34  ;;  %v1657_v3 = vsel %vm1644_vm1, %v3625_v63, %v3591_v43  ;;  %v1660_v34 = vsel %vm1644_vm1, %v3636_v11, %v3603_v46 }
  0xee   : > { %v1659_v43 = vsel %vm1644_vm1, %v3639_v17, %v3605_v47  ;;  %v321_v17 = vld [vmem:[%s3829_s5] sm:$0xff]  ;;  %v322_v47 = vld [vmem:[%s3829_s5 + $0x8] sm:$0xff] }
  0xef   : > { %v3773_v50 = vpop.permute.xlu1 %798  ;;  %v3775_v2 = vpop.permute.xlu0 %796 }
  0xf1   : > { %1042 = vrot.lane.b32.xlu1 %v3329_v5, %s3154_s26  ;;  %1040 = vrot.lane.b32.xlu0 %v3332_v6, %s3154_s26 }
  0xf3   : > { %v3781_v58 = vpop.permute.xlu1 %802  ;;  %v3783_v4 = vpop.permute.xlu0 %800 }
  0xf5   : > { %1046 = vrot.lane.b32.xlu1 %v3339_v7, %s3154_s26  ;;  %1044 = vrot.lane.b32.xlu0 %v3342_v8, %s3154_s26 }
  0xf7   : > { %v807_v39 = vpop.permute.xlu1 %806  ;;  %v805_v40 = vpop.permute.xlu0 %804 }
  0xf8   : > { %v3796_v56 = vsel %vm1677_vm2, %v1658_v1, %v807_v39  ;;  %v3799_v7 = vsel %vm1677_vm2, %v1657_v3, %v805_v40  ;;  %v323_v1 = vld [vmem:[%s3829_s5 + $0x10] sm:$0xff] }
  0xf9   : > { %1068 = vrot.lane.b32.xlu1 %v3375_v20, %s3154_s26  ;;  %1048 = vrot.lane.b32.xlu0 %v3350_v10, %s3154_s26 }
  0xfb   : > { %v811_v60 = vpop.permute.xlu1 %810  ;;  %v809_v39 = vpop.permute.xlu0 %808 }
  0xfc   : > { %v3812_v63 = vsel %vm1677_vm2, %v1660_v34, %v811_v60  ;;  %v3815_v40 = vsel %vm1677_vm2, %v1659_v43, %v809_v39  ;;  %v325_v43 = vld [vmem:[%s3829_s5 + $0x20] sm:$0xff]  ;;  %v326_v60 = vld [vmem:[%s3829_s5 + $0x28] sm:$0xff] }
  0xfd   : > { %1164 = vrot.lane.b32.xlu1 %v3431_v36, %s3155_s27  ;;  %1070 = vrot.lane.b32.xlu0 %v3372_v19, %s3154_s26  ;;  %v3001_v19 = vpack.c.bf16 %v322_v47, %v321_v17  ;;  %v327_v47 = vld [vmem:[%s3829_s5 + $0x30] sm:$0xff] }
  0xff   : > { %v3822_v20 = vpop.permute.xlu1 %814  ;;  %v3824_v46 = vpop.permute.xlu0 %812  ;;  %3002 = vmatprep.subr.bf16.mxu0 %v3001_v19  ;;  %3017 = vmatprep.subr.bf16.mxu1 %v3001_v19 }
 0x100   : > { %3004 = vmatpush3.bf16.msra.mxu0 %v3001_v19  ;;  %3022 = vmatpush3.bf16.msra.mxu1 %v3001_v19  ;;  %v328_v19 = vld [vmem:[%s3829_s5 + $0x38] sm:$0xff] }
 0x101   : > { %1166 = vrot.lane.b32.xlu1 %v3428_v35, %s3155_s27  ;;  %1196 = vrot.lane.b32.xlu0 %v3487_v52, %s3155_s27  ;;  %v324_v35 = vld [vmem:[%s3829_s5 + $0x18] sm:$0xff] }
 0x102   : > { %v3005_v52 = vpack.c.bf16 %v324_v35, %v323_v1  ;;  %v3013_v1 = vpack.c.bf16 %v328_v19, %v327_v47  ;;  %v1676_v47 = vsel %vm1644_vm1, %v3748_v55, %v3715_v59 }
 0x103   : > { %v3837_v36 = vpop.permute.xlu1 %818  ;;  %v3839_v11 = vpop.permute.xlu0 %816 }
 0x104   : > { %5065 = vst [vmem:[#allocation48_spill] sm:$0xff] %v3837_v36  ;;  %5066 = vst [vmem:[#allocation49_spill] sm:$0xff] %v3839_v11  ;;  %3006 = vmatprep.subr.bf16.mxu0 %v3005_v52  ;;  %3018 = vmatprep.subr.bf16.mxu1 %v3005_v52 }
 0x105   : > { %1292 = vrot.lane.b32.xlu1 %v3569_v29, %s3156_s6  ;;  %1198 = vrot.lane.b32.xlu0 %v3484_v51, %s3155_s27  ;;  %v3009_v51 = vpack.c.bf16 %v326_v60, %v325_v43  ;;  %v329_v60 = vld [vmem:[%s3829_s5 + $0x40] sm:$0xff] }
 0x106   : > { %3008 = vmatpush3.bf16.msra.mxu0 %v3005_v52  ;;  %3023 = vmatpush3.bf16.msra.mxu1 %v3005_v52 }
 0x107   : > { %v3847_v3 = vpop.permute.xlu1 %822  ;;  %v3849_v34 = vpop.permute.xlu0 %820  ;;  %3010 = vmatprep.subr.bf16.mxu0 %v3009_v51  ;;  %3019 = vmatprep.subr.bf16.mxu1 %v3009_v51 }
 0x109   : > { %1294 = vrot.lane.b32.xlu1 %v3566_v28, %s3156_s6  ;;  %1324 = vrot.lane.b32.xlu0 %v3681_v41, %s3156_s6 }
 0x10a   : > { %3012 = vmatpush3.bf16.msra.mxu0 %v3009_v51  ;;  %3024 = vmatpush3.bf16.msra.mxu1 %v3009_v51 }
 0x10b   : > { %v3857_v39 = vpop.permute.xlu1 %826  ;;  %v3859_v17 = vpop.permute.xlu0 %824  ;;  %3014 = vmatprep.subr.bf16.mxu0 %v3013_v1  ;;  %3020 = vmatprep.subr.bf16.mxu1 %v3013_v1 }
 0x10d   : > { %1420 = vrot.lane.b32.xlu1 %v3332_v6, %s3157_s7  ;;  %1326 = vrot.lane.b32.xlu0 %v3678_v62, %s3156_s6 }
 0x10e   : > { %3016 = vmatpush3.bf16.msra.mxu0 %v3013_v1  ;;  %3025 = vmatpush3.bf16.msra.mxu1 %v3013_v1 }
 0x10f   : > { %v3867_v35 = vpop.permute.xlu1 %830  ;;  %v3869_v52 = vpop.permute.xlu0 %828  ;;  %2951 = vmatprep.subr.mxu0 %v329_v60  ;;  %3021 = vmatprep.subr.mxu1 %v329_v60 }
 0x111   : > { %1072 = vrot.lane.b32.xlu1 %v3385_v22, %s3154_s26  ;;  %1452 = vrot.lane.b32.xlu0 %v3385_v22, %s3157_s7 }
 0x112   : > { %2952 = vmatpush3.msra.mxu0 %v329_v60  ;;  %3026 = vmatpush3.msra.mxu1 %v329_v60 }
 0x113   : > { %v3875_v6 = vpop.permute.xlu1 %834  ;;  %v3877_v43 = vpop.permute.xlu0 %832 }
 0x115   : > { %1454 = vrot.lane.b32.xlu1 %v3382_v21, %s3157_s7  ;;  %1422 = vrot.lane.b32.xlu0 %v3329_v5, %s3157_s7  ;;  %v1675_v5 = vsel %vm1644_vm1, %v3751_v25, %v3717_v0 }
 0x117   : > { %v3884_v51 = vpop.permute.xlu1 %838  ;;  %v3886_v22 = vpop.permute.xlu0 %836 }
 0x119   : > { %1580 = vrot.lane.b32.xlu1 %v3497_v54, %s3158_s9  ;;  %1548 = vrot.lane.b32.xlu0 %v3441_v38, %s3158_s9 }
 0x11b   : > { %v843_v19 = vpop.permute.xlu1 %842  ;;  %v841_v1 = vpop.permute.xlu0 %840 }
 0x11c   : > { %v3899_v60 = vsel %vm1677_vm2, %v1676_v47, %v843_v19  ;;  %v3902_v36 = vsel %vm1677_vm2, %v1675_v5, %v841_v1 }
 0x11d   : > { %1168 = vrot.lane.b32.xlu1 %v3441_v38, %s3155_s27  ;;  %1074 = vrot.lane.b32.xlu0 %v3382_v21, %s3154_s26  ;;  %v1650_v21 = vsel %vm1644_vm1, %v3566_v28, %v3541_v12  ;;  %v1649_v38 = vsel %vm1644_vm1, %v3569_v29, %v3543_v13  ;;  %v1651_v12 = vsel %vm1644_vm1, %v3583_v33, %v3549_v15 }
 0x11e   : > { %v1682_v0 = vsel %vm1677_vm2, %v1649_v38, %v3761_v16  ;;  %v1684_v16 = vsel %vm1677_vm2, %v1651_v12, %v3767_v61  ;;  %v1653_v61 = vsel %vm1644_vm1, %v3597_v45, %v3563_v27 }
 0x11f   : > { %v3908_v11 = vpop.permute.xlu1 %910  ;;  %v3910_v55 = vpop.permute.xlu0 %908 }
 0x121   : > { %1550 = vrot.lane.b32.xlu1 %v3438_v37, %s3158_s9  ;;  %1200 = vrot.lane.b32.xlu0 %v3497_v54, %s3155_s27  ;;  %v1683_v54 = vsel %vm1677_vm2, %v1650_v21, %v3759_v26  ;;  %v1652_v26 = vsel %vm1644_vm1, %v3580_v32, %v3547_v14  ;;  %v1654_v14 = vsel %vm1644_vm1, %v3594_v44, %v3561_v18 }
 0x122   : > { %v1685_v13 = vsel %vm1677_vm2, %v1652_v26, %v3765_v9  ;;  %v1687_v15 = vsel %vm1677_vm2, %v1654_v14, %v3773_v50  ;;  %v1656_v18 = vsel %vm1644_vm1, %v3608_v48, %v3575_v30  ;;  %v5074_v14 = vld [vmem:[#allocation24_spill] sm:$0xff] }
 0x123   : > { %v3916_v25 = vpop.permute.xlu1 %914  ;;  %v3918_v59 = vpop.permute.xlu0 %912  ;;  %v1689_v27 = vsel %vm1677_vm2, %v1656_v18, %v3781_v58 }
 0x125   : > { %1170 = vrot.lane.b32.xlu1 %v3438_v37, %s3155_s27  ;;  %1582 = vrot.lane.b32.xlu0 %v3494_v53, %s3158_s9 }
 0x127   : > { %v919_v47 = vpop.permute.xlu1 %918  ;;  %v917_v37 = vpop.permute.xlu0 %916 }
 0x128   : > { %v3935_v5 = vsel %vm1710_vm3, %v1683_v54, %v919_v47  ;;  %v3938_v19 = vsel %vm1710_vm3, %v1682_v0, %v917_v37  ;;  %v5068_v37 = vld [vmem:[#allocation3_spill] sm:$0xff] }
 0x129   : > { %1296 = vrot.lane.b32.xlu1 %v3583_v33, %s3156_s6  ;;  %1202 = vrot.lane.b32.xlu0 %v3494_v53, %s3155_s27  ;;  %v1686_v33 = vsel %vm1677_vm2, %v1653_v61, %v3775_v2  ;;  %v1655_v2 = vsel %vm1644_vm1, %v3611_v49, %v3577_v31  ;;  %v1666_v61 = vsel %vm1644_vm1, %v3678_v62, %v5074_v14  ;;  %v5076_v62 = vld [vmem:[#allocation10_spill] sm:$0xff] }
 0x12a   : > { %v1688_v50 = vsel %vm1677_vm2, %v1655_v2, %v3783_v4 }
 0x12b   : > { %v923_v28 = vpop.permute.xlu1 %922  ;;  %v921_v29 = vpop.permute.xlu0 %920 }
 0x12c   : > { %v3955_v1 = vsel %vm1710_vm3, %v1685_v13, %v923_v28  ;;  %v3958_v53 = vsel %vm1710_vm3, %v1684_v16, %v921_v29  ;;  %v5071_v13 = vld [vmem:[#allocation11_spill] sm:$0xff]  ;;  %v5073_v29 = vld [vmem:[#allocation6_spill] sm:$0xff] }
 0x12d   : > { %1298 = vrot.lane.b32.xlu1 %v3580_v32, %s3156_s6  ;;  %1328 = vrot.lane.b32.xlu0 %v3695_v42, %s3156_s6 }
 0x12f   : > { %v927_v9 = vpop.permute.xlu1 %926  ;;  %v925_v21 = vpop.permute.xlu0 %924 }
 0x130   : > { %v3975_v32 = vsel %vm1710_vm3, %v1687_v15, %v927_v9  ;;  %v3978_v38 = vsel %vm1710_vm3, %v1686_v33, %v925_v21  ;;  %v5075_v15 = vld [vmem:[#allocation25_spill] sm:$0xff] }
 0x131   : > { %1424 = vrot.lane.b32.xlu1 %v3342_v8, %s3157_s7  ;;  %1330 = vrot.lane.b32.xlu0 %v3692_v57, %s3156_s6  ;;  %v1665_v33 = vsel %vm1644_vm1, %v3681_v41, %v5075_v15  ;;  %v5077_v41 = vld [vmem:[#allocation28_spill] sm:$0xff] }
 0x132   : > { %v1698_v9 = vsel %vm1677_vm2, %v1665_v33, %v3849_v34  ;;  %v5083_v33 = vld [vmem:[#allocation34_spill] sm:$0xff] }
 0x133   : > { %v931_v54 = vpop.permute.xlu1 %930  ;;  %v929_v0 = vpop.permute.xlu0 %928 }
 0x134   : > { %v3995_v8 = vsel %vm1710_vm3, %v1689_v27, %v931_v54  ;;  %v3998_v47 = vsel %vm1710_vm3, %v1688_v50, %v929_v0  ;;  %v5078_v50 = vld [vmem:[#allocation29_spill] sm:$0xff] }
 0x135   : > { %1076 = vrot.lane.b32.xlu1 %v3395_v24, %s3154_s26  ;;  %1456 = vrot.lane.b32.xlu0 %v3395_v24, %s3157_s7  ;;  %v1667_v34 = vsel %vm1644_vm1, %v3695_v42, %v5078_v50  ;;  %v5079_v42 = vld [vmem:[#allocation32_spill] sm:$0xff] }
 0x136   : > { %v1700_v0 = vsel %vm1677_vm2, %v1667_v34, %v3859_v17  ;;  %v5082_v17 = vld [vmem:[#allocation39_spill] sm:$0xff]  ;;  %v5087_v34 = vld [vmem:[#allocation36_spill] sm:$0xff] }
 0x137   : > { %v935_v30 = vpop.permute.xlu1 %934  ;;  %v933_v31 = vpop.permute.xlu0 %932 }
 0x138   : > { %v4006_v58 = vsel %vm1710_vm3, %v3796_v56, %v935_v30  ;;  %v4010_v4 = vsel %vm1710_vm3, %v3799_v7, %v933_v31  ;;  %v5072_v7 = vld [vmem:[#allocation7_spill] sm:$0xff] }
 0x139   : > { %5067 = vst [vmem:[#allocation50_spill] sm:$0xff] %v4006_v58  ;;  %1458 = vrot.lane.b32.xlu1 %v3392_v23, %s3157_s7  ;;  %1426 = vrot.lane.b32.xlu0 %v5068_v37, %s3157_s7  ;;  %v2832_v58 = vld [vmem:[%s3237_s8 + $0x7a] sm:$0xff] }
 0x13b   : > { %v939_v26 = vpop.permute.xlu1 %938  ;;  %v937_v12 = vpop.permute.xlu0 %936 }
 0x13c   : > { %v4018_v24 = vsel %vm1710_vm3, %v3812_v63, %v939_v26  ;;  %v4022_v56 = vsel %vm1710_vm3, %v3815_v40, %v937_v12  ;;  %v5081_v12 = vld [vmem:[#allocation33_spill] sm:$0xff] }
 0x13d   : > { %5069 = vst [vmem:[#allocation3_spill] sm:$0xff] %v4018_v24  ;;  %5070 = vst [vmem:[#allocation51_spill] sm:$0xff] %v4022_v56  ;;  %1584 = vrot.lane.b32.xlu1 %v5071_v13, %s3158_s9  ;;  %1552 = vrot.lane.b32.xlu0 %v5072_v7, %s3158_s9  ;;  %v5102_v24 = vld [vmem:[#allocation27_spill] sm:$0xff] }
 0x13f   : > { %v4028_v16 = vpop.permute.xlu1 %942  ;;  %v4030_v28 = vpop.permute.xlu0 %940 }
 0x141   : > { %1172 = vrot.lane.b32.xlu1 %v5072_v7, %s3155_s27  ;;  %1078 = vrot.lane.b32.xlu0 %v3392_v23, %s3154_s26  ;;  %v1699_v23 = vsel %vm1677_vm2, %v1666_v61, %v3847_v3  ;;  %v1668_v3 = vsel %vm1644_vm1, %v3692_v57, %v5077_v41  ;;  %v5080_v57 = vld [vmem:[#allocation38_spill] sm:$0xff] }
 0x142   : > { %v1701_v54 = vsel %vm1677_vm2, %v1668_v3, %v3857_v39  ;;  %v1670_v39 = vsel %vm1644_vm1, %v5080_v57, %v5079_v42 }
 0x143   : > { %v4036_v63 = vpop.permute.xlu1 %946  ;;  %v4038_v40 = vpop.permute.xlu0 %944  ;;  %v1703_v7 = vsel %vm1677_vm2, %v1670_v39, %v3867_v35 }
 0x145   : > { %1554 = vrot.lane.b32.xlu1 %v5073_v29, %s3158_s9  ;;  %1204 = vrot.lane.b32.xlu0 %v5071_v13, %s3155_s27  ;;  %v1669_v13 = vsel %vm1644_vm1, %v5082_v17, %v5081_v12 }
 0x147   : > { %v951_v21 = vpop.permute.xlu1 %950  ;;  %v949_v18 = vpop.permute.xlu0 %948 }
 0x148   : > { %v4055_v2 = vsel %vm1710_vm3, %v1699_v23, %v951_v21  ;;  %v4058_v27 = vsel %vm1710_vm3, %v1698_v9, %v949_v18  ;;  %v5084_v23 = vld [vmem:[#allocation40_spill] sm:$0xff]  ;;  %v5085_v9 = vld [vmem:[#allocation35_spill] sm:$0xff] }
 0x149   : > { %1174 = vrot.lane.b32.xlu1 %v5073_v29, %s3155_s27  ;;  %1586 = vrot.lane.b32.xlu0 %v5076_v62, %s3158_s9  ;;  %v1702_v29 = vsel %vm1677_vm2, %v1669_v13, %v3869_v52  ;;  %v1672_v35 = vsel %vm1644_vm1, %v5084_v23, %v5083_v33  ;;  %v5086_v52 = vld [vmem:[#allocation41_spill] sm:$0xff] }
 0x14a   : > { %v1671_v21 = vsel %vm1644_vm1, %v5086_v52, %v5085_v9  ;;  %v1705_v18 = vsel %vm1677_vm2, %v1672_v35, %v3875_v6  ;;  %v5088_v6 = vld [vmem:[#allocation44_spill] sm:$0xff]  ;;  %v5096_v35 = vld [vmem:[#allocation13_spill] sm:$0xff] }
 0x14b   : > { %v955_v30 = vpop.permute.xlu1 %954  ;;  %v953_v31 = vpop.permute.xlu0 %952  ;;  %v2799_v13 = vld [vmem:[%s3237_s8 + $0x69] sm:$0xff] }
 0x14c   : > { %v4075_v37 = vsel %vm1710_vm3, %v1701_v54, %v955_v30  ;;  %v4078_v26 = vsel %vm1710_vm3, %v1700_v0, %v953_v31  ;;  %v1674_v54 = vsel %vm1644_vm1, %v5088_v6, %v5087_v34  ;;  %v5090_v0 = vld [vmem:[#allocation45_spill] sm:$0xff]  ;;  %v5099_v34 = vld [vmem:[#allocation8_spill] sm:$0xff] }
 0x14d   : > { %1300 = vrot.lane.b32.xlu1 %v3597_v45, %s3156_s6  ;;  %1206 = vrot.lane.b32.xlu0 %v5076_v62, %s3155_s27  ;;  %v1704_v62 = vsel %vm1677_vm2, %v1671_v21, %v3877_v43  ;;  %v5089_v43 = vld [vmem:[#allocation37_spill] sm:$0xff]  ;;  %v1707_v31 = vsel %vm1677_vm2, %v1674_v54, %v3884_v51 }
 0x14e   : > { %v1673_v30 = vsel %vm1644_vm1, %v5090_v0, %v5089_v43  ;;  %v5097_v9 = vld [vmem:[#allocation9_spill] sm:$0xff] }
 0x14f   : > { %v959_v14 = vpop.permute.xlu1 %958  ;;  %v957_v61 = vpop.permute.xlu0 %956  ;;  %v1706_v42 = vsel %vm1677_vm2, %v1673_v30, %v3886_v22 }
 0x150   : > { %v4095_v45 = vsel %vm1710_vm3, %v1703_v7, %v959_v14  ;;  %v4098_v15 = vsel %vm1710_vm3, %v1702_v29, %v957_v61  ;;  %v5095_v14 = vld [vmem:[#allocation4_spill] sm:$0xff] }
 0x151   : > { %1302 = vrot.lane.b32.xlu1 %v3594_v44, %s3156_s6  ;;  %1332 = vrot.lane.b32.xlu0 %v5082_v17, %s3156_s6  ;;  %v5092_v17 = vld [vmem:[#allocation5_spill] sm:$0xff] }
 0x153   : > { %v963_v41 = vpop.permute.xlu1 %962  ;;  %v961_v44 = vpop.permute.xlu0 %960 }
 0x154   : > { %v4115_v3 = vsel %vm1710_vm3, %v1705_v18, %v963_v41  ;;  %v4118_v50 = vsel %vm1710_vm3, %v1704_v62, %v961_v44  ;;  %v5098_v44 = vld [vmem:[#allocation12_spill] sm:$0xff] }
 0x155   : > { %1428 = vrot.lane.b32.xlu1 %v3350_v10, %s3157_s7  ;;  %1334 = vrot.lane.b32.xlu0 %v5080_v57, %s3156_s6 }
 0x157   : > { %v967_v39 = vpop.permute.xlu1 %966  ;;  %v965_v12 = vpop.permute.xlu0 %964 }
 0x158   : > { %v4135_v10 = vsel %vm1710_vm3, %v1707_v31, %v967_v39  ;;  %v4138_v57 = vsel %vm1710_vm3, %v1706_v42, %v965_v12  ;;  %v2816_v12 = vld [vmem:[%s3237_s8 + $0x139] sm:$0xff] }
 0x159   : > { %5091 = vst [vmem:[#allocation11_spill] sm:$0xff] %v4135_v10  ;;  %1080 = vrot.lane.b32.xlu1 %v5092_v17, %s3154_s26  ;;  %1460 = vrot.lane.b32.xlu0 %v5092_v17, %s3157_s7  ;;  %v2800_v17 = vld [vmem:[%s3237_s8 + $0x79] sm:$0xff] }
 0x15b   : > { %v971_v7 = vpop.permute.xlu1 %970  ;;  %v969_v51 = vpop.permute.xlu0 %968 }
 0x15c   : > { %v4147_v22 = vsel %vm1710_vm3, %v3899_v60, %v971_v7  ;;  %v4151_v29 = vsel %vm1710_vm3, %v3902_v36, %v969_v51  ;;  %v2817_v51 = vld [vmem:[%s3237_s8 + $0x141] sm:$0xff] }
 0x15d   : > { %5093 = vst [vmem:[#allocation7_spill] sm:$0xff] %v4147_v22  ;;  %5094 = vst [vmem:[#allocation6_spill] sm:$0xff] %v4151_v29  ;;  %1462 = vrot.lane.b32.xlu1 %v5095_v14, %s3157_s7  ;;  %1430 = vrot.lane.b32.xlu0 %v2799_v13, %s3157_s7  ;;  %v2848_v29 = vld [vmem:[%s3237_s8 + $0x13a] sm:$0xff] }
 0x15f   : > { %v4156_v61 = vpop.permute.xlu1 %1038  ;;  %v1037_v33 = vpop.permute.xlu0 %1036 }
 0x161   : > { %1588 = vrot.lane.b32.xlu1 %v5096_v35, %s3158_s9  ;;  %1556 = vrot.lane.b32.xlu0 %v5097_v9, %s3158_s9 }
 0x163   : > { %v4162_v60 = vpop.permute.xlu1 %1042  ;;  %v4164_v21 = vpop.permute.xlu0 %1040 }
 0x165   : > { %1082 = vrot.lane.b32.xlu1 %v5095_v14, %s3154_s26  ;;  %1050 = vrot.lane.b32.xlu0 %v2799_v13, %s3154_s26 }
 0x167   : > { %v4169_v36 = vpop.permute.xlu1 %1046  ;;  %v4171_v18 = vpop.permute.xlu0 %1044 }
 0x169   : > { %1208 = vrot.lane.b32.xlu1 %v5096_v35, %s3155_s27  ;;  %1176 = vrot.lane.b32.xlu0 %v5097_v9, %s3155_s27  ;;  %v5100_v9 = vld [vmem:[#allocation15_spill] sm:$0xff] }
 0x16b   : > { %v1069_v62 = vpop.permute.xlu1 %1068  ;;  %v4177_v41 = vpop.permute.xlu0 %1048 }
 0x16d   : > { %1590 = vrot.lane.b32.xlu1 %v5098_v44, %s3158_s9  ;;  %1558 = vrot.lane.b32.xlu0 %v5099_v34, %s3158_s9 }
 0x16f   : > { %v1165_v54 = vpop.permute.xlu1 %1164  ;;  %v4183_v43 = vpop.permute.xlu0 %1070 }
 0x171   : > { %1210 = vrot.lane.b32.xlu1 %v5098_v44, %s3155_s27  ;;  %1178 = vrot.lane.b32.xlu0 %v5099_v34, %s3155_s27  ;;  %v5101_v34 = vld [vmem:[#allocation21_spill] sm:$0xff] }
 0x172   : > { %v1661_v22 = vsel %vm1644_vm1, %v5102_v24, %v5101_v34 }
 0x173   : > { %v4189_v30 = vpop.permute.xlu1 %1166  ;;  %v1197_v31 = vpop.permute.xlu0 %1196  ;;  %v1694_v56 = vsel %vm1677_vm2, %v1661_v22, %v3824_v46 }
 0x174   : > { %v1727_v24 = vsel %vm1710_vm3, %v1694_v56, %v4030_v28 }
 0x175   : > { %1336 = vrot.lane.b32.xlu1 %v5086_v52, %s3156_s6  ;;  %1304 = vrot.lane.b32.xlu0 %v3611_v49, %s3156_s6 }
 0x177   : > { %v1293_v42 = vpop.permute.xlu1 %1292  ;;  %v4195_v39 = vpop.permute.xlu0 %1198 }
 0x179   : > { %1338 = vrot.lane.b32.xlu1 %v5084_v23, %s3156_s6  ;;  %1306 = vrot.lane.b32.xlu0 %v3608_v48, %s3156_s6  ;;  %v330_v23 = vld [vmem:[%s3237_s8] sm:$0xff] }
 0x17a   : > { %v2801_v48 = vld [vmem:[%s3237_s8 + $0x81] sm:$0xff]  ;;  %v1645_v44 = vsel %vm1644_vm1, %v330_v23, %v5100_v9 }
 0x17b   : > { %v1295_v13 = vpop.permute.xlu1 %1294  ;;  %v1325_v7 = vpop.permute.xlu0 %1324 }
 0x17d   : > { %1464 = vrot.lane.b32.xlu1 %v2816_v12, %s3157_s7  ;;  %1432 = vrot.lane.b32.xlu0 %v2800_v17, %s3157_s7 }
 0x17f   : > { %v1421_v49 = vpop.permute.xlu1 %1420  ;;  %v4205_v52 = vpop.permute.xlu0 %1326 }
 0x181   : > { %1084 = vrot.lane.b32.xlu1 %v2816_v12, %s3154_s26  ;;  %1052 = vrot.lane.b32.xlu0 %v2800_v17, %s3154_s26  ;;  %v5103_v12 = vld [vmem:[#allocation43_spill] sm:$0xff] }
 0x182   : > { %v1678_v17 = vsel %vm1677_vm2, %v1645_v44, %v5103_v12  ;;  %v1760_v44 = vsel %vm1743_vm4, %v1727_v24, %v1069_v62 }
 0x183   : > { %v4212_v14 = vpop.permute.xlu1 %1072  ;;  %v1453_v35 = vpop.permute.xlu0 %1452  ;;  %v1711_v23 = vsel %vm1710_vm3, %v1678_v17, %v3910_v55  ;;  %v1793_v22 = vsel %vm1776_vm5, %v1760_v44, %v1197_v31  ;;  %v331_v55 = vld [vmem:[%s3237_s8 + $0x8] sm:$0xff]  ;;  %v5104_v31 = vld [vmem:[#allocation17_spill] sm:$0xff] }
 0x184   : > { %v1744_v10 = vsel %vm1743_vm4, %v1711_v23, %v1037_v33  ;;  %v1826_v28 = vsel %vm1809_vm6, %v1793_v22, %v1325_v7  ;;  %v1646_v23 = vsel %vm1644_vm1, %v331_v55, %v5104_v31  ;;  %v2818_v31 = vld [vmem:[%s3237_s8 + $0x151] sm:$0xff] }
 0x185   : > { %1466 = vrot.lane.b32.xlu1 %v2817_v51, %s3157_s7  ;;  %1434 = vrot.lane.b32.xlu0 %v2801_v48, %s3157_s7  ;;  %v1777_v46 = vsel %vm1776_vm5, %v1744_v10, %v1165_v54  ;;  %v1859_v33 = vsel %vm1842_vm7, %v1826_v28, %v1453_v35  ;;  %v2833_v28 = vld [vmem:[%s3237_s8 + $0x82] sm:$0xff] }
 0x186   : > { %v1810_v56 = vsel %vm1809_vm6, %v1777_v46, %v1293_v42  ;;  %v5105_v42 = vld [vmem:[#allocation42_spill] sm:$0xff] }
 0x187   : > { %v1455_v9 = vpop.permute.xlu1 %1454  ;;  %v1423_v34 = vpop.permute.xlu0 %1422  ;;  %v1843_v12 = vsel %vm1842_vm7, %v1810_v56, %v1421_v49  ;;  %v1679_v7 = vsel %vm1677_vm2, %v1646_v23, %v5105_v42  ;;  %v5107_v46 = vld [vmem:[#allocation26_spill] sm:$0xff]  ;;  %v2849_v56 = vld [vmem:[%s3237_s8 + $0x142] sm:$0xff] }
 0x188   : > { %v1712_v49 = vsel %vm1710_vm3, %v1679_v7, %v3908_v11  ;;  %v2802_v23 = vld [vmem:[%s3237_s8 + $0x91] sm:$0xff] }
 0x189   : > { %1592 = vrot.lane.b32.xlu1 %v2848_v29, %s3158_s9  ;;  %1560 = vrot.lane.b32.xlu0 %v2832_v58, %s3158_s9  ;;  %v1745_v44 = vsel %vm1743_vm4, %v1712_v49, %v4156_v61 }
 0x18a   : > { %v1778_v22 = vsel %vm1776_vm5, %v1745_v44, %v4189_v30  ;;  %v5108_v44 = vld [vmem:[#allocation14_spill] sm:$0xff] }
 0x18b   : > { %v1581_v62 = vpop.permute.xlu1 %1580  ;;  %v1549_v17 = vpop.permute.xlu0 %1548  ;;  %v1811_v55 = vsel %vm1809_vm6, %v1778_v22, %v1295_v13 }
 0x18c   : > { %v1876_v10 = vsel %vm1875_vm8, %v1843_v12, %v1549_v17  ;;  %v1892_v54 = vsel %vm1875_vm8, %v1859_v33, %v1581_v62  ;;  %v1844_v12 = vsel %vm1842_vm7, %v1811_v55, %v1423_v34 }
 0x18d   : > { %1086 = vrot.lane.b32.xlu1 %v2817_v51, %s3154_s26  ;;  %1054 = vrot.lane.b32.xlu0 %v2801_v48, %s3154_s26  ;;  %v5106_v51 = vld [vmem:[#allocation20_spill] sm:$0xff] }
 0x18e   : > { %2953 = vmatprep.mubr.msk.f32.mxu0 %vm1940_vm9, %v1876_v10  ;;  %2977 = vmatprep.mubr.msk.f32.mxu1 %vm1940_vm9, %v1892_v54  ;;  %v1662_v48 = vsel %vm1644_vm1, %v5107_v46, %v5106_v51  ;;  %v5109_v51 = vld [vmem:[#allocation18_spill] sm:$0xff] }
 0x18f   : > { %v1169_v35 = vpop.permute.xlu1 %1168  ;;  %v4254_v24 = vpop.permute.xlu0 %1074  ;;  %v1695_v11 = vsel %vm1677_vm2, %v1662_v48, %v3822_v20  ;;  %v1647_v46 = vsel %vm1644_vm1, %v5109_v51, %v5108_v44  ;;  %v5111_v48 = vld [vmem:[#allocation31_spill] sm:$0xff]  ;;  %v5114_v44 = vld [vmem:[#allocation16_spill] sm:$0xff] }
 0x190   : > { %v1728_v61 = vsel %vm1710_vm3, %v1695_v11, %v4028_v16  ;;  %v5112_v11 = vld [vmem:[#allocation47_spill] sm:$0xff] }
 0x191   : > { %1212 = vrot.lane.b32.xlu1 %v2848_v29, %s3155_s27  ;;  %1180 = vrot.lane.b32.xlu0 %v2832_v58, %s3155_s27  ;;  %v1761_v29 = vsel %vm1743_vm4, %v1728_v61, %v4183_v43  ;;  %v1680_v55 = vsel %vm1677_vm2, %v1647_v46, %v5112_v11  ;;  %v2819_v61 = vld [vmem:[%s3237_s8 + $0x159] sm:$0xff] }
 0x192   : > { %v1794_v20 = vsel %vm1776_vm5, %v1761_v29, %v4195_v39  ;;  %v2770_v39 = vld [vmem:[%s3237_s8 + $0x90] sm:$0xff]  ;;  %v5115_v51 = vld [vmem:[#allocation19_spill] sm:$0xff]  ;;  %v5118_v11 = vld [vmem:[#allocation30_spill] sm:$0xff] }
 0x193   : > { %v1551_v33 = vpop.permute.xlu1 %1550  ;;  %v1201_v62 = vpop.permute.xlu0 %1200  ;;  %v1827_v16 = vsel %vm1809_vm6, %v1794_v20, %v4205_v52  ;;  %v1648_v46 = vsel %vm1644_vm1, %v5115_v51, %v5114_v44 }
 0x194   : > { %v1877_v58 = vsel %vm1875_vm8, %v1844_v12, %v1551_v33  ;;  %v1860_v30 = vsel %vm1842_vm7, %v1827_v16, %v1455_v9  ;;  %v2771_v9 = vld [vmem:[%s3237_s8 + $0x98] sm:$0xff]  ;;  %v1713_v33 = vsel %vm1710_vm3, %v1680_v55, %v3918_v59 }
 0x195   : > { %1594 = vrot.lane.b32.xlu1 %v2849_v56, %s3158_s9  ;;  %1562 = vrot.lane.b32.xlu0 %v2833_v28, %s3158_s9  ;;  %v2803_v12 = vld [vmem:[%s3237_s8 + $0x99] sm:$0xff]  ;;  %v1746_v16 = vsel %vm1743_vm4, %v1713_v33, %v4164_v21 }
 0x196   : > { %2954 = vmatmul.mubr.msk.f32.vlgmr.msra.gmra.mrb[0].mxu0 %vm1940_vm9, %v1877_v58 }
 0x197   : > { %v4284_v13 = vpop.permute.xlu1 %1170  ;;  %v1583_v43 = vpop.permute.xlu0 %1582 }
 0x198   : > { %v1893_v34 = vsel %vm1875_vm8, %v1860_v30, %v1583_v43  ;;  %v1779_v43 = vsel %vm1776_vm5, %v1746_v16, %v1169_v35 }
 0x199   : > { %1214 = vrot.lane.b32.xlu1 %v2849_v56, %s3155_s27  ;;  %1182 = vrot.lane.b32.xlu0 %v2833_v28, %s3155_s27  ;;  %v5113_v56 = vld [vmem:[#allocation49_spill] sm:$0xff] }
 0x19a   : > { %2978 = vmatmul.mubr.msk.f32.vlgmr.msra.gmra.mrb[0].mxu1 %vm1940_vm9, %v1893_v34 }
 0x19b   : > { %v1297_v17 = vpop.permute.xlu1 %1296  ;;  %v4291_v52 = vpop.permute.xlu0 %1202 }
 0x19c   : > { %v1812_v59 = vsel %vm1809_vm6, %v1779_v43, %v1297_v17  ;;  %v5116_v17 = vld [vmem:[#allocation46_spill] sm:$0xff] }
 0x19d   : > { %1340 = vrot.lane.b32.xlu1 %v5090_v0, %s3156_s6  ;;  %1308 = vrot.lane.b32.xlu0 %v2770_v39, %s3156_s6  ;;  %v2850_v39 = vld [vmem:[%s3237_s8 + $0x152] sm:$0xff] }
 0x19f   : > { %v1299_v10 = vpop.permute.xlu1 %1298  ;;  %v1329_v54 = vpop.permute.xlu0 %1328 }
 0x1a1   : > { %1342 = vrot.lane.b32.xlu1 %v5088_v6, %s3156_s6  ;;  %1310 = vrot.lane.b32.xlu0 %v2771_v9, %s3156_s6  ;;  %v5110_v6 = vld [vmem:[#allocation23_spill] sm:$0xff]  ;;  %v2834_v9 = vld [vmem:[%s3237_s8 + $0x92] sm:$0xff] }
 0x1a2   : > { %v1663_v22 = vsel %vm1644_vm1, %v5111_v48, %v5110_v6 }
 0x1a3   : > { %v1425_v42 = vpop.permute.xlu1 %1424  ;;  %v1331_v7 = vpop.permute.xlu0 %1330  ;;  %v1696_v28 = vsel %vm1677_vm2, %v1663_v22, %v5113_v56  ;;  %v5117_v22 = vld [vmem:[#allocation22_spill] sm:$0xff] }
 0x1a4   : > { %v1729_v29 = vsel %vm1710_vm3, %v1696_v28, %v4038_v40  ;;  %v1664_v55 = vsel %vm1644_vm1, %v5118_v11, %v5117_v22 }
 0x1a5   : > { %1468 = vrot.lane.b32.xlu1 %v2818_v31, %s3157_s7  ;;  %1436 = vrot.lane.b32.xlu0 %v2802_v23, %s3157_s7  ;;  %v1762_v30 = vsel %vm1743_vm4, %v1729_v29, %v4212_v14 }
 0x1a6   : > { %v1795_v34 = vsel %vm1776_vm5, %v1762_v30, %v1201_v62 }
 0x1a7   : > { %v4304_v0 = vpop.permute.xlu1 %1076  ;;  %v1457_v49 = vpop.permute.xlu0 %1456  ;;  %v1828_v40 = vsel %vm1809_vm6, %v1795_v34, %v1329_v54  ;;  %v1681_v54 = vsel %vm1677_vm2, %v1648_v46, %v5116_v17 }
 0x1a8   : > { %v1861_v21 = vsel %vm1842_vm7, %v1828_v40, %v1457_v49  ;;  %v2772_v40 = vld [vmem:[%s3237_s8 + $0xa8] sm:$0xff] }
 0x1a9   : > { %1088 = vrot.lane.b32.xlu1 %v2818_v31, %s3154_s26  ;;  %1056 = vrot.lane.b32.xlu0 %v2802_v23, %s3154_s26  ;;  %v1845_v31 = vsel %vm1842_vm7, %v1812_v59, %v1425_v42  ;;  %v1714_v42 = vsel %vm1710_vm3, %v1681_v54, %v3916_v25  ;;  %v5119_v25 = vld [vmem:[#allocation48_spill] sm:$0xff]  ;;  %v1748_v54 = vsel %vm1743_vm4, %v3938_v19, %v4171_v18  ;;  %v2805_v19 = vld [vmem:[%s3237_s8 + $0xb1] sm:$0xff] }
 0x1aa   : > { %v1747_v48 = vsel %vm1743_vm4, %v1714_v42, %v4162_v60  ;;  %v1697_v28 = vsel %vm1677_vm2, %v1664_v55, %v5119_v25  ;;  %v1764_v42 = vsel %vm1743_vm4, %v4058_v27, %v4304_v0 }
 0x1ab   : > { %v1459_v58 = vpop.permute.xlu1 %1458  ;;  %v1427_v20 = vpop.permute.xlu0 %1426  ;;  %v1780_v56 = vsel %vm1776_vm5, %v1747_v48, %v4284_v13  ;;  %v1730_v60 = vsel %vm1710_vm3, %v1697_v28, %v4036_v63  ;;  %v2851_v63 = vld [vmem:[%s3237_s8 + $0x15a] sm:$0xff] }
 0x1ac   : > { %v1813_v33 = vsel %vm1809_vm6, %v1780_v56, %v1299_v10  ;;  %v1763_v13 = vsel %vm1743_vm4, %v1730_v60, %v4254_v24  ;;  %v2821_v56 = vld [vmem:[%s3237_s8 + $0x171] sm:$0xff] }
 0x1ad   : > { %1470 = vrot.lane.b32.xlu1 %v2819_v61, %s3157_s7  ;;  %1438 = vrot.lane.b32.xlu0 %v2803_v12, %s3157_s7  ;;  %v1846_v29 = vsel %vm1842_vm7, %v1813_v33, %v1427_v20  ;;  %v2835_v20 = vld [vmem:[%s3237_s8 + $0x9a] sm:$0xff]  ;;  %v2852_v33 = vld [vmem:[%s3237_s8 + $0x16a] sm:$0xff] }
 0x1ae   : > { %v2836_v60 = vld [vmem:[%s3237_s8 + $0xaa] sm:$0xff] }
 0x1af   : > { %v1585_v23 = vpop.permute.xlu1 %1584  ;;  %v1553_v14 = vpop.permute.xlu0 %1552 }
 0x1b0   : > { %v1894_v35 = vsel %vm1875_vm8, %v1861_v21, %v1585_v23  ;;  %v1878_v62 = vsel %vm1875_vm8, %v1845_v31, %v1553_v14  ;;  %v2789_v31 = vld [vmem:[%s3237_s8 + $0x170] sm:$0xff] }
 0x1b1   : > { %1596 = vrot.lane.b32.xlu1 %v2850_v39, %s3158_s9  ;;  %1564 = vrot.lane.b32.xlu0 %v2834_v9, %s3158_s9  ;;  %v2773_v21 = vld [vmem:[%s3237_s8 + $0xb0] sm:$0xff] }
 0x1b2   : > { %2956 = vmatprep.mubr.msk.f32.mxu0 %vm1940_vm9, %v1878_v62  ;;  %2980 = vmatprep.mubr.msk.f32.mxu1 %vm1940_vm9, %v1894_v35  ;;  %v2820_v35 = vld [vmem:[%s3237_s8 + $0x169] sm:$0xff] }
 0x1b3   : > { %v1173_v49 = vpop.permute.xlu1 %1172  ;;  %v4351_v6 = vpop.permute.xlu0 %1078  ;;  %v2804_v62 = vld [vmem:[%s3237_s8 + $0xa9] sm:$0xff] }
 0x1b4   : > { %v1781_v48 = vsel %vm1776_vm5, %v1748_v54, %v1173_v49 }
 0x1b5   : > { %1090 = vrot.lane.b32.xlu1 %v2819_v61, %s3154_s26  ;;  %1058 = vrot.lane.b32.xlu0 %v2803_v12, %s3154_s26  ;;  %v1796_v12 = vsel %vm1776_vm5, %v1763_v13, %v4291_v52 }
 0x1b6   : > { %v1829_v10 = vsel %vm1809_vm6, %v1796_v12, %v1331_v7  ;;  %v1765_v12 = vsel %vm1743_vm4, %v4055_v2, %v4351_v6 }
 0x1b7   : > { %v1555_v16 = vpop.permute.xlu1 %1554  ;;  %v1205_v30 = vpop.permute.xlu0 %1204  ;;  %v1862_v43 = vsel %vm1842_vm7, %v1829_v10, %v1459_v58  ;;  %v2788_v58 = vld [vmem:[%s3237_s8 + $0x168] sm:$0xff] }
 0x1b8   : > { %v1879_v61 = vsel %vm1875_vm8, %v1846_v29, %v1555_v16  ;;  %v1797_v22 = vsel %vm1776_vm5, %v1764_v42, %v1205_v30 }
 0x1b9   : > { %1216 = vrot.lane.b32.xlu1 %v2850_v39, %s3155_s27  ;;  %1184 = vrot.lane.b32.xlu0 %v2834_v9, %s3155_s27 }
 0x1ba   : > { %2957 = vmatmul.mubr.msk.f32.gmra.mrb[2].mxu0 %vm1940_vm9, %v1879_v61  ;;  %v1749_v61 = vsel %vm1743_vm4, %v3935_v5, %v4169_v36 }
 0x1bb   : > { %v1175_v24 = vpop.permute.xlu1 %1174  ;;  %v1587_v34 = vpop.permute.xlu0 %1586 }
 0x1bc   : > { %v1895_v52 = vsel %vm1875_vm8, %v1862_v43, %v1587_v34  ;;  %v1782_v10 = vsel %vm1776_vm5, %v1749_v61, %v1175_v24 }
 0x1bd   : > { %1598 = vrot.lane.b32.xlu1 %v2851_v63, %s3158_s9  ;;  %1566 = vrot.lane.b32.xlu0 %v2835_v20, %s3158_s9 }
 0x1be   : > { %2981 = vmatmul.mubr.msk.f32.gmra.mrb[2].mxu1 %vm1940_vm9, %v1895_v52  ;;  %v2853_v52 = vld [vmem:[%s3237_s8 + $0x172] sm:$0xff] }
 0x1bf   : > { %v1301_v7 = vpop.permute.xlu1 %1300  ;;  %v1207_v59 = vpop.permute.xlu0 %1206 }
 0x1c0   : > { %v1814_v11 = vsel %vm1809_vm6, %v1781_v48, %v1301_v7  ;;  %v2837_v7 = vld [vmem:[%s3237_s8 + $0xb2] sm:$0xff] }
 0x1c1   : > { %1218 = vrot.lane.b32.xlu1 %v2851_v63, %s3155_s27  ;;  %1186 = vrot.lane.b32.xlu0 %v2835_v20, %s3155_s27  ;;  %v1798_v63 = vsel %vm1776_vm5, %v1765_v12, %v1207_v59 }
 0x1c3   : > { %v1303_v39 = vpop.permute.xlu1 %1302  ;;  %v1333_v9 = vpop.permute.xlu0 %1332 }
 0x1c4   : > { %v1830_v55 = vsel %vm1809_vm6, %v1797_v22, %v1333_v9  ;;  %v1815_v20 = vsel %vm1809_vm6, %v1782_v10, %v1303_v39  ;;  %v2790_v9 = vld [vmem:[%s3237_s8 + $0x180] sm:$0xff] }
 0x1c5   : > { %1344 = vrot.lane.b32.xlu1 %v2788_v58, %s3156_s6  ;;  %1312 = vrot.lane.b32.xlu0 %v2772_v40, %s3156_s6 }
 0x1c7   : > { %v1429_v23 = vpop.permute.xlu1 %1428  ;;  %v1335_v14 = vpop.permute.xlu0 %1334 }
 0x1c8   : > { %v1847_v18 = vsel %vm1842_vm7, %v1814_v11, %v1429_v23  ;;  %v1831_v43 = vsel %vm1809_vm6, %v1798_v63, %v1335_v14  ;;  %v2791_v14 = vld [vmem:[%s3237_s8 + $0x188] sm:$0xff]  ;;  %v1750_v11 = vsel %vm1743_vm4, %v3958_v53, %v4177_v41 }
 0x1c9   : > { %1346 = vrot.lane.b32.xlu1 %v2789_v31, %s3156_s6  ;;  %1314 = vrot.lane.b32.xlu0 %v2773_v21, %s3156_s6  ;;  %v2774_v31 = vld [vmem:[%s3237_s8 + $0xc0] sm:$0xff]  ;;  %v2807_v53 = vld [vmem:[%s3237_s8 + $0xc9] sm:$0xff] }
 0x1cb   : > { %v4396_v44 = vpop.permute.xlu1 %1080  ;;  %v1461_v51 = vpop.permute.xlu0 %1460 }
 0x1cc   : > { %v1863_v27 = vsel %vm1842_vm7, %v1830_v55, %v1461_v51  ;;  %v1766_v55 = vsel %vm1743_vm4, %v4078_v26, %v4396_v44 }
 0x1cd   : > { %1472 = vrot.lane.b32.xlu1 %v2820_v35, %s3157_s7  ;;  %1440 = vrot.lane.b32.xlu0 %v2804_v62, %s3157_s7 }
 0x1cf   : > { %v1463_v46 = vpop.permute.xlu1 %1462  ;;  %v1431_v17 = vpop.permute.xlu0 %1430 }
 0x1d0   : > { %v1864_v5 = vsel %vm1842_vm7, %v1831_v43, %v1463_v46  ;;  %v1848_v36 = vsel %vm1842_vm7, %v1815_v20, %v1431_v17  ;;  %v2822_v46 = vld [vmem:[%s3237_s8 + $0x181] sm:$0xff] }
 0x1d1   : > { %1092 = vrot.lane.b32.xlu1 %v2820_v35, %s3154_s26  ;;  %1060 = vrot.lane.b32.xlu0 %v2804_v62, %s3154_s26  ;;  %v2775_v35 = vld [vmem:[%s3237_s8 + $0xc8] sm:$0xff] }
 0x1d2   : > { %v2806_v17 = vld [vmem:[%s3237_s8 + $0xc1] sm:$0xff] }
 0x1d3   : > { %v1589_v0 = vpop.permute.xlu1 %1588  ;;  %v1557_v49 = vpop.permute.xlu0 %1556 }
 0x1d4   : > { %v1896_v25 = vsel %vm1875_vm8, %v1863_v27, %v1589_v0  ;;  %v1880_v28 = vsel %vm1875_vm8, %v1847_v18, %v1557_v49  ;;  %v2823_v0 = vld [vmem:[%s3237_s8 + $0x189] sm:$0xff] }
 0x1d5   : > { %1474 = vrot.lane.b32.xlu1 %v2821_v56, %s3157_s7  ;;  %1442 = vrot.lane.b32.xlu0 %v2805_v19, %s3157_s7 }
 0x1d6   : > { %2959 = vmatprep.mubr.msk.f32.mxu0 %vm1940_vm9, %v1880_v28  ;;  %2983 = vmatprep.mubr.msk.f32.mxu1 %vm1940_vm9, %v1896_v25 }
 0x1d7   : > { %v4424_v29 = vpop.permute.xlu1 %1082  ;;  %v4426_v16 = vpop.permute.xlu0 %1050 }
 0x1d8   : > { %v1767_v10 = vsel %vm1743_vm4, %v4075_v37, %v4424_v29  ;;  %v1751_v63 = vsel %vm1743_vm4, %v3955_v1, %v4426_v16 }
 0x1d9   : > { %1600 = vrot.lane.b32.xlu1 %v2852_v33, %s3158_s9  ;;  %1568 = vrot.lane.b32.xlu0 %v2836_v60, %s3158_s9 }
 0x1db   : > { %v1209_v30 = vpop.permute.xlu1 %1208  ;;  %v1177_v13 = vpop.permute.xlu0 %1176 }
 0x1dd   : > { %1094 = vrot.lane.b32.xlu1 %v2821_v56, %s3154_s26  ;;  %1062 = vrot.lane.b32.xlu0 %v2805_v19, %s3154_s26  ;;  %v1799_v56 = vsel %vm1776_vm5, %v1766_v55, %v1209_v30  ;;  %v1783_v19 = vsel %vm1776_vm5, %v1750_v11, %v1177_v13 }
 0x1df   : > { %v1591_v34 = vpop.permute.xlu1 %1590  ;;  %v1559_v2 = vpop.permute.xlu0 %1558 }
 0x1e0   : > { %v1897_v6 = vsel %vm1875_vm8, %v1864_v5, %v1591_v34  ;;  %v1881_v24 = vsel %vm1875_vm8, %v1848_v36, %v1559_v2 }
 0x1e1   : > { %1220 = vrot.lane.b32.xlu1 %v2852_v33, %s3155_s27  ;;  %1188 = vrot.lane.b32.xlu0 %v2836_v60, %s3155_s27  ;;  %v2854_v33 = vld [vmem:[%s3237_s8 + $0x182] sm:$0xff] }
 0x1e2   : > { %2960 = vmatmul.mubr.msk.f32.gmra.mrb[4].mxu0 %vm1940_vm9, %v1881_v24  ;;  %2984 = vmatmul.mubr.msk.f32.gmra.mrb[4].mxu1 %vm1940_vm9, %v1897_v6  ;;  %v2838_v60 = vld [vmem:[%s3237_s8 + $0xc2] sm:$0xff]  ;;  %v2855_v6 = vld [vmem:[%s3237_s8 + $0x18a] sm:$0xff] }
 0x1e3   : > { %v1211_v59 = vpop.permute.xlu1 %1210  ;;  %v1179_v58 = vpop.permute.xlu0 %1178  ;;  %v2839_v24 = vld [vmem:[%s3237_s8 + $0xca] sm:$0xff] }
 0x1e4   : > { %v1800_v20 = vsel %vm1776_vm5, %v1767_v10, %v1211_v59  ;;  %v1784_v43 = vsel %vm1776_vm5, %v1751_v63, %v1179_v58 }
 0x1e5   : > { %1602 = vrot.lane.b32.xlu1 %v2853_v52, %s3158_s9  ;;  %1570 = vrot.lane.b32.xlu0 %v2837_v7, %s3158_s9 }
 0x1e7   : > { %v1337_v40 = vpop.permute.xlu1 %1336  ;;  %v1305_v39 = vpop.permute.xlu0 %1304 }
 0x1e8   : > { %v1832_v18 = vsel %vm1809_vm6, %v1799_v56, %v1337_v40  ;;  %v1816_v27 = vsel %vm1809_vm6, %v1783_v19, %v1305_v39  ;;  %v2792_v40 = vld [vmem:[%s3237_s8 + $0x198] sm:$0xff] }
 0x1e9   : > { %1222 = vrot.lane.b32.xlu1 %v2853_v52, %s3155_s27  ;;  %1190 = vrot.lane.b32.xlu0 %v2837_v7, %s3155_s27  ;;  %v2776_v39 = vld [vmem:[%s3237_s8 + $0xd8] sm:$0xff] }
 0x1eb   : > { %v1339_v21 = vpop.permute.xlu1 %1338  ;;  %v1307_v23 = vpop.permute.xlu0 %1306 }
 0x1ec   : > { %v1833_v5 = vsel %vm1809_vm6, %v1800_v20, %v1339_v21  ;;  %v1817_v36 = vsel %vm1809_vm6, %v1784_v43, %v1307_v23  ;;  %v2793_v21 = vld [vmem:[%s3237_s8 + $0x1a0] sm:$0xff] }
 0x1ed   : > { %1348 = vrot.lane.b32.xlu1 %v2790_v9, %s3156_s6  ;;  %1316 = vrot.lane.b32.xlu0 %v2774_v31, %s3156_s6  ;;  %v2777_v23 = vld [vmem:[%s3237_s8 + $0xe0] sm:$0xff] }
 0x1ef   : > { %v1465_v62 = vpop.permute.xlu1 %1464  ;;  %v1433_v51 = vpop.permute.xlu0 %1432 }
 0x1f0   : > { %v1865_v41 = vsel %vm1842_vm7, %v1832_v18, %v1465_v62  ;;  %v1849_v26 = vsel %vm1842_vm7, %v1816_v27, %v1433_v51  ;;  %v2824_v62 = vld [vmem:[%s3237_s8 + $0x199] sm:$0xff] }
 0x1f1   : > { %1350 = vrot.lane.b32.xlu1 %v2791_v14, %s3156_s6  ;;  %1318 = vrot.lane.b32.xlu0 %v2775_v35, %s3156_s6  ;;  %v2808_v51 = vld [vmem:[%s3237_s8 + $0xd9] sm:$0xff] }
 0x1f3   : > { %v4466_v54 = vpop.permute.xlu1 %1084  ;;  %v4468_v42 = vpop.permute.xlu0 %1052 }
 0x1f4   : > { %v1768_v56 = vsel %vm1743_vm4, %v4098_v15, %v4466_v54  ;;  %v1752_v19 = vsel %vm1743_vm4, %v3978_v38, %v4468_v42  ;;  %v2840_v15 = vld [vmem:[%s3237_s8 + $0xda] sm:$0xff] }
 0x1f5   : > { %1476 = vrot.lane.b32.xlu1 %v2822_v46, %s3157_s7  ;;  %1444 = vrot.lane.b32.xlu0 %v2806_v17, %s3157_s7 }
 0x1f7   : > { %v1467_v48 = vpop.permute.xlu1 %1466  ;;  %v1435_v22 = vpop.permute.xlu0 %1434 }
 0x1f8   : > { %v1866_v37 = vsel %vm1842_vm7, %v1833_v5, %v1467_v48  ;;  %v1850_v29 = vsel %vm1842_vm7, %v1817_v36, %v1435_v22  ;;  %v2825_v48 = vld [vmem:[%s3237_s8 + $0x1a1] sm:$0xff] }
 0x1f9   : > { %1096 = vrot.lane.b32.xlu1 %v2822_v46, %s3154_s26  ;;  %1064 = vrot.lane.b32.xlu0 %v2806_v17, %s3154_s26  ;;  %v2809_v22 = vld [vmem:[%s3237_s8 + $0xe1] sm:$0xff] }
 0x1fb   : > { %v1593_v44 = vpop.permute.xlu1 %1592  ;;  %v1561_v49 = vpop.permute.xlu0 %1560 }
 0x1fc   : > { %v1898_v25 = vsel %vm1875_vm8, %v1865_v41, %v1593_v44  ;;  %v1882_v28 = vsel %vm1875_vm8, %v1849_v26, %v1561_v49  ;;  %v2856_v41 = vld [vmem:[%s3237_s8 + $0x19a] sm:$0xff] }
 0x1fd   : > { %1478 = vrot.lane.b32.xlu1 %v2823_v0, %s3157_s7  ;;  %1446 = vrot.lane.b32.xlu0 %v2807_v53, %s3157_s7 }
 0x1fe   : > { %2962 = vmatprep.mubr.msk.f32.mxu0 %vm1940_vm9, %v1882_v28  ;;  %2986 = vmatprep.mubr.msk.f32.mxu1 %vm1940_vm9, %v1898_v25  ;;  %v2857_v25 = vld [vmem:[%s3237_s8 + $0x1a2] sm:$0xff] }
 0x1ff   : > { %v4496_v30 = vpop.permute.xlu1 %1086  ;;  %v4498_v13 = vpop.permute.xlu0 %1054  ;;  %v2841_v28 = vld [vmem:[%s3237_s8 + $0xe2] sm:$0xff] }
 0x200   : > { %v1769_v10 = vsel %vm1743_vm4, %v4095_v45, %v4496_v30  ;;  %v1753_v63 = vsel %vm1743_vm4, %v3975_v32, %v4498_v13 }
 0x201   : > { %1604 = vrot.lane.b32.xlu1 %v2854_v33, %s3158_s9  ;;  %1572 = vrot.lane.b32.xlu0 %v2838_v60, %s3158_s9 }
 0x203   : > { %v1213_v61 = vpop.permute.xlu1 %1212  ;;  %v1181_v12 = vpop.permute.xlu0 %1180 }
 0x204   : > { %v1801_v18 = vsel %vm1776_vm5, %v1768_v56, %v1213_v61  ;;  %v1785_v27 = vsel %vm1776_vm5, %v1752_v19, %v1181_v12 }
 0x205   : > { %1098 = vrot.lane.b32.xlu1 %v2823_v0, %s3154_s26  ;;  %1066 = vrot.lane.b32.xlu0 %v2807_v53, %s3154_s26 }
 0x207   : > { %v1595_v34 = vpop.permute.xlu1 %1594  ;;  %v1563_v1 = vpop.permute.xlu0 %1562 }
 0x208   : > { %v1899_v16 = vsel %vm1875_vm8, %v1866_v37, %v1595_v34  ;;  %v1883_v2 = vsel %vm1875_vm8, %v1850_v29, %v1563_v1 }
 0x209   : > { %1224 = vrot.lane.b32.xlu1 %v2854_v33, %s3155_s27  ;;  %1192 = vrot.lane.b32.xlu0 %v2838_v60, %s3155_s27 }
 0x20a   : > { %2963 = vmatmul.mubr.msk.f32.gmra.mrb[6].mxu0 %vm1940_vm9, %v1883_v2  ;;  %2987 = vmatmul.mubr.msk.f32.gmra.mrb[6].mxu1 %vm1940_vm9, %v1899_v16 }
 0x20b   : > { %v1215_v52 = vpop.permute.xlu1 %1214  ;;  %v1183_v7 = vpop.permute.xlu0 %1182 }
 0x20c   : > { %v1802_v20 = vsel %vm1776_vm5, %v1769_v10, %v1215_v52  ;;  %v1786_v43 = vsel %vm1776_vm5, %v1753_v63, %v1183_v7 }
 0x20d   : > { %1606 = vrot.lane.b32.xlu1 %v2855_v6, %s3158_s9  ;;  %1574 = vrot.lane.b32.xlu0 %v2839_v24, %s3158_s9 }
 0x20f   : > { %v1341_v59 = vpop.permute.xlu1 %1340  ;;  %v1309_v58 = vpop.permute.xlu0 %1308 }
 0x210   : > { %v1834_v0 = vsel %vm1809_vm6, %v1801_v18, %v1341_v59  ;;  %v1818_v53 = vsel %vm1809_vm6, %v1785_v27, %v1309_v58 }
 0x211   : > { %1226 = vrot.lane.b32.xlu1 %v2855_v6, %s3155_s27  ;;  %1194 = vrot.lane.b32.xlu0 %v2839_v24, %s3155_s27 }
 0x213   : > { %v1343_v9 = vpop.permute.xlu1 %1342  ;;  %v1311_v31 = vpop.permute.xlu0 %1310 }
 0x214   : > { %v1835_v5 = vsel %vm1809_vm6, %v1802_v20, %v1343_v9  ;;  %v1819_v36 = vsel %vm1809_vm6, %v1786_v43, %v1311_v31 }
 0x215   : > { %1352 = vrot.lane.b32.xlu1 %v2792_v40, %s3156_s6  ;;  %1320 = vrot.lane.b32.xlu0 %v2776_v39, %s3156_s6 }
 0x217   : > { %v1469_v14 = vpop.permute.xlu1 %1468  ;;  %v1437_v35 = vpop.permute.xlu0 %1436 }
 0x218   : > { %v1867_v54 = vsel %vm1842_vm7, %v1834_v0, %v1469_v14  ;;  %v1851_v38 = vsel %vm1842_vm7, %v1818_v53, %v1437_v35 }
 0x219   : > { %1354 = vrot.lane.b32.xlu1 %v2793_v21, %s3156_s6  ;;  %1322 = vrot.lane.b32.xlu0 %v2777_v23, %s3156_s6 }
 0x21b   : > { %v4538_v46 = vpop.permute.xlu1 %1088  ;;  %v4540_v17 = vpop.permute.xlu0 %1056 }
 0x21c   : > { %v1770_v9 = vsel %vm1743_vm4, %v4118_v50, %v4538_v46  ;;  %v1754_v31 = vsel %vm1743_vm4, %v3998_v47, %v4540_v17 }
 0x21d   : > { %1480 = vrot.lane.b32.xlu1 %v2824_v62, %s3157_s7  ;;  %1448 = vrot.lane.b32.xlu0 %v2808_v51, %s3157_s7 }
 0x21f   : > { %v1471_v11 = vpop.permute.xlu1 %1470  ;;  %v1439_v55 = vpop.permute.xlu0 %1438 }
 0x220   : > { %v1868_v37 = vsel %vm1842_vm7, %v1835_v5, %v1471_v11  ;;  %v1852_v29 = vsel %vm1842_vm7, %v1819_v36, %v1439_v55 }
 0x221   : > { %1482 = vrot.lane.b32.xlu1 %v2825_v48, %s3157_s7  ;;  %1450 = vrot.lane.b32.xlu0 %v2809_v22, %s3157_s7 }
 0x223   : > { %v1597_v42 = vpop.permute.xlu1 %1596  ;;  %v1565_v26 = vpop.permute.xlu0 %1564 }
 0x224   : > { %v1900_v44 = vsel %vm1875_vm8, %v1867_v54, %v1597_v42  ;;  %v1884_v49 = vsel %vm1875_vm8, %v1851_v38, %v1565_v26 }
 0x225   : > { %1608 = vrot.lane.b32.xlu1 %v2856_v41, %s3158_s9  ;;  %1576 = vrot.lane.b32.xlu0 %v2840_v15, %s3158_s9 }
 0x226   : > { %2965 = vmatprep.mubr.msk.f32.mxu0 %vm1940_vm9, %v1884_v49  ;;  %2989 = vmatprep.mubr.msk.f32.mxu1 %vm1940_vm9, %v1900_v44 }
 0x227   : > { %v1091_v33 = vpop.permute.xlu1 %1090  ;;  %v1059_v60 = vpop.permute.xlu0 %1058 }
 0x228   : > { %v1771_v56 = vsel %vm1743_vm4, %v4115_v3, %v1091_v33  ;;  %v1755_v19 = vsel %vm1743_vm4, %v3995_v8, %v1059_v60 }
 0x229   : > { %1610 = vrot.lane.b32.xlu1 %v2857_v25, %s3158_s9  ;;  %1578 = vrot.lane.b32.xlu0 %v2841_v28, %s3158_s9 }
 0x22b   : > { %v1217_v61 = vpop.permute.xlu1 %1216  ;;  %v1185_v12 = vpop.permute.xlu0 %1184 }
 0x22c   : > { %v1803_v21 = vsel %vm1776_vm5, %v1770_v9, %v1217_v61  ;;  %v1787_v23 = vsel %vm1776_vm5, %v1754_v31, %v1185_v12  ;;  %v1909_v61 = vld [vmem:[%s3247_s17 + $0x8] sm:$0xff]  ;;  %v1908_v12 = vld [vmem:[%s3247_s17] sm:$0xff] }
 0x22f   : > { %v1599_v34 = vpop.permute.xlu1 %1598  ;;  %v1567_v1 = vpop.permute.xlu0 %1566 }
 0x230   : > { %v1901_v45 = vsel %vm1875_vm8, %v1868_v37, %v1599_v34  ;;  %v1885_v30 = vsel %vm1875_vm8, %v1852_v29, %v1567_v1  ;;  %v1925_v37 = vld [vmem:[%s3247_s17 + $0x88] sm:$0xff]  ;;  %v1924_v29 = vld [vmem:[%s3247_s17 + $0x80] sm:$0xff] }
 0x231   : > { %2966 = vmatmul.mubr.msk.f32.gmra.mrb[8].mxu0 %vm1940_vm9, %v1885_v30  ;;  %2990 = vmatmul.mubr.msk.f32.gmra.mrb[8].mxu1 %vm1940_vm9, %v1901_v45 }
 0x233   : > { %v1219_v32 = vpop.permute.xlu1 %1218  ;;  %v1187_v13 = vpop.permute.xlu0 %1186 }
 0x234   : > { %v1804_v18 = vsel %vm1776_vm5, %v1771_v56, %v1219_v32  ;;  %v1788_v27 = vsel %vm1776_vm5, %v1755_v19, %v1187_v13 }
 0x237   : > { %v1345_v16 = vpop.permute.xlu1 %1344  ;;  %v1313_v2 = vpop.permute.xlu0 %1312 }
 0x238   : > { %v1836_v14 = vsel %vm1809_vm6, %v1803_v21, %v1345_v16  ;;  %v1820_v35 = vsel %vm1809_vm6, %v1787_v23, %v1313_v2 }
 0x23b   : > { %v1347_v6 = vpop.permute.xlu1 %1346  ;;  %v1315_v24 = vpop.permute.xlu0 %1314 }
 0x23c   : > { %v1837_v0 = vsel %vm1809_vm6, %v1804_v18, %v1347_v6  ;;  %v1821_v53 = vsel %vm1809_vm6, %v1788_v27, %v1315_v24 }
 0x23f   : > { %v1473_v52 = vpop.permute.xlu1 %1472  ;;  %v1441_v7 = vpop.permute.xlu0 %1440 }
 0x240   : > { %v1869_v62 = vsel %vm1842_vm7, %v1836_v14, %v1473_v52  ;;  %v1853_v51 = vsel %vm1842_vm7, %v1820_v35, %v1441_v7  ;;  %v5120_v14 = vld [vmem:[#allocation11_spill] sm:$0xff] }
 0x243   : > { %v4588_v59 = vpop.permute.xlu1 %1092  ;;  %v4590_v58 = vpop.permute.xlu0 %1060 }
 0x244   : > { %v1772_v16 = vsel %vm1743_vm4, %v4138_v57, %v4588_v59  ;;  %v1756_v2 = vsel %vm1743_vm4, %v4010_v4, %v4590_v58 }
 0x247   : > { %v1475_v40 = vpop.permute.xlu1 %1474  ;;  %v1443_v39 = vpop.permute.xlu0 %1442 }
 0x248   : > { %v1870_v41 = vsel %vm1842_vm7, %v1837_v0, %v1475_v40  ;;  %v1854_v15 = vsel %vm1842_vm7, %v1821_v53, %v1443_v39 }
 0x24b   : > { %v1601_v48 = vpop.permute.xlu1 %1600  ;;  %v1569_v22 = vpop.permute.xlu0 %1568 }
 0x24c   : > { %v1902_v50 = vsel %vm1875_vm8, %v1869_v62, %v1601_v48  ;;  %v1886_v46 = vsel %vm1875_vm8, %v1853_v51, %v1569_v22  ;;  %v5121_v62 = vld [vmem:[#allocation50_spill] sm:$0xff] }
 0x24d   : > { %2968 = vmatprep.mubr.msk.f32.mxu0 %vm1940_vm9, %v1886_v46  ;;  %2992 = vmatprep.mubr.msk.f32.mxu1 %vm1940_vm9, %v1902_v50 }
 0x24f   : > { %v4608_v47 = vpop.permute.xlu1 %1094  ;;  %v4610_v17 = vpop.permute.xlu0 %1062 }
 0x250   : > { %v1773_v35 = vsel %vm1743_vm4, %v5120_v14, %v4608_v47  ;;  %v1757_v51 = vsel %vm1743_vm4, %v5121_v62, %v4610_v17  ;;  %v1913_v14 = vld [vmem:[%s3247_s17 + $0x28] sm:$0xff]  ;;  %v1912_v62 = vld [vmem:[%s3247_s17 + $0x20] sm:$0xff] }
 0x253   : > { %v1221_v11 = vpop.permute.xlu1 %1220  ;;  %v1189_v55 = vpop.permute.xlu0 %1188 }
 0x254   : > { %v1805_v6 = vsel %vm1776_vm5, %v1772_v16, %v1221_v11  ;;  %v1789_v24 = vsel %vm1776_vm5, %v1756_v2, %v1189_v55  ;;  %v5124_v2 = vld [vmem:[#allocation7_spill] sm:$0xff] }
 0x257   : > { %v1603_v54 = vpop.permute.xlu1 %1602  ;;  %v1571_v38 = vpop.permute.xlu0 %1570 }
 0x258   : > { %v1903_v3 = vsel %vm1875_vm8, %v1870_v41, %v1603_v54  ;;  %v1887_v8 = vsel %vm1875_vm8, %v1854_v15, %v1571_v38  ;;  %v1911_v54 = vld [vmem:[%s3247_s17 + $0x18] sm:$0xff]  ;;  %v1910_v38 = vld [vmem:[%s3247_s17 + $0x10] sm:$0xff] }
 0x259   : > { %2969 = vmatmul.mubr.msk.f32.gmra.mrb[10].mxu0 %vm1940_vm9, %v1887_v8  ;;  %2993 = vmatmul.mubr.msk.f32.gmra.mrb[10].mxu1 %vm1940_vm9, %v1903_v3 }
 0x25b   : > { %v1223_v42 = vpop.permute.xlu1 %1222  ;;  %v1191_v26 = vpop.permute.xlu0 %1190 }
 0x25c   : > { %v1806_v48 = vsel %vm1776_vm5, %v1773_v35, %v1223_v42  ;;  %v1790_v22 = vsel %vm1776_vm5, %v1757_v51, %v1191_v26  ;;  %v1929_v35 = vld [vmem:[%s3247_s17 + $0xa8] sm:$0xff]  ;;  %v1928_v51 = vld [vmem:[%s3247_s17 + $0xa0] sm:$0xff] }
 0x25f   : > { %v1349_v44 = vpop.permute.xlu1 %1348  ;;  %v1317_v49 = vpop.permute.xlu0 %1316 }
 0x260   : > { %v1838_v52 = vsel %vm1809_vm6, %v1805_v6, %v1349_v44  ;;  %v1822_v7 = vsel %vm1809_vm6, %v1789_v24, %v1317_v49  ;;  %v5125_v6 = vld [vmem:[#allocation3_spill] sm:$0xff] }
 0x263   : > { %v1351_v25 = vpop.permute.xlu1 %1350  ;;  %v1319_v28 = vpop.permute.xlu0 %1318 }
 0x264   : > { %v1839_v50 = vsel %vm1809_vm6, %v1806_v48, %v1351_v25  ;;  %v1823_v46 = vsel %vm1809_vm6, %v1790_v22, %v1319_v28  ;;  %v1927_v25 = vld [vmem:[%s3247_s17 + $0x98] sm:$0xff]  ;;  %v1926_v28 = vld [vmem:[%s3247_s17 + $0x90] sm:$0xff] }
 0x267   : > { %v1477_v33 = vpop.permute.xlu1 %1476  ;;  %v1445_v60 = vpop.permute.xlu0 %1444 }
 0x268   : > { %v1871_v40 = vsel %vm1842_vm7, %v1838_v52, %v1477_v33  ;;  %v1855_v57 = vsel %vm1842_vm7, %v1822_v7, %v1445_v60 }
 0x269   : > { %v2955_v10 = vpop.f32.mrb[0].mxu0 }
 0x26a   : > { %v2263_v63 = vadd.f32 %v2955_v10, %v1909_v61  ;;  %v2103_v20 = vpop.f32.mrb[1].mxu0 }
 0x26b   : > { %v2262_v43 = vadd.f32 %v2103_v20, %v1908_v12  ;;  %v4628_v5 = vpop.permute.xlu1 %1096  ;;  %v4630_v36 = vpop.permute.xlu0 %1064  ;;  %v5122_v20 = vld [vmem:[#allocation6_spill] sm:$0xff] }
 0x26c   : > { %2295 = vst.msk [vmem:[%s3247_s17 + $0x8] sm:$0xff] %vm1644_vm1, %v2263_v63 }
 0x26d   : > { %2294 = vst.msk [vmem:[%s3247_s17] sm:$0xff] %vm1644_vm1, %v2262_v43  ;;  %v2979_v34 = vpop.f32.mrb[0].mxu1  ;;  %v1774_v43 = vsel %vm1743_vm4, %v5122_v20, %v4628_v5  ;;  %v1919_v20 = vld [vmem:[%s3247_s17 + $0x58] sm:$0xff] }
 0x26e   : > { %v2279_v1 = vadd.f32 %v2979_v34, %v1925_v37  ;;  %v2183_v45 = vpop.f32.mrb[1].mxu1  ;;  %v5123_v37 = vld [vmem:[#allocation51_spill] sm:$0xff] }
 0x26f   : > { %v2278_v30 = vadd.f32 %v2183_v45, %v1924_v29  ;;  %v1479_v32 = vpop.permute.xlu1 %1478  ;;  %v1447_v13 = vpop.permute.xlu0 %1446  ;;  %v1758_v29 = vsel %vm1743_vm4, %v5123_v37, %v4630_v36  ;;  %v1918_v37 = vld [vmem:[%s3247_s17 + $0x50] sm:$0xff] }
 0x270   : > { %2311 = vst.msk [vmem:[%s3247_s17 + $0x88] sm:$0xff] %vm1644_vm1, %v2279_v1  ;;  %v1872_v11 = vsel %vm1842_vm7, %v1839_v50, %v1479_v32  ;;  %v1856_v55 = vsel %vm1842_vm7, %v1823_v46, %v1447_v13 }
 0x271   : > { %2310 = vst.msk [vmem:[%s3247_s17 + $0x80] sm:$0xff] %vm1644_vm1, %v2278_v30 }
 0x273   : > { %v1605_v59 = vpop.permute.xlu1 %1604  ;;  %v1573_v39 = vpop.permute.xlu0 %1572 }
 0x274   : > { %v1904_v4 = vsel %vm1875_vm8, %v1871_v40, %v1605_v59  ;;  %v1888_v58 = vsel %vm1875_vm8, %v1855_v57, %v1573_v39 }
 0x275   : > { %2971 = vmatprep.mubr.msk.f32.mxu0 %vm1940_vm9, %v1888_v58  ;;  %2995 = vmatprep.mubr.msk.f32.mxu1 %vm1940_vm9, %v1904_v4 }
 0x277   : > { %v1099_v9 = vpop.permute.xlu1 %1098  ;;  %v1067_v31 = vpop.permute.xlu0 %1066 }
 0x278   : > { %v1775_v36 = vsel %vm1743_vm4, %v5124_v2, %v1099_v9  ;;  %v1759_v24 = vsel %vm1743_vm4, %v5125_v6, %v1067_v31  ;;  %v1921_v2 = vld [vmem:[%s3247_s17 + $0x68] sm:$0xff]  ;;  %v1920_v6 = vld [vmem:[%s3247_s17 + $0x60] sm:$0xff] }
 0x27b   : > { %v1225_v21 = vpop.permute.xlu1 %1224  ;;  %v1193_v23 = vpop.permute.xlu0 %1192 }
 0x27c   : > { %v1807_v34 = vsel %vm1776_vm5, %v1774_v43, %v1225_v21  ;;  %v1791_v1 = vsel %vm1776_vm5, %v1758_v29, %v1193_v23  ;;  %v1935_v43 = vld [vmem:[%s3247_s17 + $0xd8] sm:$0xff]  ;;  %v1934_v29 = vld [vmem:[%s3247_s17 + $0xd0] sm:$0xff] }
 0x27f   : > { %v1607_v56 = vpop.permute.xlu1 %1606  ;;  %v1575_v47 = vpop.permute.xlu0 %1574 }
 0x280   : > { %v1905_v19 = vsel %vm1875_vm8, %v1872_v11, %v1607_v56  ;;  %v1889_v17 = vsel %vm1875_vm8, %v1856_v55, %v1575_v47 }
 0x281   : > { %2972 = vmatmul.mubr.msk.f32.gmra.mrb[12].mxu0 %vm1940_vm9, %v1889_v17  ;;  %2996 = vmatmul.mubr.msk.f32.gmra.mrb[12].mxu1 %vm1940_vm9, %v1905_v19  ;;  %v1915_v19 = vld [vmem:[%s3247_s17 + $0x38] sm:$0xff] }
 0x282   : > { %v1931_v17 = vld [vmem:[%s3247_s17 + $0xb8] sm:$0xff] }
 0x283   : > { %v1227_v18 = vpop.permute.xlu1 %1226  ;;  %v1195_v27 = vpop.permute.xlu0 %1194 }
 0x284   : > { %v1808_v40 = vsel %vm1776_vm5, %v1775_v36, %v1227_v18  ;;  %v1792_v57 = vsel %vm1776_vm5, %v1759_v24, %v1195_v27  ;;  %v1914_v18 = vld [vmem:[%s3247_s17 + $0x30] sm:$0xff]  ;;  %v1937_v36 = vld [vmem:[%s3247_s17 + $0xe8] sm:$0xff]  ;;  %v1936_v24 = vld [vmem:[%s3247_s17 + $0xe0] sm:$0xff] }
 0x285   : > { %v1930_v27 = vld [vmem:[%s3247_s17 + $0xb0] sm:$0xff] }
 0x287   : > { %v1353_v0 = vpop.permute.xlu1 %1352  ;;  %v1321_v53 = vpop.permute.xlu0 %1320 }
 0x288   : > { %v1840_v45 = vsel %vm1809_vm6, %v1807_v34, %v1353_v0  ;;  %v1824_v30 = vsel %vm1809_vm6, %v1791_v1, %v1321_v53 }
 0x28b   : > { %v1355_v41 = vpop.permute.xlu1 %1354  ;;  %v1323_v15 = vpop.permute.xlu0 %1322 }
 0x28c   : > { %v1841_v59 = vsel %vm1809_vm6, %v1808_v40, %v1355_v41  ;;  %v1825_v39 = vsel %vm1809_vm6, %v1792_v57, %v1323_v15 }
 0x28d   : > { %v2958_v3 = vpop.f32.mrb[2].mxu0 }
 0x28e   : > { %v2265_v8 = vadd.f32 %v2958_v3, %v1911_v54  ;;  %v2113_v42 = vpop.f32.mrb[3].mxu0 }
 0x28f   : > { %v2264_v26 = vadd.f32 %v2113_v42, %v1910_v38  ;;  %v1481_v44 = vpop.permute.xlu1 %1480  ;;  %v1449_v49 = vpop.permute.xlu0 %1448  ;;  %v1917_v42 = vld [vmem:[%s3247_s17 + $0x48] sm:$0xff] }
 0x290   : > { %2297 = vst.msk [vmem:[%s3247_s17 + $0x18] sm:$0xff] %vm1644_vm1, %v2265_v8  ;;  %v1873_v32 = vsel %vm1842_vm7, %v1840_v45, %v1481_v44  ;;  %v1857_v5 = vsel %vm1842_vm7, %v1824_v30, %v1449_v49  ;;  %v1916_v44 = vld [vmem:[%s3247_s17 + $0x40] sm:$0xff] }
 0x291   : > { %2296 = vst.msk [vmem:[%s3247_s17 + $0x10] sm:$0xff] %vm1644_vm1, %v2264_v26  ;;  %v2982_v33 = vpop.f32.mrb[2].mxu1  ;;  %v1933_v26 = vld [vmem:[%s3247_s17 + $0xc8] sm:$0xff]  ;;  %v1932_v49 = vld [vmem:[%s3247_s17 + $0xc0] sm:$0xff] }
 0x292   : > { %v2281_v60 = vadd.f32 %v2982_v33, %v1927_v25  ;;  %v2193_v61 = vpop.f32.mrb[3].mxu1 }
 0x293   : > { %v2280_v12 = vadd.f32 %v2193_v61, %v1926_v28  ;;  %v1483_v10 = vpop.permute.xlu1 %1482  ;;  %v1451_v63 = vpop.permute.xlu0 %1450 }
 0x294   : > { %2313 = vst.msk [vmem:[%s3247_s17 + $0x98] sm:$0xff] %vm1644_vm1, %v2281_v60  ;;  %v1874_v4 = vsel %vm1842_vm7, %v1841_v59, %v1483_v10  ;;  %v1858_v58 = vsel %vm1842_vm7, %v1825_v39, %v1451_v63 }
 0x295   : > { %2312 = vst.msk [vmem:[%s3247_s17 + $0x90] sm:$0xff] %vm1644_vm1, %v2280_v12 }
 0x297   : > { %v1609_v13 = vpop.permute.xlu1 %1608  ;;  %v1577_v16 = vpop.permute.xlu0 %1576 }
 0x298   : > { %v1906_v52 = vsel %vm1875_vm8, %v1873_v32, %v1609_v13  ;;  %v1890_v7 = vsel %vm1875_vm8, %v1857_v5, %v1577_v16 }
 0x299   : > { %2974 = vmatprep.mubr.msk.f32.mxu0 %vm1940_vm9, %v1890_v7  ;;  %2998 = vmatprep.mubr.msk.f32.mxu1 %vm1940_vm9, %v1906_v52 }
 0x29b   : > { %v1611_v9 = vpop.permute.xlu1 %1610  ;;  %v1579_v31 = vpop.permute.xlu0 %1578 }
 0x29c   : > { %v1907_v21 = vsel %vm1875_vm8, %v1874_v4, %v1611_v9  ;;  %v1891_v23 = vsel %vm1875_vm8, %v1858_v58, %v1579_v31  ;;  %v1923_v9 = vld [vmem:[%s3247_s17 + $0x78] sm:$0xff] }
 0x29d   : > { %2975 = vmatmul.mubr.msk.f32.gmra.mrb[14].mxu0 %vm1940_vm9, %v1891_v23  ;;  %2999 = vmatmul.mubr.msk.f32.gmra.mrb[14].mxu1 %vm1940_vm9, %v1907_v21  ;;  %v1939_v31 = vld [vmem:[%s3247_s17 + $0xf8] sm:$0xff]  ;;  %v1922_v21 = vld [vmem:[%s3247_s17 + $0x70] sm:$0xff] }
 0x29e   : > { %v1938_v23 = vld [vmem:[%s3247_s17 + $0xf0] sm:$0xff] }
 0x2b5   : > { %v2961_v48 = vpop.f32.mrb[4].mxu0  ;;  %v2985_v22 = vpop.f32.mrb[4].mxu1 }
 0x2b6   : > { %v2267_v50 = vadd.f32 %v2961_v48, %v1913_v14  ;;  %v2283_v46 = vadd.f32 %v2985_v22, %v1929_v35  ;;  %v2123_v11 = vpop.f32.mrb[5].mxu0  ;;  %v2203_v55 = vpop.f32.mrb[5].mxu1 }
 0x2b7   : > { %v2266_v56 = vadd.f32 %v2123_v11, %v1912_v62  ;;  %v2282_v47 = vadd.f32 %v2203_v55, %v1928_v51  ;;  %v2330_v11 = vld [vmem:[%s3247_s17] sm:$0xff] (!%p2890_p10) }
 0x2b8   : > { %2299 = vst.msk [vmem:[%s3247_s17 + $0x28] sm:$0xff] %vm1644_vm1, %v2267_v50  ;;  %2315 = vst.msk [vmem:[%s3247_s17 + $0xa8] sm:$0xff] %vm1644_vm1, %v2283_v46  ;;  %v4793_v55 = vld [vmem:[%s4977_s2] ss:$0 sm:$0xff] (!%p2890_p10) }
 0x2b9   : > { %2298 = vst.msk [vmem:[%s3247_s17 + $0x20] sm:$0xff] %vm1644_vm1, %v2266_v56  ;;  %2314 = vst.msk [vmem:[%s3247_s17 + $0xa0] sm:$0xff] %vm1644_vm1, %v2282_v47  ;;  %v2401_v56 = vld [vmem:[%s3242_s13] sm:$0xff] (!%p2890_p10)  ;;  %v2369_v47 = vadd.f32 (!%p2890_p10), %v4793_v55, %v2330_v11 }
 0x2dd   : > { %v2964_v0 = vpop.f32.mrb[6].mxu0  ;;  %v2988_v53 = vpop.f32.mrb[6].mxu1 }
 0x2de   : > { %v2269_v41 = vadd.f32 %v2964_v0, %v1915_v19  ;;  %v2285_v15 = vadd.f32 %v2988_v53, %v1931_v17  ;;  %v2133_v54 = vpop.f32.mrb[7].mxu0  ;;  %v2213_v38 = vpop.f32.mrb[7].mxu1  ;;  %v2331_v19 = vld [vmem:[%s3247_s17 + $0x8] sm:$0xff] (!%p2890_p10)  ;;  %v2403_v53 = vld [vmem:[%s3242_s13 + $0x10] sm:$0xff] (!%p2890_p10) }
 0x2df   : > { %v2268_v3 = vadd.f32 %v2133_v54, %v1914_v18  ;;  %v2284_v8 = vadd.f32 %v2213_v38, %v1930_v27  ;;  %v2402_v17 = vld [vmem:[%s3242_s13 + $0x8] sm:$0xff] (!%p2890_p10)  ;;  %v2332_v18 = vld [vmem:[%s3247_s17 + $0x10] sm:$0xff] (!%p2890_p10)  ;;  %v2370_v27 = vadd.f32 (!%p2890_p10), %v4793_v55, %v2331_v19  ;;  %v2433_v54 = vadd.f32 (!%p2890_p10), %v2401_v56, %v2369_v47 }
 0x2e0   : > { %2301 = vst.msk [vmem:[%s3247_s17 + $0x38] sm:$0xff] %vm1644_vm1, %v2269_v41  ;;  %2317 = vst.msk [vmem:[%s3247_s17 + $0xb8] sm:$0xff] %vm1644_vm1, %v2285_v15  ;;  %v2371_v0 = vadd.f32 (!%p2890_p10), %v4793_v55, %v2332_v18  ;;  %v2333_v41 = vld [vmem:[%s3247_s17 + $0x18] sm:$0xff] (!%p2890_p10)  ;;  %v2346_v18 = vld [vmem:[%s3247_s17 + $0x80] sm:$0xff] (!%p2890_p10) }
 0x2e1   : > { %2300 = vst.msk [vmem:[%s3247_s17 + $0x30] sm:$0xff] %vm1644_vm1, %v2268_v3  ;;  %2316 = vst.msk [vmem:[%s3247_s17 + $0xb0] sm:$0xff] %vm1644_vm1, %v2284_v8  ;;  %v2404_v15 = vld [vmem:[%s3242_s13 + $0x18] sm:$0xff] (!%p2890_p10)  ;;  %v2372_v38 = vadd.f32 (!%p2890_p10), %v4793_v55, %v2333_v41  ;;  %v2334_v3 = vld [vmem:[%s3247_s17 + $0x20] sm:$0xff] (!%p2890_p10) }
 0x2e2   : > { %v2405_v8 = vld [vmem:[%s3242_s13 + $0x20] sm:$0xff] (!%p2890_p10) }
 0x304   : > { %v2967_v25 = vpop.f32.mrb[8].mxu0  ;;  %v2991_v28 = vpop.f32.mrb[8].mxu1 }
 0x305   : > { %v2271_v33 = vadd.f32 %v2967_v25, %v1917_v42  ;;  %v2287_v60 = vadd.f32 %v2991_v28, %v1933_v26  ;;  %v2143_v61 = vpop.f32.mrb[9].mxu0  ;;  %v2223_v12 = vpop.f32.mrb[9].mxu1  ;;  %v2335_v42 = vld [vmem:[%s3247_s17 + $0x28] sm:$0xff] (!%p2890_p10)  ;;  %v2434_v26 = vadd.f32 (!%p2890_p10), %v2402_v17, %v2370_v27  ;;  %v2416_v17 = vld [vmem:[%s3242_s13 + $0x78] sm:$0xff] (!%p2890_p10) }
 0x306   : > { %v2270_v10 = vadd.f32 %v2143_v61, %v1916_v44  ;;  %v2286_v63 = vadd.f32 %v2223_v12, %v1932_v49  ;;  %v2435_v44 = vadd.f32 (!%p2890_p10), %v2403_v53, %v2371_v0  ;;  %v2373_v49 = vadd.f32 (!%p2890_p10), %v4793_v55, %v2334_v3  ;;  %v2406_v28 = vld [vmem:[%s3242_s13 + $0x28] sm:$0xff] (!%p2890_p10)  ;;  %v2348_v3 = vld [vmem:[%s3247_s17 + $0x90] sm:$0xff] (!%p2890_p10) }
 0x307   : > { %2303 = vst.msk [vmem:[%s3247_s17 + $0x48] sm:$0xff] %vm1644_vm1, %v2271_v33  ;;  %2319 = vst.msk [vmem:[%s3247_s17 + $0xc8] sm:$0xff] %vm1644_vm1, %v2287_v60  ;;  %v2374_v25 = vadd.f32 (!%p2890_p10), %v4793_v55, %v2335_v42  ;;  %v2336_v33 = vld [vmem:[%s3247_s17 + $0x30] sm:$0xff] (!%p2890_p10)  ;;  %v2465_v61 = vmax.f32 (!%p2890_p10), %v2433_v54, 0.0  ;;  %v2436_v12 = vadd.f32 (!%p2890_p10), %v2404_v15, %v2372_v38  ;;  %v2347_v27 = vld [vmem:[%s3247_s17 + $0x88] sm:$0xff] (!%p2890_p10) }
 0x308   : > { %2302 = vst.msk [vmem:[%s3247_s17 + $0x40] sm:$0xff] %vm1644_vm1, %v2270_v10  ;;  %2318 = vst.msk [vmem:[%s3247_s17 + $0xc0] sm:$0xff] %vm1644_vm1, %v2286_v63  ;;  %v2407_v60 = vld [vmem:[%s3242_s13 + $0x30] sm:$0xff] (!%p2890_p10)  ;;  %v2375_v10 = vadd.f32 (!%p2890_p10), %v4793_v55, %v2336_v33  ;;  %v2337_v63 = vld [vmem:[%s3247_s17 + $0x38] sm:$0xff] (!%p2890_p10) }
 0x309   : > { %2497 = vst.msk [vmem:[%s3247_s17] sm:$0xff] (!%p2890_p10), %vm1644_vm1, %v2465_v61  ;;  %v2417_v54 = vld [vmem:[%s3242_s13 + $0x80] sm:$0xff] (!%p2890_p10)  ;;  %v2418_v38 = vld [vmem:[%s3242_s13 + $0x88] sm:$0xff] (!%p2890_p10)  ;;  %v2386_v61 = vadd.f32 (!%p2890_p10), %v4793_v55, %v2347_v27 }
 0x32c   : > { %v2970_v34 = vpop.f32.mrb[10].mxu0  ;;  %v2994_v1 = vpop.f32.mrb[10].mxu1 }
 0x32d   : > { %v2273_v45 = vadd.f32 %v2970_v34, %v1919_v20  ;;  %v2289_v30 = vadd.f32 %v2994_v1, %v1935_v43  ;;  %v2153_v32 = vpop.f32.mrb[11].mxu0  ;;  %v2233_v5 = vpop.f32.mrb[11].mxu1  ;;  %v2408_v20 = vld [vmem:[%s3242_s13 + $0x38] sm:$0xff] (!%p2890_p10)  ;;  %v2338_v43 = vld [vmem:[%s3247_s17 + $0x40] sm:$0xff] (!%p2890_p10)  ;;  %v2437_v34 = vadd.f32 (!%p2890_p10), %v2405_v8, %v2373_v49  ;;  %v2438_v1 = vadd.f32 (!%p2890_p10), %v2406_v28, %v2374_v25  ;;  %v2419_v49 = vld [vmem:[%s3242_s13 + $0x90] sm:$0xff] (!%p2890_p10) }
 0x32e   : > { %v2272_v13 = vadd.f32 %v2153_v32, %v1918_v37  ;;  %v2288_v16 = vadd.f32 %v2233_v5, %v1934_v29  ;;  %v2466_v37 = vmax.f32 (!%p2890_p10), %v2434_v26, 0.0  ;;  %v2467_v29 = vmax.f32 (!%p2890_p10), %v2435_v44, 0.0  ;;  %v2410_v32 = vld [vmem:[%s3242_s13 + $0x48] sm:$0xff] (!%p2890_p10)  ;;  %v2349_v25 = vld [vmem:[%s3247_s17 + $0x98] sm:$0xff] (!%p2890_p10)  ;;  %v2350_v28 = vld [vmem:[%s3247_s17 + $0xa0] sm:$0xff] (!%p2890_p10) }
 0x32f   : > { %2305 = vst.msk [vmem:[%s3247_s17 + $0x58] sm:$0xff] %vm1644_vm1, %v2273_v45  ;;  %2321 = vst.msk [vmem:[%s3247_s17 + $0xd8] sm:$0xff] %vm1644_vm1, %v2289_v30  ;;  %v2409_v45 = vld [vmem:[%s3242_s13 + $0x40] sm:$0xff] (!%p2890_p10)  ;;  %v2339_v30 = vld [vmem:[%s3247_s17 + $0x48] sm:$0xff] (!%p2890_p10)  ;;  %v2468_v5 = vmax.f32 (!%p2890_p10), %v2436_v12, 0.0  ;;  %v2385_v44 = vadd.f32 (!%p2890_p10), %v4793_v55, %v2346_v18  ;;  %v2387_v12 = vadd.f32 (!%p2890_p10), %v4793_v55, %v2348_v3 }
 0x330   : > { %2304 = vst.msk [vmem:[%s3247_s17 + $0x50] sm:$0xff] %vm1644_vm1, %v2272_v13  ;;  %2320 = vst.msk [vmem:[%s3247_s17 + $0xd0] sm:$0xff] %vm1644_vm1, %v2288_v16  ;;  %v2439_v13 = vadd.f32 (!%p2890_p10), %v2407_v60, %v2375_v10  ;;  %v2376_v16 = vadd.f32 (!%p2890_p10), %v4793_v55, %v2337_v63  ;;  %v2420_v10 = vld [vmem:[%s3242_s13 + $0x98] sm:$0xff] (!%p2890_p10)  ;;  %v2351_v63 = vld [vmem:[%s3247_s17 + $0xa8] sm:$0xff] (!%p2890_p10) }
 0x331   : > { %2498 = vst.msk [vmem:[%s3247_s17 + $0x8] sm:$0xff] (!%p2890_p10), %vm1644_vm1, %v2466_v37  ;;  %2499 = vst.msk [vmem:[%s3247_s17 + $0x10] sm:$0xff] (!%p2890_p10), %vm1644_vm1, %v2467_v29  ;;  %v2449_v37 = vadd.f32 (!%p2890_p10), %v2417_v54, %v2385_v44  ;;  %v2388_v29 = vadd.f32 (!%p2890_p10), %v4793_v55, %v2349_v25 }
 0x332   : > { %2500 = vst.msk [vmem:[%s3247_s17 + $0x18] sm:$0xff] (!%p2890_p10), %vm1644_vm1, %v2468_v5  ;;  %v2389_v5 = vadd.f32 (!%p2890_p10), %v4793_v55, %v2350_v28 }
 0x354   : > { %v2973_v52 = vpop.f32.mrb[12].mxu0  ;;  %v2997_v7 = vpop.f32.mrb[12].mxu1 }
 0x355   : > { %v2275_v40 = vadd.f32 %v2973_v52, %v1921_v2  ;;  %v2291_v57 = vadd.f32 %v2997_v7, %v1937_v36  ;;  %v2163_v59 = vpop.f32.mrb[13].mxu0  ;;  %v2243_v39 = vpop.f32.mrb[13].mxu1  ;;  %v2377_v2 = vadd.f32 (!%p2890_p10), %v4793_v55, %v2338_v43  ;;  %v2340_v36 = vld [vmem:[%s3247_s17 + $0x50] sm:$0xff] (!%p2890_p10)  ;;  %v2469_v52 = vmax.f32 (!%p2890_p10), %v2437_v34, 0.0  ;;  %v2421_v34 = vld [vmem:[%s3242_s13 + $0xa0] sm:$0xff] (!%p2890_p10) }
 0x356   : > { %v2274_v4 = vadd.f32 %v2163_v59, %v1920_v6  ;;  %v2290_v58 = vadd.f32 %v2243_v39, %v1936_v24  ;;  %v2411_v6 = vld [vmem:[%s3242_s13 + $0x50] sm:$0xff] (!%p2890_p10)  ;;  %v2341_v24 = vld [vmem:[%s3247_s17 + $0x58] sm:$0xff] (!%p2890_p10)  ;;  %v2470_v7 = vmax.f32 (!%p2890_p10), %v2438_v1, 0.0  ;;  %v2422_v1 = vld [vmem:[%s3242_s13 + $0xa8] sm:$0xff] (!%p2890_p10) }
 0x357   : > { %2307 = vst.msk [vmem:[%s3247_s17 + $0x68] sm:$0xff] %vm1644_vm1, %v2275_v40  ;;  %2323 = vst.msk [vmem:[%s3247_s17 + $0xe8] sm:$0xff] %vm1644_vm1, %v2291_v57  ;;  %v2378_v40 = vadd.f32 (!%p2890_p10), %v4793_v55, %v2339_v30  ;;  %v2379_v57 = vadd.f32 (!%p2890_p10), %v4793_v55, %v2340_v36  ;;  %v2412_v59 = vld [vmem:[%s3242_s13 + $0x58] sm:$0xff] (!%p2890_p10)  ;;  %v2450_v30 = vadd.f32 (!%p2890_p10), %v2418_v38, %v2386_v61  ;;  %v2354_v36 = vld [vmem:[%s3247_s17 + $0xc0] sm:$0xff] (!%p2890_p10) }
 0x358   : > { %2306 = vst.msk [vmem:[%s3247_s17 + $0x60] sm:$0xff] %vm1644_vm1, %v2274_v4  ;;  %2322 = vst.msk [vmem:[%s3247_s17 + $0xe0] sm:$0xff] %vm1644_vm1, %v2290_v58  ;;  %v2413_v4 = vld [vmem:[%s3242_s13 + $0x60] sm:$0xff] (!%p2890_p10)  ;;  %v2471_v58 = vmax.f32 (!%p2890_p10), %v2439_v13, 0.0  ;;  %v2390_v13 = vadd.f32 (!%p2890_p10), %v4793_v55, %v2351_v63 }
 0x359   : > { %2501 = vst.msk [vmem:[%s3247_s17 + $0x20] sm:$0xff] (!%p2890_p10), %vm1644_vm1, %v2469_v52  ;;  %2502 = vst.msk [vmem:[%s3247_s17 + $0x28] sm:$0xff] (!%p2890_p10), %vm1644_vm1, %v2470_v7  ;;  %v2452_v52 = vadd.f32 (!%p2890_p10), %v2420_v10, %v2388_v29  ;;  %v2432_v10 = vld [vmem:[%s3242_s13 + $0xf8] sm:$0xff] (!%p2890_p10) }
 0x35a   : > { %2503 = vst.msk [vmem:[%s3247_s17 + $0x30] sm:$0xff] (!%p2890_p10), %vm1644_vm1, %v2471_v58  ;;  %v2453_v58 = vadd.f32 (!%p2890_p10), %v2421_v34, %v2389_v5 }
 0x35f   : > { %v2342_v39 = vld [vmem:[%s3247_s17 + $0x60] sm:$0xff] (!%p2890_p10) }
 0x36e   : > { %2329 = sbr.rel (%p2890_p10) target bundleno = 903 (0x387), region = 44 }
 0x370   : > { %v2976_v14 = vpop.f32.mrb[14].mxu0  ;;  %v3000_v35 = vpop.f32.mrb[14].mxu1 }
 0x371   : > { %v2277_v62 = vadd.f32 %v2976_v14, %v1923_v9  ;;  %v2293_v51 = vadd.f32 %v3000_v35, %v1939_v31  ;;  %v2173_v48 = vpop.f32.mrb[15].mxu0  ;;  %v2253_v22 = vpop.f32.mrb[15].mxu1  ;;  %v2440_v9 = vadd.f32 (!%p2890_p10), %v2408_v20, %v2376_v16  ;;  %v2441_v31 = vadd.f32 (!%p2890_p10), %v2409_v45, %v2377_v2  ;;  %v2414_v14 = vld [vmem:[%s3242_s13 + $0x68] sm:$0xff] (!%p2890_p10)  ;;  %v2352_v45 = vld [vmem:[%s3247_s17 + $0xb0] sm:$0xff] (!%p2890_p10)  ;;  %v2353_v2 = vld [vmem:[%s3247_s17 + $0xb8] sm:$0xff] (!%p2890_p10) }
 0x372   : > { %v2276_v50 = vadd.f32 %v2173_v48, %v1922_v21  ;;  %v2292_v46 = vadd.f32 %v2253_v22, %v1938_v23  ;;  %v2380_v21 = vadd.f32 (!%p2890_p10), %v4793_v55, %v2341_v24  ;;  %v2343_v23 = vld [vmem:[%s3247_s17 + $0x68] sm:$0xff] (!%p2890_p10)  ;;  %v2381_v48 = vadd.f32 (!%p2890_p10), %v4793_v55, %v2342_v39  ;;  %v2423_v16 = vld [vmem:[%s3242_s13 + $0xb0] sm:$0xff] (!%p2890_p10) }
 0x373   : > { %2309 = vst.msk [vmem:[%s3247_s17 + $0x78] sm:$0xff] %vm1644_vm1, %v2277_v62  ;;  %2325 = vst.msk [vmem:[%s3247_s17 + $0xf8] sm:$0xff] %vm1644_vm1, %v2293_v51  ;;  %v2442_v62 = vadd.f32 (!%p2890_p10), %v2410_v32, %v2378_v40  ;;  %v2443_v51 = vadd.f32 (!%p2890_p10), %v2411_v6, %v2379_v57  ;;  %v2382_v22 = vadd.f32 (!%p2890_p10), %v4793_v55, %v2343_v23  ;;  %v2472_v11 = vmax.f32 (!%p2890_p10), %v2440_v9, 0.0  ;;  %v2424_v40 = vld [vmem:[%s3242_s13 + $0xb8] sm:$0xff] (!%p2890_p10)  ;;  %v2355_v57 = vld [vmem:[%s3247_s17 + $0xc8] sm:$0xff] (!%p2890_p10) }
 0x374   : > { %2308 = vst.msk [vmem:[%s3247_s17 + $0x70] sm:$0xff] %vm1644_vm1, %v2276_v50  ;;  %2324 = vst.msk [vmem:[%s3247_s17 + $0xf0] sm:$0xff] %vm1644_vm1, %v2292_v46  ;;  %v2415_v50 = vld [vmem:[%s3242_s13 + $0x70] sm:$0xff] (!%p2890_p10)  ;;  %v2473_v56 = vmax.f32 (!%p2890_p10), %v2441_v31, 0.0  ;;  %v2444_v47 = vadd.f32 (!%p2890_p10), %v2412_v59, %v2380_v21  ;;  %v2445_v41 = vadd.f32 (!%p2890_p10), %v2413_v4, %v2381_v48  ;;  %v2451_v32 = vadd.f32 (!%p2890_p10), %v2419_v49, %v2387_v12  ;;  %v2425_v31 = vld [vmem:[%s3242_s13 + $0xc0] sm:$0xff] (!%p2890_p10) }
 0x375   : > { %v2474_v0 = vmax.f32 %v2442_v62, 0.0  ;;  %v2475_v53 = vmax.f32 %v2443_v51, 0.0  ;;  %v2446_v15 = vadd.f32 %v2414_v14, %v2382_v22  ;;  %2504 = vst.msk [vmem:[%s3247_s17 + $0x38] sm:$0xff] %vm1644_vm1, %v2472_v11  ;;  %v2481_v24 = vmax.f32 %v2449_v37, 0.0  ;;  %v2356_v59 = vld [vmem:[%s3247_s17 + $0xd0] sm:$0xff]  ;;  %v2426_v21 = vld [vmem:[%s3242_s13 + $0xc8] sm:$0xff] }
 0x376   : > { %2505 = vst.msk [vmem:[%s3247_s17 + $0x40] sm:$0xff] %vm1644_vm1, %v2473_v56  ;;  %v2476_v8 = vmax.f32 %v2444_v47, 0.0  ;;  %v2477_v33 = vmax.f32 %v2445_v41, 0.0  ;;  %v2391_v7 = vadd.f32 %v4793_v55, %v2352_v45  ;;  %v2482_v39 = vmax.f32 %v2450_v30, 0.0  ;;  %v2357_v23 = vld [vmem:[%s3247_s17 + $0xd8] sm:$0xff]  ;;  %v2427_v48 = vld [vmem:[%s3242_s13 + $0xd0] sm:$0xff] }
 0x377   : > { %2506 = vst.msk [vmem:[%s3247_s17 + $0x48] sm:$0xff] %vm1644_vm1, %v2474_v0  ;;  %2507 = vst.msk [vmem:[%s3247_s17 + $0x50] sm:$0xff] %vm1644_vm1, %v2475_v53  ;;  %v2478_v60 = vmax.f32 %v2446_v15, 0.0  ;;  %v2483_v4 = vmax.f32 %v2451_v32, 0.0  ;;  %v2454_v9 = vadd.f32 %v2422_v1, %v2390_v13  ;;  %v2484_v14 = vmax.f32 %v2452_v52, 0.0  ;;  %v2358_v22 = vld [vmem:[%s3247_s17 + $0xe0] sm:$0xff] }
 0x378   : > { %2508 = vst.msk [vmem:[%s3247_s17 + $0x58] sm:$0xff] %vm1644_vm1, %v2476_v8  ;;  %2509 = vst.msk [vmem:[%s3247_s17 + $0x60] sm:$0xff] %vm1644_vm1, %v2477_v33  ;;  %v2392_v62 = vadd.f32 %v4793_v55, %v2353_v2  ;;  %v2393_v51 = vadd.f32 %v4793_v55, %v2354_v36  ;;  %v2394_v56 = vadd.f32 %v4793_v55, %v2355_v57  ;;  %v2429_v41 = vld [vmem:[%s3242_s13 + $0xe0] sm:$0xff]  ;;  %v2430_v15 = vld [vmem:[%s3242_s13 + $0xe8] sm:$0xff] }
 0x379   : > { %2510 = vst.msk [vmem:[%s3247_s17 + $0x68] sm:$0xff] %vm1644_vm1, %v2478_v60  ;;  %2513 = vst.msk [vmem:[%s3247_s17 + $0x80] sm:$0xff] %vm1644_vm1, %v2481_v24  ;;  %v2486_v11 = vmax.f32 %v2454_v9, 0.0  ;;  %v2395_v47 = vadd.f32 %v4793_v55, %v2356_v59  ;;  %v2396_v53 = vadd.f32 %v4793_v55, %v2357_v23  ;;  %v2397_v3 = vadd.f32 %v4793_v55, %v2358_v22 }
 0x37a   : > { %v2345_v46 = vld [vmem:[%s3247_s17 + $0x78] sm:$0xff]  ;;  %2514 = vst.msk [vmem:[%s3247_s17 + $0x88] sm:$0xff] %vm1644_vm1, %v2482_v39  ;;  %2515 = vst.msk [vmem:[%s3247_s17 + $0x90] sm:$0xff] %vm1644_vm1, %v2483_v4  ;;  %v2456_v27 = vadd.f32 %v2424_v40, %v2392_v62  ;;  %v2457_v0 = vadd.f32 %v2425_v31, %v2393_v51  ;;  %v2458_v54 = vadd.f32 %v2426_v21, %v2394_v56 }
 0x37b   : > { %v2344_v35 = vld [vmem:[%s3247_s17 + $0x70] sm:$0xff]  ;;  %v2384_v26 = vadd.f32 %v4793_v55, %v2345_v46  ;;  %v2485_v46 = vmax.f32 %v2453_v58, 0.0  ;;  %2516 = vst.msk [vmem:[%s3247_s17 + $0x98] sm:$0xff] %vm1644_vm1, %v2484_v14  ;;  %2518 = vst.msk [vmem:[%s3247_s17 + $0xa8] sm:$0xff] %vm1644_vm1, %v2486_v11  ;;  %v2459_v38 = vadd.f32 %v2427_v48, %v2395_v47  ;;  %v2461_v61 = vadd.f32 %v2429_v41, %v2397_v3 }
 0x37c   : > { %v2383_v19 = vadd.f32 %v4793_v55, %v2344_v35  ;;  %v2455_v35 = vadd.f32 %v2423_v16, %v2391_v7  ;;  %v2488_v44 = vmax.f32 %v2456_v27, 0.0  ;;  %v2489_v49 = vmax.f32 %v2457_v0, 0.0 }
 0x37d   : > { %v2448_v43 = vadd.f32 %v2416_v17, %v2384_v26  ;;  %v2360_v17 = vld [vmem:[%s3247_s17 + $0xf0] sm:$0xff]  ;;  %2517 = vst.msk [vmem:[%s3247_s17 + $0xa0] sm:$0xff] %vm1644_vm1, %v2485_v46  ;;  %v2361_v26 = vld [vmem:[%s3247_s17 + $0xf8] sm:$0xff]  ;;  %v2490_v33 = vmax.f32 %v2458_v54, 0.0  ;;  %v2491_v60 = vmax.f32 %v2459_v38, 0.0  ;;  %v2493_v37 = vmax.f32 %v2461_v61, 0.0 }
 0x37e   : > { %v2447_v42 = vadd.f32 %v2415_v50, %v2383_v19  ;;  %v2359_v50 = vld [vmem:[%s3247_s17 + $0xe8] sm:$0xff]  ;;  %v2428_v19 = vld [vmem:[%s3242_s13 + $0xd8] sm:$0xff]  ;;  %v2487_v18 = vmax.f32 %v2455_v35, 0.0  ;;  %v2399_v28 = vadd.f32 %v4793_v55, %v2360_v17  ;;  %2520 = vst.msk [vmem:[%s3247_s17 + $0xb8] sm:$0xff] %vm1644_vm1, %v2488_v44  ;;  %2521 = vst.msk [vmem:[%s3247_s17 + $0xc0] sm:$0xff] %vm1644_vm1, %v2489_v49 }
 0x37f   : > { %v2480_v6 = vmax.f32 %v2448_v43, 0.0  ;;  %v2398_v8 = vadd.f32 %v4793_v55, %v2359_v50  ;;  %v2460_v25 = vadd.f32 %v2428_v19, %v2396_v53  ;;  %v2400_v43 = vadd.f32 %v4793_v55, %v2361_v26  ;;  %2522 = vst.msk [vmem:[%s3247_s17 + $0xc8] sm:$0xff] %vm1644_vm1, %v2490_v33  ;;  %2523 = vst.msk [vmem:[%s3247_s17 + $0xd0] sm:$0xff] %vm1644_vm1, %v2491_v60 }
 0x380   : > { %v2479_v20 = vmax.f32 %v2447_v42, 0.0  ;;  %v2431_v42 = vld [vmem:[%s3242_s13 + $0xf0] sm:$0xff]  ;;  %2519 = vst.msk [vmem:[%s3247_s17 + $0xb0] sm:$0xff] %vm1644_vm1, %v2487_v18  ;;  %2525 = vst.msk [vmem:[%s3247_s17 + $0xe0] sm:$0xff] %vm1644_vm1, %v2493_v37 }
 0x381   : > { %2512 = vst.msk [vmem:[%s3247_s17 + $0x78] sm:$0xff] %vm1644_vm1, %v2480_v6  ;;  %v2462_v12 = vadd.f32 %v2430_v15, %v2398_v8  ;;  %v2492_v63 = vmax.f32 %v2460_v25, 0.0  ;;  %v2464_v1 = vadd.f32 %v2432_v10, %v2400_v43 }
 0x382   : > { %2511 = vst.msk [vmem:[%s3247_s17 + $0x70] sm:$0xff] %vm1644_vm1, %v2479_v20  ;;  %v2463_v20 = vadd.f32 %v2431_v42, %v2399_v28 }
 0x383   : > { %v2494_v29 = vmax.f32 %v2462_v12, 0.0  ;;  %2524 = vst.msk [vmem:[%s3247_s17 + $0xd8] sm:$0xff] %vm1644_vm1, %v2492_v63  ;;  %v2496_v45 = vmax.f32 %v2464_v1, 0.0 }
 0x384   : > { %v2495_v34 = vmax.f32 %v2463_v20, 0.0 }
 0x385   : > { %2526 = vst.msk [vmem:[%s3247_s17 + $0xe8] sm:$0xff] %vm1644_vm1, %v2494_v29  ;;  %2528 = vst.msk [vmem:[%s3247_s17 + $0xf8] sm:$0xff] %vm1644_vm1, %v2496_v45 }
 0x386   : > { %2527 = vst.msk [vmem:[%s3247_s17 + $0xf0] sm:$0xff] %vm1644_vm1, %v2495_v34 }
 0x387 PF: > { %s14_s21 = sadd.s32 1, %s3148_s21   ;;  %s5126_s11 = sld [smem:[#allocation2_spill]] }
 0x388   : > { %p11_p11 = scmp.ge.s32.totalorder %s14_s21, 26   ;;  %s5127_s15 = smov %s3136_s18 }
 0x389   : > { %s5128_s16 = smov %s3140_s19  ;;  %s5129_s17 = smov %s3144_s20 }
 0x38a   : > { %s5130_s18 = smov %s5134_s22  ;;  %s5131_s19 = smov %s5138_s23 }
 0x38b   :  { %13 = sbr.rel (!%p11_p11) target bundleno = 4 (0x4), region = 80 }
 0x38d   : > { %s5132_s20 = smov %s5126_s11 }

// kernel: hourglass_forward.8
= control target key start
LH: loop header
LB: loop body
LE: loop exit
PB: predicated region body
PF: predicated region fallthrough
CT: control target
= control target key end

     0   :  { %s1252_s12 = smov 0   ;;  %s1254_s13 = smov 0   ;;  %s1698_s0 = inlined_call_operand.vmem [shape: f32[2,6,18,18,8], index: 0, kind: input, shape index: {}]   ;;  %s1699_s1 = inlined_call_operand.vmem [shape: f32[3,72,8], index: 1, kind: input, shape index: {}]   ;;  %s1700_s2 = inlined_call_operand.vmem [shape: f32[1,8], index: 2, kind: input, shape index: {}]   ;;  %s1701_s3 = inlined_call_operand.vmem [shape: f32[2,2,64,8], index: 3, kind: output, shape index: {}]  }
   0x1   :  { %s1256_s14 = smov 0   ;;  %s1258_s15 = smov 0  }
   0x2   :  { %s1260_s16 = smov 0   ;;  %s1262_s17 = smov 0  }
   0x3   :  { %s1264_s18 = smov 0  }
   0x4 LB: > { %s25_s19 = sadd.s32 1, %s1209_s15  ;;  %s28_s20 = sadd.s32 1, %s1213_s16  ;;  %s1221_s18 = sphi %s1264_s18, %s13_s18   ;;  %s1217_s17 = sphi %s1262_s17, %s1707_s17   ;;  %s1213_s16 = sphi %s1260_s16, %s1706_s16   ;;  %s1209_s15 = sphi %s1258_s15, %s1705_s15   ;;  %s1205_s14 = sphi %s1256_s14, %s1704_s14   ;;  %s1201_s13 = sphi %s1254_s13, %s1703_s13   ;;  %s1197_s12 = sphi %s1252_s12, %s1702_s12  }
   0x5   : > { %p26_p0 = scmp.ge.s32.totalorder %s25_s19, 3  ;;  %p960_p1 = scmp.ge.s32.totalorder %s1221_s18, 1 }
   0x6   : > { %p172_p2 = scmp.lt.s32.totalorder %s1221_s18, 13  ;;  %s32_s21 = sadd.s32 1, %s1217_s17 }
   0x7   : > { %s1709_s19 = smov (%p26_p0, %s25_s19), 0  ;;  %s1711_s20 = smov (!%p26_p0, %s28_s20), %s1213_s16 }
   0x8   : > { %p173_p3 = pnand %p960_p1, %p172_p2  ;;  %p30_p4 = scmp.ge.s32.totalorder %s1711_s20, 2 }
   0x9   : > { %s961_s22 = sshll.u32 (!%p173_p3), %s1201_s13, 1  ;;  %p208_p6 = scmp.lt.s32.totalorder (!%p173_p3), %s1205_s14, 1 }
   0xa   : > { %s1713_s20 = smov (%p30_p4, %s1711_s20), 0  ;;  %s1715_s21 = smov (!%p30_p4, %s32_s21), %s1217_s17 }
   0xb   : > { %p34_p5 = scmp.ge.s32.totalorder %s1715_s21, 2  ;;  %176 = sbr.rel (%p173_p3) target bundleno = 499 (0x1f3), region = 32 }
   0xc   : > { %s207_s23 = sadd.s32 (!%p173_p3), %s1197_s12, %s961_s22  ;;  %p221_p7 = scmp.lt.s32.totalorder (!%p173_p3), %s1201_s13, 1 }
   0xd   : > { %s1717_s21 = smov (%p34_p5, %s1715_s21), 0  ;;  %p210_p8 = scmp.lt.s32.totalorder (!%p173_p3), %s207_s23, 5 }
   0xe   : > { %p966_p9 = scmp.ne.s32.totalorder (!%p173_p3), %s1197_s12, 0 }
  0x12   : > { %s1719_s14 = smov (!%p208_p6, %s1205_s14), 1  ;;  %s1721_s23 = smov (!%p210_p8, %s207_s23), 5 }
  0x13   : > { %s1101_s24 = smul.u32 324, %s1719_s14  ;;  %s964_s25 = sshll.u32 %s1719_s14, 4  ;;  %vm232_vm0 = vcmask (!%p966_p9), 64512   ;;  %v1223_v0 = vmov (!%p966_p9), 0.0  }
  0x14   : > { %s1723_s13 = smov (!%p221_p7, %s1201_s13), 1  ;;  %s1100_s26 = smul.u32 54, %s1721_s23 }
  0x15   : > { %s963_s27 = sshll.u32 %s1723_s13, 3  ;;  %231 = sbr.rel (%p966_p9) target bundleno = 29 (0x1d), region = 36 }
  0x16   : > { %s214_s28 = sadd.s32 %s1101_s24, %s1100_s26  ;;  %s225_s29 = sadd.s32 %s964_s25, %s963_s27 }
  0x17   : > { %s962_s30 = sshll.u32 %s214_s28, 3  ;;  %s965_s4 = sshll.u32 %s225_s29, 3 }
  0x18   : > { %s1305_s7 = scalar_lea.vmem %s1698_s0, %s962_s30  ;;  %s1310_s10 = scalar_lea.vmem %s1701_s3, %s965_s4 }
  0x19   : > { %233 = vst.msk [vmem:[%s1310_s10] sm:$0xff] (!%p966_p9), %vm232_vm0, %v1223_v0  ;;  %234 = vst.msk [vmem:[%s1310_s10 + $0x8] sm:$0xff] (!%p966_p9), %vm232_vm0, %v1223_v0 }
  0x1a   : > { %235 = vst.msk [vmem:[%s1310_s10 + $0x10] sm:$0xff] (!%p966_p9), %vm232_vm0, %v1223_v0  ;;  %236 = vst.msk [vmem:[%s1310_s10 + $0x18] sm:$0xff] (!%p966_p9), %vm232_vm0, %v1223_v0 }
  0x1b   : > { %237 = vst.msk [vmem:[%s1310_s10 + $0x20] sm:$0xff] (!%p966_p9), %vm232_vm0, %v1223_v0  ;;  %238 = vst.msk [vmem:[%s1310_s10 + $0x28] sm:$0xff] (!%p966_p9), %vm232_vm0, %v1223_v0 }
  0x1c   : > { %239 = vst.msk [vmem:[%s1310_s10 + $0x30] sm:$0xff] %vm232_vm0, %v1223_v0  ;;  %240 = vst.msk [vmem:[%s1310_s10 + $0x38] sm:$0xff] %vm232_vm0, %v1223_v0 }
  0x1d PF: > { %v1322_v1 = vld [vmem:[%s1305_s7 + $0x21] sm:$0xff]  ;;  %v260_v2 = vld [vmem:[%s1305_s7 + $0x9] sm:$0xff]  ;;  %s1224_s11 = smov 8   ;;  %s1225_s13 = smov 16   ;;  %v1346_v7 = vld [vmem:[%s1305_s7 + $0x79] sm:$0xff]  ;;  %vm582_vm1 = vcmask 64512  }
  0x1e   : > { %336 = vrot.lane.b32.xlu1 %v1322_v1, %s1224_s11  ;;  %334 = vrot.lane.b32.xlu0 %v260_v2, %s1224_s11  ;;  %v1329_v3 = vld [vmem:[%s1305_s7 + $0x81] sm:$0xff]  ;;  %v1332_v4 = vld [vmem:[%s1305_s7 + $0x69] sm:$0xff]  ;;  %s1226_s14 = smov 24   ;;  %s1227_s22 = smov 32   ;;  %vm591_vm2 = vcmask 130048   ;;  %vm600_vm3 = vcmask 195584  }
  0x1f   : > { %v1339_v5 = vld [vmem:[%s1305_s7 + $0x61] sm:$0xff]  ;;  %v1349_v8 = vld [vmem:[%s1305_s7 + $0x19] sm:$0xff]  ;;  %v972_v11 = vld [vmem:[%s1305_s7 + $0x150] sm:$0xff]  ;;  %s1228_s23 = smov 40   ;;  %s1229_s24 = smov 48   ;;  %vm609_vm4 = vcmask 261120  }
  0x20   : > { %v268_v6 = vld [vmem:[%s1305_s7 + $0x1] sm:$0xff]  ;;  %v971_v9 = vld [vmem:[%s1305_s7 + $0x138] sm:$0xff]  ;;  %v968_v12 = vld [vmem:[%s1305_s7 + $0xf0] sm:$0xff]  ;;  %s241_s25 = smul.u32 72, %s1197_s12  ;;  %s1230_s29 = smov 56   ;;  %vm618_vm5 = vcmask 326656  }
  0x21   : > { %v967_v10 = vld [vmem:[%s1305_s7 + $0xd8] sm:$0xff]  ;;  %v979_v13 = vld [vmem:[%s1305_s7 + $0x141] sm:$0xff]  ;;  %v1420_v29 = vld [vmem:[%s1305_s7 + $0xa9] sm:$0xff]  ;;  %s1231_s30 = smov 64   ;;  %vm627_vm6 = vcmask 392192   ;;  %vm636_vm7 = vcmask 457728  }
  0x22   : > { %344 = vrot.lane.b32.xlu1 %v1329_v3, %s1224_s11  ;;  %342 = vrot.lane.b32.xlu0 %v1332_v4, %s1224_s11  ;;  %v975_v14 = vld [vmem:[%s1305_s7 + $0xe1] sm:$0xff]  ;;  %v1368_v15 = vld [vmem:[%s1305_s7 + $0x99] sm:$0xff]  ;;  %s1443_s28 = scalar_lea.vmem %s1699_s1, %s241_s25  ;;  %vm645_vm8 = vcmask 523264   ;;  %vm662_vm9 = vcmask 588800   ;;  %p1023_p10 = scmp.ne.s32.totalorder %s1197_s12, 2 }
  0x23   : > { %v1371_v16 = vld [vmem:[%s1305_s7 + $0x39] sm:$0xff]  ;;  %v1386_v21 = vld [vmem:[%s1305_s7 + $0xb1] sm:$0xff]  ;;  %v1423_v30 = vld [vmem:[%s1305_s7 + $0x49] sm:$0xff] }
  0x24   : > { %v980_v17 = vld [vmem:[%s1305_s7 + $0x159] sm:$0xff]  ;;  %v1389_v22 = vld [vmem:[%s1305_s7 + $0x51] sm:$0xff]  ;;  %v973_v31 = vld [vmem:[%s1305_s7 + $0x168] sm:$0xff] }
  0x25   : > { %v976_v18 = vld [vmem:[%s1305_s7 + $0xf9] sm:$0xff]  ;;  %v1396_v23 = vld [vmem:[%s1305_s7 + $0x91] sm:$0xff]  ;;  %v969_v32 = vld [vmem:[%s1305_s7 + $0x108] sm:$0xff] }
  0x26   : > { %374 = vrot.lane.b32.xlu1 %v1339_v5, %s1225_s13  ;;  %366 = vrot.lane.b32.xlu0 %v268_v6, %s1225_s13  ;;  %v987_v19 = vld [vmem:[%s1305_s7 + $0x139] sm:$0xff]  ;;  %v1399_v24 = vld [vmem:[%s1305_s7 + $0x31] sm:$0xff] }
  0x27   : > { %v983_v20 = vld [vmem:[%s1305_s7 + $0xd9] sm:$0xff]  ;;  %v988_v25 = vld [vmem:[%s1305_s7 + $0x151] sm:$0xff]  ;;  %v244_v36 = vld [vmem:[%s1443_s28 + $0x8] sm:$0xff] }
  0x28   : > { %v984_v26 = vld [vmem:[%s1305_s7 + $0xf1] sm:$0xff]  ;;  %v243_v35 = vld [vmem:[%s1443_s28] sm:$0xff]  ;;  %v248_v44 = vld [vmem:[%s1443_s28 + $0x28] sm:$0xff] }
  0x29   : > { %v1410_v27 = vld [vmem:[%s1305_s7 + $0x78] sm:$0xff]  ;;  %v1435_v33 = vld [vmem:[%s1305_s7 + $0x90] sm:$0xff]  ;;  %v1074_v37 = vpack.c.bf16 %v244_v36, %v243_v35  ;;  %v974_v41 = vld [vmem:[%s1305_s7 + $0x180] sm:$0xff] }
  0x2a   : > { %376 = vrot.lane.b32.xlu1 %v1346_v7, %s1225_s13  ;;  %368 = vrot.lane.b32.xlu0 %v1349_v8, %s1225_s13  ;;  %v1413_v28 = vld [vmem:[%s1305_s7 + $0x18] sm:$0xff]  ;;  %v1438_v34 = vld [vmem:[%s1305_s7 + $0x30] sm:$0xff] }
  0x2b   : > { %1075 = vmatprep.subr.bf16.mxu0 %v1074_v37  ;;  %1090 = vmatprep.subr.bf16.mxu1 %v1074_v37  ;;  %v245_v38 = vld [vmem:[%s1443_s28 + $0x10] sm:$0xff]  ;;  %v246_v39 = vld [vmem:[%s1443_s28 + $0x18] sm:$0xff]  ;;  %v970_v42 = vld [vmem:[%s1305_s7 + $0x120] sm:$0xff] }
  0x2c   : > { %1077 = vmatpush3.bf16.msra.mxu0 %v1074_v37  ;;  %1095 = vmatpush3.bf16.msra.mxu1 %v1074_v37  ;;  %v1078_v40 = vpack.c.bf16 %v246_v39, %v245_v38  ;;  %v247_v43 = vld [vmem:[%s1443_s28 + $0x20] sm:$0xff]  ;;  %v981_v46 = vld [vmem:[%s1305_s7 + $0x171] sm:$0xff]  ;;  %v982_v52 = vld [vmem:[%s1305_s7 + $0x189] sm:$0xff] }
  0x2d   : > { %v1082_v45 = vpack.c.bf16 %v248_v44, %v247_v43  ;;  %v977_v47 = vld [vmem:[%s1305_s7 + $0x111] sm:$0xff]  ;;  %v251_v51 = vld [vmem:[%s1443_s28 + $0x40] sm:$0xff]  ;;  %v978_v53 = vld [vmem:[%s1305_s7 + $0x129] sm:$0xff] }
  0x2e   : > { %406 = vrot.lane.b32.xlu1 %v971_v9, %s1226_s14  ;;  %398 = vrot.lane.b32.xlu0 %v967_v10, %s1226_s14  ;;  %v249_v48 = vld [vmem:[%s1443_s28 + $0x30] sm:$0xff]  ;;  %v250_v49 = vld [vmem:[%s1443_s28 + $0x38] sm:$0xff] }
  0x2f   : > { %1079 = vmatprep.subr.bf16.mxu0 %v1078_v40  ;;  %1091 = vmatprep.subr.bf16.mxu1 %v1078_v40  ;;  %v1086_v50 = vpack.c.bf16 %v250_v49, %v249_v48  ;;  %v989_v54 = vld [vmem:[%s1305_s7 + $0x169] sm:$0xff]  ;;  %v990_v56 = vld [vmem:[%s1305_s7 + $0x181] sm:$0xff] }
  0x30   : > { %1081 = vmatpush3.bf16.msra.mxu0 %v1078_v40  ;;  %1096 = vmatpush3.bf16.msra.mxu1 %v1078_v40  ;;  %v985_v55 = vld [vmem:[%s1305_s7 + $0x109] sm:$0xff]  ;;  %v986_v57 = vld [vmem:[%s1305_s7 + $0x121] sm:$0xff] }
  0x31   : > { %1083 = vmatprep.subr.bf16.mxu0 %v1082_v45  ;;  %1092 = vmatprep.subr.bf16.mxu1 %v1082_v45  ;;  %v997_v58 = vld [vmem:[%s1305_s7 + $0xa8] sm:$0xff]  ;;  %v998_v60 = vld [vmem:[%s1305_s7 + $0xc0] sm:$0xff] }
  0x32   : > { %408 = vrot.lane.b32.xlu1 %v972_v11, %s1226_s14  ;;  %400 = vrot.lane.b32.xlu0 %v968_v12, %s1226_s14  ;;  %v993_v59 = vld [vmem:[%s1305_s7 + $0x48] sm:$0xff]  ;;  %v994_v61 = vld [vmem:[%s1305_s7 + $0x60] sm:$0xff] }
  0x33   : > { %v1006_v62 = vld [vmem:[%s1305_s7 + $0xc9] sm:$0xff]  ;;  %v252_v6 = vld [vmem:[%s1305_s7] sm:$0xff] }
  0x34   : > { %1085 = vmatpush3.bf16.msra.mxu0 %v1082_v45  ;;  %1097 = vmatpush3.bf16.msra.mxu1 %v1082_v45 }
  0x35   : > { %1087 = vmatprep.subr.bf16.mxu0 %v1086_v50  ;;  %1093 = vmatprep.subr.bf16.mxu1 %v1086_v50 }
  0x36   : > { %438 = vrot.lane.b32.xlu1 %v979_v13, %s1227_s22  ;;  %430 = vrot.lane.b32.xlu0 %v975_v14, %s1227_s22 }
  0x38   : > { %1089 = vmatpush3.bf16.msra.mxu0 %v1086_v50  ;;  %1098 = vmatpush3.bf16.msra.mxu1 %v1086_v50 }
  0x39   : > { %1060 = vmatprep.subr.mxu0 %v251_v51  ;;  %1094 = vmatprep.subr.mxu1 %v251_v51 }
  0x3a   : > { %346 = vrot.lane.b32.xlu1 %v1368_v15, %s1224_s11  ;;  %338 = vrot.lane.b32.xlu0 %v1371_v16, %s1224_s11 }
  0x3c   : > { %1061 = vmatpush3.msra.mxu0 %v251_v51  ;;  %1099 = vmatpush3.msra.mxu1 %v251_v51 }
  0x3e   : > { %440 = vrot.lane.b32.xlu1 %v980_v17, %s1227_s22  ;;  %432 = vrot.lane.b32.xlu0 %v976_v18, %s1227_s22 }
  0x42   : > { %470 = vrot.lane.b32.xlu1 %v987_v19, %s1228_s23  ;;  %462 = vrot.lane.b32.xlu0 %v983_v20, %s1228_s23 }
  0x46   : > { %348 = vrot.lane.b32.xlu1 %v1386_v21, %s1224_s11  ;;  %340 = vrot.lane.b32.xlu0 %v1389_v22, %s1224_s11 }
  0x4a   : > { %378 = vrot.lane.b32.xlu1 %v1396_v23, %s1225_s13  ;;  %370 = vrot.lane.b32.xlu0 %v1399_v24, %s1225_s13 }
  0x4e   : > { %472 = vrot.lane.b32.xlu1 %v988_v25, %s1228_s23  ;;  %464 = vrot.lane.b32.xlu0 %v984_v26, %s1228_s23 }
  0x52   : > { %502 = vrot.lane.b32.xlu1 %v1410_v27, %s1229_s24  ;;  %494 = vrot.lane.b32.xlu0 %v1413_v28, %s1229_s24 }
  0x56   : > { %380 = vrot.lane.b32.xlu1 %v1420_v29, %s1225_s13  ;;  %372 = vrot.lane.b32.xlu0 %v1423_v30, %s1225_s13 }
  0x5a   : > { %410 = vrot.lane.b32.xlu1 %v973_v31, %s1226_s14  ;;  %402 = vrot.lane.b32.xlu0 %v969_v32, %s1226_s14 }
  0x5e   : > { %504 = vrot.lane.b32.xlu1 %v1435_v33, %s1229_s24  ;;  %496 = vrot.lane.b32.xlu0 %v1438_v34, %s1229_s24 }
  0x62   : > { %534 = vrot.lane.b32.xlu1 %v1329_v3, %s1230_s29  ;;  %526 = vrot.lane.b32.xlu0 %v1322_v1, %s1230_s29 }
  0x66   : > { %412 = vrot.lane.b32.xlu1 %v974_v41, %s1226_s14  ;;  %404 = vrot.lane.b32.xlu0 %v970_v42, %s1226_s14 }
  0x6a   : > { %442 = vrot.lane.b32.xlu1 %v981_v46, %s1227_s22  ;;  %434 = vrot.lane.b32.xlu0 %v977_v47, %s1227_s22 }
  0x6e   : > { %536 = vrot.lane.b32.xlu1 %v1368_v15, %s1230_s29  ;;  %528 = vrot.lane.b32.xlu0 %v1371_v16, %s1230_s29 }
  0x72   : > { %566 = vrot.lane.b32.xlu1 %v1346_v7, %s1231_s30  ;;  %558 = vrot.lane.b32.xlu0 %v1349_v8, %s1231_s30  ;;  %v1014_v8 = vld [vmem:[%s1305_s7 + $0xc1] sm:$0xff] }
  0x76   : > { %444 = vrot.lane.b32.xlu1 %v982_v52, %s1227_s22  ;;  %436 = vrot.lane.b32.xlu0 %v978_v53, %s1227_s22 }
  0x7a   : > { %474 = vrot.lane.b32.xlu1 %v989_v54, %s1228_s23  ;;  %466 = vrot.lane.b32.xlu0 %v985_v55, %s1228_s23 }
  0x7e   : > { %568 = vrot.lane.b32.xlu1 %v1396_v23, %s1231_s30  ;;  %560 = vrot.lane.b32.xlu0 %v1399_v24, %s1231_s30 }
  0x82   : > { %476 = vrot.lane.b32.xlu1 %v990_v56, %s1228_s23  ;;  %468 = vrot.lane.b32.xlu0 %v986_v57, %s1228_s23 }
  0x86   : > { %506 = vrot.lane.b32.xlu1 %v997_v58, %s1229_s24  ;;  %498 = vrot.lane.b32.xlu0 %v993_v59, %s1229_s24 }
  0x8a   : > { %508 = vrot.lane.b32.xlu1 %v998_v60, %s1229_s24  ;;  %500 = vrot.lane.b32.xlu0 %v994_v61, %s1229_s24 }
  0x8e   : > { %538 = vrot.lane.b32.xlu1 %v1386_v21, %s1230_s29  ;;  %530 = vrot.lane.b32.xlu0 %v1389_v22, %s1230_s29 }
  0x90   : > { %v337_v63 = vpop.permute.xlu1 %336  ;;  %v335_v0 = vpop.permute.xlu0 %334 }
  0x91   : > { %v584_v1 = vsel %vm582_vm1, %v1413_v28, %v337_v63  ;;  %v583_v9 = vsel %vm582_vm1, %v252_v6, %v335_v0 }
  0x92   : > { %540 = vrot.lane.b32.xlu1 %v1006_v62, %s1230_s29  ;;  %532 = vrot.lane.b32.xlu0 %v1332_v4, %s1230_s29 }
  0x94   : > { %v345_v2 = vpop.permute.xlu1 %344  ;;  %v343_v3 = vpop.permute.xlu0 %342 }
  0x95   : > { %v587_v7 = vsel %vm582_vm1, %v994_v61, %v343_v3  ;;  %v588_v13 = vsel %vm582_vm1, %v1410_v27, %v345_v2 }
  0x96   : > { %570 = vrot.lane.b32.xlu1 %v1420_v29, %s1231_s30  ;;  %562 = vrot.lane.b32.xlu0 %v1423_v30, %s1231_s30 }
  0x98   : > { %v375_v10 = vpop.permute.xlu1 %374  ;;  %v367_v11 = vpop.permute.xlu0 %366 }
  0x99   : > { %v596_v12 = vsel %vm591_vm2, %v587_v7, %v375_v10  ;;  %v592_v4 = vsel %vm591_vm2, %v583_v9, %v367_v11 }
  0x9a   : > { %572 = vrot.lane.b32.xlu1 %v1014_v8, %s1231_s30  ;;  %564 = vrot.lane.b32.xlu0 %v1339_v5, %s1231_s30 }
  0x9c   : > { %v377_v14 = vpop.permute.xlu1 %376  ;;  %v369_v15 = vpop.permute.xlu0 %368 }
  0x9d   : > { %v597_v16 = vsel %vm591_vm2, %v588_v13, %v377_v14  ;;  %v593_v17 = vsel %vm591_vm2, %v584_v1, %v369_v15 }
  0xa0   : > { %v407_v18 = vpop.permute.xlu1 %406  ;;  %v399_v19 = vpop.permute.xlu0 %398 }
  0xa1   : > { %v605_v57 = vsel %vm600_vm3, %v596_v12, %v407_v18 }
  0xa4   : > { %v409_v20 = vpop.permute.xlu1 %408  ;;  %v401_v21 = vpop.permute.xlu0 %400 }
  0xa5   : > { %v1530_v22 = vsel %vm600_vm3, %v597_v16, %v409_v20  ;;  %v1533_v23 = vsel %vm600_vm3, %v593_v17, %v401_v21 }
  0xa8   : > { %v439_v5 = vpop.permute.xlu1 %438  ;;  %v431_v24 = vpop.permute.xlu0 %430 }
  0xa9   : > { %v614_v61 = vsel %vm609_vm4, %v605_v57, %v439_v5 }
  0xac   : > { %v347_v25 = vpop.permute.xlu1 %346  ;;  %v339_v26 = vpop.permute.xlu0 %338 }
  0xad   : > { %v589_v37 = vsel %vm582_vm1, %v1435_v33, %v347_v25  ;;  %v585_v38 = vsel %vm582_vm1, %v1438_v34, %v339_v26 }
  0xb0   : > { %v441_v27 = vpop.permute.xlu1 %440  ;;  %v433_v28 = vpop.permute.xlu0 %432 }
  0xb1   : > { %v615_v14 = vsel %vm609_vm4, %v1530_v22, %v441_v27  ;;  %v611_v15 = vsel %vm609_vm4, %v1533_v23, %v433_v28 }
  0xb4   : > { %v471_v29 = vpop.permute.xlu1 %470  ;;  %v463_v30 = vpop.permute.xlu0 %462 }
  0xb5   : > { %v623_v63 = vsel %vm618_vm5, %v614_v61, %v471_v29 }
  0xb8   : > { %v349_v31 = vpop.permute.xlu1 %348  ;;  %v341_v32 = vpop.permute.xlu0 %340 }
  0xb9   : > { %v1536_v35 = vsel %vm582_vm1, %v997_v58, %v349_v31  ;;  %v1539_v36 = vsel %vm582_vm1, %v993_v59, %v341_v32  ;;  %v601_v58 = vsel %vm600_vm3, %v592_v4, %v399_v19 }
  0xba   : > { %v610_v62 = vsel %vm609_vm4, %v601_v58, %v431_v24 }
  0xbb   : > { %v619_v0 = vsel %vm618_vm5, %v610_v62, %v463_v30 }
  0xbc   : > { %v379_v39 = vpop.permute.xlu1 %378  ;;  %v371_v40 = vpop.permute.xlu0 %370 }
  0xbd   : > { %v1546_v41 = vsel %vm591_vm2, %v589_v37, %v379_v39  ;;  %v1549_v42 = vsel %vm591_vm2, %v585_v38, %v371_v40 }
  0xc0   : > { %v473_v43 = vpop.permute.xlu1 %472  ;;  %v465_v44 = vpop.permute.xlu0 %464 }
  0xc1   : > { %v624_v16 = vsel %vm618_vm5, %v615_v14, %v473_v43  ;;  %v620_v17 = vsel %vm618_vm5, %v611_v15, %v465_v44  ;;  %v657_v14 = vld [vmem:[%s1310_s10 + $0x18] sm:$0xff] }
  0xc2   : > { %v661_v15 = vld [vmem:[%s1310_s10 + $0x38] sm:$0xff] }
  0xc4   : > { %v503_v45 = vpop.permute.xlu1 %502  ;;  %v495_v46 = vpop.permute.xlu0 %494 }
  0xc5   : > { %v632_v1 = vsel %vm627_vm6, %v623_v63, %v503_v45  ;;  %v628_v2 = vsel %vm627_vm6, %v619_v0, %v495_v46 }
  0xc8   : > { %v1551_v47 = vpop.permute.xlu1 %380  ;;  %v1553_v48 = vpop.permute.xlu0 %372 }
  0xcc   : > { %v411_v33 = vpop.permute.xlu1 %410  ;;  %v403_v49 = vpop.permute.xlu0 %402 }
  0xcd   : > { %v607_v37 = vsel %vm600_vm3, %v1546_v41, %v411_v33  ;;  %v603_v38 = vsel %vm600_vm3, %v1549_v42, %v403_v49  ;;  %v595_v41 = vsel %vm591_vm2, %v1539_v36, %v1553_v48 }
  0xd0   : > { %v505_v50 = vpop.permute.xlu1 %504  ;;  %v497_v34 = vpop.permute.xlu0 %496 }
  0xd1   : > { %v633_v18 = vsel %vm627_vm6, %v624_v16, %v505_v50  ;;  %v629_v19 = vsel %vm627_vm6, %v620_v17, %v497_v34  ;;  %v599_v50 = vsel %vm591_vm2, %v1536_v35, %v1551_v47  ;;  %v656_v16 = vld [vmem:[%s1310_s10 + $0x10] sm:$0xff] }
  0xd2   : > { %v660_v17 = vld [vmem:[%s1310_s10 + $0x30] sm:$0xff] }
  0xd4   : > { %v535_v51 = vpop.permute.xlu1 %534  ;;  %v527_v52 = vpop.permute.xlu0 %526 }
  0xd5   : > { %v641_v3 = vsel %vm636_vm7, %v632_v1, %v535_v51  ;;  %v637_v6 = vsel %vm636_vm7, %v628_v2, %v527_v52  ;;  %v655_v1 = vld [vmem:[%s1310_s10 + $0x8] sm:$0xff] }
  0xd6   : > { %v659_v2 = vld [vmem:[%s1310_s10 + $0x28] sm:$0xff] }
  0xd8   : > { %v1555_v53 = vpop.permute.xlu1 %412  ;;  %v1557_v54 = vpop.permute.xlu0 %404 }
  0xd9   : > { %v608_v49 = vsel %vm600_vm3, %v599_v50, %v1555_v53  ;;  %v604_v34 = vsel %vm600_vm3, %v595_v41, %v1557_v54 }
  0xdc   : > { %v443_v55 = vpop.permute.xlu1 %442  ;;  %v435_v56 = vpop.permute.xlu0 %434 }
  0xdd   : > { %v616_v43 = vsel %vm609_vm4, %v607_v37, %v443_v55  ;;  %v612_v44 = vsel %vm609_vm4, %v603_v38, %v435_v56 }
  0xe0   : > { %v537_v59 = vpop.permute.xlu1 %536  ;;  %v529_v60 = vpop.permute.xlu0 %528 }
  0xe1   : > { %v642_v20 = vsel %vm636_vm7, %v633_v18, %v537_v59  ;;  %v638_v21 = vsel %vm636_vm7, %v629_v19, %v529_v60 }
  0xe4   : > { %v567_v7 = vpop.permute.xlu1 %566  ;;  %v559_v8 = vpop.permute.xlu0 %558 }
  0xe5   : > { %v646_v9 = vsel %vm645_vm8, %v637_v6, %v559_v8  ;;  %v650_v10 = vsel %vm645_vm8, %v641_v3, %v567_v7  ;;  %v654_v3 = vld [vmem:[%s1310_s10] sm:$0xff] }
  0xe6   : > { %1062 = vmatprep.mubr.msk.f32.mxu0 %vm662_vm9, %v646_v9  ;;  %1068 = vmatprep.mubr.msk.f32.mxu1 %vm662_vm9, %v650_v10  ;;  %v658_v6 = vld [vmem:[%s1310_s10 + $0x20] sm:$0xff] }
  0xe8   : > { %v445_v11 = vpop.permute.xlu1 %444  ;;  %v437_v12 = vpop.permute.xlu0 %436 }
  0xe9   : > { %v617_v47 = vsel %vm609_vm4, %v608_v49, %v445_v11  ;;  %v613_v36 = vsel %vm609_vm4, %v604_v34, %v437_v12 }
  0xec   : > { %v475_v4 = vpop.permute.xlu1 %474  ;;  %v467_v13 = vpop.permute.xlu0 %466 }
  0xed   : > { %v625_v45 = vsel %vm618_vm5, %v616_v43, %v475_v4  ;;  %v621_v46 = vsel %vm618_vm5, %v612_v44, %v467_v13 }
  0xf0   : > { %v569_v5 = vpop.permute.xlu1 %568  ;;  %v561_v24 = vpop.permute.xlu0 %560 }
  0xf1   : > { %v651_v25 = vsel %vm645_vm8, %v642_v20, %v569_v5  ;;  %v647_v22 = vsel %vm645_vm8, %v638_v21, %v561_v24 }
  0xf2   : > { %1063 = vmatmul.mubr.msk.f32.vlgmr.msra.gmra.mrb[0].mxu0 %vm662_vm9, %v647_v22  ;;  %1069 = vmatmul.mubr.msk.f32.vlgmr.msra.gmra.mrb[0].mxu1 %vm662_vm9, %v651_v25 }
  0xf4   : > { %v477_v23 = vpop.permute.xlu1 %476  ;;  %v469_v26 = vpop.permute.xlu0 %468 }
  0xf5   : > { %v626_v53 = vsel %vm618_vm5, %v617_v47, %v477_v23  ;;  %v622_v54 = vsel %vm618_vm5, %v613_v36, %v469_v26  ;;  %v1024_v26 = vld [vmem:[%s1700_s2] ss:$0 sm:$0xff] (!%p1023_p10) }
  0xf8   : > { %v507_v27 = vpop.permute.xlu1 %506  ;;  %v499_v28 = vpop.permute.xlu0 %498 }
  0xf9   : > { %v634_v42 = vsel %vm627_vm6, %v625_v45, %v507_v27  ;;  %v630_v33 = vsel %vm627_vm6, %v621_v46, %v499_v28 }
  0xfc   : > { %v509_v29 = vpop.permute.xlu1 %508  ;;  %v501_v30 = vpop.permute.xlu0 %500 }
  0xfd   : > { %v635_v57 = vsel %vm627_vm6, %v626_v53, %v509_v29  ;;  %v631_v58 = vsel %vm627_vm6, %v622_v54, %v501_v30 }
 0x100   : > { %v539_v31 = vpop.permute.xlu1 %538  ;;  %v531_v32 = vpop.permute.xlu0 %530 }
 0x101   : > { %v643_v51 = vsel %vm636_vm7, %v634_v42, %v539_v31  ;;  %v639_v52 = vsel %vm636_vm7, %v630_v33, %v531_v32 }
 0x104   : > { %v541_v39 = vpop.permute.xlu1 %540  ;;  %v533_v40 = vpop.permute.xlu0 %532 }
 0x105   : > { %v644_v59 = vsel %vm636_vm7, %v635_v57, %v541_v39  ;;  %v640_v60 = vsel %vm636_vm7, %v631_v58, %v533_v40 }
 0x108   : > { %v571_v55 = vpop.permute.xlu1 %570  ;;  %v563_v35 = vpop.permute.xlu0 %562 }
 0x109   : > { %v652_v48 = vsel %vm645_vm8, %v643_v51, %v571_v55  ;;  %v648_v56 = vsel %vm645_vm8, %v639_v52, %v563_v35 }
 0x10a   : > { %1065 = vmatprep.mubr.msk.f32.mxu0 %vm662_vm9, %v648_v56  ;;  %1071 = vmatprep.mubr.msk.f32.mxu1 %vm662_vm9, %v652_v48 }
 0x10c   : > { %v573_v61 = vpop.permute.xlu1 %572  ;;  %v565_v62 = vpop.permute.xlu0 %564 }
 0x10d   : > { %v653_v63 = vsel %vm645_vm8, %v644_v59, %v573_v61  ;;  %v649_v0 = vsel %vm645_vm8, %v640_v60, %v565_v62 }
 0x10e   : > { %1066 = vmatmul.mubr.msk.f32.gmra.mrb[2].mxu0 %vm662_vm9, %v649_v0  ;;  %1072 = vmatmul.mubr.msk.f32.gmra.mrb[2].mxu1 %vm662_vm9, %v653_v63 }
 0x1c5   : > { %v1064_v7 = vpop.f32.mrb[0].mxu0  ;;  %v1070_v8 = vpop.f32.mrb[0].mxu1 }
 0x1c6   : > { %v793_v9 = vadd.f32 %v1064_v7, %v655_v1  ;;  %v797_v10 = vadd.f32 %v1070_v8, %v659_v2  ;;  %v753_v11 = vpop.f32.mrb[1].mxu0  ;;  %v773_v12 = vpop.f32.mrb[1].mxu1 }
 0x1c7   : > { %v792_v4 = vadd.f32 %v753_v11, %v654_v3  ;;  %v796_v13 = vadd.f32 %v773_v12, %v658_v6 }
 0x1c8   : > { %801 = vst.msk [vmem:[%s1310_s10 + $0x8] sm:$0xff] %vm582_vm1, %v793_v9  ;;  %805 = vst.msk [vmem:[%s1310_s10 + $0x28] sm:$0xff] %vm582_vm1, %v797_v10 }
 0x1c9   : > { %800 = vst.msk [vmem:[%s1310_s10] sm:$0xff] %vm582_vm1, %v792_v4  ;;  %804 = vst.msk [vmem:[%s1310_s10 + $0x20] sm:$0xff] %vm582_vm1, %v796_v13 }
 0x1cf   : > { %v813_v27 = vld [vmem:[%s1310_s10 + $0x8] sm:$0xff] (!%p1023_p10) }
 0x1d0   : > { %v812_v23 = vld [vmem:[%s1310_s10] sm:$0xff] (!%p1023_p10)  ;;  %v828_v29 = vadd.f32 (!%p1023_p10), %v1024_v26, %v813_v27  ;;  %v817_v40 = vld [vmem:[%s1310_s10 + $0x28] sm:$0xff] (!%p1023_p10) }
 0x1d1   : > { %v827_v28 = vadd.f32 (!%p1023_p10), %v1024_v26, %v812_v23  ;;  %v816_v32 = vld [vmem:[%s1310_s10 + $0x20] sm:$0xff] (!%p1023_p10)  ;;  %v832_v50 = vadd.f32 (!%p1023_p10), %v1024_v26, %v817_v40 }
 0x1d2   : > { %v831_v39 = vadd.f32 (!%p1023_p10), %v1024_v26, %v816_v32  ;;  %v836_v46 = vmax.f32 (!%p1023_p10), %v828_v29, 0.0 }
 0x1d3   : > { %v835_v45 = vmax.f32 (!%p1023_p10), %v827_v28, 0.0  ;;  %v840_v51 = vmax.f32 (!%p1023_p10), %v832_v50, 0.0 }
 0x1d4   : > { %v839_v49 = vmax.f32 (!%p1023_p10), %v831_v39, 0.0  ;;  %844 = vst.msk [vmem:[%s1310_s10 + $0x8] sm:$0xff] (!%p1023_p10), %vm582_vm1, %v836_v46 }
 0x1d5   : > { %843 = vst.msk [vmem:[%s1310_s10] sm:$0xff] (!%p1023_p10), %vm582_vm1, %v835_v45  ;;  %848 = vst.msk [vmem:[%s1310_s10 + $0x28] sm:$0xff] (!%p1023_p10), %vm582_vm1, %v840_v51 }
 0x1d6   : > { %847 = vst.msk [vmem:[%s1310_s10 + $0x20] sm:$0xff] (!%p1023_p10), %vm582_vm1, %v839_v49 }
 0x1df   : > { %811 = sbr.rel (%p1023_p10) target bundleno = 499 (0x1f3), region = 40 }
 0x1e1   : > { %v1067_v18 = vpop.f32.mrb[2].mxu0  ;;  %v1073_v19 = vpop.f32.mrb[2].mxu1 }
 0x1e2   : > { %v795_v20 = vadd.f32 %v1067_v18, %v657_v14  ;;  %v799_v21 = vadd.f32 %v1073_v19, %v661_v15  ;;  %v763_v5 = vpop.f32.mrb[3].mxu0  ;;  %v783_v24 = vpop.f32.mrb[3].mxu1 }
 0x1e3   : > { %v794_v25 = vadd.f32 %v763_v5, %v656_v16  ;;  %v798_v22 = vadd.f32 %v783_v24, %v660_v17 }
 0x1e4   : > { %803 = vst.msk [vmem:[%s1310_s10 + $0x18] sm:$0xff] %vm582_vm1, %v795_v20  ;;  %807 = vst.msk [vmem:[%s1310_s10 + $0x38] sm:$0xff] %vm582_vm1, %v799_v21 }
 0x1e5   : > { %802 = vst.msk [vmem:[%s1310_s10 + $0x10] sm:$0xff] %vm582_vm1, %v794_v25  ;;  %806 = vst.msk [vmem:[%s1310_s10 + $0x30] sm:$0xff] %vm582_vm1, %v798_v22 }
 0x1eb   : > { %v815_v31 = vld [vmem:[%s1310_s10 + $0x18] sm:$0xff] }
 0x1ec   : > { %v814_v30 = vld [vmem:[%s1310_s10 + $0x10] sm:$0xff]  ;;  %v830_v38 = vadd.f32 %v1024_v26, %v815_v31  ;;  %v819_v44 = vld [vmem:[%s1310_s10 + $0x38] sm:$0xff] }
 0x1ed   : > { %v829_v37 = vadd.f32 %v1024_v26, %v814_v30  ;;  %v818_v43 = vld [vmem:[%s1310_s10 + $0x30] sm:$0xff]  ;;  %v834_v34 = vadd.f32 %v1024_v26, %v819_v44 }
 0x1ee   : > { %v833_v41 = vadd.f32 %v1024_v26, %v818_v43  ;;  %v838_v33 = vmax.f32 %v830_v38, 0.0 }
 0x1ef   : > { %v837_v42 = vmax.f32 %v829_v37, 0.0  ;;  %v842_v55 = vmax.f32 %v834_v34, 0.0 }
 0x1f0   : > { %v841_v52 = vmax.f32 %v833_v41, 0.0  ;;  %846 = vst.msk [vmem:[%s1310_s10 + $0x18] sm:$0xff] %vm582_vm1, %v838_v33 }
 0x1f1   : > { %845 = vst.msk [vmem:[%s1310_s10 + $0x10] sm:$0xff] %vm582_vm1, %v837_v42  ;;  %850 = vst.msk [vmem:[%s1310_s10 + $0x38] sm:$0xff] %vm582_vm1, %v842_v55 }
 0x1f2   : > { %849 = vst.msk [vmem:[%s1310_s10 + $0x30] sm:$0xff] %vm582_vm1, %v841_v52 }
 0x1f3 PF: > { %s13_s18 = sadd.s32 1, %s1221_s18   ;;  %s1702_s12 = smov %s1209_s15 }
 0x1f4   : > { %p10_p11 = scmp.ge.s32.totalorder %s13_s18, 14   ;;  %s1703_s13 = smov %s1213_s16 }
 0x1f5   : > { %s1704_s14 = smov %s1217_s17  ;;  %s1705_s15 = smov %s1709_s19 }
 0x1f6   : > { %s1706_s16 = smov %s1713_s20  ;;  %s1707_s17 = smov %s1717_s21 }
 0x1f7   :  { %12 = sbr.rel (!%p10_p11) target bundleno = 4 (0x4), region = 73 }

// kernel: hourglass_forward.9
= control target key start
LH: loop header
LB: loop body
LE: loop exit
PB: predicated region body
PF: predicated region fallthrough
CT: control target
= control target key end

     0   :  { %s1242_s12 = smov 0   ;;  %s1244_s13 = smov 0   ;;  %s1664_s0 = inlined_call_operand.vmem [shape: f32[2,4,10,10,8], index: 0, kind: input, shape index: {}]   ;;  %s1665_s1 = inlined_call_operand.vmem [shape: f32[3,72,8], index: 1, kind: input, shape index: {}]   ;;  %s1666_s2 = inlined_call_operand.vmem [shape: f32[1,8], index: 2, kind: input, shape index: {}]   ;;  %s1667_s3 = inlined_call_operand.vmem [shape: f32[2,2,64,8], index: 3, kind: output, shape index: {}]  }
   0x1   :  { %s1246_s14 = smov 0   ;;  %s1248_s15 = smov 0  }
   0x2   :  { %s1250_s16 = smov 0   ;;  %s1252_s17 = smov 0  }
   0x3   :  { %s1254_s18 = smov 0  }
   0x4 LB: > { %s25_s19 = sadd.s32 1, %s1199_s15  ;;  %s28_s20 = sadd.s32 1, %s1203_s16  ;;  %s1211_s18 = sphi %s1254_s18, %s13_s18   ;;  %s1207_s17 = sphi %s1252_s17, %s1673_s17   ;;  %s1203_s16 = sphi %s1250_s16, %s1672_s16   ;;  %s1199_s15 = sphi %s1248_s15, %s1671_s15   ;;  %s1195_s14 = sphi %s1246_s14, %s1670_s14   ;;  %s1191_s13 = sphi %s1244_s13, %s1669_s13   ;;  %s1187_s12 = sphi %s1242_s12, %s1668_s12  }
   0x5   : > { %p26_p0 = scmp.ge.s32.totalorder %s25_s19, 3  ;;  %p951_p1 = scmp.ge.s32.totalorder %s1211_s18, 1 }
   0x6   : > { %p168_p2 = scmp.lt.s32.totalorder %s1211_s18, 13  ;;  %s32_s21 = sadd.s32 1, %s1207_s17 }
   0x7   : > { %s1675_s19 = smov (%p26_p0, %s25_s19), 0  ;;  %s1677_s20 = smov (!%p26_p0, %s28_s20), %s1203_s16 }
   0x8   : > { %p169_p3 = pnand %p951_p1, %p168_p2  ;;  %p30_p4 = scmp.ge.s32.totalorder %s1677_s20, 2 }
   0x9   : > { %s201_s22 = sadd.s32 (!%p169_p3), %s1187_s12, %s1191_s13  ;;  %p202_p6 = scmp.lt.s32.totalorder (!%p169_p3), %s1195_s14, 1 }
   0xa   : > { %s1679_s20 = smov (%p30_p4, %s1677_s20), 0  ;;  %s1681_s21 = smov (!%p30_p4, %s32_s21), %s1207_s17 }
   0xb   : > { %p34_p5 = scmp.ge.s32.totalorder %s1681_s21, 2  ;;  %172 = sbr.rel (%p169_p3) target bundleno = 499 (0x1f3), region = 32 }
   0xc   : > { %p204_p7 = scmp.lt.s32.totalorder (!%p169_p3), %s201_s22, 3  ;;  %p214_p8 = scmp.lt.s32.totalorder (!%p169_p3), %s1191_s13, 1 }
   0xd   : > { %s1683_s21 = smov (%p34_p5, %s1681_s21), 0  ;;  %p956_p9 = scmp.ne.s32.totalorder (!%p169_p3), %s1187_s12, 0 }
  0x12   : > { %s1685_s14 = smov (!%p202_p6, %s1195_s14), 1  ;;  %s1687_s22 = smov (!%p204_p7, %s201_s22), 3 }
  0x13   : > { %s1091_s23 = smul.u32 80, %s1685_s14  ;;  %s954_s25 = sshll.u32 %s1685_s14, 4  ;;  %vm225_vm0 = vcmask (!%p956_p9), 64512   ;;  %v1213_v0 = vmov (!%p956_p9), 0.0  }
  0x14   : > { %s1090_s24 = smul.u32 20, %s1687_s22  ;;  %s1689_s13 = smov (!%p214_p8, %s1191_s13), 1 }
  0x15   : > { %s953_s28 = sshll.u32 %s1689_s13, 3  ;;  %224 = sbr.rel (%p956_p9) target bundleno = 29 (0x1d), region = 36 }
  0x16   : > { %s208_s26 = sadd.s32 %s1091_s23, %s1090_s24  ;;  %s218_s5 = sadd.s32 %s954_s25, %s953_s28 }
  0x17   : > { %s952_s27 = sshll.u32 %s208_s26, 3  ;;  %s955_s6 = sshll.u32 %s218_s5, 3 }
  0x18   : > { %s1295_s4 = scalar_lea.vmem %s1664_s0, %s952_s27  ;;  %s1300_s9 = scalar_lea.vmem %s1667_s3, %s955_s6 }
  0x19   : > { %226 = vst.msk [vmem:[%s1300_s9] sm:$0xff] (!%p956_p9), %vm225_vm0, %v1213_v0  ;;  %227 = vst.msk [vmem:[%s1300_s9 + $0x8] sm:$0xff] (!%p956_p9), %vm225_vm0, %v1213_v0 }
  0x1a   : > { %228 = vst.msk [vmem:[%s1300_s9 + $0x10] sm:$0xff] (!%p956_p9), %vm225_vm0, %v1213_v0  ;;  %229 = vst.msk [vmem:[%s1300_s9 + $0x18] sm:$0xff] (!%p956_p9), %vm225_vm0, %v1213_v0 }
  0x1b   : > { %230 = vst.msk [vmem:[%s1300_s9 + $0x20] sm:$0xff] (!%p956_p9), %vm225_vm0, %v1213_v0  ;;  %231 = vst.msk [vmem:[%s1300_s9 + $0x28] sm:$0xff] (!%p956_p9), %vm225_vm0, %v1213_v0 }
  0x1c   : > { %232 = vst.msk [vmem:[%s1300_s9 + $0x30] sm:$0xff] %vm225_vm0, %v1213_v0  ;;  %233 = vst.msk [vmem:[%s1300_s9 + $0x38] sm:$0xff] %vm225_vm0, %v1213_v0 }
  0x1d PF: > { %v254_v1 = vld [vmem:[%s1295_s4 + $0x11] sm:$0xff]  ;;  %v253_v2 = vld [vmem:[%s1295_s4 + $0x1] sm:$0xff]  ;;  %s1214_s10 = smov 8   ;;  %s1215_s11 = smov 16   ;;  %vm575_vm1 = vcmask 64512   ;;  %vm584_vm2 = vcmask 130048  }
  0x1e   : > { %329 = vrot.lane.b32.xlu1 %v254_v1, %s1214_s10  ;;  %327 = vrot.lane.b32.xlu0 %v253_v2, %s1214_s10  ;;  %v1316_v3 = vld [vmem:[%s1295_s4 + $0x51] sm:$0xff]  ;;  %v1319_v4 = vld [vmem:[%s1295_s4 + $0x41] sm:$0xff]  ;;  %s1216_s13 = smov 24   ;;  %s1217_s14 = smov 32   ;;  %vm593_vm3 = vcmask 195584   ;;  %vm602_vm4 = vcmask 261120  }
  0x1f   : > { %v1326_v5 = vld [vmem:[%s1295_s4 + $0x42] sm:$0xff]  ;;  %v1333_v7 = vld [vmem:[%s1295_s4 + $0x52] sm:$0xff]  ;;  %s1218_s22 = smov 40   ;;  %s1219_s23 = smov 48   ;;  %vm611_vm5 = vcmask 326656   ;;  %vm620_vm6 = vcmask 392192  }
  0x20   : > { %v261_v6 = vld [vmem:[%s1295_s4 + $0x2] sm:$0xff]  ;;  %v262_v8 = vld [vmem:[%s1295_s4 + $0x12] sm:$0xff]  ;;  %s234_s24 = smul.u32 72, %s1187_s12  ;;  %s1220_s28 = smov 56   ;;  %vm629_vm7 = vcmask 457728   ;;  %vm638_vm8 = vcmask 523264  }
  0x21   : > { %v1340_v9 = vld [vmem:[%s1295_s4 + $0x50] sm:$0xff]  ;;  %v1350_v11 = vld [vmem:[%s1295_s4 + $0x60] sm:$0xff]  ;;  %s1221_s29 = smov 64   ;;  %vm655_vm9 = vcmask 588800   ;;  %p1013_p10 = scmp.ne.s32.totalorder %s1187_s12, 2 }
  0x22   : > { %337 = vrot.lane.b32.xlu1 %v1316_v3, %s1214_s10  ;;  %335 = vrot.lane.b32.xlu0 %v1319_v4, %s1214_s10  ;;  %v1343_v10 = vld [vmem:[%s1295_s4 + $0x10] sm:$0xff]  ;;  %v1353_v12 = vld [vmem:[%s1295_s4 + $0x20] sm:$0xff]  ;;  %s1417_s27 = scalar_lea.vmem %s1665_s1, %s234_s24 }
  0x23   : > { %v259_v13 = vld [vmem:[%s1295_s4 + $0x61] sm:$0xff]  ;;  %v260_v15 = vld [vmem:[%s1295_s4 + $0x71] sm:$0xff] }
  0x24   : > { %v255_v14 = vld [vmem:[%s1295_s4 + $0x21] sm:$0xff]  ;;  %v256_v16 = vld [vmem:[%s1295_s4 + $0x31] sm:$0xff] }
  0x25   : > { %v1376_v17 = vld [vmem:[%s1295_s4 + $0x62] sm:$0xff]  ;;  %v1394_v19 = vld [vmem:[%s1295_s4 + $0x72] sm:$0xff] }
  0x26   : > { %367 = vrot.lane.b32.xlu1 %v1326_v5, %s1215_s11  ;;  %359 = vrot.lane.b32.xlu0 %v261_v6, %s1215_s11  ;;  %v1379_v18 = vld [vmem:[%s1295_s4 + $0x22] sm:$0xff]  ;;  %v1397_v20 = vld [vmem:[%s1295_s4 + $0x32] sm:$0xff] }
  0x27   : > { %v1404_v21 = vld [vmem:[%s1295_s4 + $0x70] sm:$0xff]  ;;  %v236_v23 = vld [vmem:[%s1417_s27] sm:$0xff]  ;;  %v237_v24 = vld [vmem:[%s1417_s27 + $0x8] sm:$0xff] }
  0x28   : > { %v1407_v22 = vld [vmem:[%s1295_s4 + $0x30] sm:$0xff]  ;;  %v1064_v25 = vpack.c.bf16 %v237_v24, %v236_v23  ;;  %v239_v27 = vld [vmem:[%s1417_s27 + $0x18] sm:$0xff]  ;;  %v964_v29 = vld [vmem:[%s1295_s4 + $0x80] sm:$0xff] }
  0x29   : > { %v238_v26 = vld [vmem:[%s1417_s27 + $0x10] sm:$0xff]  ;;  %v960_v30 = vld [vmem:[%s1295_s4 + $0x40] sm:$0xff]  ;;  %v241_v32 = vld [vmem:[%s1417_s27 + $0x28] sm:$0xff] }
  0x2a   : > { %369 = vrot.lane.b32.xlu1 %v1333_v7, %s1215_s11  ;;  %361 = vrot.lane.b32.xlu0 %v262_v8, %s1215_s11  ;;  %v1068_v28 = vpack.c.bf16 %v239_v27, %v238_v26  ;;  %v240_v31 = vld [vmem:[%s1417_s27 + $0x20] sm:$0xff]  ;;  %v242_v34 = vld [vmem:[%s1417_s27 + $0x30] sm:$0xff] }
  0x2b   : > { %1065 = vmatprep.subr.bf16.mxu0 %v1064_v25  ;;  %1080 = vmatprep.subr.bf16.mxu1 %v1064_v25  ;;  %v1072_v33 = vpack.c.bf16 %v241_v32, %v240_v31  ;;  %v243_v35 = vld [vmem:[%s1417_s27 + $0x38] sm:$0xff]  ;;  %v244_v37 = vld [vmem:[%s1417_s27 + $0x40] sm:$0xff]  ;;  %v988_v40 = vld [vmem:[%s1295_s4 + $0x90] sm:$0xff] }
  0x2c   : > { %1067 = vmatpush3.bf16.msra.mxu0 %v1064_v25  ;;  %1085 = vmatpush3.bf16.msra.mxu1 %v1064_v25  ;;  %v1076_v36 = vpack.c.bf16 %v243_v35, %v242_v34  ;;  %v972_v38 = vld [vmem:[%s1295_s4 + $0x81] sm:$0xff]  ;;  %v996_v41 = vld [vmem:[%s1295_s4 + $0x91] sm:$0xff] }
  0x2d   : > { %1069 = vmatprep.subr.bf16.mxu0 %v1068_v28  ;;  %1081 = vmatprep.subr.bf16.mxu1 %v1068_v28  ;;  %v980_v39 = vld [vmem:[%s1295_s4 + $0x82] sm:$0xff]  ;;  %v1004_v48 = vld [vmem:[%s1295_s4 + $0x92] sm:$0xff] }
  0x2e   : > { %399 = vrot.lane.b32.xlu1 %v1340_v9, %s1216_s13  ;;  %391 = vrot.lane.b32.xlu0 %v1343_v10, %s1216_s13  ;;  %v245_v46 = vld [vmem:[%s1295_s4] sm:$0xff] }
  0x30   : > { %1071 = vmatpush3.bf16.msra.mxu0 %v1068_v28  ;;  %1086 = vmatpush3.bf16.msra.mxu1 %v1068_v28 }
  0x31   : > { %1073 = vmatprep.subr.bf16.mxu0 %v1072_v33  ;;  %1082 = vmatprep.subr.bf16.mxu1 %v1072_v33 }
  0x32   : > { %401 = vrot.lane.b32.xlu1 %v1350_v11, %s1216_s13  ;;  %393 = vrot.lane.b32.xlu0 %v1353_v12, %s1216_s13 }
  0x34   : > { %1075 = vmatpush3.bf16.msra.mxu0 %v1072_v33  ;;  %1087 = vmatpush3.bf16.msra.mxu1 %v1072_v33 }
  0x35   : > { %1077 = vmatprep.subr.bf16.mxu0 %v1076_v36  ;;  %1083 = vmatprep.subr.bf16.mxu1 %v1076_v36 }
  0x36   : > { %431 = vrot.lane.b32.xlu1 %v1316_v3, %s1217_s14  ;;  %423 = vrot.lane.b32.xlu0 %v254_v1, %s1217_s14 }
  0x38   : > { %1079 = vmatpush3.bf16.msra.mxu0 %v1076_v36  ;;  %1088 = vmatpush3.bf16.msra.mxu1 %v1076_v36 }
  0x39   : > { %1050 = vmatprep.subr.mxu0 %v244_v37  ;;  %1084 = vmatprep.subr.mxu1 %v244_v37 }
  0x3a   : > { %339 = vrot.lane.b32.xlu1 %v259_v13, %s1214_s10  ;;  %331 = vrot.lane.b32.xlu0 %v255_v14, %s1214_s10 }
  0x3c   : > { %1051 = vmatpush3.msra.mxu0 %v244_v37  ;;  %1089 = vmatpush3.msra.mxu1 %v244_v37 }
  0x3e   : > { %433 = vrot.lane.b32.xlu1 %v259_v13, %s1217_s14  ;;  %425 = vrot.lane.b32.xlu0 %v255_v14, %s1217_s14 }
  0x42   : > { %463 = vrot.lane.b32.xlu1 %v1333_v7, %s1218_s22  ;;  %455 = vrot.lane.b32.xlu0 %v262_v8, %s1218_s22 }
  0x46   : > { %341 = vrot.lane.b32.xlu1 %v260_v15, %s1214_s10  ;;  %333 = vrot.lane.b32.xlu0 %v256_v16, %s1214_s10 }
  0x4a   : > { %371 = vrot.lane.b32.xlu1 %v1376_v17, %s1215_s11  ;;  %363 = vrot.lane.b32.xlu0 %v1379_v18, %s1215_s11 }
  0x4e   : > { %465 = vrot.lane.b32.xlu1 %v1376_v17, %s1218_s22  ;;  %457 = vrot.lane.b32.xlu0 %v1379_v18, %s1218_s22 }
  0x52   : > { %495 = vrot.lane.b32.xlu1 %v1350_v11, %s1219_s23  ;;  %487 = vrot.lane.b32.xlu0 %v1353_v12, %s1219_s23 }
  0x56   : > { %373 = vrot.lane.b32.xlu1 %v1394_v19, %s1215_s11  ;;  %365 = vrot.lane.b32.xlu0 %v1397_v20, %s1215_s11 }
  0x5a   : > { %403 = vrot.lane.b32.xlu1 %v1404_v21, %s1216_s13  ;;  %395 = vrot.lane.b32.xlu0 %v1407_v22, %s1216_s13 }
  0x5e   : > { %497 = vrot.lane.b32.xlu1 %v1404_v21, %s1219_s23  ;;  %489 = vrot.lane.b32.xlu0 %v1407_v22, %s1219_s23 }
  0x62   : > { %527 = vrot.lane.b32.xlu1 %v259_v13, %s1220_s28  ;;  %519 = vrot.lane.b32.xlu0 %v255_v14, %s1220_s28 }
  0x66   : > { %405 = vrot.lane.b32.xlu1 %v964_v29, %s1216_s13  ;;  %397 = vrot.lane.b32.xlu0 %v960_v30, %s1216_s13 }
  0x6a   : > { %435 = vrot.lane.b32.xlu1 %v260_v15, %s1217_s14  ;;  %427 = vrot.lane.b32.xlu0 %v256_v16, %s1217_s14 }
  0x6e   : > { %529 = vrot.lane.b32.xlu1 %v260_v15, %s1220_s28  ;;  %521 = vrot.lane.b32.xlu0 %v256_v16, %s1220_s28 }
  0x72   : > { %559 = vrot.lane.b32.xlu1 %v1376_v17, %s1221_s29  ;;  %551 = vrot.lane.b32.xlu0 %v1379_v18, %s1221_s29 }
  0x76   : > { %437 = vrot.lane.b32.xlu1 %v972_v38, %s1217_s14  ;;  %429 = vrot.lane.b32.xlu0 %v1319_v4, %s1217_s14 }
  0x7a   : > { %467 = vrot.lane.b32.xlu1 %v1394_v19, %s1218_s22  ;;  %459 = vrot.lane.b32.xlu0 %v1397_v20, %s1218_s22 }
  0x7e   : > { %561 = vrot.lane.b32.xlu1 %v1394_v19, %s1221_s29  ;;  %553 = vrot.lane.b32.xlu0 %v1397_v20, %s1221_s29 }
  0x82   : > { %469 = vrot.lane.b32.xlu1 %v980_v39, %s1218_s22  ;;  %461 = vrot.lane.b32.xlu0 %v1326_v5, %s1218_s22 }
  0x86   : > { %499 = vrot.lane.b32.xlu1 %v964_v29, %s1219_s23  ;;  %491 = vrot.lane.b32.xlu0 %v960_v30, %s1219_s23 }
  0x8a   : > { %501 = vrot.lane.b32.xlu1 %v988_v40, %s1219_s23  ;;  %493 = vrot.lane.b32.xlu0 %v1340_v9, %s1219_s23 }
  0x8e   : > { %531 = vrot.lane.b32.xlu1 %v972_v38, %s1220_s28  ;;  %523 = vrot.lane.b32.xlu0 %v1319_v4, %s1220_s28 }
  0x90   : > { %v330_v42 = vpop.permute.xlu1 %329  ;;  %v328_v43 = vpop.permute.xlu0 %327 }
  0x91   : > { %v576_v49 = vsel %vm575_vm1, %v245_v46, %v328_v43  ;;  %v577_v54 = vsel %vm575_vm1, %v1343_v10, %v330_v42 }
  0x92   : > { %533 = vrot.lane.b32.xlu1 %v996_v41, %s1220_s28  ;;  %525 = vrot.lane.b32.xlu0 %v1316_v3, %s1220_s28 }
  0x94   : > { %v338_v44 = vpop.permute.xlu1 %337  ;;  %v336_v45 = vpop.permute.xlu0 %335 }
  0x95   : > { %v580_v47 = vsel %vm575_vm1, %v960_v30, %v336_v45  ;;  %v581_v55 = vsel %vm575_vm1, %v1340_v9, %v338_v44 }
  0x96   : > { %563 = vrot.lane.b32.xlu1 %v980_v39, %s1221_s29  ;;  %555 = vrot.lane.b32.xlu0 %v1326_v5, %s1221_s29 }
  0x98   : > { %v368_v50 = vpop.permute.xlu1 %367  ;;  %v360_v51 = vpop.permute.xlu0 %359 }
  0x99   : > { %v589_v52 = vsel %vm584_vm2, %v580_v47, %v368_v50  ;;  %v585_v53 = vsel %vm584_vm2, %v576_v49, %v360_v51 }
  0x9a   : > { %565 = vrot.lane.b32.xlu1 %v1004_v48, %s1221_s29  ;;  %557 = vrot.lane.b32.xlu0 %v1333_v7, %s1221_s29 }
  0x9c   : > { %v370_v56 = vpop.permute.xlu1 %369  ;;  %v362_v57 = vpop.permute.xlu0 %361 }
  0x9d   : > { %v590_v58 = vsel %vm584_vm2, %v581_v55, %v370_v56  ;;  %v586_v59 = vsel %vm584_vm2, %v577_v54, %v362_v57 }
  0xa0   : > { %v400_v60 = vpop.permute.xlu1 %399  ;;  %v392_v61 = vpop.permute.xlu0 %391 }
  0xa1   : > { %v598_v36 = vsel %vm593_vm3, %v589_v52, %v400_v60  ;;  %v594_v37 = vsel %vm593_vm3, %v585_v53, %v392_v61 }
  0xa4   : > { %v402_v62 = vpop.permute.xlu1 %401  ;;  %v394_v63 = vpop.permute.xlu0 %393 }
  0xa5   : > { %v1494_v0 = vsel %vm593_vm3, %v590_v58, %v402_v62  ;;  %v1497_v1 = vsel %vm593_vm3, %v586_v59, %v394_v63 }
  0xa8   : > { %v432_v2 = vpop.permute.xlu1 %431  ;;  %v424_v3 = vpop.permute.xlu0 %423 }
  0xa9   : > { %v607_v40 = vsel %vm602_vm4, %v598_v36, %v432_v2  ;;  %v603_v41 = vsel %vm602_vm4, %v594_v37, %v424_v3 }
  0xac   : > { %v340_v4 = vpop.permute.xlu1 %339  ;;  %v332_v5 = vpop.permute.xlu0 %331 }
  0xad   : > { %v582_v14 = vsel %vm575_vm1, %v1350_v11, %v340_v4  ;;  %v578_v15 = vsel %vm575_vm1, %v1353_v12, %v332_v5 }
  0xb0   : > { %v434_v6 = vpop.permute.xlu1 %433  ;;  %v426_v7 = vpop.permute.xlu0 %425 }
  0xb1   : > { %v608_v56 = vsel %vm602_vm4, %v1494_v0, %v434_v6  ;;  %v604_v57 = vsel %vm602_vm4, %v1497_v1, %v426_v7 }
  0xb4   : > { %v464_v8 = vpop.permute.xlu1 %463  ;;  %v456_v9 = vpop.permute.xlu0 %455 }
  0xb5   : > { %v616_v42 = vsel %vm611_vm5, %v607_v40, %v464_v8  ;;  %v612_v43 = vsel %vm611_vm5, %v603_v41, %v456_v9 }
  0xb8   : > { %v1499_v10 = vpop.permute.xlu1 %341  ;;  %v1501_v13 = vpop.permute.xlu0 %333 }
  0xbc   : > { %v372_v16 = vpop.permute.xlu1 %371  ;;  %v364_v17 = vpop.permute.xlu0 %363 }
  0xbd   : > { %v1508_v18 = vsel %vm584_vm2, %v582_v14, %v372_v16  ;;  %v1511_v19 = vsel %vm584_vm2, %v578_v15, %v364_v17 }
  0xc0   : > { %v466_v20 = vpop.permute.xlu1 %465  ;;  %v458_v23 = vpop.permute.xlu0 %457 }
  0xc1   : > { %v617_v58 = vsel %vm611_vm5, %v608_v56, %v466_v20  ;;  %v613_v59 = vsel %vm611_vm5, %v604_v57, %v458_v23 }
  0xc4   : > { %v496_v24 = vpop.permute.xlu1 %495  ;;  %v488_v25 = vpop.permute.xlu0 %487 }
  0xc5   : > { %v625_v44 = vsel %vm620_vm6, %v616_v42, %v496_v24  ;;  %v621_v45 = vsel %vm620_vm6, %v612_v43, %v488_v25 }
  0xc8   : > { %v1513_v26 = vpop.permute.xlu1 %373  ;;  %v1515_v27 = vpop.permute.xlu0 %365 }
  0xcc   : > { %v404_v11 = vpop.permute.xlu1 %403  ;;  %v396_v28 = vpop.permute.xlu0 %395 }
  0xcd   : > { %v600_v16 = vsel %vm593_vm3, %v1508_v18, %v404_v11  ;;  %v596_v17 = vsel %vm593_vm3, %v1511_v19, %v396_v28 }
  0xd0   : > { %v498_v29 = vpop.permute.xlu1 %497  ;;  %v490_v12 = vpop.permute.xlu0 %489 }
  0xd1   : > { %v626_v60 = vsel %vm620_vm6, %v617_v58, %v498_v29  ;;  %v622_v61 = vsel %vm620_vm6, %v613_v59, %v490_v12  ;;  %v583_v29 = vsel %vm575_vm1, %v1404_v21, %v1499_v10  ;;  %v579_v12 = vsel %vm575_vm1, %v1407_v22, %v1501_v13  ;;  %v650_v58 = vld [vmem:[%s1300_s9 + $0x18] sm:$0xff] }
  0xd2   : > { %v592_v19 = vsel %vm584_vm2, %v583_v29, %v1513_v26  ;;  %v588_v11 = vsel %vm584_vm2, %v579_v12, %v1515_v27  ;;  %v654_v59 = vld [vmem:[%s1300_s9 + $0x38] sm:$0xff] }
  0xd4   : > { %v528_v30 = vpop.permute.xlu1 %527  ;;  %v520_v31 = vpop.permute.xlu0 %519 }
  0xd5   : > { %v634_v46 = vsel %vm629_vm7, %v625_v44, %v528_v30  ;;  %v630_v47 = vsel %vm629_vm7, %v621_v45, %v520_v31 }
  0xd8   : > { %v1517_v32 = vpop.permute.xlu1 %405  ;;  %v1519_v33 = vpop.permute.xlu0 %397 }
  0xd9   : > { %v601_v21 = vsel %vm593_vm3, %v592_v19, %v1517_v32  ;;  %v597_v22 = vsel %vm593_vm3, %v588_v11, %v1519_v33 }
  0xdc   : > { %v436_v34 = vpop.permute.xlu1 %435  ;;  %v428_v35 = vpop.permute.xlu0 %427 }
  0xdd   : > { %v609_v24 = vsel %vm602_vm4, %v600_v16, %v436_v34  ;;  %v605_v25 = vsel %vm602_vm4, %v596_v17, %v428_v35 }
  0xe0   : > { %v530_v38 = vpop.permute.xlu1 %529  ;;  %v522_v39 = vpop.permute.xlu0 %521 }
  0xe1   : > { %v635_v62 = vsel %vm629_vm7, %v626_v60, %v530_v38  ;;  %v631_v63 = vsel %vm629_vm7, %v622_v61, %v522_v39  ;;  %v649_v60 = vld [vmem:[%s1300_s9 + $0x10] sm:$0xff] }
  0xe2   : > { %v653_v61 = vld [vmem:[%s1300_s9 + $0x30] sm:$0xff] }
  0xe4   : > { %v560_v48 = vpop.permute.xlu1 %559  ;;  %v552_v49 = vpop.permute.xlu0 %551 }
  0xe5   : > { %v639_v50 = vsel %vm638_vm8, %v630_v47, %v552_v49  ;;  %v643_v51 = vsel %vm638_vm8, %v634_v46, %v560_v48  ;;  %v648_v46 = vld [vmem:[%s1300_s9 + $0x8] sm:$0xff]  ;;  %v647_v48 = vld [vmem:[%s1300_s9] sm:$0xff] }
  0xe6   : > { %1052 = vmatprep.mubr.msk.f32.mxu0 %vm655_vm9, %v639_v50  ;;  %1058 = vmatprep.mubr.msk.f32.mxu1 %vm655_vm9, %v643_v51  ;;  %v652_v47 = vld [vmem:[%s1300_s9 + $0x28] sm:$0xff]  ;;  %v651_v49 = vld [vmem:[%s1300_s9 + $0x20] sm:$0xff] }
  0xe8   : > { %v438_v52 = vpop.permute.xlu1 %437  ;;  %v430_v53 = vpop.permute.xlu0 %429 }
  0xe9   : > { %v610_v26 = vsel %vm602_vm4, %v601_v21, %v438_v52  ;;  %v606_v27 = vsel %vm602_vm4, %v597_v22, %v430_v53 }
  0xec   : > { %v468_v54 = vpop.permute.xlu1 %467  ;;  %v460_v55 = vpop.permute.xlu0 %459 }
  0xed   : > { %v618_v30 = vsel %vm611_vm5, %v609_v24, %v468_v54  ;;  %v614_v18 = vsel %vm611_vm5, %v605_v25, %v460_v55 }
  0xf0   : > { %v562_v2 = vpop.permute.xlu1 %561  ;;  %v554_v3 = vpop.permute.xlu0 %553 }
  0xf1   : > { %v644_v4 = vsel %vm638_vm8, %v635_v62, %v562_v2  ;;  %v640_v0 = vsel %vm638_vm8, %v631_v63, %v554_v3 }
  0xf2   : > { %1053 = vmatmul.mubr.msk.f32.vlgmr.msra.gmra.mrb[0].mxu0 %vm655_vm9, %v640_v0  ;;  %1059 = vmatmul.mubr.msk.f32.vlgmr.msra.gmra.mrb[0].mxu1 %vm655_vm9, %v644_v4 }
  0xf4   : > { %v470_v1 = vpop.permute.xlu1 %469  ;;  %v462_v5 = vpop.permute.xlu0 %461 }
  0xf5   : > { %v619_v32 = vsel %vm611_vm5, %v610_v26, %v470_v1  ;;  %v615_v33 = vsel %vm611_vm5, %v606_v27, %v462_v5 }
  0xf8   : > { %v500_v6 = vpop.permute.xlu1 %499  ;;  %v492_v7 = vpop.permute.xlu0 %491 }
  0xf9   : > { %v627_v28 = vsel %vm620_vm6, %v618_v30, %v500_v6  ;;  %v623_v31 = vsel %vm620_vm6, %v614_v18, %v492_v7  ;;  %v1014_v7 = vld [vmem:[%s1666_s2] ss:$0 sm:$0xff] (!%p1013_p10) }
  0xfc   : > { %v502_v8 = vpop.permute.xlu1 %501  ;;  %v494_v9 = vpop.permute.xlu0 %493 }
  0xfd   : > { %v628_v38 = vsel %vm620_vm6, %v619_v32, %v502_v8  ;;  %v624_v39 = vsel %vm620_vm6, %v615_v33, %v494_v9 }
 0x100   : > { %v532_v14 = vpop.permute.xlu1 %531  ;;  %v524_v15 = vpop.permute.xlu0 %523 }
 0x101   : > { %v636_v10 = vsel %vm629_vm7, %v627_v28, %v532_v14  ;;  %v632_v13 = vsel %vm629_vm7, %v623_v31, %v524_v15 }
 0x104   : > { %v534_v20 = vpop.permute.xlu1 %533  ;;  %v526_v23 = vpop.permute.xlu0 %525 }
 0x105   : > { %v637_v40 = vsel %vm629_vm7, %v628_v38, %v534_v20  ;;  %v633_v41 = vsel %vm629_vm7, %v624_v39, %v526_v23 }
 0x108   : > { %v564_v34 = vpop.permute.xlu1 %563  ;;  %v556_v35 = vpop.permute.xlu0 %555 }
 0x109   : > { %v645_v36 = vsel %vm638_vm8, %v636_v10, %v564_v34  ;;  %v641_v37 = vsel %vm638_vm8, %v632_v13, %v556_v35 }
 0x10a   : > { %1055 = vmatprep.mubr.msk.f32.mxu0 %vm655_vm9, %v641_v37  ;;  %1061 = vmatprep.mubr.msk.f32.mxu1 %vm655_vm9, %v645_v36 }
 0x10c   : > { %v566_v42 = vpop.permute.xlu1 %565  ;;  %v558_v43 = vpop.permute.xlu0 %557 }
 0x10d   : > { %v646_v44 = vsel %vm638_vm8, %v637_v40, %v566_v42  ;;  %v642_v45 = vsel %vm638_vm8, %v633_v41, %v558_v43 }
 0x10e   : > { %1056 = vmatmul.mubr.msk.f32.gmra.mrb[2].mxu0 %vm655_vm9, %v642_v45  ;;  %1062 = vmatmul.mubr.msk.f32.gmra.mrb[2].mxu1 %vm655_vm9, %v646_v44 }
 0x1c5   : > { %v1054_v50 = vpop.f32.mrb[0].mxu0  ;;  %v1060_v51 = vpop.f32.mrb[0].mxu1 }
 0x1c6   : > { %v786_v52 = vadd.f32 %v1054_v50, %v648_v46  ;;  %v790_v53 = vadd.f32 %v1060_v51, %v652_v47  ;;  %v746_v54 = vpop.f32.mrb[1].mxu0  ;;  %v766_v55 = vpop.f32.mrb[1].mxu1 }
 0x1c7   : > { %v785_v56 = vadd.f32 %v746_v54, %v647_v48  ;;  %v789_v57 = vadd.f32 %v766_v55, %v651_v49 }
 0x1c8   : > { %794 = vst.msk [vmem:[%s1300_s9 + $0x8] sm:$0xff] %vm575_vm1, %v786_v52  ;;  %798 = vst.msk [vmem:[%s1300_s9 + $0x28] sm:$0xff] %vm575_vm1, %v790_v53 }
 0x1c9   : > { %793 = vst.msk [vmem:[%s1300_s9] sm:$0xff] %vm575_vm1, %v785_v56  ;;  %797 = vst.msk [vmem:[%s1300_s9 + $0x20] sm:$0xff] %vm575_vm1, %v789_v57 }
 0x1cf   : > { %v806_v8 = vld [vmem:[%s1300_s9 + $0x8] sm:$0xff] (!%p1013_p10) }
 0x1d0   : > { %v805_v6 = vld [vmem:[%s1300_s9] sm:$0xff] (!%p1013_p10)  ;;  %v821_v14 = vadd.f32 (!%p1013_p10), %v1014_v7, %v806_v8  ;;  %v810_v25 = vld [vmem:[%s1300_s9 + $0x28] sm:$0xff] (!%p1013_p10) }
 0x1d1   : > { %v820_v9 = vadd.f32 (!%p1013_p10), %v1014_v7, %v805_v6  ;;  %v809_v17 = vld [vmem:[%s1300_s9 + $0x20] sm:$0xff] (!%p1013_p10)  ;;  %v825_v19 = vadd.f32 (!%p1013_p10), %v1014_v7, %v810_v25 }
 0x1d2   : > { %v824_v24 = vadd.f32 (!%p1013_p10), %v1014_v7, %v809_v17  ;;  %v829_v18 = vmax.f32 (!%p1013_p10), %v821_v14, 0.0 }
 0x1d3   : > { %v828_v30 = vmax.f32 (!%p1013_p10), %v820_v9, 0.0  ;;  %v833_v10 = vmax.f32 (!%p1013_p10), %v825_v19, 0.0 }
 0x1d4   : > { %v832_v21 = vmax.f32 (!%p1013_p10), %v824_v24, 0.0  ;;  %837 = vst.msk [vmem:[%s1300_s9 + $0x8] sm:$0xff] (!%p1013_p10), %vm575_vm1, %v829_v18 }
 0x1d5   : > { %836 = vst.msk [vmem:[%s1300_s9] sm:$0xff] (!%p1013_p10), %vm575_vm1, %v828_v30  ;;  %841 = vst.msk [vmem:[%s1300_s9 + $0x28] sm:$0xff] (!%p1013_p10), %vm575_vm1, %v833_v10 }
 0x1d6   : > { %840 = vst.msk [vmem:[%s1300_s9 + $0x20] sm:$0xff] (!%p1013_p10), %vm575_vm1, %v832_v21 }
 0x1df   : > { %804 = sbr.rel (%p1013_p10) target bundleno = 499 (0x1f3), region = 40 }
 0x1e1   : > { %v1057_v62 = vpop.f32.mrb[2].mxu0  ;;  %v1063_v63 = vpop.f32.mrb[2].mxu1 }
 0x1e2   : > { %v788_v2 = vadd.f32 %v1057_v62, %v650_v58  ;;  %v792_v3 = vadd.f32 %v1063_v63, %v654_v59  ;;  %v756_v4 = vpop.f32.mrb[3].mxu0  ;;  %v776_v0 = vpop.f32.mrb[3].mxu1 }
 0x1e3   : > { %v787_v1 = vadd.f32 %v756_v4, %v649_v60  ;;  %v791_v5 = vadd.f32 %v776_v0, %v653_v61 }
 0x1e4   : > { %796 = vst.msk [vmem:[%s1300_s9 + $0x18] sm:$0xff] %vm575_vm1, %v788_v2  ;;  %800 = vst.msk [vmem:[%s1300_s9 + $0x38] sm:$0xff] %vm575_vm1, %v792_v3 }
 0x1e5   : > { %795 = vst.msk [vmem:[%s1300_s9 + $0x10] sm:$0xff] %vm575_vm1, %v787_v1  ;;  %799 = vst.msk [vmem:[%s1300_s9 + $0x30] sm:$0xff] %vm575_vm1, %v791_v5 }
 0x1eb   : > { %v808_v16 = vld [vmem:[%s1300_s9 + $0x18] sm:$0xff] }
 0x1ec   : > { %v807_v15 = vld [vmem:[%s1300_s9 + $0x10] sm:$0xff]  ;;  %v823_v23 = vadd.f32 %v1014_v7, %v808_v16  ;;  %v812_v12 = vld [vmem:[%s1300_s9 + $0x38] sm:$0xff] }
 0x1ed   : > { %v822_v20 = vadd.f32 %v1014_v7, %v807_v15  ;;  %v811_v29 = vld [vmem:[%s1300_s9 + $0x30] sm:$0xff]  ;;  %v827_v22 = vadd.f32 %v1014_v7, %v812_v12 }
 0x1ee   : > { %v826_v11 = vadd.f32 %v1014_v7, %v811_v29  ;;  %v831_v31 = vmax.f32 %v823_v23, 0.0 }
 0x1ef   : > { %v830_v28 = vmax.f32 %v822_v20, 0.0  ;;  %v835_v34 = vmax.f32 %v827_v22, 0.0 }
 0x1f0   : > { %v834_v13 = vmax.f32 %v826_v11, 0.0  ;;  %839 = vst.msk [vmem:[%s1300_s9 + $0x18] sm:$0xff] %vm575_vm1, %v831_v31 }
 0x1f1   : > { %838 = vst.msk [vmem:[%s1300_s9 + $0x10] sm:$0xff] %vm575_vm1, %v830_v28  ;;  %843 = vst.msk [vmem:[%s1300_s9 + $0x38] sm:$0xff] %vm575_vm1, %v835_v34 }
 0x1f2   : > { %842 = vst.msk [vmem:[%s1300_s9 + $0x30] sm:$0xff] %vm575_vm1, %v834_v13 }
 0x1f3 PF: > { %s13_s18 = sadd.s32 1, %s1211_s18   ;;  %s1668_s12 = smov %s1199_s15 }
 0x1f4   : > { %p10_p11 = scmp.ge.s32.totalorder %s13_s18, 14   ;;  %s1669_s13 = smov %s1203_s16 }
 0x1f5   : > { %s1670_s14 = smov %s1207_s17  ;;  %s1671_s15 = smov %s1675_s19 }
 0x1f6   : > { %s1672_s16 = smov %s1679_s20  ;;  %s1673_s17 = smov %s1683_s21 }
 0x1f7   :  { %12 = sbr.rel (!%p10_p11) target bundleno = 4 (0x4), region = 73 }

// kernel: tile.13
= control target key start
LH: loop header
LB: loop body
LE: loop exit
PB: predicated region body
PF: predicated region fallthrough
CT: control target
= control target key end

     0   :  { %s22_s0 = inlined_call_operand.vmem [shape: f32[8], index: 0, kind: input, shape index: {}]   ;;  %s23_s1 = inlined_call_operand.vmem [shape: f32[8,8], index: 1, kind: output, shape index: {}]  }
   0x1   :  { %v4_v0 = vld [vmem:[%s22_s0] ss:$0 sm:$0xff] }
   0x2   :  { %5 = vst [vmem:[%s23_s1] sm:$0xff] %v4_v0 }

// kernel: tile.14
= control target key start
LH: loop header
LB: loop body
LE: loop exit
PB: predicated region body
PF: predicated region fallthrough
CT: control target
= control target key end

     0   :  { %s67_s10 = smov 56   ;;  %s68_s11 = smov 40   ;;  %vm3_vm0 = vcmask 64512   ;;  %vm9_vm1 = vcmask 523712   ;;  %vm15_vm2 = vcmask 458112   ;;  %vm21_vm3 = vcmask 392512   ;;  %s111_s0 = inlined_call_operand.vmem [shape: f32[8,8], index: 0, kind: input, shape index: {}]   ;;  %s112_s1 = inlined_call_operand.vmem [shape: f32[1,64], index: 1, kind: output, shape index: {}]  }
   0x1   :  { %v53_v0 = vld [vmem:[%s111_s0 + $0x7] sm:$0x1]   ;;  %v55_v1 = vld [vmem:[%s111_s0 + $0x5] sm:$0x1]   ;;  %v54_v2 = vld [vmem:[%s111_s0 + $0x6] sm:$0x1]  }
   0x2   :  { %7 = vrot.lane.b32.xlu0 %v53_v0, %s67_s10  ;;  %19 = vrot.lane.b32.xlu1 %v55_v1, %s68_s11  ;;  %v56_v3 = vld [vmem:[%s111_s0 + $0x4] sm:$0x1]   ;;  %v2_v4 = vld [vmem:[%s111_s0] sm:$0x1]   ;;  %s69_s18 = smov 48   ;;  %s70_s19 = smov 32  }
   0x3   :  { %4 = vst.msk [vmem:[#allocation0] sm:$0x1] %vm3_vm0, %v2_v4   ;;  %v57_v5 = vld [vmem:[%s111_s0 + $0x3] sm:$0x1]   ;;  %v58_v6 = vld [vmem:[%s111_s0 + $0x2] sm:$0x1]  }
   0x4   :  { %s71_s24 = smov 24   ;;  %s72_s25 = smov 16   ;;  %v59_v7 = vld [vmem:[%s111_s0 + $0x1] sm:$0x1]   ;;  %vm27_vm4 = vcmask 326912   ;;  %vm33_vm5 = vcmask 261312  }
   0x5   :  { %s73_s0 = smov 8   ;;  %vm39_vm6 = vcmask 195712   ;;  %vm45_vm7 = vcmask 130112  }
   0x6   :  { %13 = vrot.lane.b32.xlu0 %v54_v2, %s69_s18  ;;  %25 = vrot.lane.b32.xlu1 %v56_v3, %s70_s19 }
   0xa   :  { %31 = vrot.lane.b32.xlu0 %v57_v5, %s71_s24  ;;  %37 = vrot.lane.b32.xlu1 %v58_v6, %s72_s25 }
   0xe   :  { %43 = vrot.lane.b32.xlu0 %v59_v7, %s73_s0 }
  0x74   :  { %v8_v8 = vpop.permute.xlu0 %7   ;;  %v20_v9 = vpop.permute.xlu1 %19  }
  0x75   :  { %10 = vst.msk [vmem:[#allocation0] sm:$0x1] %vm9_vm1, %v8_v8  }
  0x78   :  { %v14_v10 = vpop.permute.xlu0 %13   ;;  %v26_v11 = vpop.permute.xlu1 %25  }
  0x79   :  { %16 = vst.msk [vmem:[#allocation0] sm:$0x1] %vm15_vm2, %v14_v10  }
  0x7a   :  { %22 = vst.msk [vmem:[#allocation0] sm:$0x1] %vm21_vm3, %v20_v9  }
  0x7b   :  { %28 = vst.msk [vmem:[#allocation0] sm:$0x1] %vm27_vm4, %v26_v11  }
  0x7c   :  { %v32_v12 = vpop.permute.xlu0 %31   ;;  %v38_v13 = vpop.permute.xlu1 %37  }
  0x7d   :  { %34 = vst.msk [vmem:[#allocation0] sm:$0x1] %vm33_vm5, %v32_v12  }
  0x7e   :  { %40 = vst.msk [vmem:[#allocation0] sm:$0x1] %vm39_vm6, %v38_v13  }
  0x80   :  { %v44_v14 = vpop.permute.xlu0 %43  }
  0x81   :  { %46 = vst.msk [vmem:[#allocation0] sm:$0x1] %vm45_vm7, %v44_v14  }
  0x88   :  { %v50_v15 = vld [vmem:[#allocation0] sm:$0x1] }
  0x89   :  { %52 = vst [vmem:[%s112_s1] sm:$0x1] %v50_v15 }

// kernel: hourglass_forward.10
= control target key start
LH: loop header
LB: loop body
LE: loop exit
PB: predicated region body
PF: predicated region fallthrough
CT: control target
= control target key end

     0   :  { %s1259_s15 = smov 0   ;;  %s1261_s16 = smov 0   ;;  %s1577_s0 = inlined_call_operand.vmem [shape: f32[2,3,9,9,8], index: 0, kind: input, shape index: {}, may-alias: {0,1}]   ;;  %s1578_s1 = inlined_call_operand.vmem [shape: f32[2,3,9,9,8], index: 1, kind: input, shape index: {}, may-alias: {0,1}]   ;;  %s1579_s2 = inlined_call_operand.vmem [shape: f32[2,32,64], index: 2, kind: input, shape index: {}]   ;;  %s1580_s3 = inlined_call_operand.vmem [shape: f32[1,64], index: 3, kind: input, shape index: {}]   ;;  %s1581_s4 = inlined_call_operand.vmem [shape: f32[2,2,64,64], index: 4, kind: output, shape index: {}]  }
   0x1   :  { %s1263_s17 = smov 0   ;;  %s1265_s18 = smov 0  }
   0x2   :  { %s1267_s19 = smov 0  }
   0x3 LB: > { %s23_s20 = sadd.s32 1, %s1221_s17  ;;  %s26_s21 = sadd.s32 1, %s1225_s18  ;;  %s1229_s19 = sphi %s1267_s19, %s14_s19   ;;  %s1225_s18 = sphi %s1265_s18, %s1585_s18   ;;  %s1221_s17 = sphi %s1263_s17, %s1584_s17   ;;  %s1217_s16 = sphi %s1261_s16, %s1583_s16   ;;  %s1213_s15 = sphi %s1259_s15, %s1582_s15  }
   0x4   : > { %p24_p0 = scmp.ge.s32.totalorder %s23_s20, 2  ;;  %p996_p1 = scmp.ge.s32.totalorder %s1229_s19, 1 }
   0x5   : > { %p202_p2 = scmp.lt.s32.totalorder %s1229_s19, 5 }
   0x6   : > { %s1587_s20 = smov (%p24_p0, %s23_s20), 0  ;;  %s1589_s21 = smov (!%p24_p0, %s26_s21), %s1225_s18 }
   0x7   : > { %p203_p3 = pnand %p996_p1, %p202_p2  ;;  %p28_p4 = scmp.ge.s32.totalorder %s1589_s21, 2 }
   0x8   : > { %p246_p5 = scmp.lt.s32.totalorder (!%p203_p3), %s1217_s16, 1  ;;  %p248_p6 = scmp.lt.s32.totalorder (!%p203_p3), %s1213_s15, 2  ;;  %v1034_v3 = vld [vmem:[%s1579_s2 + $0x20] sm:$0xff] (!%p203_p3)  ;;  %v1035_v4 = vld [vmem:[%s1579_s2 + $0x28] sm:$0xff] (!%p203_p3)  ;;  %v1036_v12 = vld [vmem:[%s1579_s2 + $0x30] sm:$0xff] (!%p203_p3)  ;;  %vm404_vm0 = vcmask (!%p203_p3), 64512  }
   0x9   : > { %s1591_s21 = smov (%p28_p4, %s1589_s21), 0  ;;  %206 = sbr.rel (%p203_p3) target bundleno = 451 (0x1c3), region = 36 }
   0xa   : > { %s255_s24 = sadd.s32 (!%p203_p3), 1, %s1213_s15  ;;  %s1231_s5 = smov (!%p203_p3), 8   ;;  %v1121_v7 = vpack.c.bf16 (!%p203_p3), %v1035_v4, %v1034_v3  ;;  %v431_v10 = vld [vmem:[%s1579_s2] sm:$0xff] (!%p203_p3)  ;;  %v432_v11 = vld [vmem:[%s1579_s2 + $0x8] sm:$0xff] (!%p203_p3)  ;;  %v1037_v14 = vld [vmem:[%s1579_s2 + $0x38] sm:$0xff] (!%p203_p3)  ;;  %vm413_vm1 = vcmask (!%p203_p3), 130048  }
   0xb   : > { %p258_p7 = scmp.lt.s32.totalorder (!%p203_p3), %s255_s24, 2  ;;  %s1232_s8 = smov (!%p203_p3), 16   ;;  %v1129_v13 = vpack.c.bf16 (!%p203_p3), %v432_v11, %v431_v10  ;;  %v433_v15 = vld [vmem:[%s1579_s2 + $0x10] sm:$0xff] (!%p203_p3)  ;;  %v434_v16 = vld [vmem:[%s1579_s2 + $0x18] sm:$0xff] (!%p203_p3)  ;;  %v1125_v17 = vpack.c.bf16 (!%p203_p3), %v1037_v14, %v1036_v12  ;;  %vm422_vm2 = vcmask (!%p203_p3), 195584   ;;  %vm593_vm3 = vcmask (!%p203_p3), 261120  }
   0xc   : > { %1122 = vmatprep.subr.bf16.mxu1 (!%p203_p3), %v1121_v7  ;;  %v1133_v18 = vpack.c.bf16 (!%p203_p3), %v434_v16, %v433_v15  ;;  %p268_p8 = scmp.lt.s32.totalorder (!%p203_p3), %s1213_s15, 1  ;;  %vm867_vm4 = vcmask (!%p203_p3), 523264  }
   0xd   : > { %1124 = vmatpush3.bf16.msra.mxu1 (!%p203_p3), %v1121_v7  ;;  %1130 = vmatprep.subr.bf16.mxu0 (!%p203_p3), %v1129_v13 }
   0xe   : > { %1132 = vmatpush3.bf16.msra.mxu0 (!%p203_p3), %v1129_v13  ;;  %1126 = vmatprep.subr.bf16.mxu1 (!%p203_p3), %v1125_v17 }
   0xf   : > { %1134 = vmatprep.subr.bf16.mxu0 (!%p203_p3), %v1133_v18 }
  0x10   : > { %s1593_s16 = smov (!%p246_p5, %s1217_s16), 1  ;;  %s1595_s24 = smov (!%p258_p7, %s255_s24), 2 }
  0x11   : > { %s249_s22 = scalar_select %p248_p6, %s1213_s15, 2  ;;  %1128 = vmatpush3.bf16.msra.mxu1 %v1125_v17 }
  0x12   : > { %s1146_s23 = smul.u32 54, %s1593_s16  ;;  %1136 = vmatpush3.bf16.msra.mxu0 %v1133_v18  ;;  %s1597_s15 = smov (!%p268_p8, %s1213_s15), 1 }
  0x13   : > { %s1145_s25 = smul.u32 18, %s249_s22 }
  0x14   : > { %s1147_s6 = smul.u32 18, %s1595_s24  ;;  %s1233_s24 = smov 24  }
  0x15   : > { %s252_s26 = sadd.s32 %s1146_s23, %s1145_s25 }
  0x16   : > { %s997_s27 = sshll.u32 %s252_s26, 3  ;;  %s262_s7 = sadd.s32 %s1147_s6, %s1146_s23 }
  0x17   : > { %s1300_s30 = scalar_lea.vmem %s1577_s0, %s997_s27  ;;  %s998_s9 = sshll.u32 %s262_s7, 3 }
  0x18   : > { %v284_v0 = vld [vmem:[%s1300_s30 + $0x11] sm:$0xff]  ;;  %v283_v1 = vld [vmem:[%s1300_s30 + $0x1] sm:$0xff]  ;;  %s1314_s12 = scalar_lea.vmem %s1578_s1, %s998_s9 }
  0x19   : > { %318 = vrot.lane.b32.xlu1 %v284_v0, %s1231_s5  ;;  %316 = vrot.lane.b32.xlu0 %v283_v1, %s1231_s5  ;;  %v1307_v2 = vld [vmem:[%s1300_s30 + $0x10] sm:$0xff]  ;;  %v443_v5 = vld [vmem:[%s1314_s12 + $0x1] sm:$0xff] }
  0x1a   : > { %v1324_v6 = vld [vmem:[%s1314_s12 + $0x10] sm:$0xff]  ;;  %v1332_v9 = vld [vmem:[%s1300_s30 + $0x20] sm:$0xff] }
  0x1b   : > { %v444_v8 = vld [vmem:[%s1314_s12 + $0x11] sm:$0xff]  ;;  %v1357_v19 = vld [vmem:[%s1314_s12 + $0x20] sm:$0xff] }
  0x1c   : > { %v1027_v20 = vld [vmem:[%s1314_s12 + $0x21] sm:$0xff]  ;;  %v1367_v22 = vld [vmem:[%s1300_s30 + $0x30] sm:$0xff] }
  0x1d   : > { %348 = vrot.lane.b32.xlu1 %v1307_v2, %s1232_s8  ;;  %476 = vrot.lane.b32.xlu0 %v443_v5, %s1231_s5  ;;  %v1011_v21 = vld [vmem:[%s1300_s30 + $0x21] sm:$0xff]  ;;  %v286_v23 = vld [vmem:[%s1300_s30 + $0x31] sm:$0xff] }
  0x1e   : > { %v1374_v24 = vld [vmem:[%s1314_s12 + $0x30] sm:$0xff]  ;;  %v1383_v26 = vld [vmem:[%s1300_s30 + $0x40] sm:$0xff] }
  0x1f   : > { %v446_v25 = vld [vmem:[%s1314_s12 + $0x31] sm:$0xff]  ;;  %v1389_v27 = vld [vmem:[%s1314_s12 + $0x40] sm:$0xff] }
  0x20   : > { %v1029_v28 = vld [vmem:[%s1314_s12 + $0x41] sm:$0xff]  ;;  %v1399_v30 = vld [vmem:[%s1300_s30 + $0x50] sm:$0xff] }
  0x21   : > { %508 = vrot.lane.b32.xlu1 %v1324_v6, %s1232_s8  ;;  %478 = vrot.lane.b32.xlu0 %v444_v8, %s1231_s5  ;;  %v1013_v29 = vld [vmem:[%s1300_s30 + $0x41] sm:$0xff]  ;;  %v288_v31 = vld [vmem:[%s1300_s30 + $0x51] sm:$0xff] }
  0x22   : > { %v1406_v32 = vld [vmem:[%s1314_s12 + $0x50] sm:$0xff]  ;;  %v1415_v34 = vld [vmem:[%s1300_s30 + $0x60] sm:$0xff] }
  0x23   : > { %v448_v33 = vld [vmem:[%s1314_s12 + $0x51] sm:$0xff]  ;;  %v1421_v35 = vld [vmem:[%s1314_s12 + $0x60] sm:$0xff] }
  0x24   : > { %v1031_v36 = vld [vmem:[%s1314_s12 + $0x61] sm:$0xff]  ;;  %v1431_v38 = vld [vmem:[%s1300_s30 + $0x70] sm:$0xff] }
  0x25   : > { %380 = vrot.lane.b32.xlu1 %v284_v0, %s1233_s24  ;;  %350 = vrot.lane.b32.xlu0 %v1332_v9, %s1232_s8  ;;  %v1015_v37 = vld [vmem:[%s1300_s30 + $0x61] sm:$0xff]  ;;  %v290_v39 = vld [vmem:[%s1300_s30 + $0x71] sm:$0xff] }
  0x26   : > { %v1438_v40 = vld [vmem:[%s1314_s12 + $0x70] sm:$0xff]  ;;  %v1009_v42 = vld [vmem:[%s1300_s30 + $0x80] sm:$0xff] }
  0x27   : > { %v450_v41 = vld [vmem:[%s1314_s12 + $0x71] sm:$0xff]  ;;  %v1025_v43 = vld [vmem:[%s1314_s12 + $0x80] sm:$0xff] }
  0x28   : > { %v1033_v44 = vld [vmem:[%s1314_s12 + $0x81] sm:$0xff] }
  0x29   : > { %540 = vrot.lane.b32.xlu1 %v444_v8, %s1233_s24  ;;  %510 = vrot.lane.b32.xlu0 %v1357_v19, %s1232_s8  ;;  %v1017_v45 = vld [vmem:[%s1300_s30 + $0x81] sm:$0xff] }
  0x2a   : > { %v275_v50 = vld [vmem:[%s1300_s30] sm:$0xff]  ;;  %s999_s30 = sshll.u32 %s1597_s15, 3 }
  0x2b   : > { %v435_v55 = vld [vmem:[%s1314_s12] sm:$0xff] }
  0x2d   : > { %542 = vrot.lane.b32.xlu1 %v1027_v20, %s1233_s24  ;;  %382 = vrot.lane.b32.xlu0 %v1011_v21, %s1233_s24 }
  0x31   : > { %480 = vrot.lane.b32.xlu1 %v1027_v20, %s1231_s5  ;;  %320 = vrot.lane.b32.xlu0 %v1011_v21, %s1231_s5 }
  0x35   : > { %352 = vrot.lane.b32.xlu1 %v1367_v22, %s1232_s8  ;;  %322 = vrot.lane.b32.xlu0 %v286_v23, %s1231_s5 }
  0x39   : > { %512 = vrot.lane.b32.xlu1 %v1374_v24, %s1232_s8  ;;  %482 = vrot.lane.b32.xlu0 %v446_v25, %s1231_s5 }
  0x3d   : > { %384 = vrot.lane.b32.xlu1 %v286_v23, %s1233_s24  ;;  %354 = vrot.lane.b32.xlu0 %v1383_v26, %s1232_s8 }
  0x41   : > { %544 = vrot.lane.b32.xlu1 %v446_v25, %s1233_s24  ;;  %514 = vrot.lane.b32.xlu0 %v1389_v27, %s1232_s8 }
  0x45   : > { %546 = vrot.lane.b32.xlu1 %v1029_v28, %s1233_s24  ;;  %386 = vrot.lane.b32.xlu0 %v1013_v29, %s1233_s24 }
  0x49   : > { %484 = vrot.lane.b32.xlu1 %v1029_v28, %s1231_s5  ;;  %324 = vrot.lane.b32.xlu0 %v1013_v29, %s1231_s5 }
  0x4d   : > { %356 = vrot.lane.b32.xlu1 %v1399_v30, %s1232_s8  ;;  %326 = vrot.lane.b32.xlu0 %v288_v31, %s1231_s5 }
  0x51   : > { %516 = vrot.lane.b32.xlu1 %v1406_v32, %s1232_s8  ;;  %486 = vrot.lane.b32.xlu0 %v448_v33, %s1231_s5 }
  0x55   : > { %388 = vrot.lane.b32.xlu1 %v288_v31, %s1233_s24  ;;  %358 = vrot.lane.b32.xlu0 %v1415_v34, %s1232_s8 }
  0x59   : > { %548 = vrot.lane.b32.xlu1 %v448_v33, %s1233_s24  ;;  %518 = vrot.lane.b32.xlu0 %v1421_v35, %s1232_s8 }
  0x5d   : > { %550 = vrot.lane.b32.xlu1 %v1031_v36, %s1233_s24  ;;  %390 = vrot.lane.b32.xlu0 %v1015_v37, %s1233_s24 }
  0x61   : > { %488 = vrot.lane.b32.xlu1 %v1031_v36, %s1231_s5  ;;  %328 = vrot.lane.b32.xlu0 %v1015_v37, %s1231_s5 }
  0x65   : > { %360 = vrot.lane.b32.xlu1 %v1431_v38, %s1232_s8  ;;  %330 = vrot.lane.b32.xlu0 %v290_v39, %s1231_s5 }
  0x69   : > { %520 = vrot.lane.b32.xlu1 %v1438_v40, %s1232_s8  ;;  %490 = vrot.lane.b32.xlu0 %v450_v41, %s1231_s5  ;;  %s1000_s5 = sshll.u32 %s1593_s16, 4 }
  0x6d   : > { %392 = vrot.lane.b32.xlu1 %v290_v39, %s1233_s24  ;;  %362 = vrot.lane.b32.xlu0 %v1009_v42, %s1232_s8 }
  0x71   : > { %552 = vrot.lane.b32.xlu1 %v450_v41, %s1233_s24  ;;  %522 = vrot.lane.b32.xlu0 %v1025_v43, %s1232_s8  ;;  %s272_s8 = sadd.s32 %s1000_s5, %s999_s30 }
  0x72   : > { %s1001_s12 = sshll.u32 %s272_s8, 3 }
  0x73   : > { %s1544_s26 = scalar_lea.vmem %s1581_s4, %s1001_s12 }
  0x75   : > { %554 = vrot.lane.b32.xlu1 %v1033_v44, %s1233_s24  ;;  %394 = vrot.lane.b32.xlu0 %v1017_v45, %s1233_s24 }
  0x8b   : > { %v319_v46 = vpop.permute.xlu1 %318  ;;  %v317_v47 = vpop.permute.xlu0 %316 }
  0x8c   : > { %v405_v52 = vsel %vm404_vm0, %v275_v50, %v317_v47  ;;  %v406_v5 = vsel %vm404_vm0, %v1307_v2, %v319_v46 }
  0x8f   : > { %v349_v48 = vpop.permute.xlu1 %348  ;;  %v477_v49 = vpop.permute.xlu0 %476 }
  0x90   : > { %v414_v54 = vsel %vm413_vm1, %v405_v52, %v349_v48  ;;  %v564_v58 = vsel %vm404_vm0, %v435_v55, %v477_v49 }
  0x93   : > { %v509_v51 = vpop.permute.xlu1 %508  ;;  %v479_v53 = vpop.permute.xlu0 %478 }
  0x94   : > { %v572_v60 = vsel %vm413_vm1, %v564_v58, %v509_v51  ;;  %v565_v63 = vsel %vm404_vm0, %v1324_v6, %v479_v53 }
  0x97   : > { %v381_v56 = vpop.permute.xlu1 %380  ;;  %v351_v59 = vpop.permute.xlu0 %350 }
  0x98   : > { %v423_v57 = vsel %vm422_vm2, %v414_v54, %v381_v56  ;;  %v415_v7 = vsel %vm413_vm1, %v406_v5, %v351_v59 }
  0x99   : > { %1109 = vmatprep.mubr.msk.f32.mxu0 %vm593_vm3, %v423_v57 }
  0x9b   : > { %v541_v61 = vpop.permute.xlu1 %540  ;;  %v511_v0 = vpop.permute.xlu0 %510 }
  0x9c   : > { %v580_v62 = vsel %vm422_vm2, %v572_v60, %v541_v61  ;;  %v573_v1 = vsel %vm413_vm1, %v565_v63, %v511_v0 }
  0x9d   : > { %1089 = vmatprep.mubr.msk.f32.mxu1 %vm593_vm3, %v580_v62 }
  0x9f   : > { %v543_v3 = vpop.permute.xlu1 %542  ;;  %v383_v8 = vpop.permute.xlu0 %382 }
  0xa0   : > { %v581_v4 = vsel %vm422_vm2, %v573_v1, %v543_v3  ;;  %v424_v10 = vsel %vm422_vm2, %v415_v7, %v383_v8 }
  0xa1   : > { %1090 = vmatmul.mubr.msk.f32.vlgmr.msra.gmra.mrb[0].mxu1 %vm593_vm3, %v581_v4  ;;  %1110 = vmatmul.mubr.msk.f32.vlgmr.msra.gmra.mrb[0].mxu0 %vm593_vm3, %v424_v10 }
  0xa3   : > { %v481_v11 = vpop.permute.xlu1 %480  ;;  %v321_v6 = vpop.permute.xlu0 %320 }
  0xa4   : > { %v407_v15 = vsel %vm404_vm0, %v1332_v9, %v321_v6  ;;  %v566_v20 = vsel %vm404_vm0, %v1357_v19, %v481_v11 }
  0xa7   : > { %v353_v12 = vpop.permute.xlu1 %352  ;;  %v323_v13 = vpop.permute.xlu0 %322 }
  0xa8   : > { %v416_v2 = vsel %vm413_vm1, %v407_v15, %v353_v12  ;;  %v408_v19 = vsel %vm404_vm0, %v1367_v22, %v323_v13 }
  0xab   : > { %v513_v14 = vpop.permute.xlu1 %512  ;;  %v483_v16 = vpop.permute.xlu0 %482 }
  0xac   : > { %v574_v23 = vsel %vm413_vm1, %v566_v20, %v513_v14  ;;  %v567_v9 = vsel %vm404_vm0, %v1374_v24, %v483_v16 }
  0xaf   : > { %v385_v17 = vpop.permute.xlu1 %384  ;;  %v355_v21 = vpop.permute.xlu0 %354 }
  0xb0   : > { %v425_v18 = vsel %vm422_vm2, %v416_v2, %v385_v17  ;;  %v417_v37 = vsel %vm413_vm1, %v408_v19, %v355_v21 }
  0xb1   : > { %1112 = vmatprep.mubr.msk.f32.mxu0 %vm593_vm3, %v425_v18 }
  0xb3   : > { %v545_v25 = vpop.permute.xlu1 %544  ;;  %v515_v29 = vpop.permute.xlu0 %514 }
  0xb4   : > { %v582_v28 = vsel %vm422_vm2, %v574_v23, %v545_v25  ;;  %v575_v31 = vsel %vm413_vm1, %v567_v9, %v515_v29 }
  0xb5   : > { %1092 = vmatprep.mubr.msk.f32.mxu1 %vm593_vm3, %v582_v28 }
  0xb7   : > { %v547_v33 = vpop.permute.xlu1 %546  ;;  %v387_v39 = vpop.permute.xlu0 %386 }
  0xb8   : > { %v583_v36 = vsel %vm422_vm2, %v575_v31, %v547_v33  ;;  %v426_v41 = vsel %vm422_vm2, %v417_v37, %v387_v39 }
  0xb9   : > { %1093 = vmatmul.mubr.msk.f32.gmra.mrb[2].mxu1 %vm593_vm3, %v583_v36  ;;  %1113 = vmatmul.mubr.msk.f32.gmra.mrb[2].mxu0 %vm593_vm3, %v426_v41 }
  0xbb   : > { %v485_v42 = vpop.permute.xlu1 %484  ;;  %v325_v24 = vpop.permute.xlu0 %324 }
  0xbc   : > { %v409_v46 = vsel %vm404_vm0, %v1383_v26, %v325_v24  ;;  %v568_v50 = vsel %vm404_vm0, %v1389_v27, %v485_v42 }
  0xbf   : > { %v357_v43 = vpop.permute.xlu1 %356  ;;  %v327_v44 = vpop.permute.xlu0 %326 }
  0xc0   : > { %v418_v22 = vsel %vm413_vm1, %v409_v46, %v357_v43  ;;  %v410_v27 = vsel %vm404_vm0, %v1399_v30, %v327_v44 }
  0xc3   : > { %v517_v45 = vpop.permute.xlu1 %516  ;;  %v487_v47 = vpop.permute.xlu0 %486 }
  0xc4   : > { %v576_v52 = vsel %vm413_vm1, %v568_v50, %v517_v45  ;;  %v569_v26 = vsel %vm404_vm0, %v1406_v32, %v487_v47 }
  0xc7   : > { %v389_v48 = vpop.permute.xlu1 %388  ;;  %v359_v51 = vpop.permute.xlu0 %358 }
  0xc8   : > { %v427_v49 = vsel %vm422_vm2, %v418_v22, %v389_v48  ;;  %v419_v59 = vsel %vm413_vm1, %v410_v27, %v359_v51 }
  0xc9   : > { %1115 = vmatprep.mubr.msk.f32.mxu0 %vm593_vm3, %v427_v49 }
  0xcb   : > { %v549_v53 = vpop.permute.xlu1 %548  ;;  %v519_v55 = vpop.permute.xlu0 %518 }
  0xcc   : > { %v584_v54 = vsel %vm422_vm2, %v576_v52, %v549_v53  ;;  %v577_v56 = vsel %vm413_vm1, %v569_v26, %v519_v55 }
  0xcd   : > { %1095 = vmatprep.mubr.msk.f32.mxu1 %vm593_vm3, %v584_v54 }
  0xcf   : > { %v551_v57 = vpop.permute.xlu1 %550  ;;  %v391_v60 = vpop.permute.xlu0 %390 }
  0xd0   : > { %v585_v58 = vsel %vm422_vm2, %v577_v56, %v551_v57  ;;  %v428_v61 = vsel %vm422_vm2, %v419_v59, %v391_v60 }
  0xd1   : > { %1096 = vmatmul.mubr.msk.f32.gmra.mrb[4].mxu1 %vm593_vm3, %v585_v58  ;;  %1116 = vmatmul.mubr.msk.f32.gmra.mrb[4].mxu0 %vm593_vm3, %v428_v61 }
  0xd3   : > { %v489_v62 = vpop.permute.xlu1 %488  ;;  %v329_v32 = vpop.permute.xlu0 %328 }
  0xd4   : > { %v411_v3 = vsel %vm404_vm0, %v1415_v34, %v329_v32  ;;  %v570_v8 = vsel %vm404_vm0, %v1421_v35, %v489_v62 }
  0xd7   : > { %v361_v63 = vpop.permute.xlu1 %360  ;;  %v331_v0 = vpop.permute.xlu0 %330 }
  0xd8   : > { %v420_v30 = vsel %vm413_vm1, %v411_v3, %v361_v63  ;;  %v412_v16 = vsel %vm404_vm0, %v1431_v38, %v331_v0  ;;  %v1054_v38 = vld [vmem:[%s1580_s3] ss:$0 sm:$0xff] }
  0xdb   : > { %v521_v1 = vpop.permute.xlu1 %520  ;;  %v491_v4 = vpop.permute.xlu0 %490 }
  0xdc   : > { %v578_v11 = vsel %vm413_vm1, %v570_v8, %v521_v1  ;;  %v571_v34 = vsel %vm404_vm0, %v1438_v40, %v491_v4 }
  0xdf   : > { %v393_v5 = vpop.permute.xlu1 %392  ;;  %v363_v10 = vpop.permute.xlu0 %362 }
  0xe0   : > { %v429_v7 = vsel %vm422_vm2, %v420_v30, %v393_v5  ;;  %v421_v2 = vsel %vm413_vm1, %v412_v16, %v363_v10 }
  0xe1   : > { %1118 = vmatprep.mubr.msk.f32.mxu0 %vm593_vm3, %v429_v7 }
  0xe3   : > { %v553_v6 = vpop.permute.xlu1 %552  ;;  %v523_v13 = vpop.permute.xlu0 %522 }
  0xe4   : > { %v586_v12 = vsel %vm422_vm2, %v578_v11, %v553_v6  ;;  %v579_v14 = vsel %vm413_vm1, %v571_v34, %v523_v13 }
  0xe5   : > { %1098 = vmatprep.mubr.msk.f32.mxu1 %vm593_vm3, %v586_v12 }
  0xe7   : > { %v555_v15 = vpop.permute.xlu1 %554  ;;  %v395_v17 = vpop.permute.xlu0 %394 }
  0xe8   : > { %v587_v35 = vsel %vm422_vm2, %v579_v14, %v555_v15  ;;  %v430_v18 = vsel %vm422_vm2, %v421_v2, %v395_v17 }
  0xe9   : > { %1099 = vmatmul.mubr.msk.f32.gmra.mrb[6].mxu1 %vm593_vm3, %v587_v35  ;;  %1119 = vmatmul.mubr.msk.f32.gmra.mrb[6].mxu0 %vm593_vm3, %v430_v18 }
 0x174   : > { %v1091_v40 = vpop.f32.mrb[0].mxu1  ;;  %v1111_v21 = vpop.f32.mrb[0].mxu0 }
 0x175   : > { %v684_v20 = vpop.f32.mrb[1].mxu1  ;;  %v819_v23 = vadd.f32 %v1111_v21, %v1091_v40  ;;  %v813_v25 = vpop.f32.mrb[1].mxu0 }
 0x176   : > { %v814_v28 = vadd.f32 %v813_v25, %v684_v20 }
 0x177   : > { %v860_v9 = vadd.f32 %v1054_v38, %v819_v23 }
 0x178   : > { %v859_v29 = vadd.f32 %v1054_v38, %v814_v28 }
 0x179   : > { %869 = vst.msk [vmem:[%s1544_s26 + $0x8] sm:$0xff] %vm867_vm4, %v860_v9 }
 0x17a   : > { %868 = vst.msk [vmem:[%s1544_s26] sm:$0xff] %vm867_vm4, %v859_v29 }
 0x18c   : > { %v1094_v31 = vpop.f32.mrb[2].mxu1  ;;  %v1114_v36 = vpop.f32.mrb[2].mxu0 }
 0x18d   : > { %v694_v33 = vpop.f32.mrb[3].mxu1  ;;  %v829_v19 = vadd.f32 %v1114_v36, %v1094_v31  ;;  %v823_v37 = vpop.f32.mrb[3].mxu0 }
 0x18e   : > { %v824_v39 = vadd.f32 %v823_v37, %v694_v33 }
 0x18f   : > { %v862_v41 = vadd.f32 %v1054_v38, %v829_v19 }
 0x190   : > { %v861_v42 = vadd.f32 %v1054_v38, %v824_v39 }
 0x191   : > { %871 = vst.msk [vmem:[%s1544_s26 + $0x18] sm:$0xff] %vm867_vm4, %v862_v41 }
 0x192   : > { %870 = vst.msk [vmem:[%s1544_s26 + $0x10] sm:$0xff] %vm867_vm4, %v861_v42 }
 0x1a4   : > { %v1097_v24 = vpop.f32.mrb[4].mxu1  ;;  %v1117_v44 = vpop.f32.mrb[4].mxu0 }
 0x1a5   : > { %v704_v43 = vpop.f32.mrb[5].mxu1  ;;  %v839_v45 = vadd.f32 %v1117_v44, %v1097_v24  ;;  %v833_v46 = vpop.f32.mrb[5].mxu0 }
 0x1a6   : > { %v834_v47 = vadd.f32 %v833_v46, %v704_v43 }
 0x1a7   : > { %v864_v22 = vadd.f32 %v1054_v38, %v839_v45 }
 0x1a8   : > { %v863_v48 = vadd.f32 %v1054_v38, %v834_v47 }
 0x1a9   : > { %873 = vst.msk [vmem:[%s1544_s26 + $0x28] sm:$0xff] %vm867_vm4, %v864_v22 }
 0x1aa   : > { %872 = vst.msk [vmem:[%s1544_s26 + $0x20] sm:$0xff] %vm867_vm4, %v863_v48 }
 0x1bc   : > { %v1100_v49 = vpop.f32.mrb[6].mxu1  ;;  %v1120_v51 = vpop.f32.mrb[6].mxu0 }
 0x1bd   : > { %v714_v50 = vpop.f32.mrb[7].mxu1  ;;  %v849_v52 = vadd.f32 %v1120_v51, %v1100_v49  ;;  %v843_v53 = vpop.f32.mrb[7].mxu0 }
 0x1be   : > { %v844_v54 = vadd.f32 %v843_v53, %v714_v50 }
 0x1bf   : > { %v866_v26 = vadd.f32 %v1054_v38, %v849_v52 }
 0x1c0   : > { %v865_v55 = vadd.f32 %v1054_v38, %v844_v54 }
 0x1c1   : > { %875 = vst.msk [vmem:[%s1544_s26 + $0x38] sm:$0xff] %vm867_vm4, %v866_v26 }
 0x1c2   : > { %874 = vst.msk [vmem:[%s1544_s26 + $0x30] sm:$0xff] %vm867_vm4, %v865_v55 }
 0x1c3 PF: > { %s14_s19 = sadd.s32 1, %s1229_s19   ;;  %s1582_s15 = smov %s1221_s17 }
 0x1c4   : > { %p11_p9 = scmp.ge.s32.totalorder %s14_s19, 6   ;;  %s1583_s16 = smov %s1225_s18 }
 0x1c5   : > { %s1584_s17 = smov %s1587_s20  ;;  %s1585_s18 = smov %s1591_s21 }
 0x1c6   :  { %13 = sbr.rel (!%p11_p9) target bundleno = 3 (0x3), region = 72 }

// kernel: tile.18
= control target key start
LH: loop header
LB: loop body
LE: loop exit
PB: predicated region body
PF: predicated region fallthrough
CT: control target
= control target key end

     0   :  { %s22_s0 = inlined_call_operand.vmem [shape: f32[4], index: 0, kind: input, shape index: {}]   ;;  %s23_s1 = inlined_call_operand.vmem [shape: f32[8,4], index: 1, kind: output, shape index: {}]  }
   0x1   :  { %v4_v0 = vld [vmem:[%s22_s0] ss:$0 sm:$0xff] }
   0x2   :  { %5 = vst [vmem:[%s23_s1] sm:$0xff] %v4_v0 }

// kernel: tile.19
= control target key start
LH: loop header
LB: loop body
LE: loop exit
PB: predicated region body
PF: predicated region fallthrough
CT: control target
= control target key end

     0   :  { %s67_s10 = smov 28   ;;  %s68_s11 = smov 20   ;;  %vm3_vm0 = vcmask 31744   ;;  %vm9_vm1 = vcmask 261344   ;;  %vm15_vm2 = vcmask 228544   ;;  %vm21_vm3 = vcmask 195744   ;;  %s111_s0 = inlined_call_operand.vmem [shape: f32[8,4], index: 0, kind: input, shape index: {}]   ;;  %s112_s1 = inlined_call_operand.vmem [shape: f32[1,32], index: 1, kind: output, shape index: {}]  }
   0x1   :  { %v53_v0 = vld [vmem:[%s111_s0 + $0x7] sm:$0x1]   ;;  %v55_v1 = vld [vmem:[%s111_s0 + $0x5] sm:$0x1]   ;;  %v54_v2 = vld [vmem:[%s111_s0 + $0x6] sm:$0x1]  }
   0x2   :  { %7 = vrot.lane.b32.xlu0 %v53_v0, %s67_s10  ;;  %19 = vrot.lane.b32.xlu1 %v55_v1, %s68_s11  ;;  %v56_v3 = vld [vmem:[%s111_s0 + $0x4] sm:$0x1]   ;;  %v2_v4 = vld [vmem:[%s111_s0] sm:$0x1]   ;;  %s69_s18 = smov 24   ;;  %s70_s19 = smov 16  }
   0x3   :  { %4 = vst.msk [vmem:[#allocation0] sm:$0x1] %vm3_vm0, %v2_v4   ;;  %v57_v5 = vld [vmem:[%s111_s0 + $0x3] sm:$0x1]   ;;  %v58_v6 = vld [vmem:[%s111_s0 + $0x2] sm:$0x1]  }
   0x4   :  { %s71_s24 = smov 12   ;;  %s72_s25 = smov 8   ;;  %v59_v7 = vld [vmem:[%s111_s0 + $0x1] sm:$0x1]   ;;  %vm27_vm4 = vcmask 162944   ;;  %vm33_vm5 = vcmask 130144  }
   0x5   :  { %s73_s0 = smov 4   ;;  %vm39_vm6 = vcmask 97344   ;;  %vm45_vm7 = vcmask 64544  }
   0x6   :  { %13 = vrot.lane.b32.xlu0 %v54_v2, %s69_s18  ;;  %25 = vrot.lane.b32.xlu1 %v56_v3, %s70_s19 }
   0xa   :  { %31 = vrot.lane.b32.xlu0 %v57_v5, %s71_s24  ;;  %37 = vrot.lane.b32.xlu1 %v58_v6, %s72_s25 }
   0xe   :  { %43 = vrot.lane.b32.xlu0 %v59_v7, %s73_s0 }
  0x74   :  { %v8_v8 = vpop.permute.xlu0 %7   ;;  %v20_v9 = vpop.permute.xlu1 %19  }
  0x75   :  { %10 = vst.msk [vmem:[#allocation0] sm:$0x1] %vm9_vm1, %v8_v8  }
  0x78   :  { %v14_v10 = vpop.permute.xlu0 %13   ;;  %v26_v11 = vpop.permute.xlu1 %25  }
  0x79   :  { %16 = vst.msk [vmem:[#allocation0] sm:$0x1] %vm15_vm2, %v14_v10  }
  0x7a   :  { %22 = vst.msk [vmem:[#allocation0] sm:$0x1] %vm21_vm3, %v20_v9  }
  0x7b   :  { %28 = vst.msk [vmem:[#allocation0] sm:$0x1] %vm27_vm4, %v26_v11  }
  0x7c   :  { %v32_v12 = vpop.permute.xlu0 %31   ;;  %v38_v13 = vpop.permute.xlu1 %37  }
  0x7d   :  { %34 = vst.msk [vmem:[#allocation0] sm:$0x1] %vm33_vm5, %v32_v12  }
  0x7e   :  { %40 = vst.msk [vmem:[#allocation0] sm:$0x1] %vm39_vm6, %v38_v13  }
  0x80   :  { %v44_v14 = vpop.permute.xlu0 %43  }
  0x81   :  { %46 = vst.msk [vmem:[#allocation0] sm:$0x1] %vm45_vm7, %v44_v14  }
  0x88   :  { %v50_v15 = vld [vmem:[#allocation0] sm:$0x1] }
  0x89   :  { %52 = vst [vmem:[%s112_s1] sm:$0x1] %v50_v15 }

// kernel: hourglass_forward.11
= control target key start
LH: loop header
LB: loop body
LE: loop exit
PB: predicated region body
PF: predicated region fallthrough
CT: control target
= control target key end

     0   :  { %s2890_s15 = smov 0   ;;  %s2892_s16 = smov 0   ;;  %s4067_s0 = inlined_call_operand.vmem [shape: f32[2,5,17,17,8], index: 0, kind: input, shape index: {}, may-alias: {0,1}]   ;;  %s4068_s1 = inlined_call_operand.vmem [shape: f32[2,5,17,17,8], index: 1, kind: input, shape index: {}, may-alias: {0,1}]   ;;  %s4069_s2 = inlined_call_operand.vmem [shape: f32[2,32,32], index: 2, kind: input, shape index: {}]   ;;  %s4070_s3 = inlined_call_operand.vmem [shape: f32[1,32], index: 3, kind: input, shape index: {}]   ;;  %s4071_s4 = inlined_call_operand.vmem [shape: f32[2,4,256,32], index: 4, kind: output, shape index: {}]  }
   0x1   :  { %s2894_s17 = smov 0   ;;  %s2896_s18 = smov 0  }
   0x2   :  { %s2898_s19 = smov 0  }
   0x3 LB: > { %s23_s20 = sadd.s32 1, %s2852_s17  ;;  %s26_s21 = sadd.s32 1, %s2856_s18  ;;  %s2860_s19 = sphi %s2898_s19, %s14_s19   ;;  %s2856_s18 = sphi %s2896_s18, %s4102_s18   ;;  %s2852_s17 = sphi %s2894_s17, %s4101_s17   ;;  %s2848_s16 = sphi %s2892_s16, %s4100_s16   ;;  %s2844_s15 = sphi %s2890_s15, %s4099_s15  }
   0x4   : > { %p24_p0 = scmp.ge.s32.totalorder %s23_s20, 4  ;;  %p2339_p1 = scmp.ge.s32.totalorder %s2860_s19, 1 }
   0x5   : > { %p202_p2 = scmp.lt.s32.totalorder %s2860_s19, 9 }
   0x6   : > { %s4104_s20 = smov (%p24_p0, %s23_s20), 0  ;;  %s4106_s21 = smov (!%p24_p0, %s26_s21), %s2856_s18 }
   0x7   : > { %p203_p3 = pnand %p2339_p1, %p202_p2  ;;  %p28_p4 = scmp.ge.s32.totalorder %s4106_s21, 2 }
   0x9   : > { %s4108_s21 = smov (%p28_p4, %s4106_s21), 0  ;;  %206 = sbr.rel (%p203_p3) target bundleno = 741 (0x2e5), region = 36 }
  0x10   : > { %p246_p5 = scmp.lt.s32.totalorder %s2848_s16, 1  ;;  %p248_p6 = scmp.lt.s32.totalorder %s2844_s15, 4  ;;  %v887_v22 = vld [vmem:[%s4069_s2] sm:$0xff]  ;;  %v888_v23 = vld [vmem:[%s4069_s2 + $0x8] sm:$0xff]  ;;  %v889_v29 = vld [vmem:[%s4069_s2 + $0x10] sm:$0xff]  ;;  %vm788_vm0 = vcmask 64512  }
  0x11   : > { %s2862_s30 = smov 8   ;;  %s255_s5 = sadd.s32 1, %s2844_s15  ;;  %v2736_v24 = vpack.c.bf16 %v888_v23, %v887_v22  ;;  %v2473_v27 = vld [vmem:[%s4069_s2 + $0x20] sm:$0xff]  ;;  %v2474_v28 = vld [vmem:[%s4069_s2 + $0x28] sm:$0xff]  ;;  %v890_v31 = vld [vmem:[%s4069_s2 + $0x18] sm:$0xff]  ;;  %vm821_vm1 = vcmask 130048  }
  0x12   : > { %s4110_s16 = smov (!%p246_p5, %s2848_s16), 1  ;;  %p258_p7 = scmp.lt.s32.totalorder %s255_s5, 4  ;;  %v2728_v30 = vpack.c.bf16 %v2474_v28, %v2473_v27  ;;  %v2740_v32 = vpack.c.bf16 %v890_v31, %v889_v29  ;;  %v2475_v35 = vld [vmem:[%s4069_s2 + $0x30] sm:$0xff]  ;;  %v2476_v36 = vld [vmem:[%s4069_s2 + $0x38] sm:$0xff]  ;;  %vm854_vm2 = vcmask 195584   ;;  %vm1505_vm3 = vcmask 261120  }
  0x13   : > { %s249_s22 = scalar_select %p248_p6, %s2844_s15, 4  ;;  %2737 = vmatprep.subr.bf16.mxu0 %v2736_v24  ;;  %v2732_v37 = vpack.c.bf16 %v2476_v36, %v2475_v35 }
  0x14   : > { %s2777_s23 = smul.u32 255, %s4110_s16  ;;  %s4112_s5 = smov (!%p258_p7, %s255_s5), 4  ;;  %2739 = vmatpush3.bf16.msra.mxu0 %v2736_v24  ;;  %2729 = vmatprep.subr.bf16.mxu1 %v2728_v30 }
  0x15   : > { %s2776_s24 = smul.u32 51, %s249_s22  ;;  %2741 = vmatprep.subr.bf16.mxu0 %v2740_v32  ;;  %2731 = vmatpush3.bf16.msra.mxu1 %v2728_v30  ;;  %s2863_s12 = smov 16  }
  0x16   : > { %s2778_s6 = smul.u32 51, %s4112_s5  ;;  %2733 = vmatprep.subr.bf16.mxu1 %v2732_v37  ;;  %s2864_s13 = smov 24  }
  0x17   : > { %s252_s25 = sadd.s32 %s2777_s23, %s2776_s24  ;;  %p268_p8 = scmp.lt.s32.totalorder %s2844_s15, 3 }
  0x18   : > { %s2340_s26 = sshll.u32 %s252_s25, 3  ;;  %s262_s7 = sadd.s32 %s2778_s6, %s2777_s23  ;;  %2743 = vmatpush3.bf16.msra.mxu0 %v2740_v32 }
  0x19   : > { %s2932_s29 = scalar_lea.vmem %s4067_s0, %s2340_s26  ;;  %s2341_s8 = sshll.u32 %s262_s7, 3  ;;  %2735 = vmatpush3.bf16.msra.mxu1 %v2732_v37 }
  0x1a   : > { %v2935_v0 = vld [vmem:[%s2932_s29 + $0x19] sm:$0xff]  ;;  %v307_v1 = vld [vmem:[%s2932_s29 + $0x1] sm:$0xff]  ;;  %v308_v3 = vld [vmem:[%s2932_s29 + $0x9] sm:$0xff]  ;;  %s3040_s11 = scalar_lea.vmem %s4068_s1, %s2341_s8  ;;  %s4114_s15 = smov (!%p268_p8, %s2844_s15), 3 }
  0x1b   : > { %440 = vrot.lane.b32.xlu1 %v2935_v0, %s2862_s30  ;;  %436 = vrot.lane.b32.xlu0 %v307_v1, %s2862_s30  ;;  %v2942_v2 = vld [vmem:[%s2932_s29 + $0x21] sm:$0xff]  ;;  %v2949_v4 = vld [vmem:[%s2932_s29 + $0x39] sm:$0xff]  ;;  %s2343_s14 = sshll.u32 %s4110_s16, 7 }
  0x1c   : > { %v2952_v5 = vld [vmem:[%s2932_s29 + $0x31] sm:$0xff]  ;;  %v2962_v7 = vld [vmem:[%s2932_s29 + $0x49] sm:$0xff]  ;;  %v2972_v9 = vld [vmem:[%s2932_s29 + $0x61] sm:$0xff] }
  0x1d   : > { %v2959_v6 = vld [vmem:[%s2932_s29 + $0x51] sm:$0xff]  ;;  %v2969_v8 = vld [vmem:[%s2932_s29 + $0x69] sm:$0xff]  ;;  %v2980_v10 = vld [vmem:[%s2932_s29 + $0x81] sm:$0xff] }
  0x1e   : > { %v2983_v11 = vld [vmem:[%s2932_s29 + $0x79] sm:$0xff]  ;;  %v2993_v13 = vld [vmem:[%s2932_s29 + $0x91] sm:$0xff]  ;;  %v3003_v15 = vld [vmem:[%s2932_s29 + $0xa9] sm:$0xff] }
  0x1f   : > { %442 = vrot.lane.b32.xlu1 %v2942_v2, %s2862_s30  ;;  %438 = vrot.lane.b32.xlu0 %v308_v3, %s2862_s30  ;;  %v2990_v12 = vld [vmem:[%s2932_s29 + $0x99] sm:$0xff]  ;;  %v3000_v14 = vld [vmem:[%s2932_s29 + $0xb1] sm:$0xff] }
  0x20   : > { %v3010_v16 = vld [vmem:[%s2932_s29 + $0xc9] sm:$0xff]  ;;  %v3013_v17 = vld [vmem:[%s2932_s29 + $0xc1] sm:$0xff]  ;;  %v3025_v19 = vld [vmem:[%s2932_s29 + $0xd9] sm:$0xff] }
  0x21   : > { %v3022_v18 = vld [vmem:[%s2932_s29 + $0xe1] sm:$0xff]  ;;  %v3032_v20 = vld [vmem:[%s2932_s29 + $0xf9] sm:$0xff]  ;;  %v3035_v21 = vld [vmem:[%s2932_s29 + $0xf1] sm:$0xff] }
  0x22   : > { %v923_v25 = vld [vmem:[%s3040_s11 + $0x1] sm:$0xff]  ;;  %v3054_v26 = vld [vmem:[%s2932_s29 + $0x109] sm:$0xff]  ;;  %v3073_v34 = vld [vmem:[%s2932_s29 + $0x18] sm:$0xff] }
  0x23   : > { %446 = vrot.lane.b32.xlu1 %v2949_v4, %s2862_s30  ;;  %444 = vrot.lane.b32.xlu0 %v2952_v5, %s2862_s30  ;;  %v924_v33 = vld [vmem:[%s3040_s11 + $0x9] sm:$0xff]  ;;  %v3085_v38 = vld [vmem:[%s2932_s29 + $0x20] sm:$0xff] }
  0x24   : > { %v3088_v39 = vld [vmem:[%s3040_s11 + $0x18] sm:$0xff]  ;;  %v3095_v40 = vld [vmem:[%s3040_s11 + $0x20] sm:$0xff]  ;;  %v3109_v43 = vld [vmem:[%s2932_s29 + $0x30] sm:$0xff] }
  0x25   : > { %v2441_v41 = vld [vmem:[%s3040_s11 + $0x19] sm:$0xff]  ;;  %v2442_v42 = vld [vmem:[%s3040_s11 + $0x21] sm:$0xff]  ;;  %v3118_v45 = vld [vmem:[%s3040_s11 + $0x30] sm:$0xff] }
  0x26   : > { %v3115_v44 = vld [vmem:[%s2932_s29 + $0x38] sm:$0xff]  ;;  %v3139_v49 = vld [vmem:[%s2932_s29 + $0x48] sm:$0xff]  ;;  %v3145_v50 = vld [vmem:[%s2932_s29 + $0x50] sm:$0xff] }
  0x27   : > { %450 = vrot.lane.b32.xlu1 %v2959_v6, %s2862_s30  ;;  %448 = vrot.lane.b32.xlu0 %v2962_v7, %s2862_s30  ;;  %v3125_v46 = vld [vmem:[%s3040_s11 + $0x38] sm:$0xff]  ;;  %v3148_v51 = vld [vmem:[%s3040_s11 + $0x48] sm:$0xff] }
  0x28   : > { %v2443_v47 = vld [vmem:[%s3040_s11 + $0x31] sm:$0xff]  ;;  %v2444_v48 = vld [vmem:[%s3040_s11 + $0x39] sm:$0xff]  ;;  %v2445_v53 = vld [vmem:[%s3040_s11 + $0x49] sm:$0xff] }
  0x29   : > { %v3155_v52 = vld [vmem:[%s3040_s11 + $0x50] sm:$0xff]  ;;  %v3169_v55 = vld [vmem:[%s2932_s29 + $0x60] sm:$0xff]  ;;  %v3175_v56 = vld [vmem:[%s2932_s29 + $0x68] sm:$0xff] }
  0x2a   : > { %v2446_v54 = vld [vmem:[%s3040_s11 + $0x51] sm:$0xff]  ;;  %v3178_v57 = vld [vmem:[%s3040_s11 + $0x60] sm:$0xff]  ;;  %v3185_v58 = vld [vmem:[%s3040_s11 + $0x68] sm:$0xff] }
  0x2b   : > { %454 = vrot.lane.b32.xlu1 %v2969_v8, %s2862_s30  ;;  %452 = vrot.lane.b32.xlu0 %v2972_v9, %s2862_s30  ;;  %v2447_v61 = vld [vmem:[%s3040_s11 + $0x61] sm:$0xff]  ;;  %v3211_v3 = vld [vmem:[%s2932_s29 + $0x78] sm:$0xff] }
  0x2c   : > { %v3235_v22 = vld [vmem:[%s3040_s11 + $0x80] sm:$0xff]  ;;  %v3278_v37 = vld [vmem:[%s2932_s29 + $0x98] sm:$0xff] }
  0x2d   : > { %v2450_v29 = vld [vmem:[%s3040_s11 + $0x81] sm:$0xff] }
  0x2f   : > { %458 = vrot.lane.b32.xlu1 %v2980_v10, %s2862_s30  ;;  %456 = vrot.lane.b32.xlu0 %v2983_v11, %s2862_s30 }
  0x33   : > { %462 = vrot.lane.b32.xlu1 %v2990_v12, %s2862_s30  ;;  %460 = vrot.lane.b32.xlu0 %v2993_v13, %s2862_s30 }
  0x37   : > { %466 = vrot.lane.b32.xlu1 %v3000_v14, %s2862_s30  ;;  %464 = vrot.lane.b32.xlu0 %v3003_v15, %s2862_s30 }
  0x3b   : > { %470 = vrot.lane.b32.xlu1 %v3010_v16, %s2862_s30  ;;  %468 = vrot.lane.b32.xlu0 %v3013_v17, %s2862_s30 }
  0x3f   : > { %474 = vrot.lane.b32.xlu1 %v3022_v18, %s2862_s30  ;;  %472 = vrot.lane.b32.xlu0 %v3025_v19, %s2862_s30 }
  0x43   : > { %478 = vrot.lane.b32.xlu1 %v3032_v20, %s2862_s30  ;;  %476 = vrot.lane.b32.xlu0 %v3035_v21, %s2862_s30 }
  0x47   : > { %1052 = vrot.lane.b32.xlu1 %v923_v25, %s2862_s30  ;;  %480 = vrot.lane.b32.xlu0 %v3054_v26, %s2862_s30  ;;  %v2449_v25 = vld [vmem:[%s3040_s11 + $0x79] sm:$0xff] }
  0x4b   : > { %1054 = vrot.lane.b32.xlu1 %v924_v33, %s2862_s30  ;;  %564 = vrot.lane.b32.xlu0 %v3073_v34, %s2863_s12  ;;  %v3265_v33 = vld [vmem:[%s2932_s29 + $0x90] sm:$0xff] }
  0x4f   : > { %566 = vrot.lane.b32.xlu1 %v3085_v38, %s2863_s12  ;;  %1180 = vrot.lane.b32.xlu0 %v3088_v39, %s2863_s12 }
  0x53   : > { %1182 = vrot.lane.b32.xlu1 %v3095_v40, %s2863_s12  ;;  %692 = vrot.lane.b32.xlu0 %v2935_v0, %s2864_s13  ;;  %v2448_v0 = vld [vmem:[%s3040_s11 + $0x69] sm:$0xff] }
  0x57   : > { %694 = vrot.lane.b32.xlu1 %v2942_v2, %s2864_s13  ;;  %1308 = vrot.lane.b32.xlu0 %v2441_v41, %s2864_s13 }
  0x5b   : > { %1056 = vrot.lane.b32.xlu1 %v2441_v41, %s2862_s30  ;;  %1310 = vrot.lane.b32.xlu0 %v2442_v42, %s2864_s13  ;;  %v3285_v41 = vld [vmem:[%s3040_s11 + $0x98] sm:$0xff] }
  0x5f   : > { %1058 = vrot.lane.b32.xlu1 %v2442_v42, %s2862_s30  ;;  %568 = vrot.lane.b32.xlu0 %v3109_v43, %s2863_s12 }
  0x63   : > { %570 = vrot.lane.b32.xlu1 %v3115_v44, %s2863_s12  ;;  %1184 = vrot.lane.b32.xlu0 %v3118_v45, %s2863_s12 }
  0x67   : > { %1186 = vrot.lane.b32.xlu1 %v3125_v46, %s2863_s12  ;;  %696 = vrot.lane.b32.xlu0 %v2952_v5, %s2864_s13 }
  0x6b   : > { %698 = vrot.lane.b32.xlu1 %v2949_v4, %s2864_s13  ;;  %1312 = vrot.lane.b32.xlu0 %v2443_v47, %s2864_s13 }
  0x6f   : > { %1060 = vrot.lane.b32.xlu1 %v2443_v47, %s2862_s30  ;;  %1314 = vrot.lane.b32.xlu0 %v2444_v48, %s2864_s13 }
  0x73   : > { %1062 = vrot.lane.b32.xlu1 %v2444_v48, %s2862_s30  ;;  %572 = vrot.lane.b32.xlu0 %v3139_v49, %s2863_s12  ;;  %v2451_v48 = vld [vmem:[%s3040_s11 + $0x91] sm:$0xff] }
  0x77   : > { %574 = vrot.lane.b32.xlu1 %v3145_v50, %s2863_s12  ;;  %1188 = vrot.lane.b32.xlu0 %v3148_v51, %s2863_s12 }
  0x7b   : > { %1190 = vrot.lane.b32.xlu1 %v3155_v52, %s2863_s12  ;;  %700 = vrot.lane.b32.xlu0 %v2962_v7, %s2864_s13  ;;  %v3224_v7 = vld [vmem:[%s3040_s11 + $0x78] sm:$0xff] }
  0x7f   : > { %702 = vrot.lane.b32.xlu1 %v2959_v6, %s2864_s13  ;;  %1316 = vrot.lane.b32.xlu0 %v2445_v53, %s2864_s13  ;;  %v3221_v6 = vld [vmem:[%s2932_s29 + $0x80] sm:$0xff] }
  0x83   : > { %1064 = vrot.lane.b32.xlu1 %v2445_v53, %s2862_s30  ;;  %1318 = vrot.lane.b32.xlu0 %v2446_v54, %s2864_s13 }
  0x87   : > { %1066 = vrot.lane.b32.xlu1 %v2446_v54, %s2862_s30  ;;  %576 = vrot.lane.b32.xlu0 %v3169_v55, %s2863_s12 }
  0x8b   : > { %578 = vrot.lane.b32.xlu1 %v3175_v56, %s2863_s12  ;;  %1192 = vrot.lane.b32.xlu0 %v3178_v57, %s2863_s12 }
  0x8d   : > { %v3187_v59 = vpop.permute.xlu1 %440  ;;  %v3189_v60 = vpop.permute.xlu0 %436 }
  0x8f   : > { %1194 = vrot.lane.b32.xlu1 %v3185_v58, %s2863_s12  ;;  %704 = vrot.lane.b32.xlu0 %v2972_v9, %s2864_s13 }
  0x91   : > { %v3196_v62 = vpop.permute.xlu1 %442  ;;  %v3198_v63 = vpop.permute.xlu0 %438 }
  0x93   : > { %706 = vrot.lane.b32.xlu1 %v2969_v8, %s2864_s13  ;;  %1320 = vrot.lane.b32.xlu0 %v2447_v61, %s2864_s13 }
  0x95   : > { %v3204_v1 = vpop.permute.xlu1 %446  ;;  %v3206_v2 = vpop.permute.xlu0 %444 }
  0x97   : > { %1068 = vrot.lane.b32.xlu1 %v2447_v61, %s2862_s30  ;;  %1322 = vrot.lane.b32.xlu0 %v2448_v0, %s2864_s13  ;;  %v2452_v61 = vld [vmem:[%s3040_s11 + $0x99] sm:$0xff] }
  0x99   : > { %v3213_v4 = vpop.permute.xlu1 %450  ;;  %v3215_v5 = vpop.permute.xlu0 %448 }
  0x9b   : > { %1070 = vrot.lane.b32.xlu1 %v2448_v0, %s2862_s30  ;;  %580 = vrot.lane.b32.xlu0 %v3211_v3, %s2863_s12 }
  0x9d   : > { %v3226_v8 = vpop.permute.xlu1 %454  ;;  %v3228_v9 = vpop.permute.xlu0 %452 }
  0x9f   : > { %582 = vrot.lane.b32.xlu1 %v3221_v6, %s2863_s12  ;;  %1196 = vrot.lane.b32.xlu0 %v3224_v7, %s2863_s12 }
  0xa1   : > { %v3237_v23 = vpop.permute.xlu1 %458  ;;  %v3239_v24 = vpop.permute.xlu0 %456 }
  0xa3   : > { %1198 = vrot.lane.b32.xlu1 %v3235_v22, %s2863_s12  ;;  %708 = vrot.lane.b32.xlu0 %v2983_v11, %s2864_s13 }
  0xa5   : > { %v3246_v27 = vpop.permute.xlu1 %462  ;;  %v3248_v28 = vpop.permute.xlu0 %460 }
  0xa7   : > { %710 = vrot.lane.b32.xlu1 %v2980_v10, %s2864_s13  ;;  %1324 = vrot.lane.b32.xlu0 %v2449_v25, %s2864_s13  ;;  %v3271_v10 = vld [vmem:[%s3040_s11 + $0x90] sm:$0xff] }
  0xa9   : > { %v3254_v30 = vpop.permute.xlu1 %466  ;;  %v3256_v31 = vpop.permute.xlu0 %464 }
  0xaa   : > { %4075 = vst [vmem:[#allocation2_spill] sm:$0xff] %v3254_v30  ;;  %4076 = vst [vmem:[#allocation3_spill] sm:$0xff] %v3256_v31  ;;  %v3320_v30 = vld [vmem:[%s2932_s29 + $0xb0] sm:$0xff] }
  0xab   : > { %1072 = vrot.lane.b32.xlu1 %v2449_v25, %s2862_s30  ;;  %1326 = vrot.lane.b32.xlu0 %v2450_v29, %s2864_s13  ;;  %4086 = vst [vmem:[#allocation13_spill] sm:$0xff] %v3320_v30 }
  0xad   : > { %v3260_v11 = vpop.permute.xlu1 %470  ;;  %v3262_v32 = vpop.permute.xlu0 %468 }
  0xae   : > { %4077 = vst [vmem:[#allocation4_spill] sm:$0xff] %v3260_v11  ;;  %4078 = vst [vmem:[#allocation5_spill] sm:$0xff] %v3262_v32 }
  0xaf   : > { %1074 = vrot.lane.b32.xlu1 %v2450_v29, %s2862_s30  ;;  %584 = vrot.lane.b32.xlu0 %v3265_v33, %s2863_s12 }
  0xb1   : > { %v3273_v35 = vpop.permute.xlu1 %474  ;;  %v3275_v36 = vpop.permute.xlu0 %472 }
  0xb2   : > { %4079 = vst [vmem:[#allocation6_spill] sm:$0xff] %v3273_v35  ;;  %4080 = vst [vmem:[#allocation7_spill] sm:$0xff] %v3275_v36  ;;  %v891_v35 = vld [vmem:[%s3040_s11] sm:$0xff] }
  0xb3   : > { %586 = vrot.lane.b32.xlu1 %v3278_v37, %s2863_s12  ;;  %1200 = vrot.lane.b32.xlu0 %v3271_v10, %s2863_s12 }
  0xb5   : > { %v3287_v42 = vpop.permute.xlu1 %478  ;;  %v3289_v47 = vpop.permute.xlu0 %476 }
  0xb6   : > { %4081 = vst [vmem:[#allocation8_spill] sm:$0xff] %v3287_v42  ;;  %4082 = vst [vmem:[#allocation9_spill] sm:$0xff] %v3289_v47  ;;  %v3306_v42 = vld [vmem:[%s2932_s29 + $0xa8] sm:$0xff] }
  0xb7   : > { %1202 = vrot.lane.b32.xlu1 %v3285_v41, %s2863_s12  ;;  %712 = vrot.lane.b32.xlu0 %v2993_v13, %s2864_s13  ;;  %v275_v13 = vld [vmem:[%s2932_s29] sm:$0xff]  ;;  %4084 = vst [vmem:[#allocation11_spill] sm:$0xff] %v3306_v42  ;;  %v276_v47 = vld [vmem:[%s2932_s29 + $0x8] sm:$0xff] }
  0xb9   : > { %v1053_v53 = vpop.permute.xlu1 %1052  ;;  %v3296_v54 = vpop.permute.xlu0 %480 }
  0xba   : > { %4083 = vst [vmem:[#allocation10_spill] sm:$0xff] %v3296_v54 }
  0xbb   : > { %714 = vrot.lane.b32.xlu1 %v2990_v12, %s2864_s13  ;;  %1328 = vrot.lane.b32.xlu0 %v2451_v48, %s2864_s13  ;;  %v789_v12 = vsel %vm788_vm0, %v275_v13, %v3189_v60  ;;  %v790_v60 = vsel %vm788_vm0, %v276_v47, %v3198_v63  ;;  %v1404_v13 = vsel %vm788_vm0, %v891_v35, %v1053_v53  ;;  %v2453_v35 = vld [vmem:[%s3040_s11 + $0xa9] sm:$0xff] }
  0xbd   : > { %v1055_v0 = vpop.permute.xlu1 %1054  ;;  %v565_v25 = vpop.permute.xlu0 %564 }
  0xbe   : > { %v822_v36 = vsel %vm821_vm1, %v789_v12, %v565_v25  ;;  %v3332_v25 = vld [vmem:[%s3040_s11 + $0xb0] sm:$0xff]  ;;  %v892_v12 = vld [vmem:[%s3040_s11 + $0x8] sm:$0xff] }
  0xbf   : > { %1076 = vrot.lane.b32.xlu1 %v2451_v48, %s2862_s30  ;;  %1330 = vrot.lane.b32.xlu0 %v2452_v61, %s2864_s13  ;;  %v3314_v48 = vld [vmem:[%s3040_s11 + $0xa8] sm:$0xff]  ;;  %v1405_v63 = vsel %vm788_vm0, %v892_v12, %v1055_v0 }
  0xc0   : > { %4085 = vst [vmem:[#allocation12_spill] sm:$0xff] %v3314_v48  ;;  %v3370_v12 = vld [vmem:[%s2932_s29 + $0xc8] sm:$0xff] }
  0xc1   : > { %v567_v29 = vpop.permute.xlu1 %566  ;;  %v1181_v54 = vpop.permute.xlu0 %1180 }
  0xc3   : > { %1078 = vrot.lane.b32.xlu1 %v2452_v61, %s2862_s30  ;;  %588 = vrot.lane.b32.xlu0 %v3306_v42, %s2863_s12  ;;  %v823_v42 = vsel %vm821_vm1, %v790_v60, %v567_v29  ;;  %v3357_v29 = vld [vmem:[%s2932_s29 + $0xc0] sm:$0xff] }
  0xc5   : > { %v1183_v11 = vpop.permute.xlu1 %1182  ;;  %v693_v32 = vpop.permute.xlu0 %692 }
  0xc6   : > { %v855_v61 = vsel %vm854_vm2, %v822_v36, %v693_v32  ;;  %v1436_v32 = vsel %vm821_vm1, %v1404_v13, %v1181_v54  ;;  %v1437_v47 = vsel %vm821_vm1, %v1405_v63, %v1183_v11 }
  0xc7   : > { %590 = vrot.lane.b32.xlu1 %v3320_v30, %s2863_s12  ;;  %1204 = vrot.lane.b32.xlu0 %v3314_v48, %s2863_s12 }
  0xc8   : > { %2680 = vmatprep.mubr.msk.f32.mxu0 %vm1505_vm3, %v855_v61 }
  0xc9   : > { %v695_v36 = vpop.permute.xlu1 %694  ;;  %v1309_v30 = vpop.permute.xlu0 %1308 }
  0xca   : > { %v856_v48 = vsel %vm854_vm2, %v823_v42, %v695_v36  ;;  %v1468_v31 = vsel %vm854_vm2, %v1436_v32, %v1309_v30  ;;  %v3384_v36 = vld [vmem:[%s3040_s11 + $0xc8] sm:$0xff] }
  0xcb   : > { %1206 = vrot.lane.b32.xlu1 %v3332_v25, %s2863_s12  ;;  %716 = vrot.lane.b32.xlu0 %v3003_v15, %s2864_s13  ;;  %v2454_v15 = vld [vmem:[%s3040_s11 + $0xb1] sm:$0xff] }
  0xcc   : > { %2624 = vmatprep.mubr.msk.f32.mxu1 %vm1505_vm3, %v1468_v31  ;;  %2681 = vmatmul.mubr.msk.f32.vlgmr.msra.gmra.mrb[0].mxu0 %vm1505_vm3, %v856_v48  ;;  %v3366_v48 = vld [vmem:[%s3040_s11 + $0xc0] sm:$0xff] }
  0xcd   : > { %v1057_v53 = vpop.permute.xlu1 %1056  ;;  %v1311_v42 = vpop.permute.xlu0 %1310 }
  0xce   : > { %v1469_v30 = vsel %vm854_vm2, %v1437_v47, %v1311_v42 }
  0xcf   : > { %718 = vrot.lane.b32.xlu1 %v3000_v14, %s2864_s13  ;;  %1332 = vrot.lane.b32.xlu0 %v2453_v35, %s2864_s13  ;;  %v791_v14 = vsel %vm788_vm0, %v3073_v34, %v3187_v59  ;;  %v792_v34 = vsel %vm788_vm0, %v3085_v38, %v3196_v62  ;;  %v1406_v59 = vsel %vm788_vm0, %v3088_v39, %v1057_v53  ;;  %v2455_v39 = vld [vmem:[%s3040_s11 + $0xc1] sm:$0xff] }
  0xd0   : > { %2625 = vmatmul.mubr.msk.f32.vlgmr.msra.gmra.mrb[0].mxu1 %vm1505_vm3, %v1469_v30 }
  0xd1   : > { %v1059_v31 = vpop.permute.xlu1 %1058  ;;  %v569_v54 = vpop.permute.xlu0 %568 }
  0xd2   : > { %v824_v61 = vsel %vm821_vm1, %v791_v14, %v569_v54  ;;  %v1407_v38 = vsel %vm788_vm0, %v3095_v40, %v1059_v31 }
  0xd3   : > { %1080 = vrot.lane.b32.xlu1 %v2453_v35, %s2862_s30  ;;  %1334 = vrot.lane.b32.xlu0 %v2454_v15, %s2864_s13 }
  0xd5   : > { %v571_v11 = vpop.permute.xlu1 %570  ;;  %v1185_v0 = vpop.permute.xlu0 %1184 }
  0xd6   : > { %v825_v63 = vsel %vm821_vm1, %v792_v34, %v571_v11  ;;  %v1438_v35 = vsel %vm821_vm1, %v1406_v59, %v1185_v0  ;;  %v3422_v59 = vld [vmem:[%s2932_s29 + $0xe0] sm:$0xff] }
  0xd7   : > { %1082 = vrot.lane.b32.xlu1 %v2454_v15, %s2862_s30  ;;  %592 = vrot.lane.b32.xlu0 %v3357_v29, %s2863_s12 }
  0xd9   : > { %v1187_v60 = vpop.permute.xlu1 %1186  ;;  %v697_v13 = vpop.permute.xlu0 %696 }
  0xda   : > { %v857_v32 = vsel %vm854_vm2, %v824_v61, %v697_v13  ;;  %v1439_v62 = vsel %vm821_vm1, %v1407_v38, %v1187_v60  ;;  %v3409_v61 = vld [vmem:[%s2932_s29 + $0xd8] sm:$0xff] }
  0xdb   : > { %594 = vrot.lane.b32.xlu1 %v3370_v12, %s2863_s12  ;;  %1208 = vrot.lane.b32.xlu0 %v3366_v48, %s2863_s12  ;;  %v3418_v60 = vld [vmem:[%s3040_s11 + $0xd8] sm:$0xff] }
  0xdc   : > { %2683 = vmatprep.mubr.msk.f32.mxu0 %vm1505_vm3, %v857_v32 }
  0xdd   : > { %v699_v47 = vpop.permute.xlu1 %698  ;;  %v1313_v42 = vpop.permute.xlu0 %1312 }
  0xde   : > { %v858_v30 = vsel %vm854_vm2, %v825_v63, %v699_v47  ;;  %v1470_v15 = vsel %vm854_vm2, %v1438_v35, %v1313_v42  ;;  %v3436_v35 = vld [vmem:[%s3040_s11 + $0xe0] sm:$0xff] }
  0xdf   : > { %1210 = vrot.lane.b32.xlu1 %v3384_v36, %s2863_s12  ;;  %720 = vrot.lane.b32.xlu0 %v3013_v17, %s2864_s13  ;;  %v2456_v17 = vld [vmem:[%s3040_s11 + $0xc9] sm:$0xff] }
  0xe0   : > { %2627 = vmatprep.mubr.msk.f32.mxu1 %vm1505_vm3, %v1470_v15  ;;  %2684 = vmatmul.mubr.msk.f32.gmra.mrb[2].mxu0 %vm1505_vm3, %v858_v30 }
  0xe1   : > { %v1061_v53 = vpop.permute.xlu1 %1060  ;;  %v1315_v54 = vpop.permute.xlu0 %1314 }
  0xe2   : > { %v1471_v11 = vsel %vm854_vm2, %v1439_v62, %v1315_v54 }
  0xe3   : > { %722 = vrot.lane.b32.xlu1 %v3010_v16, %s2864_s13  ;;  %1336 = vrot.lane.b32.xlu0 %v2455_v39, %s2864_s13  ;;  %v793_v16 = vsel %vm788_vm0, %v3109_v43, %v3206_v2  ;;  %v794_v43 = vsel %vm788_vm0, %v3115_v44, %v3204_v1  ;;  %v1408_v2 = vsel %vm788_vm0, %v3118_v45, %v1061_v53  ;;  %v2457_v45 = vld [vmem:[%s3040_s11 + $0xd9] sm:$0xff] }
  0xe4   : > { %2628 = vmatmul.mubr.msk.f32.gmra.mrb[2].mxu1 %vm1505_vm3, %v1471_v11 }
  0xe5   : > { %v1063_v40 = vpop.permute.xlu1 %1062  ;;  %v573_v31 = vpop.permute.xlu0 %572 }
  0xe6   : > { %v826_v13 = vsel %vm821_vm1, %v793_v16, %v573_v31  ;;  %v1409_v44 = vsel %vm788_vm0, %v3125_v46, %v1063_v40  ;;  %v3461_v31 = vld [vmem:[%s2932_s29 + $0xf0] sm:$0xff] }
  0xe7   : > { %1084 = vrot.lane.b32.xlu1 %v2455_v39, %s2862_s30  ;;  %1338 = vrot.lane.b32.xlu0 %v2456_v17, %s2864_s13 }
  0xe9   : > { %v575_v0 = vpop.permute.xlu1 %574  ;;  %v1189_v14 = vpop.permute.xlu0 %1188 }
  0xea   : > { %v827_v47 = vsel %vm821_vm1, %v794_v43, %v575_v0  ;;  %v1440_v42 = vsel %vm821_vm1, %v1408_v2, %v1189_v14  ;;  %v3470_v0 = vld [vmem:[%s3040_s11 + $0xf0] sm:$0xff] }
  0xeb   : > { %1086 = vrot.lane.b32.xlu1 %v2456_v17, %s2862_s30  ;;  %596 = vrot.lane.b32.xlu0 %v3409_v61, %s2863_s12 }
  0xed   : > { %v1191_v32 = vpop.permute.xlu1 %1190  ;;  %v701_v34 = vpop.permute.xlu0 %700 }
  0xee   : > { %v859_v63 = vsel %vm854_vm2, %v826_v13, %v701_v34  ;;  %v1441_v1 = vsel %vm821_vm1, %v1409_v44, %v1191_v32  ;;  %v3474_v32 = vld [vmem:[%s2932_s29 + $0xf8] sm:$0xff] }
  0xef   : > { %598 = vrot.lane.b32.xlu1 %v3422_v59, %s2863_s12  ;;  %1212 = vrot.lane.b32.xlu0 %v3418_v60, %s2863_s12 }
  0xf0   : > { %2686 = vmatprep.mubr.msk.f32.mxu0 %vm1505_vm3, %v859_v63  ;;  %v3488_v63 = vld [vmem:[%s3040_s11 + $0xf8] sm:$0xff] }
  0xf1   : > { %v703_v30 = vpop.permute.xlu1 %702  ;;  %v1317_v15 = vpop.permute.xlu0 %1316 }
  0xf2   : > { %v860_v38 = vsel %vm854_vm2, %v827_v47, %v703_v30  ;;  %v1472_v39 = vsel %vm854_vm2, %v1440_v42, %v1317_v15 }
  0xf3   : > { %1214 = vrot.lane.b32.xlu1 %v3436_v35, %s2863_s12  ;;  %724 = vrot.lane.b32.xlu0 %v3025_v19, %s2864_s13  ;;  %v2458_v19 = vld [vmem:[%s3040_s11 + $0xe1] sm:$0xff] }
  0xf4   : > { %2630 = vmatprep.mubr.msk.f32.mxu1 %vm1505_vm3, %v1472_v39  ;;  %2687 = vmatmul.mubr.msk.f32.gmra.mrb[4].mxu0 %vm1505_vm3, %v860_v38 }
  0xf5   : > { %v1065_v62 = vpop.permute.xlu1 %1064  ;;  %v1319_v53 = vpop.permute.xlu0 %1318 }
  0xf6   : > { %v1473_v54 = vsel %vm854_vm2, %v1441_v1, %v1319_v53  ;;  %v3513_v53 = vld [vmem:[%s2932_s29 + $0x108] sm:$0xff] }
  0xf7   : > { %726 = vrot.lane.b32.xlu1 %v3022_v18, %s2864_s13  ;;  %1340 = vrot.lane.b32.xlu0 %v2457_v45, %s2864_s13  ;;  %v795_v18 = vsel %vm788_vm0, %v3139_v49, %v3215_v5  ;;  %v796_v49 = vsel %vm788_vm0, %v3145_v50, %v3213_v4  ;;  %v1410_v5 = vsel %vm788_vm0, %v3148_v51, %v1065_v62  ;;  %v2459_v51 = vld [vmem:[%s3040_s11 + $0xf1] sm:$0xff] }
  0xf8   : > { %2631 = vmatmul.mubr.msk.f32.gmra.mrb[4].mxu1 %vm1505_vm3, %v1473_v54  ;;  %v3522_v54 = vld [vmem:[%s2932_s29 + $0x110] sm:$0xff] }
  0xf9   : > { %v1067_v46 = vpop.permute.xlu1 %1066  ;;  %v577_v11 = vpop.permute.xlu0 %576 }
  0xfa   : > { %v828_v14 = vsel %vm821_vm1, %v795_v18, %v577_v11  ;;  %v1411_v50 = vsel %vm788_vm0, %v3155_v52, %v1067_v46  ;;  %v3540_v18 = vld [vmem:[%s3040_s11 + $0x110] sm:$0xff] }
  0xfb   : > { %1088 = vrot.lane.b32.xlu1 %v2457_v45, %s2862_s30  ;;  %1342 = vrot.lane.b32.xlu0 %v2458_v19, %s2864_s13 }
  0xfd   : > { %v579_v17 = vpop.permute.xlu1 %578  ;;  %v1193_v40 = vpop.permute.xlu0 %1192 }
  0xfe   : > { %v829_v43 = vsel %vm821_vm1, %v796_v49, %v579_v17  ;;  %v1442_v2 = vsel %vm821_vm1, %v1410_v5, %v1193_v40 }
  0xff   : > { %1090 = vrot.lane.b32.xlu1 %v2458_v19, %s2862_s30  ;;  %600 = vrot.lane.b32.xlu0 %v3461_v31, %s2863_s12  ;;  %v3525_v19 = vld [vmem:[%s3040_s11 + $0x108] sm:$0xff] }
 0x101   : > { %v1195_v16 = vpop.permute.xlu1 %1194  ;;  %v705_v13 = vpop.permute.xlu0 %704 }
 0x102   : > { %v861_v34 = vsel %vm854_vm2, %v828_v14, %v705_v13  ;;  %v1443_v4 = vsel %vm821_vm1, %v1411_v50, %v1195_v16 }
 0x103   : > { %602 = vrot.lane.b32.xlu1 %v3474_v32, %s2863_s12  ;;  %1216 = vrot.lane.b32.xlu0 %v3470_v0, %s2863_s12 }
 0x104   : > { %2689 = vmatprep.mubr.msk.f32.mxu0 %vm1505_vm3, %v861_v34 }
 0x105   : > { %v707_v47 = vpop.permute.xlu1 %706  ;;  %v1321_v42 = vpop.permute.xlu0 %1320 }
 0x106   : > { %v862_v30 = vsel %vm854_vm2, %v829_v43, %v707_v47  ;;  %v1474_v15 = vsel %vm854_vm2, %v1442_v2, %v1321_v42 }
 0x107   : > { %1218 = vrot.lane.b32.xlu1 %v3488_v63, %s2863_s12  ;;  %728 = vrot.lane.b32.xlu0 %v3035_v21, %s2864_s13  ;;  %v2460_v21 = vld [vmem:[%s3040_s11 + $0xf9] sm:$0xff] }
 0x108   : > { %2633 = vmatprep.mubr.msk.f32.mxu1 %vm1505_vm3, %v1474_v15  ;;  %2690 = vmatmul.mubr.msk.f32.gmra.mrb[6].mxu0 %vm1505_vm3, %v862_v30  ;;  %v3565_v15 = vld [vmem:[%s2932_s29 + $0x120] sm:$0xff] }
 0x109   : > { %v1069_v38 = vpop.permute.xlu1 %1068  ;;  %v1323_v39 = vpop.permute.xlu0 %1322 }
 0x10a   : > { %v1475_v44 = vsel %vm854_vm2, %v1443_v4, %v1323_v39  ;;  %v799_v4 = vsel %vm788_vm0, %v3211_v3, %v3239_v24  ;;  %v2399_v24 = vld [vmem:[%s2932_s29 + $0x121] sm:$0xff] }
 0x10b   : > { %730 = vrot.lane.b32.xlu1 %v3032_v20, %s2864_s13  ;;  %1344 = vrot.lane.b32.xlu0 %v2459_v51, %s2864_s13  ;;  %v797_v20 = vsel %vm788_vm0, %v3169_v55, %v3228_v9  ;;  %v798_v55 = vsel %vm788_vm0, %v3175_v56, %v3226_v8  ;;  %v1412_v9 = vsel %vm788_vm0, %v3178_v57, %v1069_v38  ;;  %v2398_v57 = vld [vmem:[%s2932_s29 + $0x111] sm:$0xff]  ;;  %v2461_v8 = vld [vmem:[%s3040_s11 + $0x109] sm:$0xff] }
 0x10c   : > { %2634 = vmatmul.mubr.msk.f32.gmra.mrb[6].mxu1 %vm1505_vm3, %v1475_v44  ;;  %v3574_v38 = vld [vmem:[%s3040_s11 + $0x120] sm:$0xff] }
 0x10d   : > { %v1071_v52 = vpop.permute.xlu1 %1070  ;;  %v581_v45 = vpop.permute.xlu0 %580 }
 0x10e   : > { %v830_v46 = vsel %vm821_vm1, %v797_v20, %v581_v45  ;;  %v1413_v56 = vsel %vm788_vm0, %v3185_v58, %v1071_v52  ;;  %v800_v45 = vsel %vm788_vm0, %v3221_v6, %v3237_v23  ;;  %v2463_v23 = vld [vmem:[%s3040_s11 + $0x121] sm:$0xff] }
 0x10f   : > { %1092 = vrot.lane.b32.xlu1 %v2459_v51, %s2862_s30  ;;  %1346 = vrot.lane.b32.xlu0 %v2460_v21, %s2864_s13 }
 0x111   : > { %v583_v1 = vpop.permute.xlu1 %582  ;;  %v1197_v62 = vpop.permute.xlu0 %1196 }
 0x112   : > { %v831_v14 = vsel %vm821_vm1, %v798_v55, %v583_v1  ;;  %v1444_v16 = vsel %vm821_vm1, %v1412_v9, %v1197_v62  ;;  %v3589_v1 = vld [vmem:[%s2932_s29 + $0x128] sm:$0xff] }
 0x113   : > { %1094 = vrot.lane.b32.xlu1 %v2460_v21, %s2862_s30  ;;  %604 = vrot.lane.b32.xlu0 %v3513_v53, %s2863_s12 }
 0x115   : > { %v1199_v11 = vpop.permute.xlu1 %1198  ;;  %v709_v17 = vpop.permute.xlu0 %708 }
 0x116   : > { %v863_v40 = vsel %vm854_vm2, %v830_v46, %v709_v17  ;;  %v1445_v43 = vsel %vm821_vm1, %v1413_v56, %v1199_v11 }
 0x117   : > { %606 = vrot.lane.b32.xlu1 %v3522_v54, %s2863_s12  ;;  %1220 = vrot.lane.b32.xlu0 %v3525_v19, %s2863_s12 }
 0x118   : > { %2692 = vmatprep.mubr.msk.f32.mxu0 %vm1505_vm3, %v863_v40  ;;  %v3604_v40 = vld [vmem:[%s3040_s11 + $0x128] sm:$0xff] }
 0x119   : > { %v711_v13 = vpop.permute.xlu1 %710  ;;  %v1325_v34 = vpop.permute.xlu0 %1324 }
 0x11a   : > { %v864_v49 = vsel %vm854_vm2, %v831_v14, %v711_v13  ;;  %v1476_v5 = vsel %vm854_vm2, %v1444_v16, %v1325_v34  ;;  %v2400_v13 = vld [vmem:[%s2932_s29 + $0x129] sm:$0xff] }
 0x11b   : > { %1222 = vrot.lane.b32.xlu1 %v3540_v18, %s2863_s12  ;;  %732 = vrot.lane.b32.xlu0 %v3054_v26, %s2864_s13  ;;  %v2462_v26 = vld [vmem:[%s3040_s11 + $0x111] sm:$0xff] }
 0x11c   : > { %2636 = vmatprep.mubr.msk.f32.mxu1 %vm1505_vm3, %v1476_v5  ;;  %2693 = vmatmul.mubr.msk.f32.gmra.mrb[8].mxu0 %vm1505_vm3, %v864_v49 }
 0x11d   : > { %v1073_v2 = vpop.permute.xlu1 %1072  ;;  %v1327_v47 = vpop.permute.xlu0 %1326 }
 0x11e   : > { %v1477_v42 = vsel %vm854_vm2, %v1445_v43, %v1327_v47  ;;  %v1414_v3 = vsel %vm788_vm0, %v3224_v7, %v1073_v2 }
 0x11f   : > { %734 = vrot.lane.b32.xlu1 %v2398_v57, %s2864_s13  ;;  %1348 = vrot.lane.b32.xlu0 %v2461_v8, %s2864_s13 }
 0x120   : > { %2637 = vmatmul.mubr.msk.f32.gmra.mrb[8].mxu1 %vm1505_vm3, %v1477_v42 }
 0x121   : > { %v1075_v58 = vpop.permute.xlu1 %1074  ;;  %v585_v30 = vpop.permute.xlu0 %584 }
 0x122   : > { %v832_v39 = vsel %vm821_vm1, %v799_v4, %v585_v30  ;;  %v1415_v7 = vsel %vm788_vm0, %v3235_v22, %v1075_v58  ;;  %v2464_v22 = vld [vmem:[%s3040_s11 + $0x129] sm:$0xff] }
 0x123   : > { %1096 = vrot.lane.b32.xlu1 %v2461_v8, %s2862_s30  ;;  %1350 = vrot.lane.b32.xlu0 %v2462_v26, %s2864_s13  ;;  %v3622_v8 = vld [vmem:[%s2932_s29 + $0x138] sm:$0xff] }
 0x125   : > { %v587_v50 = vpop.permute.xlu1 %586  ;;  %v1201_v51 = vpop.permute.xlu0 %1200 }
 0x126   : > { %v833_v62 = vsel %vm821_vm1, %v800_v45, %v587_v50  ;;  %v1446_v20 = vsel %vm821_vm1, %v1414_v3, %v1201_v51  ;;  %v3661_v3 = vld [vmem:[%s3040_s11 + $0x140] sm:$0xff] }
 0x127   : > { %608 = vrot.lane.b32.xlu1 %v3565_v15, %s2863_s12  ;;  %482 = vrot.lane.b32.xlu0 %v2398_v57, %s2862_s30  ;;  %v801_v57 = vsel %vm788_vm0, %v3265_v33, %v3248_v28  ;;  %v3636_v33 = vld [vmem:[%s3040_s11 + $0x138] sm:$0xff] }
 0x129   : > { %v1203_v44 = vpop.permute.xlu1 %1202  ;;  %v713_v21 = vpop.permute.xlu0 %712 }
 0x12a   : > { %v865_v52 = vsel %vm854_vm2, %v832_v39, %v713_v21  ;;  %v1447_v55 = vsel %vm821_vm1, %v1415_v7, %v1203_v44  ;;  %v4088_v7 = vld [vmem:[#allocation11_spill] sm:$0xff] }
 0x12b   : > { %1224 = vrot.lane.b32.xlu1 %v3574_v38, %s2863_s12  ;;  %1098 = vrot.lane.b32.xlu0 %v2462_v26, %s2862_s30  ;;  %v802_v26 = vsel %vm788_vm0, %v3278_v37, %v3246_v27  ;;  %v3651_v37 = vld [vmem:[%s2932_s29 + $0x140] sm:$0xff] }
 0x12c   : > { %2695 = vmatprep.mubr.msk.f32.mxu0 %vm1505_vm3, %v865_v52 }
 0x12d   : > { %v715_v46 = vpop.permute.xlu1 %714  ;;  %v1329_v11 = vpop.permute.xlu0 %1328 }
 0x12e   : > { %v866_v17 = vsel %vm854_vm2, %v833_v62, %v715_v46  ;;  %v1478_v6 = vsel %vm854_vm2, %v1446_v20, %v1329_v11  ;;  %v2466_v20 = vld [vmem:[%s3040_s11 + $0x141] sm:$0xff] }
 0x12f   : > { %736 = vrot.lane.b32.xlu1 %v2399_v24, %s2864_s13  ;;  %610 = vrot.lane.b32.xlu0 %v3589_v1, %s2863_s12  ;;  %v2402_v46 = vld [vmem:[%s2932_s29 + $0x141] sm:$0xff] }
 0x130   : > { %2639 = vmatprep.mubr.msk.f32.mxu1 %vm1505_vm3, %v1478_v6  ;;  %2696 = vmatmul.mubr.msk.f32.gmra.mrb[10].mxu0 %vm1505_vm3, %v866_v17  ;;  %v4087_v6 = vld [vmem:[#allocation3_spill] sm:$0xff] }
 0x131   : > { %v1077_v9 = vpop.permute.xlu1 %1076  ;;  %v1331_v14 = vpop.permute.xlu0 %1330 }
 0x132   : > { %v1479_v16 = vsel %vm854_vm2, %v1447_v55, %v1331_v14  ;;  %v1416_v28 = vsel %vm788_vm0, %v3271_v10, %v1077_v9  ;;  %v2401_v10 = vld [vmem:[%s2932_s29 + $0x139] sm:$0xff] }
 0x133   : > { %1352 = vrot.lane.b32.xlu1 %v2463_v23, %s2864_s13  ;;  %1226 = vrot.lane.b32.xlu0 %v3604_v40, %s2863_s12 }
 0x134   : > { %2640 = vmatmul.mubr.msk.f32.gmra.mrb[10].mxu1 %vm1505_vm3, %v1479_v16 }
 0x135   : > { %v1079_v34 = vpop.permute.xlu1 %1078  ;;  %v589_v49 = vpop.permute.xlu0 %588 }
 0x136   : > { %v834_v43 = vsel %vm821_vm1, %v801_v57, %v589_v49  ;;  %v1417_v27 = vsel %vm788_vm0, %v3285_v41, %v1079_v34  ;;  %v2465_v41 = vld [vmem:[%s3040_s11 + $0x139] sm:$0xff]  ;;  %v4091_v49 = vld [vmem:[#allocation12_spill] sm:$0xff] }
 0x137   : > { %1354 = vrot.lane.b32.xlu1 %v2464_v22, %s2864_s13  ;;  %738 = vrot.lane.b32.xlu0 %v2400_v13, %s2864_s13 }
 0x139   : > { %v591_v5 = vpop.permute.xlu1 %590  ;;  %v1205_v56 = vpop.permute.xlu0 %1204 }
 0x13a   : > { %v835_v58 = vsel %vm821_vm1, %v802_v26, %v591_v5  ;;  %v1448_v30 = vsel %vm821_vm1, %v1416_v28, %v1205_v56  ;;  %v3684_v56 = vld [vmem:[%s2932_s29 + $0x150] sm:$0xff] }
 0x13b   : > { %1100 = vrot.lane.b32.xlu1 %v2463_v23, %s2862_s30  ;;  %484 = vrot.lane.b32.xlu0 %v2399_v24, %s2862_s30  ;;  %v803_v23 = vsel %vm788_vm0, %v4088_v7, %v4087_v6  ;;  %v4093_v7 = vld [vmem:[#allocation4_spill] sm:$0xff] }
 0x13d   : > { %v1207_v2 = vpop.permute.xlu1 %1206  ;;  %v717_v47 = vpop.permute.xlu0 %716 }
 0x13e   : > { %v867_v42 = vsel %vm854_vm2, %v834_v43, %v717_v47  ;;  %v1449_v44 = vsel %vm821_vm1, %v1417_v27, %v1207_v2 }
 0x13f   : > { %612 = vrot.lane.b32.xlu1 %v3622_v8, %s2863_s12  ;;  %486 = vrot.lane.b32.xlu0 %v2400_v13, %s2862_s30  ;;  %v4090_v13 = vld [vmem:[#allocation13_spill] sm:$0xff] }
 0x140   : > { %2698 = vmatprep.mubr.msk.f32.mxu0 %vm1505_vm3, %v867_v42 }
 0x141   : > { %v719_v50 = vpop.permute.xlu1 %718  ;;  %v1333_v51 = vpop.permute.xlu0 %1332 }
 0x142   : > { %v868_v4 = vsel %vm854_vm2, %v835_v58, %v719_v50  ;;  %v1480_v39 = vsel %vm854_vm2, %v1448_v30, %v1333_v51  ;;  %v3698_v58 = vld [vmem:[%s3040_s11 + $0x150] sm:$0xff] }
 0x143   : > { %1228 = vrot.lane.b32.xlu1 %v3636_v33, %s2863_s12  ;;  %1102 = vrot.lane.b32.xlu0 %v2464_v22, %s2862_s30  ;;  %v4089_v22 = vld [vmem:[#allocation2_spill] sm:$0xff] }
 0x144   : > { %2642 = vmatprep.mubr.msk.f32.mxu1 %vm1505_vm3, %v1480_v39  ;;  %2699 = vmatmul.mubr.msk.f32.gmra.mrb[12].mxu0 %vm1505_vm3, %v868_v4  ;;  %v804_v34 = vsel %vm788_vm0, %v4090_v13, %v4089_v22  ;;  %v3708_v39 = vld [vmem:[%s2932_s29 + $0x158] sm:$0xff] }
 0x145   : > { %v1081_v21 = vpop.permute.xlu1 %1080  ;;  %v1335_v52 = vpop.permute.xlu0 %1334 }
 0x146   : > { %v1481_v45 = vsel %vm854_vm2, %v1449_v44, %v1335_v52  ;;  %v1418_v5 = vsel %vm788_vm0, %v4091_v49, %v1081_v21  ;;  %v2467_v44 = vld [vmem:[%s3040_s11 + $0x151] sm:$0xff] }
 0x147   : > { %740 = vrot.lane.b32.xlu1 %v2401_v10, %s2864_s13  ;;  %614 = vrot.lane.b32.xlu0 %v3651_v37, %s2863_s12  ;;  %v3715_v21 = vld [vmem:[%s3040_s11 + $0x158] sm:$0xff] }
 0x148   : > { %2643 = vmatmul.mubr.msk.f32.gmra.mrb[12].mxu1 %vm1505_vm3, %v1481_v45 }
 0x149   : > { %v1083_v24 = vpop.permute.xlu1 %1082  ;;  %v593_v62 = vpop.permute.xlu0 %592 }
 0x14a   : > { %v836_v55 = vsel %vm821_vm1, %v803_v23, %v593_v62  ;;  %v1419_v28 = vsel %vm788_vm0, %v3332_v25, %v1083_v24  ;;  %v2403_v25 = vld [vmem:[%s2932_s29 + $0x151] sm:$0xff]  ;;  %v2468_v62 = vld [vmem:[%s3040_s11 + $0x159] sm:$0xff]  ;;  %v806_v23 = vsel %vm788_vm0, %v3370_v12, %v4093_v7  ;;  %v3746_v12 = vld [vmem:[%s2932_s29 + $0x168] sm:$0xff] }
 0x14b   : > { %1356 = vrot.lane.b32.xlu1 %v2465_v41, %s2864_s13  ;;  %1230 = vrot.lane.b32.xlu0 %v3661_v3, %s2863_s12 }
 0x14d   : > { %v595_v11 = vpop.permute.xlu1 %594  ;;  %v1209_v17 = vpop.permute.xlu0 %1208 }
 0x14e   : > { %v837_v57 = vsel %vm821_vm1, %v804_v34, %v595_v11  ;;  %v1450_v43 = vsel %vm821_vm1, %v1418_v5, %v1209_v17 }
 0x14f   : > { %1358 = vrot.lane.b32.xlu1 %v2466_v20, %s2864_s13  ;;  %742 = vrot.lane.b32.xlu0 %v2402_v46, %s2864_s13 }
 0x151   : > { %v1211_v9 = vpop.permute.xlu1 %1210  ;;  %v721_v14 = vpop.permute.xlu0 %720 }
 0x152   : > { %v869_v16 = vsel %vm854_vm2, %v836_v55, %v721_v14  ;;  %v1451_v30 = vsel %vm821_vm1, %v1419_v28, %v1211_v9 }
 0x153   : > { %1104 = vrot.lane.b32.xlu1 %v2465_v41, %s2862_s30  ;;  %488 = vrot.lane.b32.xlu0 %v2401_v10, %s2862_s30  ;;  %v4092_v41 = vld [vmem:[#allocation5_spill] sm:$0xff] }
 0x154   : > { %2701 = vmatprep.mubr.msk.f32.mxu0 %vm1505_vm3, %v869_v16  ;;  %v805_v24 = vsel %vm788_vm0, %v3357_v29, %v4092_v41  ;;  %v2470_v41 = vld [vmem:[%s3040_s11 + $0x171] sm:$0xff] }
 0x155   : > { %v723_v2 = vpop.permute.xlu1 %722  ;;  %v1337_v47 = vpop.permute.xlu0 %1336 }
 0x156   : > { %v870_v42 = vsel %vm854_vm2, %v837_v57, %v723_v2  ;;  %v1482_v26 = vsel %vm854_vm2, %v1450_v43, %v1337_v47  ;;  %v2405_v47 = vld [vmem:[%s2932_s29 + $0x169] sm:$0xff] }
 0x157   : > { %616 = vrot.lane.b32.xlu1 %v3684_v56, %s2863_s12  ;;  %490 = vrot.lane.b32.xlu0 %v2402_v46, %s2862_s30 }
 0x158   : > { %2645 = vmatprep.mubr.msk.f32.mxu1 %vm1505_vm3, %v1482_v26  ;;  %2702 = vmatmul.mubr.msk.f32.gmra.mrb[14].mxu0 %vm1505_vm3, %v870_v42  ;;  %v3762_v42 = vld [vmem:[%s2932_s29 + $0x170] sm:$0xff] }
 0x159   : > { %v1085_v50 = vpop.permute.xlu1 %1084  ;;  %v1339_v51 = vpop.permute.xlu0 %1338 }
 0x15a   : > { %v1483_v4 = vsel %vm854_vm2, %v1451_v30, %v1339_v51  ;;  %v1420_v29 = vsel %vm788_vm0, %v3366_v48, %v1085_v50  ;;  %v4094_v30 = vld [vmem:[#allocation7_spill] sm:$0xff] }
 0x15b   : > { %1232 = vrot.lane.b32.xlu1 %v3698_v58, %s2863_s12  ;;  %1106 = vrot.lane.b32.xlu0 %v2466_v20, %s2862_s30  ;;  %v2404_v20 = vld [vmem:[%s2932_s29 + $0x159] sm:$0xff]  ;;  %v807_v50 = vsel %vm788_vm0, %v3409_v61, %v4094_v30  ;;  %v2469_v51 = vld [vmem:[%s3040_s11 + $0x169] sm:$0xff] }
 0x15c   : > { %2646 = vmatmul.mubr.msk.f32.gmra.mrb[14].mxu1 %vm1505_vm3, %v1483_v4  ;;  %v3772_v4 = vld [vmem:[%s3040_s11 + $0x170] sm:$0xff]  ;;  %v2440_v30 = vld [vmem:[%s3040_s11 + $0x188] sm:$0xff] }
 0x15d   : > { %v1087_v27 = vpop.permute.xlu1 %1086  ;;  %v597_v10 = vpop.permute.xlu0 %596 }
 0x15e   : > { %v838_v46 = vsel %vm821_vm1, %v805_v24, %v597_v10  ;;  %v1421_v48 = vsel %vm788_vm0, %v3384_v36, %v1087_v27  ;;  %v3755_v36 = vld [vmem:[%s3040_s11 + $0x168] sm:$0xff]  ;;  %v2406_v24 = vld [vmem:[%s2932_s29 + $0x171] sm:$0xff] }
 0x15f   : > { %744 = vrot.lane.b32.xlu1 %v2403_v25, %s2864_s13  ;;  %618 = vrot.lane.b32.xlu0 %v3708_v39, %s2863_s12 }
 0x161   : > { %v599_v52 = vpop.permute.xlu1 %598  ;;  %v1213_v45 = vpop.permute.xlu0 %1212 }
 0x162   : > { %v839_v55 = vsel %vm821_vm1, %v806_v23, %v599_v52  ;;  %v1452_v9 = vsel %vm821_vm1, %v1420_v29, %v1213_v45  ;;  %v4095_v52 = vld [vmem:[#allocation6_spill] sm:$0xff] }
 0x163   : > { %1360 = vrot.lane.b32.xlu1 %v2467_v44, %s2864_s13  ;;  %1234 = vrot.lane.b32.xlu0 %v3715_v21, %s2863_s12  ;;  %v808_v45 = vsel %vm788_vm0, %v3422_v59, %v4095_v52  ;;  %v2408_v52 = vld [vmem:[%s2932_s29 + $0x189] sm:$0xff] }
 0x165   : > { %v1215_v11 = vpop.permute.xlu1 %1214  ;;  %v725_v17 = vpop.permute.xlu0 %724 }
 0x166   : > { %v871_v6 = vsel %vm854_vm2, %v838_v46, %v725_v17  ;;  %v1453_v34 = vsel %vm821_vm1, %v1421_v48, %v1215_v11 }
 0x167   : > { %1362 = vrot.lane.b32.xlu1 %v2468_v62, %s2864_s13  ;;  %746 = vrot.lane.b32.xlu0 %v2404_v20, %s2864_s13 }
 0x168   : > { %2704 = vmatprep.mubr.msk.f32.mxu0 %vm1505_vm3, %v871_v6 }
 0x169   : > { %v727_v14 = vpop.permute.xlu1 %726  ;;  %v1341_v16 = vpop.permute.xlu0 %1340 }
 0x16a   : > { %v872_v22 = vsel %vm854_vm2, %v839_v55, %v727_v14  ;;  %v1484_v13 = vsel %vm854_vm2, %v1452_v9, %v1341_v16  ;;  %v2375_v55 = vld [vmem:[%s2932_s29 + $0x180] sm:$0xff] }
 0x16b   : > { %1108 = vrot.lane.b32.xlu1 %v2467_v44, %s2862_s30  ;;  %492 = vrot.lane.b32.xlu0 %v2403_v25, %s2862_s30  ;;  %v2439_v14 = vld [vmem:[%s3040_s11 + $0x180] sm:$0xff] }
 0x16c   : > { %2648 = vmatprep.mubr.msk.f32.mxu1 %vm1505_vm3, %v1484_v13  ;;  %2705 = vmatmul.mubr.msk.f32.gmra.mrb[16].mxu0 %vm1505_vm3, %v872_v22  ;;  %v4096_v13 = vld [vmem:[#allocation9_spill] sm:$0xff] }
 0x16d   : > { %v1089_v49 = vpop.permute.xlu1 %1088  ;;  %v1343_v5 = vpop.permute.xlu0 %1342  ;;  %v809_v48 = vsel %vm788_vm0, %v3461_v31, %v4096_v13 }
 0x16e   : > { %v1485_v57 = vsel %vm854_vm2, %v1453_v34, %v1343_v5  ;;  %v1422_v61 = vsel %vm788_vm0, %v3418_v60, %v1089_v49  ;;  %v2407_v34 = vld [vmem:[%s2932_s29 + $0x181] sm:$0xff] }
 0x16f   : > { %620 = vrot.lane.b32.xlu1 %v3746_v12, %s2863_s12  ;;  %494 = vrot.lane.b32.xlu0 %v2404_v20, %s2862_s30  ;;  %v2376_v49 = vld [vmem:[%s2932_s29 + $0x188] sm:$0xff] }
 0x170   : > { %2649 = vmatmul.mubr.msk.f32.gmra.mrb[16].mxu1 %vm1505_vm3, %v1485_v57 }
 0x171   : > { %v1091_v43 = vpop.permute.xlu1 %1090  ;;  %v601_v2 = vpop.permute.xlu0 %600 }
 0x172   : > { %v840_v25 = vsel %vm821_vm1, %v807_v50, %v601_v2  ;;  %v1423_v60 = vsel %vm788_vm0, %v3436_v35, %v1091_v43 }
 0x173   : > { %1236 = vrot.lane.b32.xlu1 %v3755_v36, %s2863_s12  ;;  %1110 = vrot.lane.b32.xlu0 %v2468_v62, %s2862_s30 }
 0x175   : > { %v603_v26 = vpop.permute.xlu1 %602  ;;  %v1217_v28 = vpop.permute.xlu0 %1216 }
 0x176   : > { %v841_v62 = vsel %vm821_vm1, %v808_v45, %v603_v26  ;;  %v1454_v20 = vsel %vm821_vm1, %v1422_v61, %v1217_v28  ;;  %v2471_v28 = vld [vmem:[%s3040_s11 + $0x181] sm:$0xff] }
 0x177   : > { %748 = vrot.lane.b32.xlu1 %v2405_v47, %s2864_s13  ;;  %622 = vrot.lane.b32.xlu0 %v3762_v42, %s2863_s12 }
 0x179   : > { %v1219_v27 = vpop.permute.xlu1 %1218  ;;  %v729_v10 = vpop.permute.xlu0 %728 }
 0x17a   : > { %v873_v44 = vsel %vm854_vm2, %v840_v25, %v729_v10  ;;  %v1455_v59 = vsel %vm821_vm1, %v1423_v60, %v1219_v27 }
 0x17b   : > { %1364 = vrot.lane.b32.xlu1 %v2469_v51, %s2864_s13  ;;  %1238 = vrot.lane.b32.xlu0 %v3772_v4, %s2863_s12 }
 0x17c   : > { %2707 = vmatprep.mubr.msk.f32.mxu0 %vm1505_vm3, %v873_v44  ;;  %v2472_v44 = vld [vmem:[%s3040_s11 + $0x189] sm:$0xff] }
 0x17d   : > { %v731_v46 = vpop.permute.xlu1 %730  ;;  %v1345_v11 = vpop.permute.xlu0 %1344 }
 0x17e   : > { %v874_v17 = vsel %vm854_vm2, %v841_v62, %v731_v46  ;;  %v1486_v6 = vsel %vm854_vm2, %v1454_v20, %v1345_v11 }
 0x17f   : > { %1366 = vrot.lane.b32.xlu1 %v2470_v41, %s2864_s13  ;;  %750 = vrot.lane.b32.xlu0 %v2406_v24, %s2864_s13 }
 0x180   : > { %2651 = vmatprep.mubr.msk.f32.mxu1 %vm1505_vm3, %v1486_v6  ;;  %2708 = vmatmul.mubr.msk.f32.gmra.mrb[18].mxu0 %vm1505_vm3, %v874_v17  ;;  %v4098_v17 = vld [vmem:[#allocation10_spill] sm:$0xff] }
 0x181   : > { %v1093_v7 = vpop.permute.xlu1 %1092  ;;  %v1347_v23 = vpop.permute.xlu0 %1346  ;;  %v811_v6 = vsel %vm788_vm0, %v3513_v53, %v4098_v17 }
 0x182   : > { %v1487_v29 = vsel %vm854_vm2, %v1455_v59, %v1347_v23  ;;  %v1424_v31 = vsel %vm788_vm0, %v3470_v0, %v1093_v7 }
 0x183   : > { %1112 = vrot.lane.b32.xlu1 %v2469_v51, %s2862_s30  ;;  %496 = vrot.lane.b32.xlu0 %v2405_v47, %s2862_s30  ;;  %v4097_v47 = vld [vmem:[#allocation8_spill] sm:$0xff] }
 0x184   : > { %2652 = vmatmul.mubr.msk.f32.gmra.mrb[18].mxu1 %vm1505_vm3, %v1487_v29  ;;  %v810_v26 = vsel %vm788_vm0, %v3474_v32, %v4097_v47 }
 0x185   : > { %v1095_v35 = vpop.permute.xlu1 %1094  ;;  %v605_v9 = vpop.permute.xlu0 %604 }
 0x186   : > { %v842_v5 = vsel %vm821_vm1, %v809_v48, %v605_v9  ;;  %v1425_v0 = vsel %vm788_vm0, %v3488_v63, %v1095_v35  ;;  %v3853_v35 = vld [vmem:[%s4070_s3] ss:$0 sm:$0xff] }
 0x187   : > { %624 = vrot.lane.b32.xlu1 %v2375_v55, %s2863_s12  ;;  %498 = vrot.lane.b32.xlu0 %v2406_v24, %s2862_s30 }
 0x189   : > { %v607_v16 = vpop.permute.xlu1 %606  ;;  %v1221_v22 = vpop.permute.xlu0 %1220 }
 0x18a   : > { %v843_v50 = vsel %vm821_vm1, %v810_v26, %v607_v16  ;;  %v1456_v51 = vsel %vm821_vm1, %v1424_v31, %v1221_v22 }
 0x18b   : > { %1240 = vrot.lane.b32.xlu1 %v2439_v14, %s2863_s12  ;;  %1114 = vrot.lane.b32.xlu0 %v2470_v41, %s2862_s30  ;;  %s2342_s30 = sshll.u32 %s4114_s15, 5 }
 0x18c   : > { %s272_s29 = sadd.s32 %s2343_s14, %s2342_s30 }
 0x18d   : > { %v1223_v57 = vpop.permute.xlu1 %1222  ;;  %v733_v43 = vpop.permute.xlu0 %732  ;;  %s2344_s11 = sshll.u32 %s272_s29, 3 }
 0x18e   : > { %v875_v2 = vsel %vm854_vm2, %v842_v5, %v733_v43  ;;  %v1457_v45 = vsel %vm821_vm1, %v1425_v0, %v1223_v57  ;;  %s3862_s24 = scalar_lea.vmem %s4071_s4, %s2344_s11 }
 0x18f   : > { %752 = vrot.lane.b32.xlu1 %v2407_v34, %s2864_s13  ;;  %626 = vrot.lane.b32.xlu0 %v2376_v49, %s2863_s12 }
 0x190   : > { %2710 = vmatprep.mubr.msk.f32.mxu0 %vm1505_vm3, %v875_v2 }
 0x191   : > { %v735_v25 = vpop.permute.xlu1 %734  ;;  %v1349_v27 = vpop.permute.xlu0 %1348 }
 0x192   : > { %v876_v10 = vsel %vm854_vm2, %v843_v50, %v735_v25  ;;  %v1488_v32 = vsel %vm854_vm2, %v1456_v51, %v1349_v27 }
 0x193   : > { %1368 = vrot.lane.b32.xlu1 %v2471_v28, %s2864_s13  ;;  %1242 = vrot.lane.b32.xlu0 %v2440_v30, %s2863_s12 }
 0x194   : > { %2654 = vmatprep.mubr.msk.f32.mxu1 %vm1505_vm3, %v1488_v32  ;;  %2711 = vmatmul.mubr.msk.f32.gmra.mrb[20].mxu0 %vm1505_vm3, %v876_v10 }
 0x195   : > { %v1097_v61 = vpop.permute.xlu1 %1096  ;;  %v1351_v41 = vpop.permute.xlu0 %1350 }
 0x196   : > { %v1489_v24 = vsel %vm854_vm2, %v1457_v45, %v1351_v41  ;;  %v1426_v9 = vsel %vm788_vm0, %v3525_v19, %v1097_v61 }
 0x197   : > { %1370 = vrot.lane.b32.xlu1 %v2472_v44, %s2864_s13  ;;  %754 = vrot.lane.b32.xlu0 %v2408_v52, %s2864_s13 }
 0x198   : > { %2655 = vmatmul.mubr.msk.f32.gmra.mrb[20].mxu1 %vm1505_vm3, %v1489_v24 }
 0x199   : > { %v609_v63 = vpop.permute.xlu1 %608  ;;  %v483_v62 = vpop.permute.xlu0 %482 }
 0x19a   : > { %v844_v59 = vsel %vm821_vm1, %v811_v6, %v609_v63  ;;  %v812_v5 = vsel %vm788_vm0, %v3522_v54, %v483_v62 }
 0x19d   : > { %v1225_v20 = vpop.permute.xlu1 %1224  ;;  %v1099_v46 = vpop.permute.xlu0 %1098 }
 0x19e   : > { %v1458_v16 = vsel %vm821_vm1, %v1426_v9, %v1225_v20  ;;  %v1427_v57 = vsel %vm788_vm0, %v3540_v18, %v1099_v46 }
 0x19f   : > { %v2682_v11 = vpop.f32.mrb[0].mxu0 }
 0x1a0   : > { %v1989_v60 = vpop.f32.mrb[1].mxu0 }
 0x1a1   : > { %v737_v7 = vpop.permute.xlu1 %736  ;;  %v611_v23 = vpop.permute.xlu0 %610 }
 0x1a2   : > { %v877_v29 = vsel %vm854_vm2, %v844_v59, %v737_v7  ;;  %v845_v43 = vsel %vm821_vm1, %v812_v5, %v611_v23 }
 0x1a3   : > { %v2626_v55 = vpop.f32.mrb[0].mxu1  ;;  %2713 = vmatprep.mubr.msk.f32.mxu0 %vm1505_vm3, %v877_v29 }
 0x1a4   : > { %v1995_v53 = vadd.f32 %v2682_v11, %v2626_v55  ;;  %v1668_v14 = vpop.f32.mrb[1].mxu1 }
 0x1a5   : > { %v1990_v22 = vadd.f32 %v1989_v60, %v1668_v14  ;;  %v1353_v13 = vpop.permute.xlu1 %1352  ;;  %v1227_v48 = vpop.permute.xlu0 %1226 }
 0x1a6   : > { %v2156_v34 = vadd.f32 %v3853_v35, %v1995_v53  ;;  %v1490_v49 = vsel %vm854_vm2, %v1458_v16, %v1353_v13  ;;  %v1459_v2 = vsel %vm821_vm1, %v1427_v57, %v1227_v48 }
 0x1a7   : > { %v2155_v19 = vadd.f32 %v3853_v35, %v1990_v22  ;;  %2657 = vmatprep.mubr.msk.f32.mxu1 %vm1505_vm3, %v1490_v49 }
 0x1a8   : > { %2188 = vst.msk [vmem:[%s3862_s24 + $0x8] sm:$0xff] %vm1505_vm3, %v2156_v34 }
 0x1a9   : > { %2187 = vst.msk [vmem:[%s3862_s24] sm:$0xff] %vm1505_vm3, %v2155_v19  ;;  %v1355_v47 = vpop.permute.xlu1 %1354  ;;  %v739_v26 = vpop.permute.xlu0 %738 }
 0x1aa   : > { %v1491_v31 = vsel %vm854_vm2, %v1459_v2, %v1355_v47  ;;  %v878_v28 = vsel %vm854_vm2, %v845_v43, %v739_v26 }
 0x1ab   : > { %2658 = vmatmul.mubr.msk.f32.gmra.mrb[22].mxu1 %vm1505_vm3, %v1491_v31  ;;  %2714 = vmatmul.mubr.msk.f32.gmra.mrb[22].mxu0 %vm1505_vm3, %v878_v28 }
 0x1ad   : > { %v1101_v54 = vpop.permute.xlu1 %1100  ;;  %v485_v18 = vpop.permute.xlu0 %484 }
 0x1ae   : > { %v813_v0 = vsel %vm788_vm0, %v3565_v15, %v485_v18  ;;  %v1428_v46 = vsel %vm788_vm0, %v3574_v38, %v1101_v54 }
 0x1b1   : > { %v613_v30 = vpop.permute.xlu1 %612  ;;  %v487_v50 = vpop.permute.xlu0 %486 }
 0x1b2   : > { %v846_v45 = vsel %vm821_vm1, %v813_v0, %v613_v30  ;;  %v814_v60 = vsel %vm788_vm0, %v3589_v1, %v487_v50 }
 0x1b3   : > { %v2685_v51 = vpop.f32.mrb[2].mxu0 }
 0x1b4   : > { %v1999_v25 = vpop.f32.mrb[3].mxu0 }
 0x1b5   : > { %v1229_v27 = vpop.permute.xlu1 %1228  ;;  %v1103_v10 = vpop.permute.xlu0 %1102 }
 0x1b6   : > { %v1460_v15 = vsel %vm821_vm1, %v1428_v46, %v1229_v27  ;;  %v1429_v59 = vsel %vm788_vm0, %v3604_v40, %v1103_v10 }
 0x1b7   : > { %v2629_v32 = vpop.f32.mrb[2].mxu1 }
 0x1b8   : > { %v2005_v44 = vadd.f32 %v2685_v51, %v2629_v32  ;;  %v1678_v52 = vpop.f32.mrb[3].mxu1 }
 0x1b9   : > { %v2000_v61 = vadd.f32 %v1999_v25, %v1678_v52  ;;  %v741_v41 = vpop.permute.xlu1 %740  ;;  %v615_v24 = vpop.permute.xlu0 %614 }
 0x1ba   : > { %v2158_v63 = vadd.f32 %v3853_v35, %v2005_v44  ;;  %v879_v62 = vsel %vm854_vm2, %v846_v45, %v741_v41  ;;  %v847_v38 = vsel %vm821_vm1, %v814_v60, %v615_v24 }
 0x1bb   : > { %v2157_v20 = vadd.f32 %v3853_v35, %v2000_v61  ;;  %2716 = vmatprep.mubr.msk.f32.mxu0 %vm1505_vm3, %v879_v62 }
 0x1bc   : > { %2190 = vst.msk [vmem:[%s3862_s24 + $0x18] sm:$0xff] %vm1505_vm3, %v2158_v63 }
 0x1bd   : > { %2189 = vst.msk [vmem:[%s3862_s24 + $0x10] sm:$0xff] %vm1505_vm3, %v2157_v20  ;;  %v1357_v11 = vpop.permute.xlu1 %1356  ;;  %v1231_v17 = vpop.permute.xlu0 %1230 }
 0x1be   : > { %v1492_v6 = vsel %vm854_vm2, %v1460_v15, %v1357_v11  ;;  %v1461_v7 = vsel %vm821_vm1, %v1429_v59, %v1231_v17 }
 0x1bf   : > { %2660 = vmatprep.mubr.msk.f32.mxu1 %vm1505_vm3, %v1492_v6 }
 0x1c1   : > { %v1359_v23 = vpop.permute.xlu1 %1358  ;;  %v743_v29 = vpop.permute.xlu0 %742 }
 0x1c2   : > { %v1493_v55 = vsel %vm854_vm2, %v1461_v7, %v1359_v23  ;;  %v880_v9 = vsel %vm854_vm2, %v847_v38, %v743_v29 }
 0x1c3   : > { %2661 = vmatmul.mubr.msk.f32.gmra.mrb[24].mxu1 %vm1505_vm3, %v1493_v55  ;;  %2717 = vmatmul.mubr.msk.f32.gmra.mrb[24].mxu0 %vm1505_vm3, %v880_v9 }
 0x1c5   : > { %v1105_v53 = vpop.permute.xlu1 %1104  ;;  %v489_v1 = vpop.permute.xlu0 %488 }
 0x1c6   : > { %v815_v2 = vsel %vm788_vm0, %v3622_v8, %v489_v1  ;;  %v1430_v54 = vsel %vm788_vm0, %v3636_v33, %v1105_v53 }
 0x1c7   : > { %v2688_v14 = vpop.f32.mrb[4].mxu0 }
 0x1c8   : > { %v2009_v40 = vpop.f32.mrb[5].mxu0 }
 0x1c9   : > { %v617_v16 = vpop.permute.xlu1 %616  ;;  %v491_v22 = vpop.permute.xlu0 %490 }
 0x1ca   : > { %v848_v47 = vsel %vm821_vm1, %v815_v2, %v617_v16  ;;  %v816_v51 = vsel %vm788_vm0, %v3651_v37, %v491_v22 }
 0x1cb   : > { %v2632_v13 = vpop.f32.mrb[4].mxu1 }
 0x1cc   : > { %v2015_v48 = vadd.f32 %v2688_v14, %v2632_v13  ;;  %v1688_v34 = vpop.f32.mrb[5].mxu1 }
 0x1cd   : > { %v2010_v49 = vadd.f32 %v2009_v40, %v1688_v34  ;;  %v1233_v19 = vpop.permute.xlu1 %1232  ;;  %v1107_v5 = vpop.permute.xlu0 %1106 }
 0x1ce   : > { %v2160_v57 = vadd.f32 %v3853_v35, %v2015_v48  ;;  %v1462_v18 = vsel %vm821_vm1, %v1430_v54, %v1233_v19  ;;  %v1431_v25 = vsel %vm788_vm0, %v3661_v3, %v1107_v5 }
 0x1cf   : > { %v2159_v43 = vadd.f32 %v3853_v35, %v2010_v49 }
 0x1d0   : > { %2192 = vst.msk [vmem:[%s3862_s24 + $0x28] sm:$0xff] %vm1505_vm3, %v2160_v57 }
 0x1d1   : > { %2191 = vst.msk [vmem:[%s3862_s24 + $0x20] sm:$0xff] %vm1505_vm3, %v2159_v43  ;;  %v745_v26 = vpop.permute.xlu1 %744  ;;  %v619_v31 = vpop.permute.xlu0 %618 }
 0x1d2   : > { %v881_v28 = vsel %vm854_vm2, %v848_v47, %v745_v26  ;;  %v849_v27 = vsel %vm821_vm1, %v816_v51, %v619_v31 }
 0x1d3   : > { %2719 = vmatprep.mubr.msk.f32.mxu0 %vm1505_vm3, %v881_v28 }
 0x1d5   : > { %v1361_v30 = vpop.permute.xlu1 %1360  ;;  %v1235_v50 = vpop.permute.xlu0 %1234 }
 0x1d6   : > { %v1494_v8 = vsel %vm854_vm2, %v1462_v18, %v1361_v30  ;;  %v1463_v10 = vsel %vm821_vm1, %v1431_v25, %v1235_v50 }
 0x1d7   : > { %2663 = vmatprep.mubr.msk.f32.mxu1 %vm1505_vm3, %v1494_v8 }
 0x1d9   : > { %v1363_v32 = vpop.permute.xlu1 %1362  ;;  %v747_v33 = vpop.permute.xlu0 %746 }
 0x1da   : > { %v1495_v0 = vsel %vm854_vm2, %v1463_v10, %v1363_v32  ;;  %v882_v44 = vsel %vm854_vm2, %v849_v27, %v747_v33 }
 0x1db   : > { %v2691_v52 = vpop.f32.mrb[6].mxu0  ;;  %2664 = vmatmul.mubr.msk.f32.gmra.mrb[26].mxu1 %vm1505_vm3, %v1495_v0  ;;  %2720 = vmatmul.mubr.msk.f32.gmra.mrb[26].mxu0 %vm1505_vm3, %v882_v44 }
 0x1dc   : > { %v2019_v37 = vpop.f32.mrb[7].mxu0 }
 0x1dd   : > { %v1109_v45 = vpop.permute.xlu1 %1108  ;;  %v493_v3 = vpop.permute.xlu0 %492 }
 0x1de   : > { %v817_v6 = vsel %vm788_vm0, %v3684_v56, %v493_v3  ;;  %v1432_v23 = vsel %vm788_vm0, %v3698_v58, %v1109_v45 }
 0x1df   : > { %v2635_v61 = vpop.f32.mrb[6].mxu1 }
 0x1e0   : > { %v2025_v41 = vadd.f32 %v2691_v52, %v2635_v61  ;;  %v1698_v24 = vpop.f32.mrb[7].mxu1 }
 0x1e1   : > { %v2020_v63 = vadd.f32 %v2019_v37, %v1698_v24  ;;  %v621_v62 = vpop.permute.xlu1 %620  ;;  %v495_v20 = vpop.permute.xlu0 %494 }
 0x1e2   : > { %v2162_v46 = vadd.f32 %v3853_v35, %v2025_v41  ;;  %v850_v60 = vsel %vm821_vm1, %v817_v6, %v621_v62  ;;  %v818_v56 = vsel %vm788_vm0, %v3708_v39, %v495_v20 }
 0x1e3   : > { %v2161_v15 = vadd.f32 %v3853_v35, %v2020_v63 }
 0x1e4   : > { %2194 = vst.msk [vmem:[%s3862_s24 + $0x38] sm:$0xff] %vm1505_vm3, %v2162_v46 }
 0x1e5   : > { %2193 = vst.msk [vmem:[%s3862_s24 + $0x30] sm:$0xff] %vm1505_vm3, %v2161_v15  ;;  %v1237_v11 = vpop.permute.xlu1 %1236  ;;  %v1111_v17 = vpop.permute.xlu0 %1110 }
 0x1e6   : > { %v1464_v29 = vsel %vm821_vm1, %v1432_v23, %v1237_v11  ;;  %v1433_v14 = vsel %vm788_vm0, %v3715_v21, %v1111_v17 }
 0x1e9   : > { %v749_v59 = vpop.permute.xlu1 %748  ;;  %v623_v38 = vpop.permute.xlu0 %622 }
 0x1ea   : > { %v883_v7 = vsel %vm854_vm2, %v850_v60, %v749_v59  ;;  %v851_v16 = vsel %vm821_vm1, %v818_v56, %v623_v38 }
 0x1eb   : > { %2722 = vmatprep.mubr.msk.f32.mxu0 %vm1505_vm3, %v883_v7 }
 0x1ed   : > { %v1365_v55 = vpop.permute.xlu1 %1364  ;;  %v1239_v9 = vpop.permute.xlu0 %1238 }
 0x1ee   : > { %v1496_v53 = vsel %vm854_vm2, %v1464_v29, %v1365_v55  ;;  %v1465_v58 = vsel %vm821_vm1, %v1433_v14, %v1239_v9 }
 0x1ef   : > { %v2694_v1 = vpop.f32.mrb[8].mxu0  ;;  %2666 = vmatprep.mubr.msk.f32.mxu1 %vm1505_vm3, %v1496_v53 }
 0x1f0   : > { %v2029_v40 = vpop.f32.mrb[9].mxu0 }
 0x1f1   : > { %v1367_v22 = vpop.permute.xlu1 %1366  ;;  %v751_v13 = vpop.permute.xlu0 %750 }
 0x1f2   : > { %v1497_v48 = vsel %vm854_vm2, %v1465_v58, %v1367_v22  ;;  %v884_v34 = vsel %vm854_vm2, %v851_v16, %v751_v13 }
 0x1f3   : > { %v2638_v49 = vpop.f32.mrb[8].mxu1  ;;  %2667 = vmatmul.mubr.msk.f32.gmra.mrb[28].mxu1 %vm1505_vm3, %v1497_v48  ;;  %2723 = vmatmul.mubr.msk.f32.gmra.mrb[28].mxu0 %vm1505_vm3, %v884_v34 }
 0x1f4   : > { %v2035_v39 = vadd.f32 %v2694_v1, %v2638_v49  ;;  %v1708_v21 = vpop.f32.mrb[9].mxu1 }
 0x1f5   : > { %v2030_v19 = vadd.f32 %v2029_v40, %v1708_v21  ;;  %v1113_v5 = vpop.permute.xlu1 %1112  ;;  %v497_v57 = vpop.permute.xlu0 %496 }
 0x1f6   : > { %v2164_v43 = vadd.f32 %v3853_v35, %v2035_v39  ;;  %v819_v54 = vsel %vm788_vm0, %v3746_v12, %v497_v57  ;;  %v1434_v25 = vsel %vm788_vm0, %v3755_v36, %v1113_v5 }
 0x1f7   : > { %v2163_v2 = vadd.f32 %v3853_v35, %v2030_v19 }
 0x1f8   : > { %2196 = vst.msk [vmem:[%s3862_s24 + $0x48] sm:$0xff] %vm1505_vm3, %v2164_v43 }
 0x1f9   : > { %2195 = vst.msk [vmem:[%s3862_s24 + $0x40] sm:$0xff] %vm1505_vm3, %v2163_v2  ;;  %v625_v47 = vpop.permute.xlu1 %624  ;;  %v499_v26 = vpop.permute.xlu0 %498 }
 0x1fa   : > { %v852_v18 = vsel %vm821_vm1, %v819_v54, %v625_v47  ;;  %v820_v44 = vsel %vm788_vm0, %v3762_v42, %v499_v26 }
 0x1fd   : > { %v1241_v31 = vpop.permute.xlu1 %1240  ;;  %v1115_v28 = vpop.permute.xlu0 %1114 }
 0x1fe   : > { %v1466_v10 = vsel %vm821_vm1, %v1434_v25, %v1241_v31  ;;  %v1435_v52 = vsel %vm788_vm0, %v3772_v4, %v1115_v28 }
 0x201   : > { %v753_v30 = vpop.permute.xlu1 %752  ;;  %v627_v50 = vpop.permute.xlu0 %626 }
 0x202   : > { %v885_v8 = vsel %vm854_vm2, %v852_v18, %v753_v30  ;;  %v853_v45 = vsel %vm821_vm1, %v820_v44, %v627_v50 }
 0x203   : > { %v2697_v51 = vpop.f32.mrb[10].mxu0  ;;  %2725 = vmatprep.mubr.msk.f32.mxu0 %vm1505_vm3, %v885_v8 }
 0x204   : > { %v2039_v27 = vpop.f32.mrb[11].mxu0 }
 0x205   : > { %v1369_v32 = vpop.permute.xlu1 %1368  ;;  %v1243_v33 = vpop.permute.xlu0 %1242 }
 0x206   : > { %v1498_v0 = vsel %vm854_vm2, %v1466_v10, %v1369_v32  ;;  %v1467_v3 = vsel %vm821_vm1, %v1435_v52, %v1243_v33 }
 0x207   : > { %v2641_v12 = vpop.f32.mrb[10].mxu1  ;;  %2669 = vmatprep.mubr.msk.f32.mxu1 %vm1505_vm3, %v1498_v0 }
 0x208   : > { %v2045_v37 = vadd.f32 %v2697_v51, %v2641_v12  ;;  %v1718_v36 = vpop.f32.mrb[11].mxu1 }
 0x209   : > { %v2040_v61 = vadd.f32 %v2039_v27, %v1718_v36  ;;  %v1371_v41 = vpop.permute.xlu1 %1370  ;;  %v755_v24 = vpop.permute.xlu0 %754 }
 0x20a   : > { %v2166_v63 = vadd.f32 %v3853_v35, %v2045_v37  ;;  %v1499_v62 = vsel %vm854_vm2, %v1467_v3, %v1371_v41  ;;  %v886_v42 = vsel %vm854_vm2, %v853_v45, %v755_v24 }
 0x20b   : > { %v2165_v20 = vadd.f32 %v3853_v35, %v2040_v61  ;;  %2670 = vmatmul.mubr.msk.f32.gmra.mrb[30].mxu1 %vm1505_vm3, %v1499_v62  ;;  %2726 = vmatmul.mubr.msk.f32.gmra.mrb[30].mxu0 %vm1505_vm3, %v886_v42 }
 0x20c   : > { %2198 = vst.msk [vmem:[%s3862_s24 + $0x58] sm:$0xff] %vm1505_vm3, %v2166_v63 }
 0x20d   : > { %2197 = vst.msk [vmem:[%s3862_s24 + $0x50] sm:$0xff] %vm1505_vm3, %v2165_v20 }
 0x217   : > { %v2700_v4 = vpop.f32.mrb[12].mxu0 }
 0x218   : > { %v2049_v46 = vpop.f32.mrb[13].mxu0 }
 0x21b   : > { %v2644_v15 = vpop.f32.mrb[12].mxu1 }
 0x21c   : > { %v2055_v11 = vadd.f32 %v2700_v4, %v2644_v15  ;;  %v1728_v17 = vpop.f32.mrb[13].mxu1 }
 0x21d   : > { %v2050_v6 = vadd.f32 %v2049_v46, %v1728_v17 }
 0x21e   : > { %v2168_v60 = vadd.f32 %v3853_v35, %v2055_v11 }
 0x21f   : > { %v2167_v59 = vadd.f32 %v3853_v35, %v2050_v6 }
 0x220   : > { %2200 = vst.msk [vmem:[%s3862_s24 + $0x68] sm:$0xff] %vm1505_vm3, %v2168_v60 }
 0x221   : > { %2199 = vst.msk [vmem:[%s3862_s24 + $0x60] sm:$0xff] %vm1505_vm3, %v2167_v59 }
 0x22b   : > { %v2703_v38 = vpop.f32.mrb[14].mxu0 }
 0x22c   : > { %v2059_v7 = vpop.f32.mrb[15].mxu0 }
 0x22f   : > { %v2647_v23 = vpop.f32.mrb[14].mxu1 }
 0x230   : > { %v2065_v29 = vadd.f32 %v2703_v38, %v2647_v23  ;;  %v1738_v55 = vpop.f32.mrb[15].mxu1 }
 0x231   : > { %v2060_v9 = vadd.f32 %v2059_v7, %v1738_v55 }
 0x232   : > { %v2170_v53 = vadd.f32 %v3853_v35, %v2065_v29 }
 0x233   : > { %v2169_v1 = vadd.f32 %v3853_v35, %v2060_v9 }
 0x234   : > { %2202 = vst.msk [vmem:[%s3862_s24 + $0x78] sm:$0xff] %vm1505_vm3, %v2170_v53 }
 0x235   : > { %2201 = vst.msk [vmem:[%s3862_s24 + $0x70] sm:$0xff] %vm1505_vm3, %v2169_v1 }
 0x23f   : > { %v2706_v56 = vpop.f32.mrb[16].mxu0 }
 0x240   : > { %v2069_v14 = vpop.f32.mrb[17].mxu0 }
 0x243   : > { %v2650_v40 = vpop.f32.mrb[16].mxu1 }
 0x244   : > { %v2075_v16 = vadd.f32 %v2706_v56, %v2650_v40  ;;  %v1748_v58 = vpop.f32.mrb[17].mxu1 }
 0x245   : > { %v2070_v22 = vadd.f32 %v2069_v14, %v1748_v58 }
 0x246   : > { %v2172_v13 = vadd.f32 %v3853_v35, %v2075_v16 }
 0x247   : > { %v2171_v48 = vadd.f32 %v3853_v35, %v2070_v22 }
 0x248   : > { %2204 = vst.msk [vmem:[%s3862_s24 + $0x88] sm:$0xff] %vm1505_vm3, %v2172_v13 }
 0x249   : > { %2203 = vst.msk [vmem:[%s3862_s24 + $0x80] sm:$0xff] %vm1505_vm3, %v2171_v48 }
 0x253   : > { %v2709_v34 = vpop.f32.mrb[18].mxu0 }
 0x254   : > { %v2079_v49 = vpop.f32.mrb[19].mxu0 }
 0x257   : > { %v2653_v39 = vpop.f32.mrb[18].mxu1 }
 0x258   : > { %v2085_v21 = vadd.f32 %v2709_v34, %v2653_v39  ;;  %v1758_v19 = vpop.f32.mrb[19].mxu1 }
 0x259   : > { %v2080_v5 = vadd.f32 %v2079_v49, %v1758_v19 }
 0x25a   : > { %v2174_v57 = vadd.f32 %v3853_v35, %v2085_v21 }
 0x25b   : > { %v2173_v43 = vadd.f32 %v3853_v35, %v2080_v5 }
 0x25c   : > { %2206 = vst.msk [vmem:[%s3862_s24 + $0x98] sm:$0xff] %vm1505_vm3, %v2174_v57 }
 0x25d   : > { %2205 = vst.msk [vmem:[%s3862_s24 + $0x90] sm:$0xff] %vm1505_vm3, %v2173_v43 }
 0x267   : > { %v2712_v2 = vpop.f32.mrb[20].mxu0 }
 0x268   : > { %v2089_v47 = vpop.f32.mrb[21].mxu0 }
 0x26b   : > { %v2656_v26 = vpop.f32.mrb[20].mxu1 }
 0x26c   : > { %v2095_v31 = vadd.f32 %v2712_v2, %v2656_v26  ;;  %v1768_v28 = vpop.f32.mrb[21].mxu1 }
 0x26d   : > { %v2090_v54 = vadd.f32 %v2089_v47, %v1768_v28 }
 0x26e   : > { %v2176_v18 = vadd.f32 %v3853_v35, %v2095_v31 }
 0x26f   : > { %v2175_v30 = vadd.f32 %v3853_v35, %v2090_v54 }
 0x270   : > { %2208 = vst.msk [vmem:[%s3862_s24 + $0xa8] sm:$0xff] %vm1505_vm3, %v2176_v18 }
 0x271   : > { %2207 = vst.msk [vmem:[%s3862_s24 + $0xa0] sm:$0xff] %vm1505_vm3, %v2175_v30 }
 0x27e   : > { %v2659_v50 = vpop.f32.mrb[22].mxu1  ;;  %v2715_v8 = vpop.f32.mrb[22].mxu0 }
 0x27f   : > { %v2105_v51 = vadd.f32 %v2715_v8, %v2659_v50  ;;  %v1778_v25 = vpop.f32.mrb[23].mxu1  ;;  %v2099_v27 = vpop.f32.mrb[23].mxu0 }
 0x280   : > { %v2100_v10 = vadd.f32 %v2099_v27, %v1778_v25 }
 0x281   : > { %v2178_v32 = vadd.f32 %v3853_v35, %v2105_v51 }
 0x282   : > { %v2177_v33 = vadd.f32 %v3853_v35, %v2100_v10 }
 0x283   : > { %2210 = vst.msk [vmem:[%s3862_s24 + $0xb8] sm:$0xff] %vm1505_vm3, %v2178_v32 }
 0x284   : > { %2209 = vst.msk [vmem:[%s3862_s24 + $0xb0] sm:$0xff] %vm1505_vm3, %v2177_v33 }
 0x296   : > { %v2662_v0 = vpop.f32.mrb[24].mxu1  ;;  %v2718_v12 = vpop.f32.mrb[24].mxu0 }
 0x297   : > { %v2115_v44 = vadd.f32 %v2718_v12, %v2662_v0  ;;  %v1788_v52 = vpop.f32.mrb[25].mxu1  ;;  %v2109_v37 = vpop.f32.mrb[25].mxu0 }
 0x298   : > { %v2110_v36 = vadd.f32 %v2109_v37, %v1788_v52 }
 0x299   : > { %v2180_v45 = vadd.f32 %v3853_v35, %v2115_v44 }
 0x29a   : > { %v2179_v3 = vadd.f32 %v3853_v35, %v2110_v36 }
 0x29b   : > { %2212 = vst.msk [vmem:[%s3862_s24 + $0xc8] sm:$0xff] %vm1505_vm3, %v2180_v45 }
 0x29c   : > { %2211 = vst.msk [vmem:[%s3862_s24 + $0xc0] sm:$0xff] %vm1505_vm3, %v2179_v3 }
 0x2ae   : > { %v2665_v61 = vpop.f32.mrb[26].mxu1  ;;  %v2721_v41 = vpop.f32.mrb[26].mxu0 }
 0x2af   : > { %v2125_v24 = vadd.f32 %v2721_v41, %v2665_v61  ;;  %v1798_v63 = vpop.f32.mrb[27].mxu1  ;;  %v2119_v62 = vpop.f32.mrb[27].mxu0 }
 0x2b0   : > { %v2120_v42 = vadd.f32 %v2119_v62, %v1798_v63 }
 0x2b1   : > { %v2182_v20 = vadd.f32 %v3853_v35, %v2125_v24 }
 0x2b2   : > { %v2181_v4 = vadd.f32 %v3853_v35, %v2120_v42 }
 0x2b3   : > { %2214 = vst.msk [vmem:[%s3862_s24 + $0xd8] sm:$0xff] %vm1505_vm3, %v2182_v20 }
 0x2b4   : > { %2213 = vst.msk [vmem:[%s3862_s24 + $0xd0] sm:$0xff] %vm1505_vm3, %v2181_v4 }
 0x2c6   : > { %v2668_v46 = vpop.f32.mrb[28].mxu1  ;;  %v2724_v15 = vpop.f32.mrb[28].mxu0 }
 0x2c7   : > { %v2135_v11 = vadd.f32 %v2724_v15, %v2668_v46  ;;  %v1808_v17 = vpop.f32.mrb[29].mxu1  ;;  %v2129_v6 = vpop.f32.mrb[29].mxu0 }
 0x2c8   : > { %v2130_v60 = vadd.f32 %v2129_v6, %v1808_v17 }
 0x2c9   : > { %v2184_v59 = vadd.f32 %v3853_v35, %v2135_v11 }
 0x2ca   : > { %v2183_v38 = vadd.f32 %v3853_v35, %v2130_v60 }
 0x2cb   : > { %2216 = vst.msk [vmem:[%s3862_s24 + $0xe8] sm:$0xff] %vm1505_vm3, %v2184_v59 }
 0x2cc   : > { %2215 = vst.msk [vmem:[%s3862_s24 + $0xe0] sm:$0xff] %vm1505_vm3, %v2183_v38 }
 0x2de   : > { %v2671_v7 = vpop.f32.mrb[30].mxu1  ;;  %v2727_v23 = vpop.f32.mrb[30].mxu0 }
 0x2df   : > { %v2145_v29 = vadd.f32 %v2727_v23, %v2671_v7  ;;  %v1818_v55 = vpop.f32.mrb[31].mxu1  ;;  %v2139_v9 = vpop.f32.mrb[31].mxu0 }
 0x2e0   : > { %v2140_v53 = vadd.f32 %v2139_v9, %v1818_v55 }
 0x2e1   : > { %v2186_v1 = vadd.f32 %v3853_v35, %v2145_v29 }
 0x2e2   : > { %v2185_v56 = vadd.f32 %v3853_v35, %v2140_v53 }
 0x2e3   : > { %2218 = vst.msk [vmem:[%s3862_s24 + $0xf8] sm:$0xff] %vm1505_vm3, %v2186_v1 }
 0x2e4   : > { %2217 = vst.msk [vmem:[%s3862_s24 + $0xf0] sm:$0xff] %vm1505_vm3, %v2185_v56 }
 0x2e5 PF: > { %s14_s19 = sadd.s32 1, %s2860_s19   ;;  %s4099_s15 = smov %s2852_s17 }
 0x2e6   : > { %p11_p9 = scmp.ge.s32.totalorder %s14_s19, 10   ;;  %s4100_s16 = smov %s2856_s18 }
 0x2e7   : > { %s4101_s17 = smov %s4104_s20  ;;  %s4102_s18 = smov %s4108_s21 }
 0x2e8   :  { %13 = sbr.rel (!%p11_p9) target bundleno = 3 (0x3), region = 72 }

</bundles_post_ra>
